<compile_context>
chip_gen: v7x
topology: tpu7x:2x2x1
jax: 0.10.0
libtpu: 0.0.40
codegen_flags: <defaults>
</compile_context>

<pallas_src>
import functools
import math

import jax
import jax.numpy as jnp
from jax import lax
from jax.experimental import pallas as pl


# ----------------------------- kernel helpers -------------------------------

def _layer_norm(v, g, b, eps=1e-5):
    # v: (N, D); g, b: (1, D)
    mu = jnp.mean(v, axis=-1, keepdims=True)
    var = jnp.mean((v - mu) ** 2, axis=-1, keepdims=True)
    return (v - mu) * lax.rsqrt(var + eps) * g + b


def _attend(q2, k2, v2, mask, *, B, S, nh, dh):
    """Scaled-dot-product attention.

    q2/k2/v2 : (B*S, nh*dh) lane-dense projections (q already carries the
               1/sqrt(d_head) scale, folded into Wq/bq on the host).
    mask     : (S, S) additive mask or None.
    Returns the merged (lane-concatenated) context of shape (B*S, nh*dh).
    Heads are split only here, via static lane slices; scores/context are
    tiny 3-D einsums batched over B (no replicated weights/activations).
    """
    D = nh * dh
    q3 = q2.reshape(B, S, D)
    k3 = k2.reshape(B, S, D)
    v3 = v2.reshape(B, S, D)

    ctx_heads = []
    for h in range(nh):
        sl = slice(h * dh, (h + 1) * dh)
        qh, kh, vh = q3[:, :, sl], k3[:, :, sl], v3[:, :, sl]
        s = jnp.einsum('bqd,bkd->bqk', qh, kh,
                       preferred_element_type=jnp.float32)         # (B, S, S)
        if mask is not None:
            s = s + mask[None]
        s = s - jnp.max(s, axis=-1, keepdims=True)
        p = jnp.exp(s)
        p = p * pl.reciprocal(jnp.sum(p, axis=-1, keepdims=True), approx=True)
        ctx_heads.append(jnp.einsum('bqk,bkd->bqd', p, vh,
                                    preferred_element_type=jnp.float32))
    ctx = jnp.concatenate(ctx_heads, axis=-1)                       # (B, S, D)
    return ctx.reshape(B * S, D)


# ------------------------------- the kernel ---------------------------------

def decoder_kernel(x_ref, y_ref, mask_ref,
                   wqkv_s_ref, bqkv_s_ref, wo_s_ref, bo_s_ref,
                   wq_c_ref, bq_c_ref, wkv_c_ref, bkv_c_ref, wo_c_ref, bo_c_ref,
                   ln_g_ref, ln_b_ref,
                   w1_ref, b1_ref, w2_ref, b2_ref,
                   out_ref, *, num_layers, num_heads, dims_per_head):
    B, S, D = x_ref.shape
    nh, dh = num_heads, dims_per_head
    f32 = jnp.float32

    x2 = x_ref[...].reshape(B * S, D)       # encoder memory (constant), rows-dense
    y2 = y_ref[...].reshape(B * S, D)       # decoder state, carried in values
    mask = mask_ref[...]                    # (S, S) additive mask

    # Unrolled layer loop: whole-model weights are resident (tiny), the state
    # never touches HBM between layers, and there is no per-step grid overhead.
    for l in range(num_layers):
        ln_g = ln_g_ref[l]                  # (3, D)
        ln_b = ln_b_ref[l]

        # --- masked self-attention + residual + LayerNorm --------------------
        qkv = jnp.dot(y2, wqkv_s_ref[l], preferred_element_type=f32) + bqkv_s_ref[l]
        ctx = _attend(qkv[:, :D], qkv[:, D:2 * D], qkv[:, 2 * D:], mask,
                      B=B, S=S, nh=nh, dh=dh)
        sa = jnp.dot(ctx, wo_s_ref[l], preferred_element_type=f32) + bo_s_ref[l]
        y2 = _layer_norm(y2 + sa, ln_g[0:1], ln_b[0:1])

        # --- cross-attention over encoder memory (no mask) + residual + LN ---
        qc = jnp.dot(y2, wq_c_ref[l], preferred_element_type=f32) + bq_c_ref[l]
        kv = jnp.dot(x2, wkv_c_ref[l], preferred_element_type=f32) + bkv_c_ref[l]
        ctx = _attend(qc, kv[:, :D], kv[:, D:], None, B=B, S=S, nh=nh, dh=dh)
        ca = jnp.dot(ctx, wo_c_ref[l], preferred_element_type=f32) + bo_c_ref[l]
        y2 = _layer_norm(y2 + ca, ln_g[1:2], ln_b[1:2])

        # --- position-wise feed-forward + residual + LayerNorm ---------------
        hdn = jnp.maximum(
            jnp.dot(y2, w1_ref[l], preferred_element_type=f32) + b1_ref[l], 0.0)
        ff = jnp.dot(hdn, w2_ref[l], preferred_element_type=f32) + b2_ref[l]
        y2 = _layer_norm(y2 + ff, ln_g[2:3], ln_b[2:3])

    out_ref[...] = y2.reshape(B, S, D)      # single HBM store of the result


# ------------------------------ host wrapper --------------------------------

def decoder_forward(x, y, mask, packed, *, num_heads, dims_per_head):
    B, S, D = x.shape
    L = packed["wqkv_self"].shape[0]
    assert num_heads * dims_per_head == D

    kernel = functools.partial(decoder_kernel, num_layers=L,
                               num_heads=num_heads, dims_per_head=dims_per_head)

    # No grid: everything (activations + all 5 layers' lane-dense weights,
    # a few hundred KB total) is VMEM-resident for the single invocation.
    return pl.pallas_call(
        kernel,
        out_shape=jax.ShapeDtypeStruct((B, S, D), jnp.float32),
    )(x, y, mask,
      packed["wqkv_self"], packed["bqkv_self"], packed["wo_self"], packed["bo_self"],
      packed["wq_cross"], packed["bq_cross"], packed["wkv_cross"], packed["bkv_cross"],
      packed["wo_cross"], packed["bo_cross"],
      packed["ln_g"], packed["ln_b"],
      packed["w1"], packed["b1"], packed["w2"], packed["b2"])


# ------------------------- parameter init / packing --------------------------

def init_decoder_params(key, num_layers, D, REP):
    """Per-layer parameters in their natural (unpacked) layout."""
    H = REP * D
    layers = []
    for i in range(num_layers):
        k = jax.random.fold_in(key, i)
        ks = jax.random.split(k, 10)
        s = 0.05
        layers.append({
            "wq_self": s * jax.random.normal(ks[0], (D, D), jnp.float32),
            "wk_self": s * jax.random.normal(ks[1], (D, D), jnp.float32),
            "wv_self": s * jax.random.normal(ks[2], (D, D), jnp.float32),
            "wo_self": s * jax.random.normal(ks[3], (D, D), jnp.float32),
            "bq_self": jnp.zeros((D,), jnp.float32),
            "bk_self": jnp.zeros((D,), jnp.float32),
            "bv_self": jnp.zeros((D,), jnp.float32),
            "bo_self": jnp.zeros((D,), jnp.float32),
            "wq_cross": s * jax.random.normal(ks[4], (D, D), jnp.float32),
            "wk_cross": s * jax.random.normal(ks[5], (D, D), jnp.float32),
            "wv_cross": s * jax.random.normal(ks[6], (D, D), jnp.float32),
            "wo_cross": s * jax.random.normal(ks[7], (D, D), jnp.float32),
            "bq_cross": jnp.zeros((D,), jnp.float32),
            "bk_cross": jnp.zeros((D,), jnp.float32),
            "bv_cross": jnp.zeros((D,), jnp.float32),
            "bo_cross": jnp.zeros((D,), jnp.float32),
            "ln_g": jnp.ones((3, D), jnp.float32),
            "ln_b": jnp.zeros((3, D), jnp.float32),
            "w1": s * jax.random.normal(ks[8], (D, H), jnp.float32),
            "b1": jnp.zeros((H,), jnp.float32),
            "w2": s * jax.random.normal(ks[9], (H, D), jnp.float32),
            "b2": jnp.zeros((D,), jnp.float32),
        })
    return layers


def pack_decoder_params(layers, *, dims_per_head):
    """Stack params along a leading L axis, lane-dense:
       - self-attn QKV fused along the output dim -> (L, D, 3*D), bias (L, 1, 3*D)
       - cross-attn K/V fused -> (L, D, 2*D), Q separate -> (L, D, D)
       - 1/sqrt(d_head) folded into Wq / bq so the kernel never multiplies by it.
    Head split stays the natural contiguous (nh, dh) order of the output dim,
    matching the standard PyTorch reshape, so the kernel only lane-slices."""
    scale = 1.0 / math.sqrt(dims_per_head)

    def stack(fn):
        return jnp.stack([fn(p) for p in layers], axis=0)

    return {
        "wqkv_self": stack(lambda p: jnp.concatenate(
            [p["wq_self"] * scale, p["wk_self"], p["wv_self"]], axis=1)),
        "bqkv_self": stack(lambda p: jnp.concatenate(
            [p["bq_self"] * scale, p["bk_self"], p["bv_self"]])[None, :]),
        "wo_self": stack(lambda p: p["wo_self"]),
        "bo_self": stack(lambda p: p["bo_self"][None, :]),
        "wq_cross": stack(lambda p: p["wq_cross"] * scale),
        "bq_cross": stack(lambda p: (p["bq_cross"] * scale)[None, :]),
        "wkv_cross": stack(lambda p: jnp.concatenate(
            [p["wk_cross"], p["wv_cross"]], axis=1)),
        "bkv_cross": stack(lambda p: jnp.concatenate(
            [p["bk_cross"], p["bv_cross"]])[None, :]),
        "wo_cross": stack(lambda p: p["wo_cross"]),
        "bo_cross": stack(lambda p: p["bo_cross"][None, :]),
        "ln_g": stack(lambda p: p["ln_g"]),
        "ln_b": stack(lambda p: p["ln_b"]),
        "w1": stack(lambda p: p["w1"]),
        "b1": stack(lambda p: p["b1"][None, :]),
        "w2": stack(lambda p: p["w2"]),
        "b2": stack(lambda p: p["b2"][None, :]),
    }


# ---------------------------------- main -------------------------------------

if __name__ == "__main__":
    BATCH = 2
    SEQ_LENGTH = 8
    INPUT_DIM = 32
    REP = 4
    TOTAL_HEADS = 4
    DIMS_PER_HEAD = 8          # TOTAL_HEADS * DIMS_PER_HEAD == INPUT_DIM
    NUM_LAYERS = 5

    key = jax.random.PRNGKey(0)
    kx, ky, kp = jax.random.split(key, 3)

    x = jax.random.normal(kx, (BATCH, SEQ_LENGTH, INPUT_DIM), jnp.float32)
    y = jax.random.normal(ky, (BATCH, SEQ_LENGTH, INPUT_DIM), jnp.float32)

    # causal additive mask (0 on/below diagonal, -1e9 above)
    causal = jnp.tril(jnp.ones((SEQ_LENGTH, SEQ_LENGTH), jnp.float32))
    mask = (1.0 - causal) * (-1e9)

    layers = init_decoder_params(kp, NUM_LAYERS, INPUT_DIM, REP)
    packed = pack_decoder_params(layers, dims_per_head=DIMS_PER_HEAD)

    out = decoder_forward(x, y, mask, packed,
                          num_heads=TOTAL_HEADS, dims_per_head=DIMS_PER_HEAD)
    out = jax.block_until_ready(out)
    assert out.shape == (BATCH, SEQ_LENGTH, INPUT_DIM)
    assert bool(jnp.all(jnp.isfinite(out)))
    print("KERNEL_OK")
</pallas_src>

<mosaic_0001>
module attributes {stable_mosaic.version = 11 : i64} {
  func.func @decoder_kernel(%arg0: memref<2x8x32xf32, #tpu.memory_space<vmem>>, %arg1: memref<2x8x32xf32, #tpu.memory_space<vmem>>, %arg2: memref<8x8xf32, #tpu.memory_space<vmem>>, %arg3: memref<5x32x96xf32, #tpu.memory_space<vmem>>, %arg4: memref<5x1x96xf32, #tpu.memory_space<vmem>>, %arg5: memref<5x32x32xf32, #tpu.memory_space<vmem>>, %arg6: memref<5x1x32xf32, #tpu.memory_space<vmem>>, %arg7: memref<5x32x32xf32, #tpu.memory_space<vmem>>, %arg8: memref<5x1x32xf32, #tpu.memory_space<vmem>>, %arg9: memref<5x32x64xf32, #tpu.memory_space<vmem>>, %arg10: memref<5x1x64xf32, #tpu.memory_space<vmem>>, %arg11: memref<5x32x32xf32, #tpu.memory_space<vmem>>, %arg12: memref<5x1x32xf32, #tpu.memory_space<vmem>>, %arg13: memref<5x3x32xf32, #tpu.memory_space<vmem>>, %arg14: memref<5x3x32xf32, #tpu.memory_space<vmem>>, %arg15: memref<5x32x128xf32, #tpu.memory_space<vmem>>, %arg16: memref<5x1x128xf32, #tpu.memory_space<vmem>>, %arg17: memref<5x128x32xf32, #tpu.memory_space<vmem>>, %arg18: memref<5x1x32xf32, #tpu.memory_space<vmem>>, %arg19: memref<2x8x32xf32, #tpu.memory_space<vmem>>) attributes {dimension_semantics = [], scalar_prefetch = 0 : i64, scratch_operands = 0 : i64, tpu.core_type = #tpu.core_type<tc>} {
    %c0 = arith.constant 0 : index
    %c0_0 = arith.constant 0 : index
    %c0_1 = arith.constant 0 : index
    %0 = vector.load %arg0[%c0, %c0_0, %c0_1] : memref<2x8x32xf32, #tpu.memory_space<vmem>>, vector<2x8x32xf32>
    %1 = vector.shape_cast %0 : vector<2x8x32xf32> to vector<16x32xf32>
    %c0_2 = arith.constant 0 : index
    %c0_3 = arith.constant 0 : index
    %c0_4 = arith.constant 0 : index
    %2 = vector.load %arg1[%c0_2, %c0_3, %c0_4] : memref<2x8x32xf32, #tpu.memory_space<vmem>>, vector<2x8x32xf32>
    %3 = vector.shape_cast %2 : vector<2x8x32xf32> to vector<16x32xf32>
    %c0_5 = arith.constant 0 : index
    %c0_6 = arith.constant 0 : index
    %4 = vector.load %arg2[%c0_5, %c0_6] : memref<8x8xf32, #tpu.memory_space<vmem>>, vector<8x8xf32>
    %c0_7 = arith.constant 0 : index
    %c0_8 = arith.constant 0 : index
    %c0_9 = arith.constant 0 : index
    %5 = vector.load %arg13[%c0_7, %c0_8, %c0_9] : memref<5x3x32xf32, #tpu.memory_space<vmem>>, vector<1x3x32xf32>
    %6 = vector.shape_cast %5 : vector<1x3x32xf32> to vector<3x32xf32>
    %c0_10 = arith.constant 0 : index
    %c0_11 = arith.constant 0 : index
    %c0_12 = arith.constant 0 : index
    %7 = vector.load %arg14[%c0_10, %c0_11, %c0_12] : memref<5x3x32xf32, #tpu.memory_space<vmem>>, vector<1x3x32xf32>
    %8 = vector.shape_cast %7 : vector<1x3x32xf32> to vector<3x32xf32>
    %c0_13 = arith.constant 0 : index
    %c0_14 = arith.constant 0 : index
    %c0_15 = arith.constant 0 : index
    %9 = vector.load %arg3[%c0_13, %c0_14, %c0_15] : memref<5x32x96xf32, #tpu.memory_space<vmem>>, vector<1x32x96xf32>
    %10 = vector.shape_cast %9 : vector<1x32x96xf32> to vector<32x96xf32>
    %cst = arith.constant dense<0.000000e+00> : vector<16x96xf32>
    %11 = tpu.matmul %3, %10, %cst {dimension_numbers = #tpu.dot_dimension_numbers<[1], [0], [0], [1], [0, 0, 1, 1], [], []>} : vector<16x32xf32>, vector<32x96xf32>, vector<16x96xf32> -> vector<16x96xf32>
    %c0_16 = arith.constant 0 : index
    %c0_17 = arith.constant 0 : index
    %c0_18 = arith.constant 0 : index
    %12 = vector.load %arg4[%c0_16, %c0_17, %c0_18] : memref<5x1x96xf32, #tpu.memory_space<vmem>>, vector<1x1x96xf32>
    %13 = vector.shape_cast %12 : vector<1x1x96xf32> to vector<1x96xf32>
    %14 = vector.broadcast %13 : vector<1x96xf32> to vector<16x96xf32>
    %15 = arith.addf %11, %14 : vector<16x96xf32>
    %16 = vector.extract_strided_slice %15 {offsets = [0, 0], sizes = [16, 32], strides = [1, 1]} : vector<16x96xf32> to vector<16x32xf32>
    %17 = vector.extract_strided_slice %15 {offsets = [0, 32], sizes = [16, 32], strides = [1, 1]} : vector<16x96xf32> to vector<16x32xf32>
    %18 = vector.extract_strided_slice %15 {offsets = [0, 64], sizes = [16, 32], strides = [1, 1]} : vector<16x96xf32> to vector<16x32xf32>
    %19 = vector.shape_cast %16 : vector<16x32xf32> to vector<2x8x32xf32>
    %20 = vector.shape_cast %17 : vector<16x32xf32> to vector<2x8x32xf32>
    %21 = vector.shape_cast %18 : vector<16x32xf32> to vector<2x8x32xf32>
    %22 = vector.extract_strided_slice %19 {offsets = [0, 0, 0], sizes = [2, 8, 8], strides = [1, 1, 1]} : vector<2x8x32xf32> to vector<2x8x8xf32>
    %23 = vector.extract_strided_slice %20 {offsets = [0, 0, 0], sizes = [2, 8, 8], strides = [1, 1, 1]} : vector<2x8x32xf32> to vector<2x8x8xf32>
    %24 = vector.extract_strided_slice %21 {offsets = [0, 0, 0], sizes = [2, 8, 8], strides = [1, 1, 1]} : vector<2x8x32xf32> to vector<2x8x8xf32>
    "tpu.trace_start"() <{level = 10 : i32, message = "bqd,bkd->bqk"}> : () -> ()
    %cst_19 = arith.constant dense<0.000000e+00> : vector<2x8x8xf32>
    %25 = tpu.matmul %22, %23, %cst_19 {dimension_numbers = #tpu.dot_dimension_numbers<[2], [2], [1], [1], [0, 0, 0, 1, 1, 1], [0], [0]>} : vector<2x8x8xf32>, vector<2x8x8xf32>, vector<2x8x8xf32> -> vector<2x8x8xf32>
    "tpu.trace_stop"() : () -> ()
    %26 = vector.shape_cast %4 : vector<8x8xf32> to vector<1x8x8xf32>
    %27 = vector.broadcast %26 : vector<1x8x8xf32> to vector<2x8x8xf32>
    %28 = arith.addf %25, %27 : vector<2x8x8xf32>
    %cst_20 = arith.constant dense<0xFF800000> : vector<2x8xf32>
    %29 = vector.multi_reduction <maximumf>, %28, %cst_20 [2] : vector<2x8x8xf32> to vector<2x8xf32>
    %30 = vector.shape_cast %29 : vector<2x8xf32> to vector<2x8x1xf32>
    %31 = vector.broadcast %30 : vector<2x8x1xf32> to vector<2x8x8xf32>
    %32 = arith.subf %28, %31 : vector<2x8x8xf32>
    %33 = math.exp %32 : vector<2x8x8xf32>
    %cst_21 = arith.constant dense<0.000000e+00> : vector<2x8xf32>
    %34 = vector.multi_reduction <add>, %33, %cst_21 [2] : vector<2x8x8xf32> to vector<2x8xf32>
    %35 = vector.shape_cast %34 : vector<2x8xf32> to vector<2x8x1xf32>
    %36 = tpu.reciprocal %35 {approx = true} : vector<2x8x1xf32> -> vector<2x8x1xf32>
    %37 = vector.broadcast %36 : vector<2x8x1xf32> to vector<2x8x8xf32>
    %38 = arith.mulf %33, %37 : vector<2x8x8xf32>
    "tpu.trace_start"() <{level = 10 : i32, message = "bqk,bkd->bqd"}> : () -> ()
    %cst_22 = arith.constant dense<0.000000e+00> : vector<2x8x8xf32>
    %39 = tpu.matmul %38, %24, %cst_22 {dimension_numbers = #tpu.dot_dimension_numbers<[2], [1], [1], [2], [0, 0, 0, 1, 1, 2], [0], [0]>} : vector<2x8x8xf32>, vector<2x8x8xf32>, vector<2x8x8xf32> -> vector<2x8x8xf32>
    "tpu.trace_stop"() : () -> ()
    %40 = vector.extract_strided_slice %19 {offsets = [0, 0, 8], sizes = [2, 8, 8], strides = [1, 1, 1]} : vector<2x8x32xf32> to vector<2x8x8xf32>
    %41 = vector.extract_strided_slice %20 {offsets = [0, 0, 8], sizes = [2, 8, 8], strides = [1, 1, 1]} : vector<2x8x32xf32> to vector<2x8x8xf32>
    %42 = vector.extract_strided_slice %21 {offsets = [0, 0, 8], sizes = [2, 8, 8], strides = [1, 1, 1]} : vector<2x8x32xf32> to vector<2x8x8xf32>
    "tpu.trace_start"() <{level = 10 : i32, message = "bqd,bkd->bqk"}> : () -> ()
    %cst_23 = arith.constant dense<0.000000e+00> : vector<2x8x8xf32>
    %43 = tpu.matmul %40, %41, %cst_23 {dimension_numbers = #tpu.dot_dimension_numbers<[2], [2], [1], [1], [0, 0, 0, 1, 1, 1], [0], [0]>} : vector<2x8x8xf32>, vector<2x8x8xf32>, vector<2x8x8xf32> -> vector<2x8x8xf32>
    "tpu.trace_stop"() : () -> ()
    %44 = vector.shape_cast %4 : vector<8x8xf32> to vector<1x8x8xf32>
    %45 = vector.broadcast %44 : vector<1x8x8xf32> to vector<2x8x8xf32>
    %46 = arith.addf %43, %45 : vector<2x8x8xf32>
    %cst_24 = arith.constant dense<0xFF800000> : vector<2x8xf32>
    %47 = vector.multi_reduction <maximumf>, %46, %cst_24 [2] : vector<2x8x8xf32> to vector<2x8xf32>
    %48 = vector.shape_cast %47 : vector<2x8xf32> to vector<2x8x1xf32>
    %49 = vector.broadcast %48 : vector<2x8x1xf32> to vector<2x8x8xf32>
    %50 = arith.subf %46, %49 : vector<2x8x8xf32>
    %51 = math.exp %50 : vector<2x8x8xf32>
    %cst_25 = arith.constant dense<0.000000e+00> : vector<2x8xf32>
    %52 = vector.multi_reduction <add>, %51, %cst_25 [2] : vector<2x8x8xf32> to vector<2x8xf32>
    %53 = vector.shape_cast %52 : vector<2x8xf32> to vector<2x8x1xf32>
    %54 = tpu.reciprocal %53 {approx = true} : vector<2x8x1xf32> -> vector<2x8x1xf32>
    %55 = vector.broadcast %54 : vector<2x8x1xf32> to vector<2x8x8xf32>
    %56 = arith.mulf %51, %55 : vector<2x8x8xf32>
    "tpu.trace_start"() <{level = 10 : i32, message = "bqk,bkd->bqd"}> : () -> ()
    %cst_26 = arith.constant dense<0.000000e+00> : vector<2x8x8xf32>
    %57 = tpu.matmul %56, %42, %cst_26 {dimension_numbers = #tpu.dot_dimension_numbers<[2], [1], [1], [2], [0, 0, 0, 1, 1, 2], [0], [0]>} : vector<2x8x8xf32>, vector<2x8x8xf32>, vector<2x8x8xf32> -> vector<2x8x8xf32>
    "tpu.trace_stop"() : () -> ()
    %58 = vector.extract_strided_slice %19 {offsets = [0, 0, 16], sizes = [2, 8, 8], strides = [1, 1, 1]} : vector<2x8x32xf32> to vector<2x8x8xf32>
    %59 = vector.extract_strided_slice %20 {offsets = [0, 0, 16], sizes = [2, 8, 8], strides = [1, 1, 1]} : vector<2x8x32xf32> to vector<2x8x8xf32>
    %60 = vector.extract_strided_slice %21 {offsets = [0, 0, 16], sizes = [2, 8, 8], strides = [1, 1, 1]} : vector<2x8x32xf32> to vector<2x8x8xf32>
    "tpu.trace_start"() <{level = 10 : i32, message = "bqd,bkd->bqk"}> : () -> ()
    %cst_27 = arith.constant dense<0.000000e+00> : vector<2x8x8xf32>
    %61 = tpu.matmul %58, %59, %cst_27 {dimension_numbers = #tpu.dot_dimension_numbers<[2], [2], [1], [1], [0, 0, 0, 1, 1, 1], [0], [0]>} : vector<2x8x8xf32>, vector<2x8x8xf32>, vector<2x8x8xf32> -> vector<2x8x8xf32>
    "tpu.trace_stop"() : () -> ()
    %62 = vector.shape_cast %4 : vector<8x8xf32> to vector<1x8x8xf32>
    %63 = vector.broadcast %62 : vector<1x8x8xf32> to vector<2x8x8xf32>
    %64 = arith.addf %61, %63 : vector<2x8x8xf32>
    %cst_28 = arith.constant dense<0xFF800000> : vector<2x8xf32>
    %65 = vector.multi_reduction <maximumf>, %64, %cst_28 [2] : vector<2x8x8xf32> to vector<2x8xf32>
    %66 = vector.shape_cast %65 : vector<2x8xf32> to vector<2x8x1xf32>
    %67 = vector.broadcast %66 : vector<2x8x1xf32> to vector<2x8x8xf32>
    %68 = arith.subf %64, %67 : vector<2x8x8xf32>
    %69 = math.exp %68 : vector<2x8x8xf32>
    %cst_29 = arith.constant dense<0.000000e+00> : vector<2x8xf32>
    %70 = vector.multi_reduction <add>, %69, %cst_29 [2] : vector<2x8x8xf32> to vector<2x8xf32>
    %71 = vector.shape_cast %70 : vector<2x8xf32> to vector<2x8x1xf32>
    %72 = tpu.reciprocal %71 {approx = true} : vector<2x8x1xf32> -> vector<2x8x1xf32>
    %73 = vector.broadcast %72 : vector<2x8x1xf32> to vector<2x8x8xf32>
    %74 = arith.mulf %69, %73 : vector<2x8x8xf32>
    "tpu.trace_start"() <{level = 10 : i32, message = "bqk,bkd->bqd"}> : () -> ()
    %cst_30 = arith.constant dense<0.000000e+00> : vector<2x8x8xf32>
    %75 = tpu.matmul %74, %60, %cst_30 {dimension_numbers = #tpu.dot_dimension_numbers<[2], [1], [1], [2], [0, 0, 0, 1, 1, 2], [0], [0]>} : vector<2x8x8xf32>, vector<2x8x8xf32>, vector<2x8x8xf32> -> vector<2x8x8xf32>
    "tpu.trace_stop"() : () -> ()
    %76 = vector.extract_strided_slice %19 {offsets = [0, 0, 24], sizes = [2, 8, 8], strides = [1, 1, 1]} : vector<2x8x32xf32> to vector<2x8x8xf32>
    %77 = vector.extract_strided_slice %20 {offsets = [0, 0, 24], sizes = [2, 8, 8], strides = [1, 1, 1]} : vector<2x8x32xf32> to vector<2x8x8xf32>
    %78 = vector.extract_strided_slice %21 {offsets = [0, 0, 24], sizes = [2, 8, 8], strides = [1, 1, 1]} : vector<2x8x32xf32> to vector<2x8x8xf32>
    "tpu.trace_start"() <{level = 10 : i32, message = "bqd,bkd->bqk"}> : () -> ()
    %cst_31 = arith.constant dense<0.000000e+00> : vector<2x8x8xf32>
    %79 = tpu.matmul %76, %77, %cst_31 {dimension_numbers = #tpu.dot_dimension_numbers<[2], [2], [1], [1], [0, 0, 0, 1, 1, 1], [0], [0]>} : vector<2x8x8xf32>, vector<2x8x8xf32>, vector<2x8x8xf32> -> vector<2x8x8xf32>
    "tpu.trace_stop"() : () -> ()
    %80 = vector.shape_cast %4 : vector<8x8xf32> to vector<1x8x8xf32>
    %81 = vector.broadcast %80 : vector<1x8x8xf32> to vector<2x8x8xf32>
    %82 = arith.addf %79, %81 : vector<2x8x8xf32>
    %cst_32 = arith.constant dense<0xFF800000> : vector<2x8xf32>
    %83 = vector.multi_reduction <maximumf>, %82, %cst_32 [2] : vector<2x8x8xf32> to vector<2x8xf32>
    %84 = vector.shape_cast %83 : vector<2x8xf32> to vector<2x8x1xf32>
    %85 = vector.broadcast %84 : vector<2x8x1xf32> to vector<2x8x8xf32>
    %86 = arith.subf %82, %85 : vector<2x8x8xf32>
    %87 = math.exp %86 : vector<2x8x8xf32>
    %cst_33 = arith.constant dense<0.000000e+00> : vector<2x8xf32>
    %88 = vector.multi_reduction <add>, %87, %cst_33 [2] : vector<2x8x8xf32> to vector<2x8xf32>
    %89 = vector.shape_cast %88 : vector<2x8xf32> to vector<2x8x1xf32>
    %90 = tpu.reciprocal %89 {approx = true} : vector<2x8x1xf32> -> vector<2x8x1xf32>
    %91 = vector.broadcast %90 : vector<2x8x1xf32> to vector<2x8x8xf32>
    %92 = arith.mulf %87, %91 : vector<2x8x8xf32>
    "tpu.trace_start"() <{level = 10 : i32, message = "bqk,bkd->bqd"}> : () -> ()
    %cst_34 = arith.constant dense<0.000000e+00> : vector<2x8x8xf32>
    %93 = tpu.matmul %92, %78, %cst_34 {dimension_numbers = #tpu.dot_dimension_numbers<[2], [1], [1], [2], [0, 0, 0, 1, 1, 2], [0], [0]>} : vector<2x8x8xf32>, vector<2x8x8xf32>, vector<2x8x8xf32> -> vector<2x8x8xf32>
    "tpu.trace_stop"() : () -> ()
    %94 = tpu.concatenate %39, %57, %75, %93 in 2 : vector<2x8x8xf32>, vector<2x8x8xf32>, vector<2x8x8xf32>, vector<2x8x8xf32> -> vector<2x8x32xf32>
    %95 = vector.shape_cast %94 : vector<2x8x32xf32> to vector<16x32xf32>
    %c0_35 = arith.constant 0 : index
    %c0_36 = arith.constant 0 : index
    %c0_37 = arith.constant 0 : index
    %96 = vector.load %arg5[%c0_35, %c0_36, %c0_37] : memref<5x32x32xf32, #tpu.memory_space<vmem>>, vector<1x32x32xf32>
    %97 = vector.shape_cast %96 : vector<1x32x32xf32> to vector<32x32xf32>
    %cst_38 = arith.constant dense<0.000000e+00> : vector<16x32xf32>
    %98 = tpu.matmul %95, %97, %cst_38 {dimension_numbers = #tpu.dot_dimension_numbers<[1], [0], [0], [1], [0, 0, 1, 1], [], []>} : vector<16x32xf32>, vector<32x32xf32>, vector<16x32xf32> -> vector<16x32xf32>
    %c0_39 = arith.constant 0 : index
    %c0_40 = arith.constant 0 : index
    %c0_41 = arith.constant 0 : index
    %99 = vector.load %arg6[%c0_39, %c0_40, %c0_41] : memref<5x1x32xf32, #tpu.memory_space<vmem>>, vector<1x1x32xf32>
    %100 = vector.shape_cast %99 : vector<1x1x32xf32> to vector<1x32xf32>
    %101 = vector.broadcast %100 : vector<1x32xf32> to vector<16x32xf32>
    %102 = arith.addf %98, %101 : vector<16x32xf32>
    %103 = arith.addf %3, %102 : vector<16x32xf32>
    %104 = vector.extract_strided_slice %6 {offsets = [0, 0], sizes = [1, 32], strides = [1, 1]} : vector<3x32xf32> to vector<1x32xf32>
    %105 = vector.extract_strided_slice %8 {offsets = [0, 0], sizes = [1, 32], strides = [1, 1]} : vector<3x32xf32> to vector<1x32xf32>
    %cst_42 = arith.constant dense<0.000000e+00> : vector<16xf32>
    %106 = vector.multi_reduction <add>, %103, %cst_42 [1] : vector<16x32xf32> to vector<16xf32>
    %107 = vector.shape_cast %106 : vector<16xf32> to vector<16x1xf32>
    %cst_43 = arith.constant 3.200000e+01 : f32
    %108 = vector.broadcast %cst_43 : f32 to vector<16x1xf32>
    %109 = arith.divf %107, %108 : vector<16x1xf32>
    %110 = vector.broadcast %109 : vector<16x1xf32> to vector<16x32xf32>
    %111 = arith.subf %103, %110 : vector<16x32xf32>
    %112 = arith.mulf %111, %111 : vector<16x32xf32>
    %cst_44 = arith.constant dense<0.000000e+00> : vector<16xf32>
    %113 = vector.multi_reduction <add>, %112, %cst_44 [1] : vector<16x32xf32> to vector<16xf32>
    %114 = vector.shape_cast %113 : vector<16xf32> to vector<16x1xf32>
    %cst_45 = arith.constant 3.200000e+01 : f32
    %115 = vector.broadcast %cst_45 : f32 to vector<16x1xf32>
    %116 = arith.divf %114, %115 : vector<16x1xf32>
    %117 = vector.broadcast %109 : vector<16x1xf32> to vector<16x32xf32>
    %118 = arith.subf %103, %117 : vector<16x32xf32>
    %cst_46 = arith.constant 9.99999974E-6 : f32
    %119 = vector.broadcast %cst_46 : f32 to vector<16x1xf32>
    %120 = arith.addf %116, %119 : vector<16x1xf32>
    %121 = math.rsqrt %120 : vector<16x1xf32>
    %122 = vector.broadcast %121 : vector<16x1xf32> to vector<16x32xf32>
    %123 = arith.mulf %118, %122 : vector<16x32xf32>
    %124 = vector.broadcast %104 : vector<1x32xf32> to vector<16x32xf32>
    %125 = arith.mulf %123, %124 : vector<16x32xf32>
    %126 = vector.broadcast %105 : vector<1x32xf32> to vector<16x32xf32>
    %127 = arith.addf %125, %126 : vector<16x32xf32>
    %c0_47 = arith.constant 0 : index
    %c0_48 = arith.constant 0 : index
    %c0_49 = arith.constant 0 : index
    %128 = vector.load %arg7[%c0_47, %c0_48, %c0_49] : memref<5x32x32xf32, #tpu.memory_space<vmem>>, vector<1x32x32xf32>
    %129 = vector.shape_cast %128 : vector<1x32x32xf32> to vector<32x32xf32>
    %cst_50 = arith.constant dense<0.000000e+00> : vector<16x32xf32>
    %130 = tpu.matmul %127, %129, %cst_50 {dimension_numbers = #tpu.dot_dimension_numbers<[1], [0], [0], [1], [0, 0, 1, 1], [], []>} : vector<16x32xf32>, vector<32x32xf32>, vector<16x32xf32> -> vector<16x32xf32>
    %c0_51 = arith.constant 0 : index
    %c0_52 = arith.constant 0 : index
    %c0_53 = arith.constant 0 : index
    %131 = vector.load %arg8[%c0_51, %c0_52, %c0_53] : memref<5x1x32xf32, #tpu.memory_space<vmem>>, vector<1x1x32xf32>
    %132 = vector.shape_cast %131 : vector<1x1x32xf32> to vector<1x32xf32>
    %133 = vector.broadcast %132 : vector<1x32xf32> to vector<16x32xf32>
    %134 = arith.addf %130, %133 : vector<16x32xf32>
    %c0_54 = arith.constant 0 : index
    %c0_55 = arith.constant 0 : index
    %c0_56 = arith.constant 0 : index
    %135 = vector.load %arg9[%c0_54, %c0_55, %c0_56] : memref<5x32x64xf32, #tpu.memory_space<vmem>>, vector<1x32x64xf32>
    %136 = vector.shape_cast %135 : vector<1x32x64xf32> to vector<32x64xf32>
    %cst_57 = arith.constant dense<0.000000e+00> : vector<16x64xf32>
    %137 = tpu.matmul %1, %136, %cst_57 {dimension_numbers = #tpu.dot_dimension_numbers<[1], [0], [0], [1], [0, 0, 1, 1], [], []>} : vector<16x32xf32>, vector<32x64xf32>, vector<16x64xf32> -> vector<16x64xf32>
    %c0_58 = arith.constant 0 : index
    %c0_59 = arith.constant 0 : index
    %c0_60 = arith.constant 0 : index
    %138 = vector.load %arg10[%c0_58, %c0_59, %c0_60] : memref<5x1x64xf32, #tpu.memory_space<vmem>>, vector<1x1x64xf32>
    %139 = vector.shape_cast %138 : vector<1x1x64xf32> to vector<1x64xf32>
    %140 = vector.broadcast %139 : vector<1x64xf32> to vector<16x64xf32>
    %141 = arith.addf %137, %140 : vector<16x64xf32>
    %142 = vector.extract_strided_slice %141 {offsets = [0, 0], sizes = [16, 32], strides = [1, 1]} : vector<16x64xf32> to vector<16x32xf32>
    %143 = vector.extract_strided_slice %141 {offsets = [0, 32], sizes = [16, 32], strides = [1, 1]} : vector<16x64xf32> to vector<16x32xf32>
    %144 = vector.shape_cast %134 : vector<16x32xf32> to vector<2x8x32xf32>
    %145 = vector.shape_cast %142 : vector<16x32xf32> to vector<2x8x32xf32>
    %146 = vector.shape_cast %143 : vector<16x32xf32> to vector<2x8x32xf32>
    %147 = vector.extract_strided_slice %144 {offsets = [0, 0, 0], sizes = [2, 8, 8], strides = [1, 1, 1]} : vector<2x8x32xf32> to vector<2x8x8xf32>
    %148 = vector.extract_strided_slice %145 {offsets = [0, 0, 0], sizes = [2, 8, 8], strides = [1, 1, 1]} : vector<2x8x32xf32> to vector<2x8x8xf32>
    %149 = vector.extract_strided_slice %146 {offsets = [0, 0, 0], sizes = [2, 8, 8], strides = [1, 1, 1]} : vector<2x8x32xf32> to vector<2x8x8xf32>
    "tpu.trace_start"() <{level = 10 : i32, message = "bqd,bkd->bqk"}> : () -> ()
    %cst_61 = arith.constant dense<0.000000e+00> : vector<2x8x8xf32>
    %150 = tpu.matmul %147, %148, %cst_61 {dimension_numbers = #tpu.dot_dimension_numbers<[2], [2], [1], [1], [0, 0, 0, 1, 1, 1], [0], [0]>} : vector<2x8x8xf32>, vector<2x8x8xf32>, vector<2x8x8xf32> -> vector<2x8x8xf32>
    "tpu.trace_stop"() : () -> ()
    %cst_62 = arith.constant dense<0xFF800000> : vector<2x8xf32>
    %151 = vector.multi_reduction <maximumf>, %150, %cst_62 [2] : vector<2x8x8xf32> to vector<2x8xf32>
    %152 = vector.shape_cast %151 : vector<2x8xf32> to vector<2x8x1xf32>
    %153 = vector.broadcast %152 : vector<2x8x1xf32> to vector<2x8x8xf32>
    %154 = arith.subf %150, %153 : vector<2x8x8xf32>
    %155 = math.exp %154 : vector<2x8x8xf32>
    %cst_63 = arith.constant dense<0.000000e+00> : vector<2x8xf32>
    %156 = vector.multi_reduction <add>, %155, %cst_63 [2] : vector<2x8x8xf32> to vector<2x8xf32>
    %157 = vector.shape_cast %156 : vector<2x8xf32> to vector<2x8x1xf32>
    %158 = tpu.reciprocal %157 {approx = true} : vector<2x8x1xf32> -> vector<2x8x1xf32>
    %159 = vector.broadcast %158 : vector<2x8x1xf32> to vector<2x8x8xf32>
    %160 = arith.mulf %155, %159 : vector<2x8x8xf32>
    "tpu.trace_start"() <{level = 10 : i32, message = "bqk,bkd->bqd"}> : () -> ()
    %cst_64 = arith.constant dense<0.000000e+00> : vector<2x8x8xf32>
    %161 = tpu.matmul %160, %149, %cst_64 {dimension_numbers = #tpu.dot_dimension_numbers<[2], [1], [1], [2], [0, 0, 0, 1, 1, 2], [0], [0]>} : vector<2x8x8xf32>, vector<2x8x8xf32>, vector<2x8x8xf32> -> vector<2x8x8xf32>
    "tpu.trace_stop"() : () -> ()
    %162 = vector.extract_strided_slice %144 {offsets = [0, 0, 8], sizes = [2, 8, 8], strides = [1, 1, 1]} : vector<2x8x32xf32> to vector<2x8x8xf32>
    %163 = vector.extract_strided_slice %145 {offsets = [0, 0, 8], sizes = [2, 8, 8], strides = [1, 1, 1]} : vector<2x8x32xf32> to vector<2x8x8xf32>
    %164 = vector.extract_strided_slice %146 {offsets = [0, 0, 8], sizes = [2, 8, 8], strides = [1, 1, 1]} : vector<2x8x32xf32> to vector<2x8x8xf32>
    "tpu.trace_start"() <{level = 10 : i32, message = "bqd,bkd->bqk"}> : () -> ()
    %cst_65 = arith.constant dense<0.000000e+00> : vector<2x8x8xf32>
    %165 = tpu.matmul %162, %163, %cst_65 {dimension_numbers = #tpu.dot_dimension_numbers<[2], [2], [1], [1], [0, 0, 0, 1, 1, 1], [0], [0]>} : vector<2x8x8xf32>, vector<2x8x8xf32>, vector<2x8x8xf32> -> vector<2x8x8xf32>
    "tpu.trace_stop"() : () -> ()
    %cst_66 = arith.constant dense<0xFF800000> : vector<2x8xf32>
    %166 = vector.multi_reduction <maximumf>, %165, %cst_66 [2] : vector<2x8x8xf32> to vector<2x8xf32>
    %167 = vector.shape_cast %166 : vector<2x8xf32> to vector<2x8x1xf32>
    %168 = vector.broadcast %167 : vector<2x8x1xf32> to vector<2x8x8xf32>
    %169 = arith.subf %165, %168 : vector<2x8x8xf32>
    %170 = math.exp %169 : vector<2x8x8xf32>
    %cst_67 = arith.constant dense<0.000000e+00> : vector<2x8xf32>
    %171 = vector.multi_reduction <add>, %170, %cst_67 [2] : vector<2x8x8xf32> to vector<2x8xf32>
    %172 = vector.shape_cast %171 : vector<2x8xf32> to vector<2x8x1xf32>
    %173 = tpu.reciprocal %172 {approx = true} : vector<2x8x1xf32> -> vector<2x8x1xf32>
    %174 = vector.broadcast %173 : vector<2x8x1xf32> to vector<2x8x8xf32>
    %175 = arith.mulf %170, %174 : vector<2x8x8xf32>
    "tpu.trace_start"() <{level = 10 : i32, message = "bqk,bkd->bqd"}> : () -> ()
    %cst_68 = arith.constant dense<0.000000e+00> : vector<2x8x8xf32>
    %176 = tpu.matmul %175, %164, %cst_68 {dimension_numbers = #tpu.dot_dimension_numbers<[2], [1], [1], [2], [0, 0, 0, 1, 1, 2], [0], [0]>} : vector<2x8x8xf32>, vector<2x8x8xf32>, vector<2x8x8xf32> -> vector<2x8x8xf32>
    "tpu.trace_stop"() : () -> ()
    %177 = vector.extract_strided_slice %144 {offsets = [0, 0, 16], sizes = [2, 8, 8], strides = [1, 1, 1]} : vector<2x8x32xf32> to vector<2x8x8xf32>
    %178 = vector.extract_strided_slice %145 {offsets = [0, 0, 16], sizes = [2, 8, 8], strides = [1, 1, 1]} : vector<2x8x32xf32> to vector<2x8x8xf32>
    %179 = vector.extract_strided_slice %146 {offsets = [0, 0, 16], sizes = [2, 8, 8], strides = [1, 1, 1]} : vector<2x8x32xf32> to vector<2x8x8xf32>
    "tpu.trace_start"() <{level = 10 : i32, message = "bqd,bkd->bqk"}> : () -> ()
    %cst_69 = arith.constant dense<0.000000e+00> : vector<2x8x8xf32>
    %180 = tpu.matmul %177, %178, %cst_69 {dimension_numbers = #tpu.dot_dimension_numbers<[2], [2], [1], [1], [0, 0, 0, 1, 1, 1], [0], [0]>} : vector<2x8x8xf32>, vector<2x8x8xf32>, vector<2x8x8xf32> -> vector<2x8x8xf32>
    "tpu.trace_stop"() : () -> ()
    %cst_70 = arith.constant dense<0xFF800000> : vector<2x8xf32>
    %181 = vector.multi_reduction <maximumf>, %180, %cst_70 [2] : vector<2x8x8xf32> to vector<2x8xf32>
    %182 = vector.shape_cast %181 : vector<2x8xf32> to vector<2x8x1xf32>
    %183 = vector.broadcast %182 : vector<2x8x1xf32> to vector<2x8x8xf32>
    %184 = arith.subf %180, %183 : vector<2x8x8xf32>
    %185 = math.exp %184 : vector<2x8x8xf32>
    %cst_71 = arith.constant dense<0.000000e+00> : vector<2x8xf32>
    %186 = vector.multi_reduction <add>, %185, %cst_71 [2] : vector<2x8x8xf32> to vector<2x8xf32>
    %187 = vector.shape_cast %186 : vector<2x8xf32> to vector<2x8x1xf32>
    %188 = tpu.reciprocal %187 {approx = true} : vector<2x8x1xf32> -> vector<2x8x1xf32>
    %189 = vector.broadcast %188 : vector<2x8x1xf32> to vector<2x8x8xf32>
    %190 = arith.mulf %185, %189 : vector<2x8x8xf32>
    "tpu.trace_start"() <{level = 10 : i32, message = "bqk,bkd->bqd"}> : () -> ()
    %cst_72 = arith.constant dense<0.000000e+00> : vector<2x8x8xf32>
    %191 = tpu.matmul %190, %179, %cst_72 {dimension_numbers = #tpu.dot_dimension_numbers<[2], [1], [1], [2], [0, 0, 0, 1, 1, 2], [0], [0]>} : vector<2x8x8xf32>, vector<2x8x8xf32>, vector<2x8x8xf32> -> vector<2x8x8xf32>
    "tpu.trace_stop"() : () -> ()
    %192 = vector.extract_strided_slice %144 {offsets = [0, 0, 24], sizes = [2, 8, 8], strides = [1, 1, 1]} : vector<2x8x32xf32> to vector<2x8x8xf32>
    %193 = vector.extract_strided_slice %145 {offsets = [0, 0, 24], sizes = [2, 8, 8], strides = [1, 1, 1]} : vector<2x8x32xf32> to vector<2x8x8xf32>
    %194 = vector.extract_strided_slice %146 {offsets = [0, 0, 24], sizes = [2, 8, 8], strides = [1, 1, 1]} : vector<2x8x32xf32> to vector<2x8x8xf32>
    "tpu.trace_start"() <{level = 10 : i32, message = "bqd,bkd->bqk"}> : () -> ()
    %cst_73 = arith.constant dense<0.000000e+00> : vector<2x8x8xf32>
    %195 = tpu.matmul %192, %193, %cst_73 {dimension_numbers = #tpu.dot_dimension_numbers<[2], [2], [1], [1], [0, 0, 0, 1, 1, 1], [0], [0]>} : vector<2x8x8xf32>, vector<2x8x8xf32>, vector<2x8x8xf32> -> vector<2x8x8xf32>
    "tpu.trace_stop"() : () -> ()
    %cst_74 = arith.constant dense<0xFF800000> : vector<2x8xf32>
    %196 = vector.multi_reduction <maximumf>, %195, %cst_74 [2] : vector<2x8x8xf32> to vector<2x8xf32>
    %197 = vector.shape_cast %196 : vector<2x8xf32> to vector<2x8x1xf32>
    %198 = vector.broadcast %197 : vector<2x8x1xf32> to vector<2x8x8xf32>
    %199 = arith.subf %195, %198 : vector<2x8x8xf32>
    %200 = math.exp %199 : vector<2x8x8xf32>
    %cst_75 = arith.constant dense<0.000000e+00> : vector<2x8xf32>
    %201 = vector.multi_reduction <add>, %200, %cst_75 [2] : vector<2x8x8xf32> to vector<2x8xf32>
    %202 = vector.shape_cast %201 : vector<2x8xf32> to vector<2x8x1xf32>
    %203 = tpu.reciprocal %202 {approx = true} : vector<2x8x1xf32> -> vector<2x8x1xf32>
    %204 = vector.broadcast %203 : vector<2x8x1xf32> to vector<2x8x8xf32>
    %205 = arith.mulf %200, %204 : vector<2x8x8xf32>
    "tpu.trace_start"() <{level = 10 : i32, message = "bqk,bkd->bqd"}> : () -> ()
    %cst_76 = arith.constant dense<0.000000e+00> : vector<2x8x8xf32>
    %206 = tpu.matmul %205, %194, %cst_76 {dimension_numbers = #tpu.dot_dimension_numbers<[2], [1], [1], [2], [0, 0, 0, 1, 1, 2], [0], [0]>} : vector<2x8x8xf32>, vector<2x8x8xf32>, vector<2x8x8xf32> -> vector<2x8x8xf32>
    "tpu.trace_stop"() : () -> ()
    %207 = tpu.concatenate %161, %176, %191, %206 in 2 : vector<2x8x8xf32>, vector<2x8x8xf32>, vector<2x8x8xf32>, vector<2x8x8xf32> -> vector<2x8x32xf32>
    %208 = vector.shape_cast %207 : vector<2x8x32xf32> to vector<16x32xf32>
    %c0_77 = arith.constant 0 : index
    %c0_78 = arith.constant 0 : index
    %c0_79 = arith.constant 0 : index
    %209 = vector.load %arg11[%c0_77, %c0_78, %c0_79] : memref<5x32x32xf32, #tpu.memory_space<vmem>>, vector<1x32x32xf32>
    %210 = vector.shape_cast %209 : vector<1x32x32xf32> to vector<32x32xf32>
    %cst_80 = arith.constant dense<0.000000e+00> : vector<16x32xf32>
    %211 = tpu.matmul %208, %210, %cst_80 {dimension_numbers = #tpu.dot_dimension_numbers<[1], [0], [0], [1], [0, 0, 1, 1], [], []>} : vector<16x32xf32>, vector<32x32xf32>, vector<16x32xf32> -> vector<16x32xf32>
    %c0_81 = arith.constant 0 : index
    %c0_82 = arith.constant 0 : index
    %c0_83 = arith.constant 0 : index
    %212 = vector.load %arg12[%c0_81, %c0_82, %c0_83] : memref<5x1x32xf32, #tpu.memory_space<vmem>>, vector<1x1x32xf32>
    %213 = vector.shape_cast %212 : vector<1x1x32xf32> to vector<1x32xf32>
    %214 = vector.broadcast %213 : vector<1x32xf32> to vector<16x32xf32>
    %215 = arith.addf %211, %214 : vector<16x32xf32>
    %216 = arith.addf %127, %215 : vector<16x32xf32>
    %217 = vector.extract_strided_slice %6 {offsets = [1, 0], sizes = [1, 32], strides = [1, 1]} : vector<3x32xf32> to vector<1x32xf32>
    %218 = vector.extract_strided_slice %8 {offsets = [1, 0], sizes = [1, 32], strides = [1, 1]} : vector<3x32xf32> to vector<1x32xf32>
    %cst_84 = arith.constant dense<0.000000e+00> : vector<16xf32>
    %219 = vector.multi_reduction <add>, %216, %cst_84 [1] : vector<16x32xf32> to vector<16xf32>
    %220 = vector.shape_cast %219 : vector<16xf32> to vector<16x1xf32>
    %cst_85 = arith.constant 3.200000e+01 : f32
    %221 = vector.broadcast %cst_85 : f32 to vector<16x1xf32>
    %222 = arith.divf %220, %221 : vector<16x1xf32>
    %223 = vector.broadcast %222 : vector<16x1xf32> to vector<16x32xf32>
    %224 = arith.subf %216, %223 : vector<16x32xf32>
    %225 = arith.mulf %224, %224 : vector<16x32xf32>
    %cst_86 = arith.constant dense<0.000000e+00> : vector<16xf32>
    %226 = vector.multi_reduction <add>, %225, %cst_86 [1] : vector<16x32xf32> to vector<16xf32>
    %227 = vector.shape_cast %226 : vector<16xf32> to vector<16x1xf32>
    %cst_87 = arith.constant 3.200000e+01 : f32
    %228 = vector.broadcast %cst_87 : f32 to vector<16x1xf32>
    %229 = arith.divf %227, %228 : vector<16x1xf32>
    %230 = vector.broadcast %222 : vector<16x1xf32> to vector<16x32xf32>
    %231 = arith.subf %216, %230 : vector<16x32xf32>
    %cst_88 = arith.constant 9.99999974E-6 : f32
    %232 = vector.broadcast %cst_88 : f32 to vector<16x1xf32>
    %233 = arith.addf %229, %232 : vector<16x1xf32>
    %234 = math.rsqrt %233 : vector<16x1xf32>
    %235 = vector.broadcast %234 : vector<16x1xf32> to vector<16x32xf32>
    %236 = arith.mulf %231, %235 : vector<16x32xf32>
    %237 = vector.broadcast %217 : vector<1x32xf32> to vector<16x32xf32>
    %238 = arith.mulf %236, %237 : vector<16x32xf32>
    %239 = vector.broadcast %218 : vector<1x32xf32> to vector<16x32xf32>
    %240 = arith.addf %238, %239 : vector<16x32xf32>
    %c0_89 = arith.constant 0 : index
    %c0_90 = arith.constant 0 : index
    %c0_91 = arith.constant 0 : index
    %241 = vector.load %arg15[%c0_89, %c0_90, %c0_91] : memref<5x32x128xf32, #tpu.memory_space<vmem>>, vector<1x32x128xf32>
    %242 = vector.shape_cast %241 : vector<1x32x128xf32> to vector<32x128xf32>
    %cst_92 = arith.constant dense<0.000000e+00> : vector<16x128xf32>
    %243 = tpu.matmul %240, %242, %cst_92 {dimension_numbers = #tpu.dot_dimension_numbers<[1], [0], [0], [1], [0, 0, 1, 1], [], []>} : vector<16x32xf32>, vector<32x128xf32>, vector<16x128xf32> -> vector<16x128xf32>
    %c0_93 = arith.constant 0 : index
    %c0_94 = arith.constant 0 : index
    %c0_95 = arith.constant 0 : index
    %244 = vector.load %arg16[%c0_93, %c0_94, %c0_95] : memref<5x1x128xf32, #tpu.memory_space<vmem>>, vector<1x1x128xf32>
    %245 = vector.shape_cast %244 : vector<1x1x128xf32> to vector<1x128xf32>
    %246 = vector.broadcast %245 : vector<1x128xf32> to vector<16x128xf32>
    %247 = arith.addf %243, %246 : vector<16x128xf32>
    %cst_96 = arith.constant 0.000000e+00 : f32
    %248 = vector.broadcast %cst_96 : f32 to vector<16x128xf32>
    %249 = arith.maximumf %247, %248 : vector<16x128xf32>
    %c0_97 = arith.constant 0 : index
    %c0_98 = arith.constant 0 : index
    %c0_99 = arith.constant 0 : index
    %250 = vector.load %arg17[%c0_97, %c0_98, %c0_99] : memref<5x128x32xf32, #tpu.memory_space<vmem>>, vector<1x128x32xf32>
    %251 = vector.shape_cast %250 : vector<1x128x32xf32> to vector<128x32xf32>
    %cst_100 = arith.constant dense<0.000000e+00> : vector<16x32xf32>
    %252 = tpu.matmul %249, %251, %cst_100 {dimension_numbers = #tpu.dot_dimension_numbers<[1], [0], [0], [1], [0, 0, 1, 1], [], []>} : vector<16x128xf32>, vector<128x32xf32>, vector<16x32xf32> -> vector<16x32xf32>
    %c0_101 = arith.constant 0 : index
    %c0_102 = arith.constant 0 : index
    %c0_103 = arith.constant 0 : index
    %253 = vector.load %arg18[%c0_101, %c0_102, %c0_103] : memref<5x1x32xf32, #tpu.memory_space<vmem>>, vector<1x1x32xf32>
    %254 = vector.shape_cast %253 : vector<1x1x32xf32> to vector<1x32xf32>
    %255 = vector.broadcast %254 : vector<1x32xf32> to vector<16x32xf32>
    %256 = arith.addf %252, %255 : vector<16x32xf32>
    %257 = arith.addf %240, %256 : vector<16x32xf32>
    %258 = vector.extract_strided_slice %6 {offsets = [2, 0], sizes = [1, 32], strides = [1, 1]} : vector<3x32xf32> to vector<1x32xf32>
    %259 = vector.extract_strided_slice %8 {offsets = [2, 0], sizes = [1, 32], strides = [1, 1]} : vector<3x32xf32> to vector<1x32xf32>
    %cst_104 = arith.constant dense<0.000000e+00> : vector<16xf32>
    %260 = vector.multi_reduction <add>, %257, %cst_104 [1] : vector<16x32xf32> to vector<16xf32>
    %261 = vector.shape_cast %260 : vector<16xf32> to vector<16x1xf32>
    %cst_105 = arith.constant 3.200000e+01 : f32
    %262 = vector.broadcast %cst_105 : f32 to vector<16x1xf32>
    %263 = arith.divf %261, %262 : vector<16x1xf32>
    %264 = vector.broadcast %263 : vector<16x1xf32> to vector<16x32xf32>
    %265 = arith.subf %257, %264 : vector<16x32xf32>
    %266 = arith.mulf %265, %265 : vector<16x32xf32>
    %cst_106 = arith.constant dense<0.000000e+00> : vector<16xf32>
    %267 = vector.multi_reduction <add>, %266, %cst_106 [1] : vector<16x32xf32> to vector<16xf32>
    %268 = vector.shape_cast %267 : vector<16xf32> to vector<16x1xf32>
    %cst_107 = arith.constant 3.200000e+01 : f32
    %269 = vector.broadcast %cst_107 : f32 to vector<16x1xf32>
    %270 = arith.divf %268, %269 : vector<16x1xf32>
    %271 = vector.broadcast %263 : vector<16x1xf32> to vector<16x32xf32>
    %272 = arith.subf %257, %271 : vector<16x32xf32>
    %cst_108 = arith.constant 9.99999974E-6 : f32
    %273 = vector.broadcast %cst_108 : f32 to vector<16x1xf32>
    %274 = arith.addf %270, %273 : vector<16x1xf32>
    %275 = math.rsqrt %274 : vector<16x1xf32>
    %276 = vector.broadcast %275 : vector<16x1xf32> to vector<16x32xf32>
    %277 = arith.mulf %272, %276 : vector<16x32xf32>
    %278 = vector.broadcast %258 : vector<1x32xf32> to vector<16x32xf32>
    %279 = arith.mulf %277, %278 : vector<16x32xf32>
    %280 = vector.broadcast %259 : vector<1x32xf32> to vector<16x32xf32>
    %281 = arith.addf %279, %280 : vector<16x32xf32>
    %c1 = arith.constant 1 : index
    %c0_109 = arith.constant 0 : index
    %c0_110 = arith.constant 0 : index
    %282 = vector.load %arg13[%c1, %c0_109, %c0_110] : memref<5x3x32xf32, #tpu.memory_space<vmem>>, vector<1x3x32xf32>
    %283 = vector.shape_cast %282 : vector<1x3x32xf32> to vector<3x32xf32>
    %c1_111 = arith.constant 1 : index
    %c0_112 = arith.constant 0 : index
    %c0_113 = arith.constant 0 : index
    %284 = vector.load %arg14[%c1_111, %c0_112, %c0_113] : memref<5x3x32xf32, #tpu.memory_space<vmem>>, vector<1x3x32xf32>
    %285 = vector.shape_cast %284 : vector<1x3x32xf32> to vector<3x32xf32>
    %c1_114 = arith.constant 1 : index
    %c0_115 = arith.constant 0 : index
    %c0_116 = arith.constant 0 : index
    %286 = vector.load %arg3[%c1_114, %c0_115, %c0_116] : memref<5x32x96xf32, #tpu.memory_space<vmem>>, vector<1x32x96xf32>
    %287 = vector.shape_cast %286 : vector<1x32x96xf32> to vector<32x96xf32>
    %cst_117 = arith.constant dense<0.000000e+00> : vector<16x96xf32>
    %288 = tpu.matmul %281, %287, %cst_117 {dimension_numbers = #tpu.dot_dimension_numbers<[1], [0], [0], [1], [0, 0, 1, 1], [], []>} : vector<16x32xf32>, vector<32x96xf32>, vector<16x96xf32> -> vector<16x96xf32>
    %c1_118 = arith.constant 1 : index
    %c0_119 = arith.constant 0 : index
    %c0_120 = arith.constant 0 : index
    %289 = vector.load %arg4[%c1_118, %c0_119, %c0_120] : memref<5x1x96xf32, #tpu.memory_space<vmem>>, vector<1x1x96xf32>
    %290 = vector.shape_cast %289 : vector<1x1x96xf32> to vector<1x96xf32>
    %291 = vector.broadcast %290 : vector<1x96xf32> to vector<16x96xf32>
    %292 = arith.addf %288, %291 : vector<16x96xf32>
    %293 = vector.extract_strided_slice %292 {offsets = [0, 0], sizes = [16, 32], strides = [1, 1]} : vector<16x96xf32> to vector<16x32xf32>
    %294 = vector.extract_strided_slice %292 {offsets = [0, 32], sizes = [16, 32], strides = [1, 1]} : vector<16x96xf32> to vector<16x32xf32>
    %295 = vector.extract_strided_slice %292 {offsets = [0, 64], sizes = [16, 32], strides = [1, 1]} : vector<16x96xf32> to vector<16x32xf32>
    %296 = vector.shape_cast %293 : vector<16x32xf32> to vector<2x8x32xf32>
    %297 = vector.shape_cast %294 : vector<16x32xf32> to vector<2x8x32xf32>
    %298 = vector.shape_cast %295 : vector<16x32xf32> to vector<2x8x32xf32>
    %299 = vector.extract_strided_slice %296 {offsets = [0, 0, 0], sizes = [2, 8, 8], strides = [1, 1, 1]} : vector<2x8x32xf32> to vector<2x8x8xf32>
    %300 = vector.extract_strided_slice %297 {offsets = [0, 0, 0], sizes = [2, 8, 8], strides = [1, 1, 1]} : vector<2x8x32xf32> to vector<2x8x8xf32>
    %301 = vector.extract_strided_slice %298 {offsets = [0, 0, 0], sizes = [2, 8, 8], strides = [1, 1, 1]} : vector<2x8x32xf32> to vector<2x8x8xf32>
    "tpu.trace_start"() <{level = 10 : i32, message = "bqd,bkd->bqk"}> : () -> ()
    %cst_121 = arith.constant dense<0.000000e+00> : vector<2x8x8xf32>
    %302 = tpu.matmul %299, %300, %cst_121 {dimension_numbers = #tpu.dot_dimension_numbers<[2], [2], [1], [1], [0, 0, 0, 1, 1, 1], [0], [0]>} : vector<2x8x8xf32>, vector<2x8x8xf32>, vector<2x8x8xf32> -> vector<2x8x8xf32>
    "tpu.trace_stop"() : () -> ()
    %303 = vector.shape_cast %4 : vector<8x8xf32> to vector<1x8x8xf32>
    %304 = vector.broadcast %303 : vector<1x8x8xf32> to vector<2x8x8xf32>
    %305 = arith.addf %302, %304 : vector<2x8x8xf32>
    %cst_122 = arith.constant dense<0xFF800000> : vector<2x8xf32>
    %306 = vector.multi_reduction <maximumf>, %305, %cst_122 [2] : vector<2x8x8xf32> to vector<2x8xf32>
    %307 = vector.shape_cast %306 : vector<2x8xf32> to vector<2x8x1xf32>
    %308 = vector.broadcast %307 : vector<2x8x1xf32> to vector<2x8x8xf32>
    %309 = arith.subf %305, %308 : vector<2x8x8xf32>
    %310 = math.exp %309 : vector<2x8x8xf32>
    %cst_123 = arith.constant dense<0.000000e+00> : vector<2x8xf32>
    %311 = vector.multi_reduction <add>, %310, %cst_123 [2] : vector<2x8x8xf32> to vector<2x8xf32>
    %312 = vector.shape_cast %311 : vector<2x8xf32> to vector<2x8x1xf32>
    %313 = tpu.reciprocal %312 {approx = true} : vector<2x8x1xf32> -> vector<2x8x1xf32>
    %314 = vector.broadcast %313 : vector<2x8x1xf32> to vector<2x8x8xf32>
    %315 = arith.mulf %310, %314 : vector<2x8x8xf32>
    "tpu.trace_start"() <{level = 10 : i32, message = "bqk,bkd->bqd"}> : () -> ()
    %cst_124 = arith.constant dense<0.000000e+00> : vector<2x8x8xf32>
    %316 = tpu.matmul %315, %301, %cst_124 {dimension_numbers = #tpu.dot_dimension_numbers<[2], [1], [1], [2], [0, 0, 0, 1, 1, 2], [0], [0]>} : vector<2x8x8xf32>, vector<2x8x8xf32>, vector<2x8x8xf32> -> vector<2x8x8xf32>
    "tpu.trace_stop"() : () -> ()
    %317 = vector.extract_strided_slice %296 {offsets = [0, 0, 8], sizes = [2, 8, 8], strides = [1, 1, 1]} : vector<2x8x32xf32> to vector<2x8x8xf32>
    %318 = vector.extract_strided_slice %297 {offsets = [0, 0, 8], sizes = [2, 8, 8], strides = [1, 1, 1]} : vector<2x8x32xf32> to vector<2x8x8xf32>
    %319 = vector.extract_strided_slice %298 {offsets = [0, 0, 8], sizes = [2, 8, 8], strides = [1, 1, 1]} : vector<2x8x32xf32> to vector<2x8x8xf32>
    "tpu.trace_start"() <{level = 10 : i32, message = "bqd,bkd->bqk"}> : () -> ()
    %cst_125 = arith.constant dense<0.000000e+00> : vector<2x8x8xf32>
    %320 = tpu.matmul %317, %318, %cst_125 {dimension_numbers = #tpu.dot_dimension_numbers<[2], [2], [1], [1], [0, 0, 0, 1, 1, 1], [0], [0]>} : vector<2x8x8xf32>, vector<2x8x8xf32>, vector<2x8x8xf32> -> vector<2x8x8xf32>
    "tpu.trace_stop"() : () -> ()
    %321 = vector.shape_cast %4 : vector<8x8xf32> to vector<1x8x8xf32>
    %322 = vector.broadcast %321 : vector<1x8x8xf32> to vector<2x8x8xf32>
    %323 = arith.addf %320, %322 : vector<2x8x8xf32>
    %cst_126 = arith.constant dense<0xFF800000> : vector<2x8xf32>
    %324 = vector.multi_reduction <maximumf>, %323, %cst_126 [2] : vector<2x8x8xf32> to vector<2x8xf32>
    %325 = vector.shape_cast %324 : vector<2x8xf32> to vector<2x8x1xf32>
    %326 = vector.broadcast %325 : vector<2x8x1xf32> to vector<2x8x8xf32>
    %327 = arith.subf %323, %326 : vector<2x8x8xf32>
    %328 = math.exp %327 : vector<2x8x8xf32>
    %cst_127 = arith.constant dense<0.000000e+00> : vector<2x8xf32>
    %329 = vector.multi_reduction <add>, %328, %cst_127 [2] : vector<2x8x8xf32> to vector<2x8xf32>
    %330 = vector.shape_cast %329 : vector<2x8xf32> to vector<2x8x1xf32>
    %331 = tpu.reciprocal %330 {approx = true} : vector<2x8x1xf32> -> vector<2x8x1xf32>
    %332 = vector.broadcast %331 : vector<2x8x1xf32> to vector<2x8x8xf32>
    %333 = arith.mulf %328, %332 : vector<2x8x8xf32>
    "tpu.trace_start"() <{level = 10 : i32, message = "bqk,bkd->bqd"}> : () -> ()
    %cst_128 = arith.constant dense<0.000000e+00> : vector<2x8x8xf32>
    %334 = tpu.matmul %333, %319, %cst_128 {dimension_numbers = #tpu.dot_dimension_numbers<[2], [1], [1], [2], [0, 0, 0, 1, 1, 2], [0], [0]>} : vector<2x8x8xf32>, vector<2x8x8xf32>, vector<2x8x8xf32> -> vector<2x8x8xf32>
    "tpu.trace_stop"() : () -> ()
    %335 = vector.extract_strided_slice %296 {offsets = [0, 0, 16], sizes = [2, 8, 8], strides = [1, 1, 1]} : vector<2x8x32xf32> to vector<2x8x8xf32>
    %336 = vector.extract_strided_slice %297 {offsets = [0, 0, 16], sizes = [2, 8, 8], strides = [1, 1, 1]} : vector<2x8x32xf32> to vector<2x8x8xf32>
    %337 = vector.extract_strided_slice %298 {offsets = [0, 0, 16], sizes = [2, 8, 8], strides = [1, 1, 1]} : vector<2x8x32xf32> to vector<2x8x8xf32>
    "tpu.trace_start"() <{level = 10 : i32, message = "bqd,bkd->bqk"}> : () -> ()
    %cst_129 = arith.constant dense<0.000000e+00> : vector<2x8x8xf32>
    %338 = tpu.matmul %335, %336, %cst_129 {dimension_numbers = #tpu.dot_dimension_numbers<[2], [2], [1], [1], [0, 0, 0, 1, 1, 1], [0], [0]>} : vector<2x8x8xf32>, vector<2x8x8xf32>, vector<2x8x8xf32> -> vector<2x8x8xf32>
    "tpu.trace_stop"() : () -> ()
    %339 = vector.shape_cast %4 : vector<8x8xf32> to vector<1x8x8xf32>
    %340 = vector.broadcast %339 : vector<1x8x8xf32> to vector<2x8x8xf32>
    %341 = arith.addf %338, %340 : vector<2x8x8xf32>
    %cst_130 = arith.constant dense<0xFF800000> : vector<2x8xf32>
    %342 = vector.multi_reduction <maximumf>, %341, %cst_130 [2] : vector<2x8x8xf32> to vector<2x8xf32>
    %343 = vector.shape_cast %342 : vector<2x8xf32> to vector<2x8x1xf32>
    %344 = vector.broadcast %343 : vector<2x8x1xf32> to vector<2x8x8xf32>
    %345 = arith.subf %341, %344 : vector<2x8x8xf32>
    %346 = math.exp %345 : vector<2x8x8xf32>
    %cst_131 = arith.constant dense<0.000000e+00> : vector<2x8xf32>
    %347 = vector.multi_reduction <add>, %346, %cst_131 [2] : vector<2x8x8xf32> to vector<2x8xf32>
    %348 = vector.shape_cast %347 : vector<2x8xf32> to vector<2x8x1xf32>
    %349 = tpu.reciprocal %348 {approx = true} : vector<2x8x1xf32> -> vector<2x8x1xf32>
    %350 = vector.broadcast %349 : vector<2x8x1xf32> to vector<2x8x8xf32>
    %351 = arith.mulf %346, %350 : vector<2x8x8xf32>
    "tpu.trace_start"() <{level = 10 : i32, message = "bqk,bkd->bqd"}> : () -> ()
    %cst_132 = arith.constant dense<0.000000e+00> : vector<2x8x8xf32>
    %352 = tpu.matmul %351, %337, %cst_132 {dimension_numbers = #tpu.dot_dimension_numbers<[2], [1], [1], [2], [0, 0, 0, 1, 1, 2], [0], [0]>} : vector<2x8x8xf32>, vector<2x8x8xf32>, vector<2x8x8xf32> -> vector<2x8x8xf32>
    "tpu.trace_stop"() : () -> ()
    %353 = vector.extract_strided_slice %296 {offsets = [0, 0, 24], sizes = [2, 8, 8], strides = [1, 1, 1]} : vector<2x8x32xf32> to vector<2x8x8xf32>
    %354 = vector.extract_strided_slice %297 {offsets = [0, 0, 24], sizes = [2, 8, 8], strides = [1, 1, 1]} : vector<2x8x32xf32> to vector<2x8x8xf32>
    %355 = vector.extract_strided_slice %298 {offsets = [0, 0, 24], sizes = [2, 8, 8], strides = [1, 1, 1]} : vector<2x8x32xf32> to vector<2x8x8xf32>
    "tpu.trace_start"() <{level = 10 : i32, message = "bqd,bkd->bqk"}> : () -> ()
    %cst_133 = arith.constant dense<0.000000e+00> : vector<2x8x8xf32>
    %356 = tpu.matmul %353, %354, %cst_133 {dimension_numbers = #tpu.dot_dimension_numbers<[2], [2], [1], [1], [0, 0, 0, 1, 1, 1], [0], [0]>} : vector<2x8x8xf32>, vector<2x8x8xf32>, vector<2x8x8xf32> -> vector<2x8x8xf32>
    "tpu.trace_stop"() : () -> ()
    %357 = vector.shape_cast %4 : vector<8x8xf32> to vector<1x8x8xf32>
    %358 = vector.broadcast %357 : vector<1x8x8xf32> to vector<2x8x8xf32>
    %359 = arith.addf %356, %358 : vector<2x8x8xf32>
    %cst_134 = arith.constant dense<0xFF800000> : vector<2x8xf32>
    %360 = vector.multi_reduction <maximumf>, %359, %cst_134 [2] : vector<2x8x8xf32> to vector<2x8xf32>
    %361 = vector.shape_cast %360 : vector<2x8xf32> to vector<2x8x1xf32>
    %362 = vector.broadcast %361 : vector<2x8x1xf32> to vector<2x8x8xf32>
    %363 = arith.subf %359, %362 : vector<2x8x8xf32>
    %364 = math.exp %363 : vector<2x8x8xf32>
    %cst_135 = arith.constant dense<0.000000e+00> : vector<2x8xf32>
    %365 = vector.multi_reduction <add>, %364, %cst_135 [2] : vector<2x8x8xf32> to vector<2x8xf32>
    %366 = vector.shape_cast %365 : vector<2x8xf32> to vector<2x8x1xf32>
    %367 = tpu.reciprocal %366 {approx = true} : vector<2x8x1xf32> -> vector<2x8x1xf32>
    %368 = vector.broadcast %367 : vector<2x8x1xf32> to vector<2x8x8xf32>
    %369 = arith.mulf %364, %368 : vector<2x8x8xf32>
    "tpu.trace_start"() <{level = 10 : i32, message = "bqk,bkd->bqd"}> : () -> ()
    %cst_136 = arith.constant dense<0.000000e+00> : vector<2x8x8xf32>
    %370 = tpu.matmul %369, %355, %cst_136 {dimension_numbers = #tpu.dot_dimension_numbers<[2], [1], [1], [2], [0, 0, 0, 1, 1, 2], [0], [0]>} : vector<2x8x8xf32>, vector<2x8x8xf32>, vector<2x8x8xf32> -> vector<2x8x8xf32>
    "tpu.trace_stop"() : () -> ()
    %371 = tpu.concatenate %316, %334, %352, %370 in 2 : vector<2x8x8xf32>, vector<2x8x8xf32>, vector<2x8x8xf32>, vector<2x8x8xf32> -> vector<2x8x32xf32>
    %372 = vector.shape_cast %371 : vector<2x8x32xf32> to vector<16x32xf32>
    %c1_137 = arith.constant 1 : index
    %c0_138 = arith.constant 0 : index
    %c0_139 = arith.constant 0 : index
    %373 = vector.load %arg5[%c1_137, %c0_138, %c0_139] : memref<5x32x32xf32, #tpu.memory_space<vmem>>, vector<1x32x32xf32>
    %374 = vector.shape_cast %373 : vector<1x32x32xf32> to vector<32x32xf32>
    %cst_140 = arith.constant dense<0.000000e+00> : vector<16x32xf32>
    %375 = tpu.matmul %372, %374, %cst_140 {dimension_numbers = #tpu.dot_dimension_numbers<[1], [0], [0], [1], [0, 0, 1, 1], [], []>} : vector<16x32xf32>, vector<32x32xf32>, vector<16x32xf32> -> vector<16x32xf32>
    %c1_141 = arith.constant 1 : index
    %c0_142 = arith.constant 0 : index
    %c0_143 = arith.constant 0 : index
    %376 = vector.load %arg6[%c1_141, %c0_142, %c0_143] : memref<5x1x32xf32, #tpu.memory_space<vmem>>, vector<1x1x32xf32>
    %377 = vector.shape_cast %376 : vector<1x1x32xf32> to vector<1x32xf32>
    %378 = vector.broadcast %377 : vector<1x32xf32> to vector<16x32xf32>
    %379 = arith.addf %375, %378 : vector<16x32xf32>
    %380 = arith.addf %281, %379 : vector<16x32xf32>
    %381 = vector.extract_strided_slice %283 {offsets = [0, 0], sizes = [1, 32], strides = [1, 1]} : vector<3x32xf32> to vector<1x32xf32>
    %382 = vector.extract_strided_slice %285 {offsets = [0, 0], sizes = [1, 32], strides = [1, 1]} : vector<3x32xf32> to vector<1x32xf32>
    %cst_144 = arith.constant dense<0.000000e+00> : vector<16xf32>
    %383 = vector.multi_reduction <add>, %380, %cst_144 [1] : vector<16x32xf32> to vector<16xf32>
    %384 = vector.shape_cast %383 : vector<16xf32> to vector<16x1xf32>
    %cst_145 = arith.constant 3.200000e+01 : f32
    %385 = vector.broadcast %cst_145 : f32 to vector<16x1xf32>
    %386 = arith.divf %384, %385 : vector<16x1xf32>
    %387 = vector.broadcast %386 : vector<16x1xf32> to vector<16x32xf32>
    %388 = arith.subf %380, %387 : vector<16x32xf32>
    %389 = arith.mulf %388, %388 : vector<16x32xf32>
    %cst_146 = arith.constant dense<0.000000e+00> : vector<16xf32>
    %390 = vector.multi_reduction <add>, %389, %cst_146 [1] : vector<16x32xf32> to vector<16xf32>
    %391 = vector.shape_cast %390 : vector<16xf32> to vector<16x1xf32>
    %cst_147 = arith.constant 3.200000e+01 : f32
    %392 = vector.broadcast %cst_147 : f32 to vector<16x1xf32>
    %393 = arith.divf %391, %392 : vector<16x1xf32>
    %394 = vector.broadcast %386 : vector<16x1xf32> to vector<16x32xf32>
    %395 = arith.subf %380, %394 : vector<16x32xf32>
    %cst_148 = arith.constant 9.99999974E-6 : f32
    %396 = vector.broadcast %cst_148 : f32 to vector<16x1xf32>
    %397 = arith.addf %393, %396 : vector<16x1xf32>
    %398 = math.rsqrt %397 : vector<16x1xf32>
    %399 = vector.broadcast %398 : vector<16x1xf32> to vector<16x32xf32>
    %400 = arith.mulf %395, %399 : vector<16x32xf32>
    %401 = vector.broadcast %381 : vector<1x32xf32> to vector<16x32xf32>
    %402 = arith.mulf %400, %401 : vector<16x32xf32>
    %403 = vector.broadcast %382 : vector<1x32xf32> to vector<16x32xf32>
    %404 = arith.addf %402, %403 : vector<16x32xf32>
    %c1_149 = arith.constant 1 : index
    %c0_150 = arith.constant 0 : index
    %c0_151 = arith.constant 0 : index
    %405 = vector.load %arg7[%c1_149, %c0_150, %c0_151] : memref<5x32x32xf32, #tpu.memory_space<vmem>>, vector<1x32x32xf32>
    %406 = vector.shape_cast %405 : vector<1x32x32xf32> to vector<32x32xf32>
    %cst_152 = arith.constant dense<0.000000e+00> : vector<16x32xf32>
    %407 = tpu.matmul %404, %406, %cst_152 {dimension_numbers = #tpu.dot_dimension_numbers<[1], [0], [0], [1], [0, 0, 1, 1], [], []>} : vector<16x32xf32>, vector<32x32xf32>, vector<16x32xf32> -> vector<16x32xf32>
    %c1_153 = arith.constant 1 : index
    %c0_154 = arith.constant 0 : index
    %c0_155 = arith.constant 0 : index
    %408 = vector.load %arg8[%c1_153, %c0_154, %c0_155] : memref<5x1x32xf32, #tpu.memory_space<vmem>>, vector<1x1x32xf32>
    %409 = vector.shape_cast %408 : vector<1x1x32xf32> to vector<1x32xf32>
    %410 = vector.broadcast %409 : vector<1x32xf32> to vector<16x32xf32>
    %411 = arith.addf %407, %410 : vector<16x32xf32>
    %c1_156 = arith.constant 1 : index
    %c0_157 = arith.constant 0 : index
    %c0_158 = arith.constant 0 : index
    %412 = vector.load %arg9[%c1_156, %c0_157, %c0_158] : memref<5x32x64xf32, #tpu.memory_space<vmem>>, vector<1x32x64xf32>
    %413 = vector.shape_cast %412 : vector<1x32x64xf32> to vector<32x64xf32>
    %cst_159 = arith.constant dense<0.000000e+00> : vector<16x64xf32>
    %414 = tpu.matmul %1, %413, %cst_159 {dimension_numbers = #tpu.dot_dimension_numbers<[1], [0], [0], [1], [0, 0, 1, 1], [], []>} : vector<16x32xf32>, vector<32x64xf32>, vector<16x64xf32> -> vector<16x64xf32>
    %c1_160 = arith.constant 1 : index
    %c0_161 = arith.constant 0 : index
    %c0_162 = arith.constant 0 : index
    %415 = vector.load %arg10[%c1_160, %c0_161, %c0_162] : memref<5x1x64xf32, #tpu.memory_space<vmem>>, vector<1x1x64xf32>
    %416 = vector.shape_cast %415 : vector<1x1x64xf32> to vector<1x64xf32>
    %417 = vector.broadcast %416 : vector<1x64xf32> to vector<16x64xf32>
    %418 = arith.addf %414, %417 : vector<16x64xf32>
    %419 = vector.extract_strided_slice %418 {offsets = [0, 0], sizes = [16, 32], strides = [1, 1]} : vector<16x64xf32> to vector<16x32xf32>
    %420 = vector.extract_strided_slice %418 {offsets = [0, 32], sizes = [16, 32], strides = [1, 1]} : vector<16x64xf32> to vector<16x32xf32>
    %421 = vector.shape_cast %411 : vector<16x32xf32> to vector<2x8x32xf32>
    %422 = vector.shape_cast %419 : vector<16x32xf32> to vector<2x8x32xf32>
    %423 = vector.shape_cast %420 : vector<16x32xf32> to vector<2x8x32xf32>
    %424 = vector.extract_strided_slice %421 {offsets = [0, 0, 0], sizes = [2, 8, 8], strides = [1, 1, 1]} : vector<2x8x32xf32> to vector<2x8x8xf32>
    %425 = vector.extract_strided_slice %422 {offsets = [0, 0, 0], sizes = [2, 8, 8], strides = [1, 1, 1]} : vector<2x8x32xf32> to vector<2x8x8xf32>
    %426 = vector.extract_strided_slice %423 {offsets = [0, 0, 0], sizes = [2, 8, 8], strides = [1, 1, 1]} : vector<2x8x32xf32> to vector<2x8x8xf32>
    "tpu.trace_start"() <{level = 10 : i32, message = "bqd,bkd->bqk"}> : () -> ()
    %cst_163 = arith.constant dense<0.000000e+00> : vector<2x8x8xf32>
    %427 = tpu.matmul %424, %425, %cst_163 {dimension_numbers = #tpu.dot_dimension_numbers<[2], [2], [1], [1], [0, 0, 0, 1, 1, 1], [0], [0]>} : vector<2x8x8xf32>, vector<2x8x8xf32>, vector<2x8x8xf32> -> vector<2x8x8xf32>
    "tpu.trace_stop"() : () -> ()
    %cst_164 = arith.constant dense<0xFF800000> : vector<2x8xf32>
    %428 = vector.multi_reduction <maximumf>, %427, %cst_164 [2] : vector<2x8x8xf32> to vector<2x8xf32>
    %429 = vector.shape_cast %428 : vector<2x8xf32> to vector<2x8x1xf32>
    %430 = vector.broadcast %429 : vector<2x8x1xf32> to vector<2x8x8xf32>
    %431 = arith.subf %427, %430 : vector<2x8x8xf32>
    %432 = math.exp %431 : vector<2x8x8xf32>
    %cst_165 = arith.constant dense<0.000000e+00> : vector<2x8xf32>
    %433 = vector.multi_reduction <add>, %432, %cst_165 [2] : vector<2x8x8xf32> to vector<2x8xf32>
    %434 = vector.shape_cast %433 : vector<2x8xf32> to vector<2x8x1xf32>
    %435 = tpu.reciprocal %434 {approx = true} : vector<2x8x1xf32> -> vector<2x8x1xf32>
    %436 = vector.broadcast %435 : vector<2x8x1xf32> to vector<2x8x8xf32>
    %437 = arith.mulf %432, %436 : vector<2x8x8xf32>
    "tpu.trace_start"() <{level = 10 : i32, message = "bqk,bkd->bqd"}> : () -> ()
    %cst_166 = arith.constant dense<0.000000e+00> : vector<2x8x8xf32>
    %438 = tpu.matmul %437, %426, %cst_166 {dimension_numbers = #tpu.dot_dimension_numbers<[2], [1], [1], [2], [0, 0, 0, 1, 1, 2], [0], [0]>} : vector<2x8x8xf32>, vector<2x8x8xf32>, vector<2x8x8xf32> -> vector<2x8x8xf32>
    "tpu.trace_stop"() : () -> ()
    %439 = vector.extract_strided_slice %421 {offsets = [0, 0, 8], sizes = [2, 8, 8], strides = [1, 1, 1]} : vector<2x8x32xf32> to vector<2x8x8xf32>
    %440 = vector.extract_strided_slice %422 {offsets = [0, 0, 8], sizes = [2, 8, 8], strides = [1, 1, 1]} : vector<2x8x32xf32> to vector<2x8x8xf32>
    %441 = vector.extract_strided_slice %423 {offsets = [0, 0, 8], sizes = [2, 8, 8], strides = [1, 1, 1]} : vector<2x8x32xf32> to vector<2x8x8xf32>
    "tpu.trace_start"() <{level = 10 : i32, message = "bqd,bkd->bqk"}> : () -> ()
    %cst_167 = arith.constant dense<0.000000e+00> : vector<2x8x8xf32>
    %442 = tpu.matmul %439, %440, %cst_167 {dimension_numbers = #tpu.dot_dimension_numbers<[2], [2], [1], [1], [0, 0, 0, 1, 1, 1], [0], [0]>} : vector<2x8x8xf32>, vector<2x8x8xf32>, vector<2x8x8xf32> -> vector<2x8x8xf32>
    "tpu.trace_stop"() : () -> ()
    %cst_168 = arith.constant dense<0xFF800000> : vector<2x8xf32>
    %443 = vector.multi_reduction <maximumf>, %442, %cst_168 [2] : vector<2x8x8xf32> to vector<2x8xf32>
    %444 = vector.shape_cast %443 : vector<2x8xf32> to vector<2x8x1xf32>
    %445 = vector.broadcast %444 : vector<2x8x1xf32> to vector<2x8x8xf32>
    %446 = arith.subf %442, %445 : vector<2x8x8xf32>
    %447 = math.exp %446 : vector<2x8x8xf32>
    %cst_169 = arith.constant dense<0.000000e+00> : vector<2x8xf32>
    %448 = vector.multi_reduction <add>, %447, %cst_169 [2] : vector<2x8x8xf32> to vector<2x8xf32>
    %449 = vector.shape_cast %448 : vector<2x8xf32> to vector<2x8x1xf32>
    %450 = tpu.reciprocal %449 {approx = true} : vector<2x8x1xf32> -> vector<2x8x1xf32>
    %451 = vector.broadcast %450 : vector<2x8x1xf32> to vector<2x8x8xf32>
    %452 = arith.mulf %447, %451 : vector<2x8x8xf32>
    "tpu.trace_start"() <{level = 10 : i32, message = "bqk,bkd->bqd"}> : () -> ()
    %cst_170 = arith.constant dense<0.000000e+00> : vector<2x8x8xf32>
    %453 = tpu.matmul %452, %441, %cst_170 {dimension_numbers = #tpu.dot_dimension_numbers<[2], [1], [1], [2], [0, 0, 0, 1, 1, 2], [0], [0]>} : vector<2x8x8xf32>, vector<2x8x8xf32>, vector<2x8x8xf32> -> vector<2x8x8xf32>
    "tpu.trace_stop"() : () -> ()
    %454 = vector.extract_strided_slice %421 {offsets = [0, 0, 16], sizes = [2, 8, 8], strides = [1, 1, 1]} : vector<2x8x32xf32> to vector<2x8x8xf32>
    %455 = vector.extract_strided_slice %422 {offsets = [0, 0, 16], sizes = [2, 8, 8], strides = [1, 1, 1]} : vector<2x8x32xf32> to vector<2x8x8xf32>
    %456 = vector.extract_strided_slice %423 {offsets = [0, 0, 16], sizes = [2, 8, 8], strides = [1, 1, 1]} : vector<2x8x32xf32> to vector<2x8x8xf32>
    "tpu.trace_start"() <{level = 10 : i32, message = "bqd,bkd->bqk"}> : () -> ()
    %cst_171 = arith.constant dense<0.000000e+00> : vector<2x8x8xf32>
    %457 = tpu.matmul %454, %455, %cst_171 {dimension_numbers = #tpu.dot_dimension_numbers<[2], [2], [1], [1], [0, 0, 0, 1, 1, 1], [0], [0]>} : vector<2x8x8xf32>, vector<2x8x8xf32>, vector<2x8x8xf32> -> vector<2x8x8xf32>
    "tpu.trace_stop"() : () -> ()
    %cst_172 = arith.constant dense<0xFF800000> : vector<2x8xf32>
    %458 = vector.multi_reduction <maximumf>, %457, %cst_172 [2] : vector<2x8x8xf32> to vector<2x8xf32>
    %459 = vector.shape_cast %458 : vector<2x8xf32> to vector<2x8x1xf32>
    %460 = vector.broadcast %459 : vector<2x8x1xf32> to vector<2x8x8xf32>
    %461 = arith.subf %457, %460 : vector<2x8x8xf32>
    %462 = math.exp %461 : vector<2x8x8xf32>
    %cst_173 = arith.constant dense<0.000000e+00> : vector<2x8xf32>
    %463 = vector.multi_reduction <add>, %462, %cst_173 [2] : vector<2x8x8xf32> to vector<2x8xf32>
    %464 = vector.shape_cast %463 : vector<2x8xf32> to vector<2x8x1xf32>
    %465 = tpu.reciprocal %464 {approx = true} : vector<2x8x1xf32> -> vector<2x8x1xf32>
    %466 = vector.broadcast %465 : vector<2x8x1xf32> to vector<2x8x8xf32>
    %467 = arith.mulf %462, %466 : vector<2x8x8xf32>
    "tpu.trace_start"() <{level = 10 : i32, message = "bqk,bkd->bqd"}> : () -> ()
    %cst_174 = arith.constant dense<0.000000e+00> : vector<2x8x8xf32>
    %468 = tpu.matmul %467, %456, %cst_174 {dimension_numbers = #tpu.dot_dimension_numbers<[2], [1], [1], [2], [0, 0, 0, 1, 1, 2], [0], [0]>} : vector<2x8x8xf32>, vector<2x8x8xf32>, vector<2x8x8xf32> -> vector<2x8x8xf32>
    "tpu.trace_stop"() : () -> ()
    %469 = vector.extract_strided_slice %421 {offsets = [0, 0, 24], sizes = [2, 8, 8], strides = [1, 1, 1]} : vector<2x8x32xf32> to vector<2x8x8xf32>
    %470 = vector.extract_strided_slice %422 {offsets = [0, 0, 24], sizes = [2, 8, 8], strides = [1, 1, 1]} : vector<2x8x32xf32> to vector<2x8x8xf32>
    %471 = vector.extract_strided_slice %423 {offsets = [0, 0, 24], sizes = [2, 8, 8], strides = [1, 1, 1]} : vector<2x8x32xf32> to vector<2x8x8xf32>
    "tpu.trace_start"() <{level = 10 : i32, message = "bqd,bkd->bqk"}> : () -> ()
    %cst_175 = arith.constant dense<0.000000e+00> : vector<2x8x8xf32>
    %472 = tpu.matmul %469, %470, %cst_175 {dimension_numbers = #tpu.dot_dimension_numbers<[2], [2], [1], [1], [0, 0, 0, 1, 1, 1], [0], [0]>} : vector<2x8x8xf32>, vector<2x8x8xf32>, vector<2x8x8xf32> -> vector<2x8x8xf32>
    "tpu.trace_stop"() : () -> ()
    %cst_176 = arith.constant dense<0xFF800000> : vector<2x8xf32>
    %473 = vector.multi_reduction <maximumf>, %472, %cst_176 [2] : vector<2x8x8xf32> to vector<2x8xf32>
    %474 = vector.shape_cast %473 : vector<2x8xf32> to vector<2x8x1xf32>
    %475 = vector.broadcast %474 : vector<2x8x1xf32> to vector<2x8x8xf32>
    %476 = arith.subf %472, %475 : vector<2x8x8xf32>
    %477 = math.exp %476 : vector<2x8x8xf32>
    %cst_177 = arith.constant dense<0.000000e+00> : vector<2x8xf32>
    %478 = vector.multi_reduction <add>, %477, %cst_177 [2] : vector<2x8x8xf32> to vector<2x8xf32>
    %479 = vector.shape_cast %478 : vector<2x8xf32> to vector<2x8x1xf32>
    %480 = tpu.reciprocal %479 {approx = true} : vector<2x8x1xf32> -> vector<2x8x1xf32>
    %481 = vector.broadcast %480 : vector<2x8x1xf32> to vector<2x8x8xf32>
    %482 = arith.mulf %477, %481 : vector<2x8x8xf32>
    "tpu.trace_start"() <{level = 10 : i32, message = "bqk,bkd->bqd"}> : () -> ()
    %cst_178 = arith.constant dense<0.000000e+00> : vector<2x8x8xf32>
    %483 = tpu.matmul %482, %471, %cst_178 {dimension_numbers = #tpu.dot_dimension_numbers<[2], [1], [1], [2], [0, 0, 0, 1, 1, 2], [0], [0]>} : vector<2x8x8xf32>, vector<2x8x8xf32>, vector<2x8x8xf32> -> vector<2x8x8xf32>
    "tpu.trace_stop"() : () -> ()
    %484 = tpu.concatenate %438, %453, %468, %483 in 2 : vector<2x8x8xf32>, vector<2x8x8xf32>, vector<2x8x8xf32>, vector<2x8x8xf32> -> vector<2x8x32xf32>
    %485 = vector.shape_cast %484 : vector<2x8x32xf32> to vector<16x32xf32>
    %c1_179 = arith.constant 1 : index
    %c0_180 = arith.constant 0 : index
    %c0_181 = arith.constant 0 : index
    %486 = vector.load %arg11[%c1_179, %c0_180, %c0_181] : memref<5x32x32xf32, #tpu.memory_space<vmem>>, vector<1x32x32xf32>
    %487 = vector.shape_cast %486 : vector<1x32x32xf32> to vector<32x32xf32>
    %cst_182 = arith.constant dense<0.000000e+00> : vector<16x32xf32>
    %488 = tpu.matmul %485, %487, %cst_182 {dimension_numbers = #tpu.dot_dimension_numbers<[1], [0], [0], [1], [0, 0, 1, 1], [], []>} : vector<16x32xf32>, vector<32x32xf32>, vector<16x32xf32> -> vector<16x32xf32>
    %c1_183 = arith.constant 1 : index
    %c0_184 = arith.constant 0 : index
    %c0_185 = arith.constant 0 : index
    %489 = vector.load %arg12[%c1_183, %c0_184, %c0_185] : memref<5x1x32xf32, #tpu.memory_space<vmem>>, vector<1x1x32xf32>
    %490 = vector.shape_cast %489 : vector<1x1x32xf32> to vector<1x32xf32>
    %491 = vector.broadcast %490 : vector<1x32xf32> to vector<16x32xf32>
    %492 = arith.addf %488, %491 : vector<16x32xf32>
    %493 = arith.addf %404, %492 : vector<16x32xf32>
    %494 = vector.extract_strided_slice %283 {offsets = [1, 0], sizes = [1, 32], strides = [1, 1]} : vector<3x32xf32> to vector<1x32xf32>
    %495 = vector.extract_strided_slice %285 {offsets = [1, 0], sizes = [1, 32], strides = [1, 1]} : vector<3x32xf32> to vector<1x32xf32>
    %cst_186 = arith.constant dense<0.000000e+00> : vector<16xf32>
    %496 = vector.multi_reduction <add>, %493, %cst_186 [1] : vector<16x32xf32> to vector<16xf32>
    %497 = vector.shape_cast %496 : vector<16xf32> to vector<16x1xf32>
    %cst_187 = arith.constant 3.200000e+01 : f32
    %498 = vector.broadcast %cst_187 : f32 to vector<16x1xf32>
    %499 = arith.divf %497, %498 : vector<16x1xf32>
    %500 = vector.broadcast %499 : vector<16x1xf32> to vector<16x32xf32>
    %501 = arith.subf %493, %500 : vector<16x32xf32>
    %502 = arith.mulf %501, %501 : vector<16x32xf32>
    %cst_188 = arith.constant dense<0.000000e+00> : vector<16xf32>
    %503 = vector.multi_reduction <add>, %502, %cst_188 [1] : vector<16x32xf32> to vector<16xf32>
    %504 = vector.shape_cast %503 : vector<16xf32> to vector<16x1xf32>
    %cst_189 = arith.constant 3.200000e+01 : f32
    %505 = vector.broadcast %cst_189 : f32 to vector<16x1xf32>
    %506 = arith.divf %504, %505 : vector<16x1xf32>
    %507 = vector.broadcast %499 : vector<16x1xf32> to vector<16x32xf32>
    %508 = arith.subf %493, %507 : vector<16x32xf32>
    %cst_190 = arith.constant 9.99999974E-6 : f32
    %509 = vector.broadcast %cst_190 : f32 to vector<16x1xf32>
    %510 = arith.addf %506, %509 : vector<16x1xf32>
    %511 = math.rsqrt %510 : vector<16x1xf32>
    %512 = vector.broadcast %511 : vector<16x1xf32> to vector<16x32xf32>
    %513 = arith.mulf %508, %512 : vector<16x32xf32>
    %514 = vector.broadcast %494 : vector<1x32xf32> to vector<16x32xf32>
    %515 = arith.mulf %513, %514 : vector<16x32xf32>
    %516 = vector.broadcast %495 : vector<1x32xf32> to vector<16x32xf32>
    %517 = arith.addf %515, %516 : vector<16x32xf32>
    %c1_191 = arith.constant 1 : index
    %c0_192 = arith.constant 0 : index
    %c0_193 = arith.constant 0 : index
    %518 = vector.load %arg15[%c1_191, %c0_192, %c0_193] : memref<5x32x128xf32, #tpu.memory_space<vmem>>, vector<1x32x128xf32>
    %519 = vector.shape_cast %518 : vector<1x32x128xf32> to vector<32x128xf32>
    %cst_194 = arith.constant dense<0.000000e+00> : vector<16x128xf32>
    %520 = tpu.matmul %517, %519, %cst_194 {dimension_numbers = #tpu.dot_dimension_numbers<[1], [0], [0], [1], [0, 0, 1, 1], [], []>} : vector<16x32xf32>, vector<32x128xf32>, vector<16x128xf32> -> vector<16x128xf32>
    %c1_195 = arith.constant 1 : index
    %c0_196 = arith.constant 0 : index
    %c0_197 = arith.constant 0 : index
    %521 = vector.load %arg16[%c1_195, %c0_196, %c0_197] : memref<5x1x128xf32, #tpu.memory_space<vmem>>, vector<1x1x128xf32>
    %522 = vector.shape_cast %521 : vector<1x1x128xf32> to vector<1x128xf32>
    %523 = vector.broadcast %522 : vector<1x128xf32> to vector<16x128xf32>
    %524 = arith.addf %520, %523 : vector<16x128xf32>
    %cst_198 = arith.constant 0.000000e+00 : f32
    %525 = vector.broadcast %cst_198 : f32 to vector<16x128xf32>
    %526 = arith.maximumf %524, %525 : vector<16x128xf32>
    %c1_199 = arith.constant 1 : index
    %c0_200 = arith.constant 0 : index
    %c0_201 = arith.constant 0 : index
    %527 = vector.load %arg17[%c1_199, %c0_200, %c0_201] : memref<5x128x32xf32, #tpu.memory_space<vmem>>, vector<1x128x32xf32>
    %528 = vector.shape_cast %527 : vector<1x128x32xf32> to vector<128x32xf32>
    %cst_202 = arith.constant dense<0.000000e+00> : vector<16x32xf32>
    %529 = tpu.matmul %526, %528, %cst_202 {dimension_numbers = #tpu.dot_dimension_numbers<[1], [0], [0], [1], [0, 0, 1, 1], [], []>} : vector<16x128xf32>, vector<128x32xf32>, vector<16x32xf32> -> vector<16x32xf32>
    %c1_203 = arith.constant 1 : index
    %c0_204 = arith.constant 0 : index
    %c0_205 = arith.constant 0 : index
    %530 = vector.load %arg18[%c1_203, %c0_204, %c0_205] : memref<5x1x32xf32, #tpu.memory_space<vmem>>, vector<1x1x32xf32>
    %531 = vector.shape_cast %530 : vector<1x1x32xf32> to vector<1x32xf32>
    %532 = vector.broadcast %531 : vector<1x32xf32> to vector<16x32xf32>
    %533 = arith.addf %529, %532 : vector<16x32xf32>
    %534 = arith.addf %517, %533 : vector<16x32xf32>
    %535 = vector.extract_strided_slice %283 {offsets = [2, 0], sizes = [1, 32], strides = [1, 1]} : vector<3x32xf32> to vector<1x32xf32>
    %536 = vector.extract_strided_slice %285 {offsets = [2, 0], sizes = [1, 32], strides = [1, 1]} : vector<3x32xf32> to vector<1x32xf32>
    %cst_206 = arith.constant dense<0.000000e+00> : vector<16xf32>
    %537 = vector.multi_reduction <add>, %534, %cst_206 [1] : vector<16x32xf32> to vector<16xf32>
    %538 = vector.shape_cast %537 : vector<16xf32> to vector<16x1xf32>
    %cst_207 = arith.constant 3.200000e+01 : f32
    %539 = vector.broadcast %cst_207 : f32 to vector<16x1xf32>
    %540 = arith.divf %538, %539 : vector<16x1xf32>
    %541 = vector.broadcast %540 : vector<16x1xf32> to vector<16x32xf32>
    %542 = arith.subf %534, %541 : vector<16x32xf32>
    %543 = arith.mulf %542, %542 : vector<16x32xf32>
    %cst_208 = arith.constant dense<0.000000e+00> : vector<16xf32>
    %544 = vector.multi_reduction <add>, %543, %cst_208 [1] : vector<16x32xf32> to vector<16xf32>
    %545 = vector.shape_cast %544 : vector<16xf32> to vector<16x1xf32>
    %cst_209 = arith.constant 3.200000e+01 : f32
    %546 = vector.broadcast %cst_209 : f32 to vector<16x1xf32>
    %547 = arith.divf %545, %546 : vector<16x1xf32>
    %548 = vector.broadcast %540 : vector<16x1xf32> to vector<16x32xf32>
    %549 = arith.subf %534, %548 : vector<16x32xf32>
    %cst_210 = arith.constant 9.99999974E-6 : f32
    %550 = vector.broadcast %cst_210 : f32 to vector<16x1xf32>
    %551 = arith.addf %547, %550 : vector<16x1xf32>
    %552 = math.rsqrt %551 : vector<16x1xf32>
    %553 = vector.broadcast %552 : vector<16x1xf32> to vector<16x32xf32>
    %554 = arith.mulf %549, %553 : vector<16x32xf32>
    %555 = vector.broadcast %535 : vector<1x32xf32> to vector<16x32xf32>
    %556 = arith.mulf %554, %555 : vector<16x32xf32>
    %557 = vector.broadcast %536 : vector<1x32xf32> to vector<16x32xf32>
    %558 = arith.addf %556, %557 : vector<16x32xf32>
    %c2 = arith.constant 2 : index
    %c0_211 = arith.constant 0 : index
    %c0_212 = arith.constant 0 : index
    %559 = vector.load %arg13[%c2, %c0_211, %c0_212] : memref<5x3x32xf32, #tpu.memory_space<vmem>>, vector<1x3x32xf32>
    %560 = vector.shape_cast %559 : vector<1x3x32xf32> to vector<3x32xf32>
    %c2_213 = arith.constant 2 : index
    %c0_214 = arith.constant 0 : index
    %c0_215 = arith.constant 0 : index
    %561 = vector.load %arg14[%c2_213, %c0_214, %c0_215] : memref<5x3x32xf32, #tpu.memory_space<vmem>>, vector<1x3x32xf32>
    %562 = vector.shape_cast %561 : vector<1x3x32xf32> to vector<3x32xf32>
    %c2_216 = arith.constant 2 : index
    %c0_217 = arith.constant 0 : index
    %c0_218 = arith.constant 0 : index
    %563 = vector.load %arg3[%c2_216, %c0_217, %c0_218] : memref<5x32x96xf32, #tpu.memory_space<vmem>>, vector<1x32x96xf32>
    %564 = vector.shape_cast %563 : vector<1x32x96xf32> to vector<32x96xf32>
    %cst_219 = arith.constant dense<0.000000e+00> : vector<16x96xf32>
    %565 = tpu.matmul %558, %564, %cst_219 {dimension_numbers = #tpu.dot_dimension_numbers<[1], [0], [0], [1], [0, 0, 1, 1], [], []>} : vector<16x32xf32>, vector<32x96xf32>, vector<16x96xf32> -> vector<16x96xf32>
    %c2_220 = arith.constant 2 : index
    %c0_221 = arith.constant 0 : index
    %c0_222 = arith.constant 0 : index
    %566 = vector.load %arg4[%c2_220, %c0_221, %c0_222] : memref<5x1x96xf32, #tpu.memory_space<vmem>>, vector<1x1x96xf32>
    %567 = vector.shape_cast %566 : vector<1x1x96xf32> to vector<1x96xf32>
    %568 = vector.broadcast %567 : vector<1x96xf32> to vector<16x96xf32>
    %569 = arith.addf %565, %568 : vector<16x96xf32>
    %570 = vector.extract_strided_slice %569 {offsets = [0, 0], sizes = [16, 32], strides = [1, 1]} : vector<16x96xf32> to vector<16x32xf32>
    %571 = vector.extract_strided_slice %569 {offsets = [0, 32], sizes = [16, 32], strides = [1, 1]} : vector<16x96xf32> to vector<16x32xf32>
    %572 = vector.extract_strided_slice %569 {offsets = [0, 64], sizes = [16, 32], strides = [1, 1]} : vector<16x96xf32> to vector<16x32xf32>
    %573 = vector.shape_cast %570 : vector<16x32xf32> to vector<2x8x32xf32>
    %574 = vector.shape_cast %571 : vector<16x32xf32> to vector<2x8x32xf32>
    %575 = vector.shape_cast %572 : vector<16x32xf32> to vector<2x8x32xf32>
    %576 = vector.extract_strided_slice %573 {offsets = [0, 0, 0], sizes = [2, 8, 8], strides = [1, 1, 1]} : vector<2x8x32xf32> to vector<2x8x8xf32>
    %577 = vector.extract_strided_slice %574 {offsets = [0, 0, 0], sizes = [2, 8, 8], strides = [1, 1, 1]} : vector<2x8x32xf32> to vector<2x8x8xf32>
    %578 = vector.extract_strided_slice %575 {offsets = [0, 0, 0], sizes = [2, 8, 8], strides = [1, 1, 1]} : vector<2x8x32xf32> to vector<2x8x8xf32>
    "tpu.trace_start"() <{level = 10 : i32, message = "bqd,bkd->bqk"}> : () -> ()
    %cst_223 = arith.constant dense<0.000000e+00> : vector<2x8x8xf32>
    %579 = tpu.matmul %576, %577, %cst_223 {dimension_numbers = #tpu.dot_dimension_numbers<[2], [2], [1], [1], [0, 0, 0, 1, 1, 1], [0], [0]>} : vector<2x8x8xf32>, vector<2x8x8xf32>, vector<2x8x8xf32> -> vector<2x8x8xf32>
    "tpu.trace_stop"() : () -> ()
    %580 = vector.shape_cast %4 : vector<8x8xf32> to vector<1x8x8xf32>
    %581 = vector.broadcast %580 : vector<1x8x8xf32> to vector<2x8x8xf32>
    %582 = arith.addf %579, %581 : vector<2x8x8xf32>
    %cst_224 = arith.constant dense<0xFF800000> : vector<2x8xf32>
    %583 = vector.multi_reduction <maximumf>, %582, %cst_224 [2] : vector<2x8x8xf32> to vector<2x8xf32>
    %584 = vector.shape_cast %583 : vector<2x8xf32> to vector<2x8x1xf32>
    %585 = vector.broadcast %584 : vector<2x8x1xf32> to vector<2x8x8xf32>
    %586 = arith.subf %582, %585 : vector<2x8x8xf32>
    %587 = math.exp %586 : vector<2x8x8xf32>
    %cst_225 = arith.constant dense<0.000000e+00> : vector<2x8xf32>
    %588 = vector.multi_reduction <add>, %587, %cst_225 [2] : vector<2x8x8xf32> to vector<2x8xf32>
    %589 = vector.shape_cast %588 : vector<2x8xf32> to vector<2x8x1xf32>
    %590 = tpu.reciprocal %589 {approx = true} : vector<2x8x1xf32> -> vector<2x8x1xf32>
    %591 = vector.broadcast %590 : vector<2x8x1xf32> to vector<2x8x8xf32>
    %592 = arith.mulf %587, %591 : vector<2x8x8xf32>
    "tpu.trace_start"() <{level = 10 : i32, message = "bqk,bkd->bqd"}> : () -> ()
    %cst_226 = arith.constant dense<0.000000e+00> : vector<2x8x8xf32>
    %593 = tpu.matmul %592, %578, %cst_226 {dimension_numbers = #tpu.dot_dimension_numbers<[2], [1], [1], [2], [0, 0, 0, 1, 1, 2], [0], [0]>} : vector<2x8x8xf32>, vector<2x8x8xf32>, vector<2x8x8xf32> -> vector<2x8x8xf32>
    "tpu.trace_stop"() : () -> ()
    %594 = vector.extract_strided_slice %573 {offsets = [0, 0, 8], sizes = [2, 8, 8], strides = [1, 1, 1]} : vector<2x8x32xf32> to vector<2x8x8xf32>
    %595 = vector.extract_strided_slice %574 {offsets = [0, 0, 8], sizes = [2, 8, 8], strides = [1, 1, 1]} : vector<2x8x32xf32> to vector<2x8x8xf32>
    %596 = vector.extract_strided_slice %575 {offsets = [0, 0, 8], sizes = [2, 8, 8], strides = [1, 1, 1]} : vector<2x8x32xf32> to vector<2x8x8xf32>
    "tpu.trace_start"() <{level = 10 : i32, message = "bqd,bkd->bqk"}> : () -> ()
    %cst_227 = arith.constant dense<0.000000e+00> : vector<2x8x8xf32>
    %597 = tpu.matmul %594, %595, %cst_227 {dimension_numbers = #tpu.dot_dimension_numbers<[2], [2], [1], [1], [0, 0, 0, 1, 1, 1], [0], [0]>} : vector<2x8x8xf32>, vector<2x8x8xf32>, vector<2x8x8xf32> -> vector<2x8x8xf32>
    "tpu.trace_stop"() : () -> ()
    %598 = vector.shape_cast %4 : vector<8x8xf32> to vector<1x8x8xf32>
    %599 = vector.broadcast %598 : vector<1x8x8xf32> to vector<2x8x8xf32>
    %600 = arith.addf %597, %599 : vector<2x8x8xf32>
    %cst_228 = arith.constant dense<0xFF800000> : vector<2x8xf32>
    %601 = vector.multi_reduction <maximumf>, %600, %cst_228 [2] : vector<2x8x8xf32> to vector<2x8xf32>
    %602 = vector.shape_cast %601 : vector<2x8xf32> to vector<2x8x1xf32>
    %603 = vector.broadcast %602 : vector<2x8x1xf32> to vector<2x8x8xf32>
    %604 = arith.subf %600, %603 : vector<2x8x8xf32>
    %605 = math.exp %604 : vector<2x8x8xf32>
    %cst_229 = arith.constant dense<0.000000e+00> : vector<2x8xf32>
    %606 = vector.multi_reduction <add>, %605, %cst_229 [2] : vector<2x8x8xf32> to vector<2x8xf32>
    %607 = vector.shape_cast %606 : vector<2x8xf32> to vector<2x8x1xf32>
    %608 = tpu.reciprocal %607 {approx = true} : vector<2x8x1xf32> -> vector<2x8x1xf32>
    %609 = vector.broadcast %608 : vector<2x8x1xf32> to vector<2x8x8xf32>
    %610 = arith.mulf %605, %609 : vector<2x8x8xf32>
    "tpu.trace_start"() <{level = 10 : i32, message = "bqk,bkd->bqd"}> : () -> ()
    %cst_230 = arith.constant dense<0.000000e+00> : vector<2x8x8xf32>
    %611 = tpu.matmul %610, %596, %cst_230 {dimension_numbers = #tpu.dot_dimension_numbers<[2], [1], [1], [2], [0, 0, 0, 1, 1, 2], [0], [0]>} : vector<2x8x8xf32>, vector<2x8x8xf32>, vector<2x8x8xf32> -> vector<2x8x8xf32>
    "tpu.trace_stop"() : () -> ()
    %612 = vector.extract_strided_slice %573 {offsets = [0, 0, 16], sizes = [2, 8, 8], strides = [1, 1, 1]} : vector<2x8x32xf32> to vector<2x8x8xf32>
    %613 = vector.extract_strided_slice %574 {offsets = [0, 0, 16], sizes = [2, 8, 8], strides = [1, 1, 1]} : vector<2x8x32xf32> to vector<2x8x8xf32>
    %614 = vector.extract_strided_slice %575 {offsets = [0, 0, 16], sizes = [2, 8, 8], strides = [1, 1, 1]} : vector<2x8x32xf32> to vector<2x8x8xf32>
    "tpu.trace_start"() <{level = 10 : i32, message = "bqd,bkd->bqk"}> : () -> ()
    %cst_231 = arith.constant dense<0.000000e+00> : vector<2x8x8xf32>
    %615 = tpu.matmul %612, %613, %cst_231 {dimension_numbers = #tpu.dot_dimension_numbers<[2], [2], [1], [1], [0, 0, 0, 1, 1, 1], [0], [0]>} : vector<2x8x8xf32>, vector<2x8x8xf32>, vector<2x8x8xf32> -> vector<2x8x8xf32>
    "tpu.trace_stop"() : () -> ()
    %616 = vector.shape_cast %4 : vector<8x8xf32> to vector<1x8x8xf32>
    %617 = vector.broadcast %616 : vector<1x8x8xf32> to vector<2x8x8xf32>
    %618 = arith.addf %615, %617 : vector<2x8x8xf32>
    %cst_232 = arith.constant dense<0xFF800000> : vector<2x8xf32>
    %619 = vector.multi_reduction <maximumf>, %618, %cst_232 [2] : vector<2x8x8xf32> to vector<2x8xf32>
    %620 = vector.shape_cast %619 : vector<2x8xf32> to vector<2x8x1xf32>
    %621 = vector.broadcast %620 : vector<2x8x1xf32> to vector<2x8x8xf32>
    %622 = arith.subf %618, %621 : vector<2x8x8xf32>
    %623 = math.exp %622 : vector<2x8x8xf32>
    %cst_233 = arith.constant dense<0.000000e+00> : vector<2x8xf32>
    %624 = vector.multi_reduction <add>, %623, %cst_233 [2] : vector<2x8x8xf32> to vector<2x8xf32>
    %625 = vector.shape_cast %624 : vector<2x8xf32> to vector<2x8x1xf32>
    %626 = tpu.reciprocal %625 {approx = true} : vector<2x8x1xf32> -> vector<2x8x1xf32>
    %627 = vector.broadcast %626 : vector<2x8x1xf32> to vector<2x8x8xf32>
    %628 = arith.mulf %623, %627 : vector<2x8x8xf32>
    "tpu.trace_start"() <{level = 10 : i32, message = "bqk,bkd->bqd"}> : () -> ()
    %cst_234 = arith.constant dense<0.000000e+00> : vector<2x8x8xf32>
    %629 = tpu.matmul %628, %614, %cst_234 {dimension_numbers = #tpu.dot_dimension_numbers<[2], [1], [1], [2], [0, 0, 0, 1, 1, 2], [0], [0]>} : vector<2x8x8xf32>, vector<2x8x8xf32>, vector<2x8x8xf32> -> vector<2x8x8xf32>
    "tpu.trace_stop"() : () -> ()
    %630 = vector.extract_strided_slice %573 {offsets = [0, 0, 24], sizes = [2, 8, 8], strides = [1, 1, 1]} : vector<2x8x32xf32> to vector<2x8x8xf32>
    %631 = vector.extract_strided_slice %574 {offsets = [0, 0, 24], sizes = [2, 8, 8], strides = [1, 1, 1]} : vector<2x8x32xf32> to vector<2x8x8xf32>
    %632 = vector.extract_strided_slice %575 {offsets = [0, 0, 24], sizes = [2, 8, 8], strides = [1, 1, 1]} : vector<2x8x32xf32> to vector<2x8x8xf32>
    "tpu.trace_start"() <{level = 10 : i32, message = "bqd,bkd->bqk"}> : () -> ()
    %cst_235 = arith.constant dense<0.000000e+00> : vector<2x8x8xf32>
    %633 = tpu.matmul %630, %631, %cst_235 {dimension_numbers = #tpu.dot_dimension_numbers<[2], [2], [1], [1], [0, 0, 0, 1, 1, 1], [0], [0]>} : vector<2x8x8xf32>, vector<2x8x8xf32>, vector<2x8x8xf32> -> vector<2x8x8xf32>
    "tpu.trace_stop"() : () -> ()
    %634 = vector.shape_cast %4 : vector<8x8xf32> to vector<1x8x8xf32>
    %635 = vector.broadcast %634 : vector<1x8x8xf32> to vector<2x8x8xf32>
    %636 = arith.addf %633, %635 : vector<2x8x8xf32>
    %cst_236 = arith.constant dense<0xFF800000> : vector<2x8xf32>
    %637 = vector.multi_reduction <maximumf>, %636, %cst_236 [2] : vector<2x8x8xf32> to vector<2x8xf32>
    %638 = vector.shape_cast %637 : vector<2x8xf32> to vector<2x8x1xf32>
    %639 = vector.broadcast %638 : vector<2x8x1xf32> to vector<2x8x8xf32>
    %640 = arith.subf %636, %639 : vector<2x8x8xf32>
    %641 = math.exp %640 : vector<2x8x8xf32>
    %cst_237 = arith.constant dense<0.000000e+00> : vector<2x8xf32>
    %642 = vector.multi_reduction <add>, %641, %cst_237 [2] : vector<2x8x8xf32> to vector<2x8xf32>
    %643 = vector.shape_cast %642 : vector<2x8xf32> to vector<2x8x1xf32>
    %644 = tpu.reciprocal %643 {approx = true} : vector<2x8x1xf32> -> vector<2x8x1xf32>
    %645 = vector.broadcast %644 : vector<2x8x1xf32> to vector<2x8x8xf32>
    %646 = arith.mulf %641, %645 : vector<2x8x8xf32>
    "tpu.trace_start"() <{level = 10 : i32, message = "bqk,bkd->bqd"}> : () -> ()
    %cst_238 = arith.constant dense<0.000000e+00> : vector<2x8x8xf32>
    %647 = tpu.matmul %646, %632, %cst_238 {dimension_numbers = #tpu.dot_dimension_numbers<[2], [1], [1], [2], [0, 0, 0, 1, 1, 2], [0], [0]>} : vector<2x8x8xf32>, vector<2x8x8xf32>, vector<2x8x8xf32> -> vector<2x8x8xf32>
    "tpu.trace_stop"() : () -> ()
    %648 = tpu.concatenate %593, %611, %629, %647 in 2 : vector<2x8x8xf32>, vector<2x8x8xf32>, vector<2x8x8xf32>, vector<2x8x8xf32> -> vector<2x8x32xf32>
    %649 = vector.shape_cast %648 : vector<2x8x32xf32> to vector<16x32xf32>
    %c2_239 = arith.constant 2 : index
    %c0_240 = arith.constant 0 : index
    %c0_241 = arith.constant 0 : index
    %650 = vector.load %arg5[%c2_239, %c0_240, %c0_241] : memref<5x32x32xf32, #tpu.memory_space<vmem>>, vector<1x32x32xf32>
    %651 = vector.shape_cast %650 : vector<1x32x32xf32> to vector<32x32xf32>
    %cst_242 = arith.constant dense<0.000000e+00> : vector<16x32xf32>
    %652 = tpu.matmul %649, %651, %cst_242 {dimension_numbers = #tpu.dot_dimension_numbers<[1], [0], [0], [1], [0, 0, 1, 1], [], []>} : vector<16x32xf32>, vector<32x32xf32>, vector<16x32xf32> -> vector<16x32xf32>
    %c2_243 = arith.constant 2 : index
    %c0_244 = arith.constant 0 : index
    %c0_245 = arith.constant 0 : index
    %653 = vector.load %arg6[%c2_243, %c0_244, %c0_245] : memref<5x1x32xf32, #tpu.memory_space<vmem>>, vector<1x1x32xf32>
    %654 = vector.shape_cast %653 : vector<1x1x32xf32> to vector<1x32xf32>
    %655 = vector.broadcast %654 : vector<1x32xf32> to vector<16x32xf32>
    %656 = arith.addf %652, %655 : vector<16x32xf32>
    %657 = arith.addf %558, %656 : vector<16x32xf32>
    %658 = vector.extract_strided_slice %560 {offsets = [0, 0], sizes = [1, 32], strides = [1, 1]} : vector<3x32xf32> to vector<1x32xf32>
    %659 = vector.extract_strided_slice %562 {offsets = [0, 0], sizes = [1, 32], strides = [1, 1]} : vector<3x32xf32> to vector<1x32xf32>
    %cst_246 = arith.constant dense<0.000000e+00> : vector<16xf32>
    %660 = vector.multi_reduction <add>, %657, %cst_246 [1] : vector<16x32xf32> to vector<16xf32>
    %661 = vector.shape_cast %660 : vector<16xf32> to vector<16x1xf32>
    %cst_247 = arith.constant 3.200000e+01 : f32
    %662 = vector.broadcast %cst_247 : f32 to vector<16x1xf32>
    %663 = arith.divf %661, %662 : vector<16x1xf32>
    %664 = vector.broadcast %663 : vector<16x1xf32> to vector<16x32xf32>
    %665 = arith.subf %657, %664 : vector<16x32xf32>
    %666 = arith.mulf %665, %665 : vector<16x32xf32>
    %cst_248 = arith.constant dense<0.000000e+00> : vector<16xf32>
    %667 = vector.multi_reduction <add>, %666, %cst_248 [1] : vector<16x32xf32> to vector<16xf32>
    %668 = vector.shape_cast %667 : vector<16xf32> to vector<16x1xf32>
    %cst_249 = arith.constant 3.200000e+01 : f32
    %669 = vector.broadcast %cst_249 : f32 to vector<16x1xf32>
    %670 = arith.divf %668, %669 : vector<16x1xf32>
    %671 = vector.broadcast %663 : vector<16x1xf32> to vector<16x32xf32>
    %672 = arith.subf %657, %671 : vector<16x32xf32>
    %cst_250 = arith.constant 9.99999974E-6 : f32
    %673 = vector.broadcast %cst_250 : f32 to vector<16x1xf32>
    %674 = arith.addf %670, %673 : vector<16x1xf32>
    %675 = math.rsqrt %674 : vector<16x1xf32>
    %676 = vector.broadcast %675 : vector<16x1xf32> to vector<16x32xf32>
    %677 = arith.mulf %672, %676 : vector<16x32xf32>
    %678 = vector.broadcast %658 : vector<1x32xf32> to vector<16x32xf32>
    %679 = arith.mulf %677, %678 : vector<16x32xf32>
    %680 = vector.broadcast %659 : vector<1x32xf32> to vector<16x32xf32>
    %681 = arith.addf %679, %680 : vector<16x32xf32>
    %c2_251 = arith.constant 2 : index
    %c0_252 = arith.constant 0 : index
    %c0_253 = arith.constant 0 : index
    %682 = vector.load %arg7[%c2_251, %c0_252, %c0_253] : memref<5x32x32xf32, #tpu.memory_space<vmem>>, vector<1x32x32xf32>
    %683 = vector.shape_cast %682 : vector<1x32x32xf32> to vector<32x32xf32>
    %cst_254 = arith.constant dense<0.000000e+00> : vector<16x32xf32>
    %684 = tpu.matmul %681, %683, %cst_254 {dimension_numbers = #tpu.dot_dimension_numbers<[1], [0], [0], [1], [0, 0, 1, 1], [], []>} : vector<16x32xf32>, vector<32x32xf32>, vector<16x32xf32> -> vector<16x32xf32>
    %c2_255 = arith.constant 2 : index
    %c0_256 = arith.constant 0 : index
    %c0_257 = arith.constant 0 : index
    %685 = vector.load %arg8[%c2_255, %c0_256, %c0_257] : memref<5x1x32xf32, #tpu.memory_space<vmem>>, vector<1x1x32xf32>
    %686 = vector.shape_cast %685 : vector<1x1x32xf32> to vector<1x32xf32>
    %687 = vector.broadcast %686 : vector<1x32xf32> to vector<16x32xf32>
    %688 = arith.addf %684, %687 : vector<16x32xf32>
    %c2_258 = arith.constant 2 : index
    %c0_259 = arith.constant 0 : index
    %c0_260 = arith.constant 0 : index
    %689 = vector.load %arg9[%c2_258, %c0_259, %c0_260] : memref<5x32x64xf32, #tpu.memory_space<vmem>>, vector<1x32x64xf32>
    %690 = vector.shape_cast %689 : vector<1x32x64xf32> to vector<32x64xf32>
    %cst_261 = arith.constant dense<0.000000e+00> : vector<16x64xf32>
    %691 = tpu.matmul %1, %690, %cst_261 {dimension_numbers = #tpu.dot_dimension_numbers<[1], [0], [0], [1], [0, 0, 1, 1], [], []>} : vector<16x32xf32>, vector<32x64xf32>, vector<16x64xf32> -> vector<16x64xf32>
    %c2_262 = arith.constant 2 : index
    %c0_263 = arith.constant 0 : index
    %c0_264 = arith.constant 0 : index
    %692 = vector.load %arg10[%c2_262, %c0_263, %c0_264] : memref<5x1x64xf32, #tpu.memory_space<vmem>>, vector<1x1x64xf32>
    %693 = vector.shape_cast %692 : vector<1x1x64xf32> to vector<1x64xf32>
    %694 = vector.broadcast %693 : vector<1x64xf32> to vector<16x64xf32>
    %695 = arith.addf %691, %694 : vector<16x64xf32>
    %696 = vector.extract_strided_slice %695 {offsets = [0, 0], sizes = [16, 32], strides = [1, 1]} : vector<16x64xf32> to vector<16x32xf32>
    %697 = vector.extract_strided_slice %695 {offsets = [0, 32], sizes = [16, 32], strides = [1, 1]} : vector<16x64xf32> to vector<16x32xf32>
    %698 = vector.shape_cast %688 : vector<16x32xf32> to vector<2x8x32xf32>
    %699 = vector.shape_cast %696 : vector<16x32xf32> to vector<2x8x32xf32>
    %700 = vector.shape_cast %697 : vector<16x32xf32> to vector<2x8x32xf32>
    %701 = vector.extract_strided_slice %698 {offsets = [0, 0, 0], sizes = [2, 8, 8], strides = [1, 1, 1]} : vector<2x8x32xf32> to vector<2x8x8xf32>
    %702 = vector.extract_strided_slice %699 {offsets = [0, 0, 0], sizes = [2, 8, 8], strides = [1, 1, 1]} : vector<2x8x32xf32> to vector<2x8x8xf32>
    %703 = vector.extract_strided_slice %700 {offsets = [0, 0, 0], sizes = [2, 8, 8], strides = [1, 1, 1]} : vector<2x8x32xf32> to vector<2x8x8xf32>
    "tpu.trace_start"() <{level = 10 : i32, message = "bqd,bkd->bqk"}> : () -> ()
    %cst_265 = arith.constant dense<0.000000e+00> : vector<2x8x8xf32>
    %704 = tpu.matmul %701, %702, %cst_265 {dimension_numbers = #tpu.dot_dimension_numbers<[2], [2], [1], [1], [0, 0, 0, 1, 1, 1], [0], [0]>} : vector<2x8x8xf32>, vector<2x8x8xf32>, vector<2x8x8xf32> -> vector<2x8x8xf32>
    "tpu.trace_stop"() : () -> ()
    %cst_266 = arith.constant dense<0xFF800000> : vector<2x8xf32>
    %705 = vector.multi_reduction <maximumf>, %704, %cst_266 [2] : vector<2x8x8xf32> to vector<2x8xf32>
    %706 = vector.shape_cast %705 : vector<2x8xf32> to vector<2x8x1xf32>
    %707 = vector.broadcast %706 : vector<2x8x1xf32> to vector<2x8x8xf32>
    %708 = arith.subf %704, %707 : vector<2x8x8xf32>
    %709 = math.exp %708 : vector<2x8x8xf32>
    %cst_267 = arith.constant dense<0.000000e+00> : vector<2x8xf32>
    %710 = vector.multi_reduction <add>, %709, %cst_267 [2] : vector<2x8x8xf32> to vector<2x8xf32>
    %711 = vector.shape_cast %710 : vector<2x8xf32> to vector<2x8x1xf32>
    %712 = tpu.reciprocal %711 {approx = true} : vector<2x8x1xf32> -> vector<2x8x1xf32>
    %713 = vector.broadcast %712 : vector<2x8x1xf32> to vector<2x8x8xf32>
    %714 = arith.mulf %709, %713 : vector<2x8x8xf32>
    "tpu.trace_start"() <{level = 10 : i32, message = "bqk,bkd->bqd"}> : () -> ()
    %cst_268 = arith.constant dense<0.000000e+00> : vector<2x8x8xf32>
    %715 = tpu.matmul %714, %703, %cst_268 {dimension_numbers = #tpu.dot_dimension_numbers<[2], [1], [1], [2], [0, 0, 0, 1, 1, 2], [0], [0]>} : vector<2x8x8xf32>, vector<2x8x8xf32>, vector<2x8x8xf32> -> vector<2x8x8xf32>
    "tpu.trace_stop"() : () -> ()
    %716 = vector.extract_strided_slice %698 {offsets = [0, 0, 8], sizes = [2, 8, 8], strides = [1, 1, 1]} : vector<2x8x32xf32> to vector<2x8x8xf32>
    %717 = vector.extract_strided_slice %699 {offsets = [0, 0, 8], sizes = [2, 8, 8], strides = [1, 1, 1]} : vector<2x8x32xf32> to vector<2x8x8xf32>
    %718 = vector.extract_strided_slice %700 {offsets = [0, 0, 8], sizes = [2, 8, 8], strides = [1, 1, 1]} : vector<2x8x32xf32> to vector<2x8x8xf32>
    "tpu.trace_start"() <{level = 10 : i32, message = "bqd,bkd->bqk"}> : () -> ()
    %cst_269 = arith.constant dense<0.000000e+00> : vector<2x8x8xf32>
    %719 = tpu.matmul %716, %717, %cst_269 {dimension_numbers = #tpu.dot_dimension_numbers<[2], [2], [1], [1], [0, 0, 0, 1, 1, 1], [0], [0]>} : vector<2x8x8xf32>, vector<2x8x8xf32>, vector<2x8x8xf32> -> vector<2x8x8xf32>
    "tpu.trace_stop"() : () -> ()
    %cst_270 = arith.constant dense<0xFF800000> : vector<2x8xf32>
    %720 = vector.multi_reduction <maximumf>, %719, %cst_270 [2] : vector<2x8x8xf32> to vector<2x8xf32>
    %721 = vector.shape_cast %720 : vector<2x8xf32> to vector<2x8x1xf32>
    %722 = vector.broadcast %721 : vector<2x8x1xf32> to vector<2x8x8xf32>
    %723 = arith.subf %719, %722 : vector<2x8x8xf32>
    %724 = math.exp %723 : vector<2x8x8xf32>
    %cst_271 = arith.constant dense<0.000000e+00> : vector<2x8xf32>
    %725 = vector.multi_reduction <add>, %724, %cst_271 [2] : vector<2x8x8xf32> to vector<2x8xf32>
    %726 = vector.shape_cast %725 : vector<2x8xf32> to vector<2x8x1xf32>
    %727 = tpu.reciprocal %726 {approx = true} : vector<2x8x1xf32> -> vector<2x8x1xf32>
    %728 = vector.broadcast %727 : vector<2x8x1xf32> to vector<2x8x8xf32>
    %729 = arith.mulf %724, %728 : vector<2x8x8xf32>
    "tpu.trace_start"() <{level = 10 : i32, message = "bqk,bkd->bqd"}> : () -> ()
    %cst_272 = arith.constant dense<0.000000e+00> : vector<2x8x8xf32>
    %730 = tpu.matmul %729, %718, %cst_272 {dimension_numbers = #tpu.dot_dimension_numbers<[2], [1], [1], [2], [0, 0, 0, 1, 1, 2], [0], [0]>} : vector<2x8x8xf32>, vector<2x8x8xf32>, vector<2x8x8xf32> -> vector<2x8x8xf32>
    "tpu.trace_stop"() : () -> ()
    %731 = vector.extract_strided_slice %698 {offsets = [0, 0, 16], sizes = [2, 8, 8], strides = [1, 1, 1]} : vector<2x8x32xf32> to vector<2x8x8xf32>
    %732 = vector.extract_strided_slice %699 {offsets = [0, 0, 16], sizes = [2, 8, 8], strides = [1, 1, 1]} : vector<2x8x32xf32> to vector<2x8x8xf32>
    %733 = vector.extract_strided_slice %700 {offsets = [0, 0, 16], sizes = [2, 8, 8], strides = [1, 1, 1]} : vector<2x8x32xf32> to vector<2x8x8xf32>
    "tpu.trace_start"() <{level = 10 : i32, message = "bqd,bkd->bqk"}> : () -> ()
    %cst_273 = arith.constant dense<0.000000e+00> : vector<2x8x8xf32>
    %734 = tpu.matmul %731, %732, %cst_273 {dimension_numbers = #tpu.dot_dimension_numbers<[2], [2], [1], [1], [0, 0, 0, 1, 1, 1], [0], [0]>} : vector<2x8x8xf32>, vector<2x8x8xf32>, vector<2x8x8xf32> -> vector<2x8x8xf32>
    "tpu.trace_stop"() : () -> ()
    %cst_274 = arith.constant dense<0xFF800000> : vector<2x8xf32>
    %735 = vector.multi_reduction <maximumf>, %734, %cst_274 [2] : vector<2x8x8xf32> to vector<2x8xf32>
    %736 = vector.shape_cast %735 : vector<2x8xf32> to vector<2x8x1xf32>
    %737 = vector.broadcast %736 : vector<2x8x1xf32> to vector<2x8x8xf32>
    %738 = arith.subf %734, %737 : vector<2x8x8xf32>
    %739 = math.exp %738 : vector<2x8x8xf32>
    %cst_275 = arith.constant dense<0.000000e+00> : vector<2x8xf32>
    %740 = vector.multi_reduction <add>, %739, %cst_275 [2] : vector<2x8x8xf32> to vector<2x8xf32>
    %741 = vector.shape_cast %740 : vector<2x8xf32> to vector<2x8x1xf32>
    %742 = tpu.reciprocal %741 {approx = true} : vector<2x8x1xf32> -> vector<2x8x1xf32>
    %743 = vector.broadcast %742 : vector<2x8x1xf32> to vector<2x8x8xf32>
    %744 = arith.mulf %739, %743 : vector<2x8x8xf32>
    "tpu.trace_start"() <{level = 10 : i32, message = "bqk,bkd->bqd"}> : () -> ()
    %cst_276 = arith.constant dense<0.000000e+00> : vector<2x8x8xf32>
    %745 = tpu.matmul %744, %733, %cst_276 {dimension_numbers = #tpu.dot_dimension_numbers<[2], [1], [1], [2], [0, 0, 0, 1, 1, 2], [0], [0]>} : vector<2x8x8xf32>, vector<2x8x8xf32>, vector<2x8x8xf32> -> vector<2x8x8xf32>
    "tpu.trace_stop"() : () -> ()
    %746 = vector.extract_strided_slice %698 {offsets = [0, 0, 24], sizes = [2, 8, 8], strides = [1, 1, 1]} : vector<2x8x32xf32> to vector<2x8x8xf32>
    %747 = vector.extract_strided_slice %699 {offsets = [0, 0, 24], sizes = [2, 8, 8], strides = [1, 1, 1]} : vector<2x8x32xf32> to vector<2x8x8xf32>
    %748 = vector.extract_strided_slice %700 {offsets = [0, 0, 24], sizes = [2, 8, 8], strides = [1, 1, 1]} : vector<2x8x32xf32> to vector<2x8x8xf32>
    "tpu.trace_start"() <{level = 10 : i32, message = "bqd,bkd->bqk"}> : () -> ()
    %cst_277 = arith.constant dense<0.000000e+00> : vector<2x8x8xf32>
    %749 = tpu.matmul %746, %747, %cst_277 {dimension_numbers = #tpu.dot_dimension_numbers<[2], [2], [1], [1], [0, 0, 0, 1, 1, 1], [0], [0]>} : vector<2x8x8xf32>, vector<2x8x8xf32>, vector<2x8x8xf32> -> vector<2x8x8xf32>
    "tpu.trace_stop"() : () -> ()
    %cst_278 = arith.constant dense<0xFF800000> : vector<2x8xf32>
    %750 = vector.multi_reduction <maximumf>, %749, %cst_278 [2] : vector<2x8x8xf32> to vector<2x8xf32>
    %751 = vector.shape_cast %750 : vector<2x8xf32> to vector<2x8x1xf32>
    %752 = vector.broadcast %751 : vector<2x8x1xf32> to vector<2x8x8xf32>
    %753 = arith.subf %749, %752 : vector<2x8x8xf32>
    %754 = math.exp %753 : vector<2x8x8xf32>
    %cst_279 = arith.constant dense<0.000000e+00> : vector<2x8xf32>
    %755 = vector.multi_reduction <add>, %754, %cst_279 [2] : vector<2x8x8xf32> to vector<2x8xf32>
    %756 = vector.shape_cast %755 : vector<2x8xf32> to vector<2x8x1xf32>
    %757 = tpu.reciprocal %756 {approx = true} : vector<2x8x1xf32> -> vector<2x8x1xf32>
    %758 = vector.broadcast %757 : vector<2x8x1xf32> to vector<2x8x8xf32>
    %759 = arith.mulf %754, %758 : vector<2x8x8xf32>
    "tpu.trace_start"() <{level = 10 : i32, message = "bqk,bkd->bqd"}> : () -> ()
    %cst_280 = arith.constant dense<0.000000e+00> : vector<2x8x8xf32>
    %760 = tpu.matmul %759, %748, %cst_280 {dimension_numbers = #tpu.dot_dimension_numbers<[2], [1], [1], [2], [0, 0, 0, 1, 1, 2], [0], [0]>} : vector<2x8x8xf32>, vector<2x8x8xf32>, vector<2x8x8xf32> -> vector<2x8x8xf32>
    "tpu.trace_stop"() : () -> ()
    %761 = tpu.concatenate %715, %730, %745, %760 in 2 : vector<2x8x8xf32>, vector<2x8x8xf32>, vector<2x8x8xf32>, vector<2x8x8xf32> -> vector<2x8x32xf32>
    %762 = vector.shape_cast %761 : vector<2x8x32xf32> to vector<16x32xf32>
    %c2_281 = arith.constant 2 : index
    %c0_282 = arith.constant 0 : index
    %c0_283 = arith.constant 0 : index
    %763 = vector.load %arg11[%c2_281, %c0_282, %c0_283] : memref<5x32x32xf32, #tpu.memory_space<vmem>>, vector<1x32x32xf32>
    %764 = vector.shape_cast %763 : vector<1x32x32xf32> to vector<32x32xf32>
    %cst_284 = arith.constant dense<0.000000e+00> : vector<16x32xf32>
    %765 = tpu.matmul %762, %764, %cst_284 {dimension_numbers = #tpu.dot_dimension_numbers<[1], [0], [0], [1], [0, 0, 1, 1], [], []>} : vector<16x32xf32>, vector<32x32xf32>, vector<16x32xf32> -> vector<16x32xf32>
    %c2_285 = arith.constant 2 : index
    %c0_286 = arith.constant 0 : index
    %c0_287 = arith.constant 0 : index
    %766 = vector.load %arg12[%c2_285, %c0_286, %c0_287] : memref<5x1x32xf32, #tpu.memory_space<vmem>>, vector<1x1x32xf32>
    %767 = vector.shape_cast %766 : vector<1x1x32xf32> to vector<1x32xf32>
    %768 = vector.broadcast %767 : vector<1x32xf32> to vector<16x32xf32>
    %769 = arith.addf %765, %768 : vector<16x32xf32>
    %770 = arith.addf %681, %769 : vector<16x32xf32>
    %771 = vector.extract_strided_slice %560 {offsets = [1, 0], sizes = [1, 32], strides = [1, 1]} : vector<3x32xf32> to vector<1x32xf32>
    %772 = vector.extract_strided_slice %562 {offsets = [1, 0], sizes = [1, 32], strides = [1, 1]} : vector<3x32xf32> to vector<1x32xf32>
    %cst_288 = arith.constant dense<0.000000e+00> : vector<16xf32>
    %773 = vector.multi_reduction <add>, %770, %cst_288 [1] : vector<16x32xf32> to vector<16xf32>
    %774 = vector.shape_cast %773 : vector<16xf32> to vector<16x1xf32>
    %cst_289 = arith.constant 3.200000e+01 : f32
    %775 = vector.broadcast %cst_289 : f32 to vector<16x1xf32>
    %776 = arith.divf %774, %775 : vector<16x1xf32>
    %777 = vector.broadcast %776 : vector<16x1xf32> to vector<16x32xf32>
    %778 = arith.subf %770, %777 : vector<16x32xf32>
    %779 = arith.mulf %778, %778 : vector<16x32xf32>
    %cst_290 = arith.constant dense<0.000000e+00> : vector<16xf32>
    %780 = vector.multi_reduction <add>, %779, %cst_290 [1] : vector<16x32xf32> to vector<16xf32>
    %781 = vector.shape_cast %780 : vector<16xf32> to vector<16x1xf32>
    %cst_291 = arith.constant 3.200000e+01 : f32
    %782 = vector.broadcast %cst_291 : f32 to vector<16x1xf32>
    %783 = arith.divf %781, %782 : vector<16x1xf32>
    %784 = vector.broadcast %776 : vector<16x1xf32> to vector<16x32xf32>
    %785 = arith.subf %770, %784 : vector<16x32xf32>
    %cst_292 = arith.constant 9.99999974E-6 : f32
    %786 = vector.broadcast %cst_292 : f32 to vector<16x1xf32>
    %787 = arith.addf %783, %786 : vector<16x1xf32>
    %788 = math.rsqrt %787 : vector<16x1xf32>
    %789 = vector.broadcast %788 : vector<16x1xf32> to vector<16x32xf32>
    %790 = arith.mulf %785, %789 : vector<16x32xf32>
    %791 = vector.broadcast %771 : vector<1x32xf32> to vector<16x32xf32>
    %792 = arith.mulf %790, %791 : vector<16x32xf32>
    %793 = vector.broadcast %772 : vector<1x32xf32> to vector<16x32xf32>
    %794 = arith.addf %792, %793 : vector<16x32xf32>
    %c2_293 = arith.constant 2 : index
    %c0_294 = arith.constant 0 : index
    %c0_295 = arith.constant 0 : index
    %795 = vector.load %arg15[%c2_293, %c0_294, %c0_295] : memref<5x32x128xf32, #tpu.memory_space<vmem>>, vector<1x32x128xf32>
    %796 = vector.shape_cast %795 : vector<1x32x128xf32> to vector<32x128xf32>
    %cst_296 = arith.constant dense<0.000000e+00> : vector<16x128xf32>
    %797 = tpu.matmul %794, %796, %cst_296 {dimension_numbers = #tpu.dot_dimension_numbers<[1], [0], [0], [1], [0, 0, 1, 1], [], []>} : vector<16x32xf32>, vector<32x128xf32>, vector<16x128xf32> -> vector<16x128xf32>
    %c2_297 = arith.constant 2 : index
    %c0_298 = arith.constant 0 : index
    %c0_299 = arith.constant 0 : index
    %798 = vector.load %arg16[%c2_297, %c0_298, %c0_299] : memref<5x1x128xf32, #tpu.memory_space<vmem>>, vector<1x1x128xf32>
    %799 = vector.shape_cast %798 : vector<1x1x128xf32> to vector<1x128xf32>
    %800 = vector.broadcast %799 : vector<1x128xf32> to vector<16x128xf32>
    %801 = arith.addf %797, %800 : vector<16x128xf32>
    %cst_300 = arith.constant 0.000000e+00 : f32
    %802 = vector.broadcast %cst_300 : f32 to vector<16x128xf32>
    %803 = arith.maximumf %801, %802 : vector<16x128xf32>
    %c2_301 = arith.constant 2 : index
    %c0_302 = arith.constant 0 : index
    %c0_303 = arith.constant 0 : index
    %804 = vector.load %arg17[%c2_301, %c0_302, %c0_303] : memref<5x128x32xf32, #tpu.memory_space<vmem>>, vector<1x128x32xf32>
    %805 = vector.shape_cast %804 : vector<1x128x32xf32> to vector<128x32xf32>
    %cst_304 = arith.constant dense<0.000000e+00> : vector<16x32xf32>
    %806 = tpu.matmul %803, %805, %cst_304 {dimension_numbers = #tpu.dot_dimension_numbers<[1], [0], [0], [1], [0, 0, 1, 1], [], []>} : vector<16x128xf32>, vector<128x32xf32>, vector<16x32xf32> -> vector<16x32xf32>
    %c2_305 = arith.constant 2 : index
    %c0_306 = arith.constant 0 : index
    %c0_307 = arith.constant 0 : index
    %807 = vector.load %arg18[%c2_305, %c0_306, %c0_307] : memref<5x1x32xf32, #tpu.memory_space<vmem>>, vector<1x1x32xf32>
    %808 = vector.shape_cast %807 : vector<1x1x32xf32> to vector<1x32xf32>
    %809 = vector.broadcast %808 : vector<1x32xf32> to vector<16x32xf32>
    %810 = arith.addf %806, %809 : vector<16x32xf32>
    %811 = arith.addf %794, %810 : vector<16x32xf32>
    %812 = vector.extract_strided_slice %560 {offsets = [2, 0], sizes = [1, 32], strides = [1, 1]} : vector<3x32xf32> to vector<1x32xf32>
    %813 = vector.extract_strided_slice %562 {offsets = [2, 0], sizes = [1, 32], strides = [1, 1]} : vector<3x32xf32> to vector<1x32xf32>
    %cst_308 = arith.constant dense<0.000000e+00> : vector<16xf32>
    %814 = vector.multi_reduction <add>, %811, %cst_308 [1] : vector<16x32xf32> to vector<16xf32>
    %815 = vector.shape_cast %814 : vector<16xf32> to vector<16x1xf32>
    %cst_309 = arith.constant 3.200000e+01 : f32
    %816 = vector.broadcast %cst_309 : f32 to vector<16x1xf32>
    %817 = arith.divf %815, %816 : vector<16x1xf32>
    %818 = vector.broadcast %817 : vector<16x1xf32> to vector<16x32xf32>
    %819 = arith.subf %811, %818 : vector<16x32xf32>
    %820 = arith.mulf %819, %819 : vector<16x32xf32>
    %cst_310 = arith.constant dense<0.000000e+00> : vector<16xf32>
    %821 = vector.multi_reduction <add>, %820, %cst_310 [1] : vector<16x32xf32> to vector<16xf32>
    %822 = vector.shape_cast %821 : vector<16xf32> to vector<16x1xf32>
    %cst_311 = arith.constant 3.200000e+01 : f32
    %823 = vector.broadcast %cst_311 : f32 to vector<16x1xf32>
    %824 = arith.divf %822, %823 : vector<16x1xf32>
    %825 = vector.broadcast %817 : vector<16x1xf32> to vector<16x32xf32>
    %826 = arith.subf %811, %825 : vector<16x32xf32>
    %cst_312 = arith.constant 9.99999974E-6 : f32
    %827 = vector.broadcast %cst_312 : f32 to vector<16x1xf32>
    %828 = arith.addf %824, %827 : vector<16x1xf32>
    %829 = math.rsqrt %828 : vector<16x1xf32>
    %830 = vector.broadcast %829 : vector<16x1xf32> to vector<16x32xf32>
    %831 = arith.mulf %826, %830 : vector<16x32xf32>
    %832 = vector.broadcast %812 : vector<1x32xf32> to vector<16x32xf32>
    %833 = arith.mulf %831, %832 : vector<16x32xf32>
    %834 = vector.broadcast %813 : vector<1x32xf32> to vector<16x32xf32>
    %835 = arith.addf %833, %834 : vector<16x32xf32>
    %c3 = arith.constant 3 : index
    %c0_313 = arith.constant 0 : index
    %c0_314 = arith.constant 0 : index
    %836 = vector.load %arg13[%c3, %c0_313, %c0_314] : memref<5x3x32xf32, #tpu.memory_space<vmem>>, vector<1x3x32xf32>
    %837 = vector.shape_cast %836 : vector<1x3x32xf32> to vector<3x32xf32>
    %c3_315 = arith.constant 3 : index
    %c0_316 = arith.constant 0 : index
    %c0_317 = arith.constant 0 : index
    %838 = vector.load %arg14[%c3_315, %c0_316, %c0_317] : memref<5x3x32xf32, #tpu.memory_space<vmem>>, vector<1x3x32xf32>
    %839 = vector.shape_cast %838 : vector<1x3x32xf32> to vector<3x32xf32>
    %c3_318 = arith.constant 3 : index
    %c0_319 = arith.constant 0 : index
    %c0_320 = arith.constant 0 : index
    %840 = vector.load %arg3[%c3_318, %c0_319, %c0_320] : memref<5x32x96xf32, #tpu.memory_space<vmem>>, vector<1x32x96xf32>
    %841 = vector.shape_cast %840 : vector<1x32x96xf32> to vector<32x96xf32>
    %cst_321 = arith.constant dense<0.000000e+00> : vector<16x96xf32>
    %842 = tpu.matmul %835, %841, %cst_321 {dimension_numbers = #tpu.dot_dimension_numbers<[1], [0], [0], [1], [0, 0, 1, 1], [], []>} : vector<16x32xf32>, vector<32x96xf32>, vector<16x96xf32> -> vector<16x96xf32>
    %c3_322 = arith.constant 3 : index
    %c0_323 = arith.constant 0 : index
    %c0_324 = arith.constant 0 : index
    %843 = vector.load %arg4[%c3_322, %c0_323, %c0_324] : memref<5x1x96xf32, #tpu.memory_space<vmem>>, vector<1x1x96xf32>
    %844 = vector.shape_cast %843 : vector<1x1x96xf32> to vector<1x96xf32>
    %845 = vector.broadcast %844 : vector<1x96xf32> to vector<16x96xf32>
    %846 = arith.addf %842, %845 : vector<16x96xf32>
    %847 = vector.extract_strided_slice %846 {offsets = [0, 0], sizes = [16, 32], strides = [1, 1]} : vector<16x96xf32> to vector<16x32xf32>
    %848 = vector.extract_strided_slice %846 {offsets = [0, 32], sizes = [16, 32], strides = [1, 1]} : vector<16x96xf32> to vector<16x32xf32>
    %849 = vector.extract_strided_slice %846 {offsets = [0, 64], sizes = [16, 32], strides = [1, 1]} : vector<16x96xf32> to vector<16x32xf32>
    %850 = vector.shape_cast %847 : vector<16x32xf32> to vector<2x8x32xf32>
    %851 = vector.shape_cast %848 : vector<16x32xf32> to vector<2x8x32xf32>
    %852 = vector.shape_cast %849 : vector<16x32xf32> to vector<2x8x32xf32>
    %853 = vector.extract_strided_slice %850 {offsets = [0, 0, 0], sizes = [2, 8, 8], strides = [1, 1, 1]} : vector<2x8x32xf32> to vector<2x8x8xf32>
    %854 = vector.extract_strided_slice %851 {offsets = [0, 0, 0], sizes = [2, 8, 8], strides = [1, 1, 1]} : vector<2x8x32xf32> to vector<2x8x8xf32>
    %855 = vector.extract_strided_slice %852 {offsets = [0, 0, 0], sizes = [2, 8, 8], strides = [1, 1, 1]} : vector<2x8x32xf32> to vector<2x8x8xf32>
    "tpu.trace_start"() <{level = 10 : i32, message = "bqd,bkd->bqk"}> : () -> ()
    %cst_325 = arith.constant dense<0.000000e+00> : vector<2x8x8xf32>
    %856 = tpu.matmul %853, %854, %cst_325 {dimension_numbers = #tpu.dot_dimension_numbers<[2], [2], [1], [1], [0, 0, 0, 1, 1, 1], [0], [0]>} : vector<2x8x8xf32>, vector<2x8x8xf32>, vector<2x8x8xf32> -> vector<2x8x8xf32>
    "tpu.trace_stop"() : () -> ()
    %857 = vector.shape_cast %4 : vector<8x8xf32> to vector<1x8x8xf32>
    %858 = vector.broadcast %857 : vector<1x8x8xf32> to vector<2x8x8xf32>
    %859 = arith.addf %856, %858 : vector<2x8x8xf32>
    %cst_326 = arith.constant dense<0xFF800000> : vector<2x8xf32>
    %860 = vector.multi_reduction <maximumf>, %859, %cst_326 [2] : vector<2x8x8xf32> to vector<2x8xf32>
    %861 = vector.shape_cast %860 : vector<2x8xf32> to vector<2x8x1xf32>
    %862 = vector.broadcast %861 : vector<2x8x1xf32> to vector<2x8x8xf32>
    %863 = arith.subf %859, %862 : vector<2x8x8xf32>
    %864 = math.exp %863 : vector<2x8x8xf32>
    %cst_327 = arith.constant dense<0.000000e+00> : vector<2x8xf32>
    %865 = vector.multi_reduction <add>, %864, %cst_327 [2] : vector<2x8x8xf32> to vector<2x8xf32>
    %866 = vector.shape_cast %865 : vector<2x8xf32> to vector<2x8x1xf32>
    %867 = tpu.reciprocal %866 {approx = true} : vector<2x8x1xf32> -> vector<2x8x1xf32>
    %868 = vector.broadcast %867 : vector<2x8x1xf32> to vector<2x8x8xf32>
    %869 = arith.mulf %864, %868 : vector<2x8x8xf32>
    "tpu.trace_start"() <{level = 10 : i32, message = "bqk,bkd->bqd"}> : () -> ()
    %cst_328 = arith.constant dense<0.000000e+00> : vector<2x8x8xf32>
    %870 = tpu.matmul %869, %855, %cst_328 {dimension_numbers = #tpu.dot_dimension_numbers<[2], [1], [1], [2], [0, 0, 0, 1, 1, 2], [0], [0]>} : vector<2x8x8xf32>, vector<2x8x8xf32>, vector<2x8x8xf32> -> vector<2x8x8xf32>
    "tpu.trace_stop"() : () -> ()
    %871 = vector.extract_strided_slice %850 {offsets = [0, 0, 8], sizes = [2, 8, 8], strides = [1, 1, 1]} : vector<2x8x32xf32> to vector<2x8x8xf32>
    %872 = vector.extract_strided_slice %851 {offsets = [0, 0, 8], sizes = [2, 8, 8], strides = [1, 1, 1]} : vector<2x8x32xf32> to vector<2x8x8xf32>
    %873 = vector.extract_strided_slice %852 {offsets = [0, 0, 8], sizes = [2, 8, 8], strides = [1, 1, 1]} : vector<2x8x32xf32> to vector<2x8x8xf32>
    "tpu.trace_start"() <{level = 10 : i32, message = "bqd,bkd->bqk"}> : () -> ()
    %cst_329 = arith.constant dense<0.000000e+00> : vector<2x8x8xf32>
    %874 = tpu.matmul %871, %872, %cst_329 {dimension_numbers = #tpu.dot_dimension_numbers<[2], [2], [1], [1], [0, 0, 0, 1, 1, 1], [0], [0]>} : vector<2x8x8xf32>, vector<2x8x8xf32>, vector<2x8x8xf32> -> vector<2x8x8xf32>
    "tpu.trace_stop"() : () -> ()
    %875 = vector.shape_cast %4 : vector<8x8xf32> to vector<1x8x8xf32>
    %876 = vector.broadcast %875 : vector<1x8x8xf32> to vector<2x8x8xf32>
    %877 = arith.addf %874, %876 : vector<2x8x8xf32>
    %cst_330 = arith.constant dense<0xFF800000> : vector<2x8xf32>
    %878 = vector.multi_reduction <maximumf>, %877, %cst_330 [2] : vector<2x8x8xf32> to vector<2x8xf32>
    %879 = vector.shape_cast %878 : vector<2x8xf32> to vector<2x8x1xf32>
    %880 = vector.broadcast %879 : vector<2x8x1xf32> to vector<2x8x8xf32>
    %881 = arith.subf %877, %880 : vector<2x8x8xf32>
    %882 = math.exp %881 : vector<2x8x8xf32>
    %cst_331 = arith.constant dense<0.000000e+00> : vector<2x8xf32>
    %883 = vector.multi_reduction <add>, %882, %cst_331 [2] : vector<2x8x8xf32> to vector<2x8xf32>
    %884 = vector.shape_cast %883 : vector<2x8xf32> to vector<2x8x1xf32>
    %885 = tpu.reciprocal %884 {approx = true} : vector<2x8x1xf32> -> vector<2x8x1xf32>
    %886 = vector.broadcast %885 : vector<2x8x1xf32> to vector<2x8x8xf32>
    %887 = arith.mulf %882, %886 : vector<2x8x8xf32>
    "tpu.trace_start"() <{level = 10 : i32, message = "bqk,bkd->bqd"}> : () -> ()
    %cst_332 = arith.constant dense<0.000000e+00> : vector<2x8x8xf32>
    %888 = tpu.matmul %887, %873, %cst_332 {dimension_numbers = #tpu.dot_dimension_numbers<[2], [1], [1], [2], [0, 0, 0, 1, 1, 2], [0], [0]>} : vector<2x8x8xf32>, vector<2x8x8xf32>, vector<2x8x8xf32> -> vector<2x8x8xf32>
    "tpu.trace_stop"() : () -> ()
    %889 = vector.extract_strided_slice %850 {offsets = [0, 0, 16], sizes = [2, 8, 8], strides = [1, 1, 1]} : vector<2x8x32xf32> to vector<2x8x8xf32>
    %890 = vector.extract_strided_slice %851 {offsets = [0, 0, 16], sizes = [2, 8, 8], strides = [1, 1, 1]} : vector<2x8x32xf32> to vector<2x8x8xf32>
    %891 = vector.extract_strided_slice %852 {offsets = [0, 0, 16], sizes = [2, 8, 8], strides = [1, 1, 1]} : vector<2x8x32xf32> to vector<2x8x8xf32>
    "tpu.trace_start"() <{level = 10 : i32, message = "bqd,bkd->bqk"}> : () -> ()
    %cst_333 = arith.constant dense<0.000000e+00> : vector<2x8x8xf32>
    %892 = tpu.matmul %889, %890, %cst_333 {dimension_numbers = #tpu.dot_dimension_numbers<[2], [2], [1], [1], [0, 0, 0, 1, 1, 1], [0], [0]>} : vector<2x8x8xf32>, vector<2x8x8xf32>, vector<2x8x8xf32> -> vector<2x8x8xf32>
    "tpu.trace_stop"() : () -> ()
    %893 = vector.shape_cast %4 : vector<8x8xf32> to vector<1x8x8xf32>
    %894 = vector.broadcast %893 : vector<1x8x8xf32> to vector<2x8x8xf32>
    %895 = arith.addf %892, %894 : vector<2x8x8xf32>
    %cst_334 = arith.constant dense<0xFF800000> : vector<2x8xf32>
    %896 = vector.multi_reduction <maximumf>, %895, %cst_334 [2] : vector<2x8x8xf32> to vector<2x8xf32>
    %897 = vector.shape_cast %896 : vector<2x8xf32> to vector<2x8x1xf32>
    %898 = vector.broadcast %897 : vector<2x8x1xf32> to vector<2x8x8xf32>
    %899 = arith.subf %895, %898 : vector<2x8x8xf32>
    %900 = math.exp %899 : vector<2x8x8xf32>
    %cst_335 = arith.constant dense<0.000000e+00> : vector<2x8xf32>
    %901 = vector.multi_reduction <add>, %900, %cst_335 [2] : vector<2x8x8xf32> to vector<2x8xf32>
    %902 = vector.shape_cast %901 : vector<2x8xf32> to vector<2x8x1xf32>
    %903 = tpu.reciprocal %902 {approx = true} : vector<2x8x1xf32> -> vector<2x8x1xf32>
    %904 = vector.broadcast %903 : vector<2x8x1xf32> to vector<2x8x8xf32>
    %905 = arith.mulf %900, %904 : vector<2x8x8xf32>
    "tpu.trace_start"() <{level = 10 : i32, message = "bqk,bkd->bqd"}> : () -> ()
    %cst_336 = arith.constant dense<0.000000e+00> : vector<2x8x8xf32>
    %906 = tpu.matmul %905, %891, %cst_336 {dimension_numbers = #tpu.dot_dimension_numbers<[2], [1], [1], [2], [0, 0, 0, 1, 1, 2], [0], [0]>} : vector<2x8x8xf32>, vector<2x8x8xf32>, vector<2x8x8xf32> -> vector<2x8x8xf32>
    "tpu.trace_stop"() : () -> ()
    %907 = vector.extract_strided_slice %850 {offsets = [0, 0, 24], sizes = [2, 8, 8], strides = [1, 1, 1]} : vector<2x8x32xf32> to vector<2x8x8xf32>
    %908 = vector.extract_strided_slice %851 {offsets = [0, 0, 24], sizes = [2, 8, 8], strides = [1, 1, 1]} : vector<2x8x32xf32> to vector<2x8x8xf32>
    %909 = vector.extract_strided_slice %852 {offsets = [0, 0, 24], sizes = [2, 8, 8], strides = [1, 1, 1]} : vector<2x8x32xf32> to vector<2x8x8xf32>
    "tpu.trace_start"() <{level = 10 : i32, message = "bqd,bkd->bqk"}> : () -> ()
    %cst_337 = arith.constant dense<0.000000e+00> : vector<2x8x8xf32>
    %910 = tpu.matmul %907, %908, %cst_337 {dimension_numbers = #tpu.dot_dimension_numbers<[2], [2], [1], [1], [0, 0, 0, 1, 1, 1], [0], [0]>} : vector<2x8x8xf32>, vector<2x8x8xf32>, vector<2x8x8xf32> -> vector<2x8x8xf32>
    "tpu.trace_stop"() : () -> ()
    %911 = vector.shape_cast %4 : vector<8x8xf32> to vector<1x8x8xf32>
    %912 = vector.broadcast %911 : vector<1x8x8xf32> to vector<2x8x8xf32>
    %913 = arith.addf %910, %912 : vector<2x8x8xf32>
    %cst_338 = arith.constant dense<0xFF800000> : vector<2x8xf32>
    %914 = vector.multi_reduction <maximumf>, %913, %cst_338 [2] : vector<2x8x8xf32> to vector<2x8xf32>
    %915 = vector.shape_cast %914 : vector<2x8xf32> to vector<2x8x1xf32>
    %916 = vector.broadcast %915 : vector<2x8x1xf32> to vector<2x8x8xf32>
    %917 = arith.subf %913, %916 : vector<2x8x8xf32>
    %918 = math.exp %917 : vector<2x8x8xf32>
    %cst_339 = arith.constant dense<0.000000e+00> : vector<2x8xf32>
    %919 = vector.multi_reduction <add>, %918, %cst_339 [2] : vector<2x8x8xf32> to vector<2x8xf32>
    %920 = vector.shape_cast %919 : vector<2x8xf32> to vector<2x8x1xf32>
    %921 = tpu.reciprocal %920 {approx = true} : vector<2x8x1xf32> -> vector<2x8x1xf32>
    %922 = vector.broadcast %921 : vector<2x8x1xf32> to vector<2x8x8xf32>
    %923 = arith.mulf %918, %922 : vector<2x8x8xf32>
    "tpu.trace_start"() <{level = 10 : i32, message = "bqk,bkd->bqd"}> : () -> ()
    %cst_340 = arith.constant dense<0.000000e+00> : vector<2x8x8xf32>
    %924 = tpu.matmul %923, %909, %cst_340 {dimension_numbers = #tpu.dot_dimension_numbers<[2], [1], [1], [2], [0, 0, 0, 1, 1, 2], [0], [0]>} : vector<2x8x8xf32>, vector<2x8x8xf32>, vector<2x8x8xf32> -> vector<2x8x8xf32>
    "tpu.trace_stop"() : () -> ()
    %925 = tpu.concatenate %870, %888, %906, %924 in 2 : vector<2x8x8xf32>, vector<2x8x8xf32>, vector<2x8x8xf32>, vector<2x8x8xf32> -> vector<2x8x32xf32>
    %926 = vector.shape_cast %925 : vector<2x8x32xf32> to vector<16x32xf32>
    %c3_341 = arith.constant 3 : index
    %c0_342 = arith.constant 0 : index
    %c0_343 = arith.constant 0 : index
    %927 = vector.load %arg5[%c3_341, %c0_342, %c0_343] : memref<5x32x32xf32, #tpu.memory_space<vmem>>, vector<1x32x32xf32>
    %928 = vector.shape_cast %927 : vector<1x32x32xf32> to vector<32x32xf32>
    %cst_344 = arith.constant dense<0.000000e+00> : vector<16x32xf32>
    %929 = tpu.matmul %926, %928, %cst_344 {dimension_numbers = #tpu.dot_dimension_numbers<[1], [0], [0], [1], [0, 0, 1, 1], [], []>} : vector<16x32xf32>, vector<32x32xf32>, vector<16x32xf32> -> vector<16x32xf32>
    %c3_345 = arith.constant 3 : index
    %c0_346 = arith.constant 0 : index
    %c0_347 = arith.constant 0 : index
    %930 = vector.load %arg6[%c3_345, %c0_346, %c0_347] : memref<5x1x32xf32, #tpu.memory_space<vmem>>, vector<1x1x32xf32>
    %931 = vector.shape_cast %930 : vector<1x1x32xf32> to vector<1x32xf32>
    %932 = vector.broadcast %931 : vector<1x32xf32> to vector<16x32xf32>
    %933 = arith.addf %929, %932 : vector<16x32xf32>
    %934 = arith.addf %835, %933 : vector<16x32xf32>
    %935 = vector.extract_strided_slice %837 {offsets = [0, 0], sizes = [1, 32], strides = [1, 1]} : vector<3x32xf32> to vector<1x32xf32>
    %936 = vector.extract_strided_slice %839 {offsets = [0, 0], sizes = [1, 32], strides = [1, 1]} : vector<3x32xf32> to vector<1x32xf32>
    %cst_348 = arith.constant dense<0.000000e+00> : vector<16xf32>
    %937 = vector.multi_reduction <add>, %934, %cst_348 [1] : vector<16x32xf32> to vector<16xf32>
    %938 = vector.shape_cast %937 : vector<16xf32> to vector<16x1xf32>
    %cst_349 = arith.constant 3.200000e+01 : f32
    %939 = vector.broadcast %cst_349 : f32 to vector<16x1xf32>
    %940 = arith.divf %938, %939 : vector<16x1xf32>
    %941 = vector.broadcast %940 : vector<16x1xf32> to vector<16x32xf32>
    %942 = arith.subf %934, %941 : vector<16x32xf32>
    %943 = arith.mulf %942, %942 : vector<16x32xf32>
    %cst_350 = arith.constant dense<0.000000e+00> : vector<16xf32>
    %944 = vector.multi_reduction <add>, %943, %cst_350 [1] : vector<16x32xf32> to vector<16xf32>
    %945 = vector.shape_cast %944 : vector<16xf32> to vector<16x1xf32>
    %cst_351 = arith.constant 3.200000e+01 : f32
    %946 = vector.broadcast %cst_351 : f32 to vector<16x1xf32>
    %947 = arith.divf %945, %946 : vector<16x1xf32>
    %948 = vector.broadcast %940 : vector<16x1xf32> to vector<16x32xf32>
    %949 = arith.subf %934, %948 : vector<16x32xf32>
    %cst_352 = arith.constant 9.99999974E-6 : f32
    %950 = vector.broadcast %cst_352 : f32 to vector<16x1xf32>
    %951 = arith.addf %947, %950 : vector<16x1xf32>
    %952 = math.rsqrt %951 : vector<16x1xf32>
    %953 = vector.broadcast %952 : vector<16x1xf32> to vector<16x32xf32>
    %954 = arith.mulf %949, %953 : vector<16x32xf32>
    %955 = vector.broadcast %935 : vector<1x32xf32> to vector<16x32xf32>
    %956 = arith.mulf %954, %955 : vector<16x32xf32>
    %957 = vector.broadcast %936 : vector<1x32xf32> to vector<16x32xf32>
    %958 = arith.addf %956, %957 : vector<16x32xf32>
    %c3_353 = arith.constant 3 : index
    %c0_354 = arith.constant 0 : index
    %c0_355 = arith.constant 0 : index
    %959 = vector.load %arg7[%c3_353, %c0_354, %c0_355] : memref<5x32x32xf32, #tpu.memory_space<vmem>>, vector<1x32x32xf32>
    %960 = vector.shape_cast %959 : vector<1x32x32xf32> to vector<32x32xf32>
    %cst_356 = arith.constant dense<0.000000e+00> : vector<16x32xf32>
    %961 = tpu.matmul %958, %960, %cst_356 {dimension_numbers = #tpu.dot_dimension_numbers<[1], [0], [0], [1], [0, 0, 1, 1], [], []>} : vector<16x32xf32>, vector<32x32xf32>, vector<16x32xf32> -> vector<16x32xf32>
    %c3_357 = arith.constant 3 : index
    %c0_358 = arith.constant 0 : index
    %c0_359 = arith.constant 0 : index
    %962 = vector.load %arg8[%c3_357, %c0_358, %c0_359] : memref<5x1x32xf32, #tpu.memory_space<vmem>>, vector<1x1x32xf32>
    %963 = vector.shape_cast %962 : vector<1x1x32xf32> to vector<1x32xf32>
    %964 = vector.broadcast %963 : vector<1x32xf32> to vector<16x32xf32>
    %965 = arith.addf %961, %964 : vector<16x32xf32>
    %c3_360 = arith.constant 3 : index
    %c0_361 = arith.constant 0 : index
    %c0_362 = arith.constant 0 : index
    %966 = vector.load %arg9[%c3_360, %c0_361, %c0_362] : memref<5x32x64xf32, #tpu.memory_space<vmem>>, vector<1x32x64xf32>
    %967 = vector.shape_cast %966 : vector<1x32x64xf32> to vector<32x64xf32>
    %cst_363 = arith.constant dense<0.000000e+00> : vector<16x64xf32>
    %968 = tpu.matmul %1, %967, %cst_363 {dimension_numbers = #tpu.dot_dimension_numbers<[1], [0], [0], [1], [0, 0, 1, 1], [], []>} : vector<16x32xf32>, vector<32x64xf32>, vector<16x64xf32> -> vector<16x64xf32>
    %c3_364 = arith.constant 3 : index
    %c0_365 = arith.constant 0 : index
    %c0_366 = arith.constant 0 : index
    %969 = vector.load %arg10[%c3_364, %c0_365, %c0_366] : memref<5x1x64xf32, #tpu.memory_space<vmem>>, vector<1x1x64xf32>
    %970 = vector.shape_cast %969 : vector<1x1x64xf32> to vector<1x64xf32>
    %971 = vector.broadcast %970 : vector<1x64xf32> to vector<16x64xf32>
    %972 = arith.addf %968, %971 : vector<16x64xf32>
    %973 = vector.extract_strided_slice %972 {offsets = [0, 0], sizes = [16, 32], strides = [1, 1]} : vector<16x64xf32> to vector<16x32xf32>
    %974 = vector.extract_strided_slice %972 {offsets = [0, 32], sizes = [16, 32], strides = [1, 1]} : vector<16x64xf32> to vector<16x32xf32>
    %975 = vector.shape_cast %965 : vector<16x32xf32> to vector<2x8x32xf32>
    %976 = vector.shape_cast %973 : vector<16x32xf32> to vector<2x8x32xf32>
    %977 = vector.shape_cast %974 : vector<16x32xf32> to vector<2x8x32xf32>
    %978 = vector.extract_strided_slice %975 {offsets = [0, 0, 0], sizes = [2, 8, 8], strides = [1, 1, 1]} : vector<2x8x32xf32> to vector<2x8x8xf32>
    %979 = vector.extract_strided_slice %976 {offsets = [0, 0, 0], sizes = [2, 8, 8], strides = [1, 1, 1]} : vector<2x8x32xf32> to vector<2x8x8xf32>
    %980 = vector.extract_strided_slice %977 {offsets = [0, 0, 0], sizes = [2, 8, 8], strides = [1, 1, 1]} : vector<2x8x32xf32> to vector<2x8x8xf32>
    "tpu.trace_start"() <{level = 10 : i32, message = "bqd,bkd->bqk"}> : () -> ()
    %cst_367 = arith.constant dense<0.000000e+00> : vector<2x8x8xf32>
    %981 = tpu.matmul %978, %979, %cst_367 {dimension_numbers = #tpu.dot_dimension_numbers<[2], [2], [1], [1], [0, 0, 0, 1, 1, 1], [0], [0]>} : vector<2x8x8xf32>, vector<2x8x8xf32>, vector<2x8x8xf32> -> vector<2x8x8xf32>
    "tpu.trace_stop"() : () -> ()
    %cst_368 = arith.constant dense<0xFF800000> : vector<2x8xf32>
    %982 = vector.multi_reduction <maximumf>, %981, %cst_368 [2] : vector<2x8x8xf32> to vector<2x8xf32>
    %983 = vector.shape_cast %982 : vector<2x8xf32> to vector<2x8x1xf32>
    %984 = vector.broadcast %983 : vector<2x8x1xf32> to vector<2x8x8xf32>
    %985 = arith.subf %981, %984 : vector<2x8x8xf32>
    %986 = math.exp %985 : vector<2x8x8xf32>
    %cst_369 = arith.constant dense<0.000000e+00> : vector<2x8xf32>
    %987 = vector.multi_reduction <add>, %986, %cst_369 [2] : vector<2x8x8xf32> to vector<2x8xf32>
    %988 = vector.shape_cast %987 : vector<2x8xf32> to vector<2x8x1xf32>
    %989 = tpu.reciprocal %988 {approx = true} : vector<2x8x1xf32> -> vector<2x8x1xf32>
    %990 = vector.broadcast %989 : vector<2x8x1xf32> to vector<2x8x8xf32>
    %991 = arith.mulf %986, %990 : vector<2x8x8xf32>
    "tpu.trace_start"() <{level = 10 : i32, message = "bqk,bkd->bqd"}> : () -> ()
    %cst_370 = arith.constant dense<0.000000e+00> : vector<2x8x8xf32>
    %992 = tpu.matmul %991, %980, %cst_370 {dimension_numbers = #tpu.dot_dimension_numbers<[2], [1], [1], [2], [0, 0, 0, 1, 1, 2], [0], [0]>} : vector<2x8x8xf32>, vector<2x8x8xf32>, vector<2x8x8xf32> -> vector<2x8x8xf32>
    "tpu.trace_stop"() : () -> ()
    %993 = vector.extract_strided_slice %975 {offsets = [0, 0, 8], sizes = [2, 8, 8], strides = [1, 1, 1]} : vector<2x8x32xf32> to vector<2x8x8xf32>
    %994 = vector.extract_strided_slice %976 {offsets = [0, 0, 8], sizes = [2, 8, 8], strides = [1, 1, 1]} : vector<2x8x32xf32> to vector<2x8x8xf32>
    %995 = vector.extract_strided_slice %977 {offsets = [0, 0, 8], sizes = [2, 8, 8], strides = [1, 1, 1]} : vector<2x8x32xf32> to vector<2x8x8xf32>
    "tpu.trace_start"() <{level = 10 : i32, message = "bqd,bkd->bqk"}> : () -> ()
    %cst_371 = arith.constant dense<0.000000e+00> : vector<2x8x8xf32>
    %996 = tpu.matmul %993, %994, %cst_371 {dimension_numbers = #tpu.dot_dimension_numbers<[2], [2], [1], [1], [0, 0, 0, 1, 1, 1], [0], [0]>} : vector<2x8x8xf32>, vector<2x8x8xf32>, vector<2x8x8xf32> -> vector<2x8x8xf32>
    "tpu.trace_stop"() : () -> ()
    %cst_372 = arith.constant dense<0xFF800000> : vector<2x8xf32>
    %997 = vector.multi_reduction <maximumf>, %996, %cst_372 [2] : vector<2x8x8xf32> to vector<2x8xf32>
    %998 = vector.shape_cast %997 : vector<2x8xf32> to vector<2x8x1xf32>
    %999 = vector.broadcast %998 : vector<2x8x1xf32> to vector<2x8x8xf32>
    %1000 = arith.subf %996, %999 : vector<2x8x8xf32>
    %1001 = math.exp %1000 : vector<2x8x8xf32>
    %cst_373 = arith.constant dense<0.000000e+00> : vector<2x8xf32>
    %1002 = vector.multi_reduction <add>, %1001, %cst_373 [2] : vector<2x8x8xf32> to vector<2x8xf32>
    %1003 = vector.shape_cast %1002 : vector<2x8xf32> to vector<2x8x1xf32>
    %1004 = tpu.reciprocal %1003 {approx = true} : vector<2x8x1xf32> -> vector<2x8x1xf32>
    %1005 = vector.broadcast %1004 : vector<2x8x1xf32> to vector<2x8x8xf32>
    %1006 = arith.mulf %1001, %1005 : vector<2x8x8xf32>
    "tpu.trace_start"() <{level = 10 : i32, message = "bqk,bkd->bqd"}> : () -> ()
    %cst_374 = arith.constant dense<0.000000e+00> : vector<2x8x8xf32>
    %1007 = tpu.matmul %1006, %995, %cst_374 {dimension_numbers = #tpu.dot_dimension_numbers<[2], [1], [1], [2], [0, 0, 0, 1, 1, 2], [0], [0]>} : vector<2x8x8xf32>, vector<2x8x8xf32>, vector<2x8x8xf32> -> vector<2x8x8xf32>
    "tpu.trace_stop"() : () -> ()
    %1008 = vector.extract_strided_slice %975 {offsets = [0, 0, 16], sizes = [2, 8, 8], strides = [1, 1, 1]} : vector<2x8x32xf32> to vector<2x8x8xf32>
    %1009 = vector.extract_strided_slice %976 {offsets = [0, 0, 16], sizes = [2, 8, 8], strides = [1, 1, 1]} : vector<2x8x32xf32> to vector<2x8x8xf32>
    %1010 = vector.extract_strided_slice %977 {offsets = [0, 0, 16], sizes = [2, 8, 8], strides = [1, 1, 1]} : vector<2x8x32xf32> to vector<2x8x8xf32>
    "tpu.trace_start"() <{level = 10 : i32, message = "bqd,bkd->bqk"}> : () -> ()
    %cst_375 = arith.constant dense<0.000000e+00> : vector<2x8x8xf32>
    %1011 = tpu.matmul %1008, %1009, %cst_375 {dimension_numbers = #tpu.dot_dimension_numbers<[2], [2], [1], [1], [0, 0, 0, 1, 1, 1], [0], [0]>} : vector<2x8x8xf32>, vector<2x8x8xf32>, vector<2x8x8xf32> -> vector<2x8x8xf32>
    "tpu.trace_stop"() : () -> ()
    %cst_376 = arith.constant dense<0xFF800000> : vector<2x8xf32>
    %1012 = vector.multi_reduction <maximumf>, %1011, %cst_376 [2] : vector<2x8x8xf32> to vector<2x8xf32>
    %1013 = vector.shape_cast %1012 : vector<2x8xf32> to vector<2x8x1xf32>
    %1014 = vector.broadcast %1013 : vector<2x8x1xf32> to vector<2x8x8xf32>
    %1015 = arith.subf %1011, %1014 : vector<2x8x8xf32>
    %1016 = math.exp %1015 : vector<2x8x8xf32>
    %cst_377 = arith.constant dense<0.000000e+00> : vector<2x8xf32>
    %1017 = vector.multi_reduction <add>, %1016, %cst_377 [2] : vector<2x8x8xf32> to vector<2x8xf32>
    %1018 = vector.shape_cast %1017 : vector<2x8xf32> to vector<2x8x1xf32>
    %1019 = tpu.reciprocal %1018 {approx = true} : vector<2x8x1xf32> -> vector<2x8x1xf32>
    %1020 = vector.broadcast %1019 : vector<2x8x1xf32> to vector<2x8x8xf32>
    %1021 = arith.mulf %1016, %1020 : vector<2x8x8xf32>
    "tpu.trace_start"() <{level = 10 : i32, message = "bqk,bkd->bqd"}> : () -> ()
    %cst_378 = arith.constant dense<0.000000e+00> : vector<2x8x8xf32>
    %1022 = tpu.matmul %1021, %1010, %cst_378 {dimension_numbers = #tpu.dot_dimension_numbers<[2], [1], [1], [2], [0, 0, 0, 1, 1, 2], [0], [0]>} : vector<2x8x8xf32>, vector<2x8x8xf32>, vector<2x8x8xf32> -> vector<2x8x8xf32>
    "tpu.trace_stop"() : () -> ()
    %1023 = vector.extract_strided_slice %975 {offsets = [0, 0, 24], sizes = [2, 8, 8], strides = [1, 1, 1]} : vector<2x8x32xf32> to vector<2x8x8xf32>
    %1024 = vector.extract_strided_slice %976 {offsets = [0, 0, 24], sizes = [2, 8, 8], strides = [1, 1, 1]} : vector<2x8x32xf32> to vector<2x8x8xf32>
    %1025 = vector.extract_strided_slice %977 {offsets = [0, 0, 24], sizes = [2, 8, 8], strides = [1, 1, 1]} : vector<2x8x32xf32> to vector<2x8x8xf32>
    "tpu.trace_start"() <{level = 10 : i32, message = "bqd,bkd->bqk"}> : () -> ()
    %cst_379 = arith.constant dense<0.000000e+00> : vector<2x8x8xf32>
    %1026 = tpu.matmul %1023, %1024, %cst_379 {dimension_numbers = #tpu.dot_dimension_numbers<[2], [2], [1], [1], [0, 0, 0, 1, 1, 1], [0], [0]>} : vector<2x8x8xf32>, vector<2x8x8xf32>, vector<2x8x8xf32> -> vector<2x8x8xf32>
    "tpu.trace_stop"() : () -> ()
    %cst_380 = arith.constant dense<0xFF800000> : vector<2x8xf32>
    %1027 = vector.multi_reduction <maximumf>, %1026, %cst_380 [2] : vector<2x8x8xf32> to vector<2x8xf32>
    %1028 = vector.shape_cast %1027 : vector<2x8xf32> to vector<2x8x1xf32>
    %1029 = vector.broadcast %1028 : vector<2x8x1xf32> to vector<2x8x8xf32>
    %1030 = arith.subf %1026, %1029 : vector<2x8x8xf32>
    %1031 = math.exp %1030 : vector<2x8x8xf32>
    %cst_381 = arith.constant dense<0.000000e+00> : vector<2x8xf32>
    %1032 = vector.multi_reduction <add>, %1031, %cst_381 [2] : vector<2x8x8xf32> to vector<2x8xf32>
    %1033 = vector.shape_cast %1032 : vector<2x8xf32> to vector<2x8x1xf32>
    %1034 = tpu.reciprocal %1033 {approx = true} : vector<2x8x1xf32> -> vector<2x8x1xf32>
    %1035 = vector.broadcast %1034 : vector<2x8x1xf32> to vector<2x8x8xf32>
    %1036 = arith.mulf %1031, %1035 : vector<2x8x8xf32>
    "tpu.trace_start"() <{level = 10 : i32, message = "bqk,bkd->bqd"}> : () -> ()
    %cst_382 = arith.constant dense<0.000000e+00> : vector<2x8x8xf32>
    %1037 = tpu.matmul %1036, %1025, %cst_382 {dimension_numbers = #tpu.dot_dimension_numbers<[2], [1], [1], [2], [0, 0, 0, 1, 1, 2], [0], [0]>} : vector<2x8x8xf32>, vector<2x8x8xf32>, vector<2x8x8xf32> -> vector<2x8x8xf32>
    "tpu.trace_stop"() : () -> ()
    %1038 = tpu.concatenate %992, %1007, %1022, %1037 in 2 : vector<2x8x8xf32>, vector<2x8x8xf32>, vector<2x8x8xf32>, vector<2x8x8xf32> -> vector<2x8x32xf32>
    %1039 = vector.shape_cast %1038 : vector<2x8x32xf32> to vector<16x32xf32>
    %c3_383 = arith.constant 3 : index
    %c0_384 = arith.constant 0 : index
    %c0_385 = arith.constant 0 : index
    %1040 = vector.load %arg11[%c3_383, %c0_384, %c0_385] : memref<5x32x32xf32, #tpu.memory_space<vmem>>, vector<1x32x32xf32>
    %1041 = vector.shape_cast %1040 : vector<1x32x32xf32> to vector<32x32xf32>
    %cst_386 = arith.constant dense<0.000000e+00> : vector<16x32xf32>
    %1042 = tpu.matmul %1039, %1041, %cst_386 {dimension_numbers = #tpu.dot_dimension_numbers<[1], [0], [0], [1], [0, 0, 1, 1], [], []>} : vector<16x32xf32>, vector<32x32xf32>, vector<16x32xf32> -> vector<16x32xf32>
    %c3_387 = arith.constant 3 : index
    %c0_388 = arith.constant 0 : index
    %c0_389 = arith.constant 0 : index
    %1043 = vector.load %arg12[%c3_387, %c0_388, %c0_389] : memref<5x1x32xf32, #tpu.memory_space<vmem>>, vector<1x1x32xf32>
    %1044 = vector.shape_cast %1043 : vector<1x1x32xf32> to vector<1x32xf32>
    %1045 = vector.broadcast %1044 : vector<1x32xf32> to vector<16x32xf32>
    %1046 = arith.addf %1042, %1045 : vector<16x32xf32>
    %1047 = arith.addf %958, %1046 : vector<16x32xf32>
    %1048 = vector.extract_strided_slice %837 {offsets = [1, 0], sizes = [1, 32], strides = [1, 1]} : vector<3x32xf32> to vector<1x32xf32>
    %1049 = vector.extract_strided_slice %839 {offsets = [1, 0], sizes = [1, 32], strides = [1, 1]} : vector<3x32xf32> to vector<1x32xf32>
    %cst_390 = arith.constant dense<0.000000e+00> : vector<16xf32>
    %1050 = vector.multi_reduction <add>, %1047, %cst_390 [1] : vector<16x32xf32> to vector<16xf32>
    %1051 = vector.shape_cast %1050 : vector<16xf32> to vector<16x1xf32>
    %cst_391 = arith.constant 3.200000e+01 : f32
    %1052 = vector.broadcast %cst_391 : f32 to vector<16x1xf32>
    %1053 = arith.divf %1051, %1052 : vector<16x1xf32>
    %1054 = vector.broadcast %1053 : vector<16x1xf32> to vector<16x32xf32>
    %1055 = arith.subf %1047, %1054 : vector<16x32xf32>
    %1056 = arith.mulf %1055, %1055 : vector<16x32xf32>
    %cst_392 = arith.constant dense<0.000000e+00> : vector<16xf32>
    %1057 = vector.multi_reduction <add>, %1056, %cst_392 [1] : vector<16x32xf32> to vector<16xf32>
    %1058 = vector.shape_cast %1057 : vector<16xf32> to vector<16x1xf32>
    %cst_393 = arith.constant 3.200000e+01 : f32
    %1059 = vector.broadcast %cst_393 : f32 to vector<16x1xf32>
    %1060 = arith.divf %1058, %1059 : vector<16x1xf32>
    %1061 = vector.broadcast %1053 : vector<16x1xf32> to vector<16x32xf32>
    %1062 = arith.subf %1047, %1061 : vector<16x32xf32>
    %cst_394 = arith.constant 9.99999974E-6 : f32
    %1063 = vector.broadcast %cst_394 : f32 to vector<16x1xf32>
    %1064 = arith.addf %1060, %1063 : vector<16x1xf32>
    %1065 = math.rsqrt %1064 : vector<16x1xf32>
    %1066 = vector.broadcast %1065 : vector<16x1xf32> to vector<16x32xf32>
    %1067 = arith.mulf %1062, %1066 : vector<16x32xf32>
    %1068 = vector.broadcast %1048 : vector<1x32xf32> to vector<16x32xf32>
    %1069 = arith.mulf %1067, %1068 : vector<16x32xf32>
    %1070 = vector.broadcast %1049 : vector<1x32xf32> to vector<16x32xf32>
    %1071 = arith.addf %1069, %1070 : vector<16x32xf32>
    %c3_395 = arith.constant 3 : index
    %c0_396 = arith.constant 0 : index
    %c0_397 = arith.constant 0 : index
    %1072 = vector.load %arg15[%c3_395, %c0_396, %c0_397] : memref<5x32x128xf32, #tpu.memory_space<vmem>>, vector<1x32x128xf32>
    %1073 = vector.shape_cast %1072 : vector<1x32x128xf32> to vector<32x128xf32>
    %cst_398 = arith.constant dense<0.000000e+00> : vector<16x128xf32>
    %1074 = tpu.matmul %1071, %1073, %cst_398 {dimension_numbers = #tpu.dot_dimension_numbers<[1], [0], [0], [1], [0, 0, 1, 1], [], []>} : vector<16x32xf32>, vector<32x128xf32>, vector<16x128xf32> -> vector<16x128xf32>
    %c3_399 = arith.constant 3 : index
    %c0_400 = arith.constant 0 : index
    %c0_401 = arith.constant 0 : index
    %1075 = vector.load %arg16[%c3_399, %c0_400, %c0_401] : memref<5x1x128xf32, #tpu.memory_space<vmem>>, vector<1x1x128xf32>
    %1076 = vector.shape_cast %1075 : vector<1x1x128xf32> to vector<1x128xf32>
    %1077 = vector.broadcast %1076 : vector<1x128xf32> to vector<16x128xf32>
    %1078 = arith.addf %1074, %1077 : vector<16x128xf32>
    %cst_402 = arith.constant 0.000000e+00 : f32
    %1079 = vector.broadcast %cst_402 : f32 to vector<16x128xf32>
    %1080 = arith.maximumf %1078, %1079 : vector<16x128xf32>
    %c3_403 = arith.constant 3 : index
    %c0_404 = arith.constant 0 : index
    %c0_405 = arith.constant 0 : index
    %1081 = vector.load %arg17[%c3_403, %c0_404, %c0_405] : memref<5x128x32xf32, #tpu.memory_space<vmem>>, vector<1x128x32xf32>
    %1082 = vector.shape_cast %1081 : vector<1x128x32xf32> to vector<128x32xf32>
    %cst_406 = arith.constant dense<0.000000e+00> : vector<16x32xf32>
    %1083 = tpu.matmul %1080, %1082, %cst_406 {dimension_numbers = #tpu.dot_dimension_numbers<[1], [0], [0], [1], [0, 0, 1, 1], [], []>} : vector<16x128xf32>, vector<128x32xf32>, vector<16x32xf32> -> vector<16x32xf32>
    %c3_407 = arith.constant 3 : index
    %c0_408 = arith.constant 0 : index
    %c0_409 = arith.constant 0 : index
    %1084 = vector.load %arg18[%c3_407, %c0_408, %c0_409] : memref<5x1x32xf32, #tpu.memory_space<vmem>>, vector<1x1x32xf32>
    %1085 = vector.shape_cast %1084 : vector<1x1x32xf32> to vector<1x32xf32>
    %1086 = vector.broadcast %1085 : vector<1x32xf32> to vector<16x32xf32>
    %1087 = arith.addf %1083, %1086 : vector<16x32xf32>
    %1088 = arith.addf %1071, %1087 : vector<16x32xf32>
    %1089 = vector.extract_strided_slice %837 {offsets = [2, 0], sizes = [1, 32], strides = [1, 1]} : vector<3x32xf32> to vector<1x32xf32>
    %1090 = vector.extract_strided_slice %839 {offsets = [2, 0], sizes = [1, 32], strides = [1, 1]} : vector<3x32xf32> to vector<1x32xf32>
    %cst_410 = arith.constant dense<0.000000e+00> : vector<16xf32>
    %1091 = vector.multi_reduction <add>, %1088, %cst_410 [1] : vector<16x32xf32> to vector<16xf32>
    %1092 = vector.shape_cast %1091 : vector<16xf32> to vector<16x1xf32>
    %cst_411 = arith.constant 3.200000e+01 : f32
    %1093 = vector.broadcast %cst_411 : f32 to vector<16x1xf32>
    %1094 = arith.divf %1092, %1093 : vector<16x1xf32>
    %1095 = vector.broadcast %1094 : vector<16x1xf32> to vector<16x32xf32>
    %1096 = arith.subf %1088, %1095 : vector<16x32xf32>
    %1097 = arith.mulf %1096, %1096 : vector<16x32xf32>
    %cst_412 = arith.constant dense<0.000000e+00> : vector<16xf32>
    %1098 = vector.multi_reduction <add>, %1097, %cst_412 [1] : vector<16x32xf32> to vector<16xf32>
    %1099 = vector.shape_cast %1098 : vector<16xf32> to vector<16x1xf32>
    %cst_413 = arith.constant 3.200000e+01 : f32
    %1100 = vector.broadcast %cst_413 : f32 to vector<16x1xf32>
    %1101 = arith.divf %1099, %1100 : vector<16x1xf32>
    %1102 = vector.broadcast %1094 : vector<16x1xf32> to vector<16x32xf32>
    %1103 = arith.subf %1088, %1102 : vector<16x32xf32>
    %cst_414 = arith.constant 9.99999974E-6 : f32
    %1104 = vector.broadcast %cst_414 : f32 to vector<16x1xf32>
    %1105 = arith.addf %1101, %1104 : vector<16x1xf32>
    %1106 = math.rsqrt %1105 : vector<16x1xf32>
    %1107 = vector.broadcast %1106 : vector<16x1xf32> to vector<16x32xf32>
    %1108 = arith.mulf %1103, %1107 : vector<16x32xf32>
    %1109 = vector.broadcast %1089 : vector<1x32xf32> to vector<16x32xf32>
    %1110 = arith.mulf %1108, %1109 : vector<16x32xf32>
    %1111 = vector.broadcast %1090 : vector<1x32xf32> to vector<16x32xf32>
    %1112 = arith.addf %1110, %1111 : vector<16x32xf32>
    %c4 = arith.constant 4 : index
    %c0_415 = arith.constant 0 : index
    %c0_416 = arith.constant 0 : index
    %1113 = vector.load %arg13[%c4, %c0_415, %c0_416] : memref<5x3x32xf32, #tpu.memory_space<vmem>>, vector<1x3x32xf32>
    %1114 = vector.shape_cast %1113 : vector<1x3x32xf32> to vector<3x32xf32>
    %c4_417 = arith.constant 4 : index
    %c0_418 = arith.constant 0 : index
    %c0_419 = arith.constant 0 : index
    %1115 = vector.load %arg14[%c4_417, %c0_418, %c0_419] : memref<5x3x32xf32, #tpu.memory_space<vmem>>, vector<1x3x32xf32>
    %1116 = vector.shape_cast %1115 : vector<1x3x32xf32> to vector<3x32xf32>
    %c4_420 = arith.constant 4 : index
    %c0_421 = arith.constant 0 : index
    %c0_422 = arith.constant 0 : index
    %1117 = vector.load %arg3[%c4_420, %c0_421, %c0_422] : memref<5x32x96xf32, #tpu.memory_space<vmem>>, vector<1x32x96xf32>
    %1118 = vector.shape_cast %1117 : vector<1x32x96xf32> to vector<32x96xf32>
    %cst_423 = arith.constant dense<0.000000e+00> : vector<16x96xf32>
    %1119 = tpu.matmul %1112, %1118, %cst_423 {dimension_numbers = #tpu.dot_dimension_numbers<[1], [0], [0], [1], [0, 0, 1, 1], [], []>} : vector<16x32xf32>, vector<32x96xf32>, vector<16x96xf32> -> vector<16x96xf32>
    %c4_424 = arith.constant 4 : index
    %c0_425 = arith.constant 0 : index
    %c0_426 = arith.constant 0 : index
    %1120 = vector.load %arg4[%c4_424, %c0_425, %c0_426] : memref<5x1x96xf32, #tpu.memory_space<vmem>>, vector<1x1x96xf32>
    %1121 = vector.shape_cast %1120 : vector<1x1x96xf32> to vector<1x96xf32>
    %1122 = vector.broadcast %1121 : vector<1x96xf32> to vector<16x96xf32>
    %1123 = arith.addf %1119, %1122 : vector<16x96xf32>
    %1124 = vector.extract_strided_slice %1123 {offsets = [0, 0], sizes = [16, 32], strides = [1, 1]} : vector<16x96xf32> to vector<16x32xf32>
    %1125 = vector.extract_strided_slice %1123 {offsets = [0, 32], sizes = [16, 32], strides = [1, 1]} : vector<16x96xf32> to vector<16x32xf32>
    %1126 = vector.extract_strided_slice %1123 {offsets = [0, 64], sizes = [16, 32], strides = [1, 1]} : vector<16x96xf32> to vector<16x32xf32>
    %1127 = vector.shape_cast %1124 : vector<16x32xf32> to vector<2x8x32xf32>
    %1128 = vector.shape_cast %1125 : vector<16x32xf32> to vector<2x8x32xf32>
    %1129 = vector.shape_cast %1126 : vector<16x32xf32> to vector<2x8x32xf32>
    %1130 = vector.extract_strided_slice %1127 {offsets = [0, 0, 0], sizes = [2, 8, 8], strides = [1, 1, 1]} : vector<2x8x32xf32> to vector<2x8x8xf32>
    %1131 = vector.extract_strided_slice %1128 {offsets = [0, 0, 0], sizes = [2, 8, 8], strides = [1, 1, 1]} : vector<2x8x32xf32> to vector<2x8x8xf32>
    %1132 = vector.extract_strided_slice %1129 {offsets = [0, 0, 0], sizes = [2, 8, 8], strides = [1, 1, 1]} : vector<2x8x32xf32> to vector<2x8x8xf32>
    "tpu.trace_start"() <{level = 10 : i32, message = "bqd,bkd->bqk"}> : () -> ()
    %cst_427 = arith.constant dense<0.000000e+00> : vector<2x8x8xf32>
    %1133 = tpu.matmul %1130, %1131, %cst_427 {dimension_numbers = #tpu.dot_dimension_numbers<[2], [2], [1], [1], [0, 0, 0, 1, 1, 1], [0], [0]>} : vector<2x8x8xf32>, vector<2x8x8xf32>, vector<2x8x8xf32> -> vector<2x8x8xf32>
    "tpu.trace_stop"() : () -> ()
    %1134 = vector.shape_cast %4 : vector<8x8xf32> to vector<1x8x8xf32>
    %1135 = vector.broadcast %1134 : vector<1x8x8xf32> to vector<2x8x8xf32>
    %1136 = arith.addf %1133, %1135 : vector<2x8x8xf32>
    %cst_428 = arith.constant dense<0xFF800000> : vector<2x8xf32>
    %1137 = vector.multi_reduction <maximumf>, %1136, %cst_428 [2] : vector<2x8x8xf32> to vector<2x8xf32>
    %1138 = vector.shape_cast %1137 : vector<2x8xf32> to vector<2x8x1xf32>
    %1139 = vector.broadcast %1138 : vector<2x8x1xf32> to vector<2x8x8xf32>
    %1140 = arith.subf %1136, %1139 : vector<2x8x8xf32>
    %1141 = math.exp %1140 : vector<2x8x8xf32>
    %cst_429 = arith.constant dense<0.000000e+00> : vector<2x8xf32>
    %1142 = vector.multi_reduction <add>, %1141, %cst_429 [2] : vector<2x8x8xf32> to vector<2x8xf32>
    %1143 = vector.shape_cast %1142 : vector<2x8xf32> to vector<2x8x1xf32>
    %1144 = tpu.reciprocal %1143 {approx = true} : vector<2x8x1xf32> -> vector<2x8x1xf32>
    %1145 = vector.broadcast %1144 : vector<2x8x1xf32> to vector<2x8x8xf32>
    %1146 = arith.mulf %1141, %1145 : vector<2x8x8xf32>
    "tpu.trace_start"() <{level = 10 : i32, message = "bqk,bkd->bqd"}> : () -> ()
    %cst_430 = arith.constant dense<0.000000e+00> : vector<2x8x8xf32>
    %1147 = tpu.matmul %1146, %1132, %cst_430 {dimension_numbers = #tpu.dot_dimension_numbers<[2], [1], [1], [2], [0, 0, 0, 1, 1, 2], [0], [0]>} : vector<2x8x8xf32>, vector<2x8x8xf32>, vector<2x8x8xf32> -> vector<2x8x8xf32>
    "tpu.trace_stop"() : () -> ()
    %1148 = vector.extract_strided_slice %1127 {offsets = [0, 0, 8], sizes = [2, 8, 8], strides = [1, 1, 1]} : vector<2x8x32xf32> to vector<2x8x8xf32>
    %1149 = vector.extract_strided_slice %1128 {offsets = [0, 0, 8], sizes = [2, 8, 8], strides = [1, 1, 1]} : vector<2x8x32xf32> to vector<2x8x8xf32>
    %1150 = vector.extract_strided_slice %1129 {offsets = [0, 0, 8], sizes = [2, 8, 8], strides = [1, 1, 1]} : vector<2x8x32xf32> to vector<2x8x8xf32>
    "tpu.trace_start"() <{level = 10 : i32, message = "bqd,bkd->bqk"}> : () -> ()
    %cst_431 = arith.constant dense<0.000000e+00> : vector<2x8x8xf32>
    %1151 = tpu.matmul %1148, %1149, %cst_431 {dimension_numbers = #tpu.dot_dimension_numbers<[2], [2], [1], [1], [0, 0, 0, 1, 1, 1], [0], [0]>} : vector<2x8x8xf32>, vector<2x8x8xf32>, vector<2x8x8xf32> -> vector<2x8x8xf32>
    "tpu.trace_stop"() : () -> ()
    %1152 = vector.shape_cast %4 : vector<8x8xf32> to vector<1x8x8xf32>
    %1153 = vector.broadcast %1152 : vector<1x8x8xf32> to vector<2x8x8xf32>
    %1154 = arith.addf %1151, %1153 : vector<2x8x8xf32>
    %cst_432 = arith.constant dense<0xFF800000> : vector<2x8xf32>
    %1155 = vector.multi_reduction <maximumf>, %1154, %cst_432 [2] : vector<2x8x8xf32> to vector<2x8xf32>
    %1156 = vector.shape_cast %1155 : vector<2x8xf32> to vector<2x8x1xf32>
    %1157 = vector.broadcast %1156 : vector<2x8x1xf32> to vector<2x8x8xf32>
    %1158 = arith.subf %1154, %1157 : vector<2x8x8xf32>
    %1159 = math.exp %1158 : vector<2x8x8xf32>
    %cst_433 = arith.constant dense<0.000000e+00> : vector<2x8xf32>
    %1160 = vector.multi_reduction <add>, %1159, %cst_433 [2] : vector<2x8x8xf32> to vector<2x8xf32>
    %1161 = vector.shape_cast %1160 : vector<2x8xf32> to vector<2x8x1xf32>
    %1162 = tpu.reciprocal %1161 {approx = true} : vector<2x8x1xf32> -> vector<2x8x1xf32>
    %1163 = vector.broadcast %1162 : vector<2x8x1xf32> to vector<2x8x8xf32>
    %1164 = arith.mulf %1159, %1163 : vector<2x8x8xf32>
    "tpu.trace_start"() <{level = 10 : i32, message = "bqk,bkd->bqd"}> : () -> ()
    %cst_434 = arith.constant dense<0.000000e+00> : vector<2x8x8xf32>
    %1165 = tpu.matmul %1164, %1150, %cst_434 {dimension_numbers = #tpu.dot_dimension_numbers<[2], [1], [1], [2], [0, 0, 0, 1, 1, 2], [0], [0]>} : vector<2x8x8xf32>, vector<2x8x8xf32>, vector<2x8x8xf32> -> vector<2x8x8xf32>
    "tpu.trace_stop"() : () -> ()
    %1166 = vector.extract_strided_slice %1127 {offsets = [0, 0, 16], sizes = [2, 8, 8], strides = [1, 1, 1]} : vector<2x8x32xf32> to vector<2x8x8xf32>
    %1167 = vector.extract_strided_slice %1128 {offsets = [0, 0, 16], sizes = [2, 8, 8], strides = [1, 1, 1]} : vector<2x8x32xf32> to vector<2x8x8xf32>
    %1168 = vector.extract_strided_slice %1129 {offsets = [0, 0, 16], sizes = [2, 8, 8], strides = [1, 1, 1]} : vector<2x8x32xf32> to vector<2x8x8xf32>
    "tpu.trace_start"() <{level = 10 : i32, message = "bqd,bkd->bqk"}> : () -> ()
    %cst_435 = arith.constant dense<0.000000e+00> : vector<2x8x8xf32>
    %1169 = tpu.matmul %1166, %1167, %cst_435 {dimension_numbers = #tpu.dot_dimension_numbers<[2], [2], [1], [1], [0, 0, 0, 1, 1, 1], [0], [0]>} : vector<2x8x8xf32>, vector<2x8x8xf32>, vector<2x8x8xf32> -> vector<2x8x8xf32>
    "tpu.trace_stop"() : () -> ()
    %1170 = vector.shape_cast %4 : vector<8x8xf32> to vector<1x8x8xf32>
    %1171 = vector.broadcast %1170 : vector<1x8x8xf32> to vector<2x8x8xf32>
    %1172 = arith.addf %1169, %1171 : vector<2x8x8xf32>
    %cst_436 = arith.constant dense<0xFF800000> : vector<2x8xf32>
    %1173 = vector.multi_reduction <maximumf>, %1172, %cst_436 [2] : vector<2x8x8xf32> to vector<2x8xf32>
    %1174 = vector.shape_cast %1173 : vector<2x8xf32> to vector<2x8x1xf32>
    %1175 = vector.broadcast %1174 : vector<2x8x1xf32> to vector<2x8x8xf32>
    %1176 = arith.subf %1172, %1175 : vector<2x8x8xf32>
    %1177 = math.exp %1176 : vector<2x8x8xf32>
    %cst_437 = arith.constant dense<0.000000e+00> : vector<2x8xf32>
    %1178 = vector.multi_reduction <add>, %1177, %cst_437 [2] : vector<2x8x8xf32> to vector<2x8xf32>
    %1179 = vector.shape_cast %1178 : vector<2x8xf32> to vector<2x8x1xf32>
    %1180 = tpu.reciprocal %1179 {approx = true} : vector<2x8x1xf32> -> vector<2x8x1xf32>
    %1181 = vector.broadcast %1180 : vector<2x8x1xf32> to vector<2x8x8xf32>
    %1182 = arith.mulf %1177, %1181 : vector<2x8x8xf32>
    "tpu.trace_start"() <{level = 10 : i32, message = "bqk,bkd->bqd"}> : () -> ()
    %cst_438 = arith.constant dense<0.000000e+00> : vector<2x8x8xf32>
    %1183 = tpu.matmul %1182, %1168, %cst_438 {dimension_numbers = #tpu.dot_dimension_numbers<[2], [1], [1], [2], [0, 0, 0, 1, 1, 2], [0], [0]>} : vector<2x8x8xf32>, vector<2x8x8xf32>, vector<2x8x8xf32> -> vector<2x8x8xf32>
    "tpu.trace_stop"() : () -> ()
    %1184 = vector.extract_strided_slice %1127 {offsets = [0, 0, 24], sizes = [2, 8, 8], strides = [1, 1, 1]} : vector<2x8x32xf32> to vector<2x8x8xf32>
    %1185 = vector.extract_strided_slice %1128 {offsets = [0, 0, 24], sizes = [2, 8, 8], strides = [1, 1, 1]} : vector<2x8x32xf32> to vector<2x8x8xf32>
    %1186 = vector.extract_strided_slice %1129 {offsets = [0, 0, 24], sizes = [2, 8, 8], strides = [1, 1, 1]} : vector<2x8x32xf32> to vector<2x8x8xf32>
    "tpu.trace_start"() <{level = 10 : i32, message = "bqd,bkd->bqk"}> : () -> ()
    %cst_439 = arith.constant dense<0.000000e+00> : vector<2x8x8xf32>
    %1187 = tpu.matmul %1184, %1185, %cst_439 {dimension_numbers = #tpu.dot_dimension_numbers<[2], [2], [1], [1], [0, 0, 0, 1, 1, 1], [0], [0]>} : vector<2x8x8xf32>, vector<2x8x8xf32>, vector<2x8x8xf32> -> vector<2x8x8xf32>
    "tpu.trace_stop"() : () -> ()
    %1188 = vector.shape_cast %4 : vector<8x8xf32> to vector<1x8x8xf32>
    %1189 = vector.broadcast %1188 : vector<1x8x8xf32> to vector<2x8x8xf32>
    %1190 = arith.addf %1187, %1189 : vector<2x8x8xf32>
    %cst_440 = arith.constant dense<0xFF800000> : vector<2x8xf32>
    %1191 = vector.multi_reduction <maximumf>, %1190, %cst_440 [2] : vector<2x8x8xf32> to vector<2x8xf32>
    %1192 = vector.shape_cast %1191 : vector<2x8xf32> to vector<2x8x1xf32>
    %1193 = vector.broadcast %1192 : vector<2x8x1xf32> to vector<2x8x8xf32>
    %1194 = arith.subf %1190, %1193 : vector<2x8x8xf32>
    %1195 = math.exp %1194 : vector<2x8x8xf32>
    %cst_441 = arith.constant dense<0.000000e+00> : vector<2x8xf32>
    %1196 = vector.multi_reduction <add>, %1195, %cst_441 [2] : vector<2x8x8xf32> to vector<2x8xf32>
    %1197 = vector.shape_cast %1196 : vector<2x8xf32> to vector<2x8x1xf32>
    %1198 = tpu.reciprocal %1197 {approx = true} : vector<2x8x1xf32> -> vector<2x8x1xf32>
    %1199 = vector.broadcast %1198 : vector<2x8x1xf32> to vector<2x8x8xf32>
    %1200 = arith.mulf %1195, %1199 : vector<2x8x8xf32>
    "tpu.trace_start"() <{level = 10 : i32, message = "bqk,bkd->bqd"}> : () -> ()
    %cst_442 = arith.constant dense<0.000000e+00> : vector<2x8x8xf32>
    %1201 = tpu.matmul %1200, %1186, %cst_442 {dimension_numbers = #tpu.dot_dimension_numbers<[2], [1], [1], [2], [0, 0, 0, 1, 1, 2], [0], [0]>} : vector<2x8x8xf32>, vector<2x8x8xf32>, vector<2x8x8xf32> -> vector<2x8x8xf32>
    "tpu.trace_stop"() : () -> ()
    %1202 = tpu.concatenate %1147, %1165, %1183, %1201 in 2 : vector<2x8x8xf32>, vector<2x8x8xf32>, vector<2x8x8xf32>, vector<2x8x8xf32> -> vector<2x8x32xf32>
    %1203 = vector.shape_cast %1202 : vector<2x8x32xf32> to vector<16x32xf32>
    %c4_443 = arith.constant 4 : index
    %c0_444 = arith.constant 0 : index
    %c0_445 = arith.constant 0 : index
    %1204 = vector.load %arg5[%c4_443, %c0_444, %c0_445] : memref<5x32x32xf32, #tpu.memory_space<vmem>>, vector<1x32x32xf32>
    %1205 = vector.shape_cast %1204 : vector<1x32x32xf32> to vector<32x32xf32>
    %cst_446 = arith.constant dense<0.000000e+00> : vector<16x32xf32>
    %1206 = tpu.matmul %1203, %1205, %cst_446 {dimension_numbers = #tpu.dot_dimension_numbers<[1], [0], [0], [1], [0, 0, 1, 1], [], []>} : vector<16x32xf32>, vector<32x32xf32>, vector<16x32xf32> -> vector<16x32xf32>
    %c4_447 = arith.constant 4 : index
    %c0_448 = arith.constant 0 : index
    %c0_449 = arith.constant 0 : index
    %1207 = vector.load %arg6[%c4_447, %c0_448, %c0_449] : memref<5x1x32xf32, #tpu.memory_space<vmem>>, vector<1x1x32xf32>
    %1208 = vector.shape_cast %1207 : vector<1x1x32xf32> to vector<1x32xf32>
    %1209 = vector.broadcast %1208 : vector<1x32xf32> to vector<16x32xf32>
    %1210 = arith.addf %1206, %1209 : vector<16x32xf32>
    %1211 = arith.addf %1112, %1210 : vector<16x32xf32>
    %1212 = vector.extract_strided_slice %1114 {offsets = [0, 0], sizes = [1, 32], strides = [1, 1]} : vector<3x32xf32> to vector<1x32xf32>
    %1213 = vector.extract_strided_slice %1116 {offsets = [0, 0], sizes = [1, 32], strides = [1, 1]} : vector<3x32xf32> to vector<1x32xf32>
    %cst_450 = arith.constant dense<0.000000e+00> : vector<16xf32>
    %1214 = vector.multi_reduction <add>, %1211, %cst_450 [1] : vector<16x32xf32> to vector<16xf32>
    %1215 = vector.shape_cast %1214 : vector<16xf32> to vector<16x1xf32>
    %cst_451 = arith.constant 3.200000e+01 : f32
    %1216 = vector.broadcast %cst_451 : f32 to vector<16x1xf32>
    %1217 = arith.divf %1215, %1216 : vector<16x1xf32>
    %1218 = vector.broadcast %1217 : vector<16x1xf32> to vector<16x32xf32>
    %1219 = arith.subf %1211, %1218 : vector<16x32xf32>
    %1220 = arith.mulf %1219, %1219 : vector<16x32xf32>
    %cst_452 = arith.constant dense<0.000000e+00> : vector<16xf32>
    %1221 = vector.multi_reduction <add>, %1220, %cst_452 [1] : vector<16x32xf32> to vector<16xf32>
    %1222 = vector.shape_cast %1221 : vector<16xf32> to vector<16x1xf32>
    %cst_453 = arith.constant 3.200000e+01 : f32
    %1223 = vector.broadcast %cst_453 : f32 to vector<16x1xf32>
    %1224 = arith.divf %1222, %1223 : vector<16x1xf32>
    %1225 = vector.broadcast %1217 : vector<16x1xf32> to vector<16x32xf32>
    %1226 = arith.subf %1211, %1225 : vector<16x32xf32>
    %cst_454 = arith.constant 9.99999974E-6 : f32
    %1227 = vector.broadcast %cst_454 : f32 to vector<16x1xf32>
    %1228 = arith.addf %1224, %1227 : vector<16x1xf32>
    %1229 = math.rsqrt %1228 : vector<16x1xf32>
    %1230 = vector.broadcast %1229 : vector<16x1xf32> to vector<16x32xf32>
    %1231 = arith.mulf %1226, %1230 : vector<16x32xf32>
    %1232 = vector.broadcast %1212 : vector<1x32xf32> to vector<16x32xf32>
    %1233 = arith.mulf %1231, %1232 : vector<16x32xf32>
    %1234 = vector.broadcast %1213 : vector<1x32xf32> to vector<16x32xf32>
    %1235 = arith.addf %1233, %1234 : vector<16x32xf32>
    %c4_455 = arith.constant 4 : index
    %c0_456 = arith.constant 0 : index
    %c0_457 = arith.constant 0 : index
    %1236 = vector.load %arg7[%c4_455, %c0_456, %c0_457] : memref<5x32x32xf32, #tpu.memory_space<vmem>>, vector<1x32x32xf32>
    %1237 = vector.shape_cast %1236 : vector<1x32x32xf32> to vector<32x32xf32>
    %cst_458 = arith.constant dense<0.000000e+00> : vector<16x32xf32>
    %1238 = tpu.matmul %1235, %1237, %cst_458 {dimension_numbers = #tpu.dot_dimension_numbers<[1], [0], [0], [1], [0, 0, 1, 1], [], []>} : vector<16x32xf32>, vector<32x32xf32>, vector<16x32xf32> -> vector<16x32xf32>
    %c4_459 = arith.constant 4 : index
    %c0_460 = arith.constant 0 : index
    %c0_461 = arith.constant 0 : index
    %1239 = vector.load %arg8[%c4_459, %c0_460, %c0_461] : memref<5x1x32xf32, #tpu.memory_space<vmem>>, vector<1x1x32xf32>
    %1240 = vector.shape_cast %1239 : vector<1x1x32xf32> to vector<1x32xf32>
    %1241 = vector.broadcast %1240 : vector<1x32xf32> to vector<16x32xf32>
    %1242 = arith.addf %1238, %1241 : vector<16x32xf32>
    %c4_462 = arith.constant 4 : index
    %c0_463 = arith.constant 0 : index
    %c0_464 = arith.constant 0 : index
    %1243 = vector.load %arg9[%c4_462, %c0_463, %c0_464] : memref<5x32x64xf32, #tpu.memory_space<vmem>>, vector<1x32x64xf32>
    %1244 = vector.shape_cast %1243 : vector<1x32x64xf32> to vector<32x64xf32>
    %cst_465 = arith.constant dense<0.000000e+00> : vector<16x64xf32>
    %1245 = tpu.matmul %1, %1244, %cst_465 {dimension_numbers = #tpu.dot_dimension_numbers<[1], [0], [0], [1], [0, 0, 1, 1], [], []>} : vector<16x32xf32>, vector<32x64xf32>, vector<16x64xf32> -> vector<16x64xf32>
    %c4_466 = arith.constant 4 : index
    %c0_467 = arith.constant 0 : index
    %c0_468 = arith.constant 0 : index
    %1246 = vector.load %arg10[%c4_466, %c0_467, %c0_468] : memref<5x1x64xf32, #tpu.memory_space<vmem>>, vector<1x1x64xf32>
    %1247 = vector.shape_cast %1246 : vector<1x1x64xf32> to vector<1x64xf32>
    %1248 = vector.broadcast %1247 : vector<1x64xf32> to vector<16x64xf32>
    %1249 = arith.addf %1245, %1248 : vector<16x64xf32>
    %1250 = vector.extract_strided_slice %1249 {offsets = [0, 0], sizes = [16, 32], strides = [1, 1]} : vector<16x64xf32> to vector<16x32xf32>
    %1251 = vector.extract_strided_slice %1249 {offsets = [0, 32], sizes = [16, 32], strides = [1, 1]} : vector<16x64xf32> to vector<16x32xf32>
    %1252 = vector.shape_cast %1242 : vector<16x32xf32> to vector<2x8x32xf32>
    %1253 = vector.shape_cast %1250 : vector<16x32xf32> to vector<2x8x32xf32>
    %1254 = vector.shape_cast %1251 : vector<16x32xf32> to vector<2x8x32xf32>
    %1255 = vector.extract_strided_slice %1252 {offsets = [0, 0, 0], sizes = [2, 8, 8], strides = [1, 1, 1]} : vector<2x8x32xf32> to vector<2x8x8xf32>
    %1256 = vector.extract_strided_slice %1253 {offsets = [0, 0, 0], sizes = [2, 8, 8], strides = [1, 1, 1]} : vector<2x8x32xf32> to vector<2x8x8xf32>
    %1257 = vector.extract_strided_slice %1254 {offsets = [0, 0, 0], sizes = [2, 8, 8], strides = [1, 1, 1]} : vector<2x8x32xf32> to vector<2x8x8xf32>
    "tpu.trace_start"() <{level = 10 : i32, message = "bqd,bkd->bqk"}> : () -> ()
    %cst_469 = arith.constant dense<0.000000e+00> : vector<2x8x8xf32>
    %1258 = tpu.matmul %1255, %1256, %cst_469 {dimension_numbers = #tpu.dot_dimension_numbers<[2], [2], [1], [1], [0, 0, 0, 1, 1, 1], [0], [0]>} : vector<2x8x8xf32>, vector<2x8x8xf32>, vector<2x8x8xf32> -> vector<2x8x8xf32>
    "tpu.trace_stop"() : () -> ()
    %cst_470 = arith.constant dense<0xFF800000> : vector<2x8xf32>
    %1259 = vector.multi_reduction <maximumf>, %1258, %cst_470 [2] : vector<2x8x8xf32> to vector<2x8xf32>
    %1260 = vector.shape_cast %1259 : vector<2x8xf32> to vector<2x8x1xf32>
    %1261 = vector.broadcast %1260 : vector<2x8x1xf32> to vector<2x8x8xf32>
    %1262 = arith.subf %1258, %1261 : vector<2x8x8xf32>
    %1263 = math.exp %1262 : vector<2x8x8xf32>
    %cst_471 = arith.constant dense<0.000000e+00> : vector<2x8xf32>
    %1264 = vector.multi_reduction <add>, %1263, %cst_471 [2] : vector<2x8x8xf32> to vector<2x8xf32>
    %1265 = vector.shape_cast %1264 : vector<2x8xf32> to vector<2x8x1xf32>
    %1266 = tpu.reciprocal %1265 {approx = true} : vector<2x8x1xf32> -> vector<2x8x1xf32>
    %1267 = vector.broadcast %1266 : vector<2x8x1xf32> to vector<2x8x8xf32>
    %1268 = arith.mulf %1263, %1267 : vector<2x8x8xf32>
    "tpu.trace_start"() <{level = 10 : i32, message = "bqk,bkd->bqd"}> : () -> ()
    %cst_472 = arith.constant dense<0.000000e+00> : vector<2x8x8xf32>
    %1269 = tpu.matmul %1268, %1257, %cst_472 {dimension_numbers = #tpu.dot_dimension_numbers<[2], [1], [1], [2], [0, 0, 0, 1, 1, 2], [0], [0]>} : vector<2x8x8xf32>, vector<2x8x8xf32>, vector<2x8x8xf32> -> vector<2x8x8xf32>
    "tpu.trace_stop"() : () -> ()
    %1270 = vector.extract_strided_slice %1252 {offsets = [0, 0, 8], sizes = [2, 8, 8], strides = [1, 1, 1]} : vector<2x8x32xf32> to vector<2x8x8xf32>
    %1271 = vector.extract_strided_slice %1253 {offsets = [0, 0, 8], sizes = [2, 8, 8], strides = [1, 1, 1]} : vector<2x8x32xf32> to vector<2x8x8xf32>
    %1272 = vector.extract_strided_slice %1254 {offsets = [0, 0, 8], sizes = [2, 8, 8], strides = [1, 1, 1]} : vector<2x8x32xf32> to vector<2x8x8xf32>
    "tpu.trace_start"() <{level = 10 : i32, message = "bqd,bkd->bqk"}> : () -> ()
    %cst_473 = arith.constant dense<0.000000e+00> : vector<2x8x8xf32>
    %1273 = tpu.matmul %1270, %1271, %cst_473 {dimension_numbers = #tpu.dot_dimension_numbers<[2], [2], [1], [1], [0, 0, 0, 1, 1, 1], [0], [0]>} : vector<2x8x8xf32>, vector<2x8x8xf32>, vector<2x8x8xf32> -> vector<2x8x8xf32>
    "tpu.trace_stop"() : () -> ()
    %cst_474 = arith.constant dense<0xFF800000> : vector<2x8xf32>
    %1274 = vector.multi_reduction <maximumf>, %1273, %cst_474 [2] : vector<2x8x8xf32> to vector<2x8xf32>
    %1275 = vector.shape_cast %1274 : vector<2x8xf32> to vector<2x8x1xf32>
    %1276 = vector.broadcast %1275 : vector<2x8x1xf32> to vector<2x8x8xf32>
    %1277 = arith.subf %1273, %1276 : vector<2x8x8xf32>
    %1278 = math.exp %1277 : vector<2x8x8xf32>
    %cst_475 = arith.constant dense<0.000000e+00> : vector<2x8xf32>
    %1279 = vector.multi_reduction <add>, %1278, %cst_475 [2] : vector<2x8x8xf32> to vector<2x8xf32>
    %1280 = vector.shape_cast %1279 : vector<2x8xf32> to vector<2x8x1xf32>
    %1281 = tpu.reciprocal %1280 {approx = true} : vector<2x8x1xf32> -> vector<2x8x1xf32>
    %1282 = vector.broadcast %1281 : vector<2x8x1xf32> to vector<2x8x8xf32>
    %1283 = arith.mulf %1278, %1282 : vector<2x8x8xf32>
    "tpu.trace_start"() <{level = 10 : i32, message = "bqk,bkd->bqd"}> : () -> ()
    %cst_476 = arith.constant dense<0.000000e+00> : vector<2x8x8xf32>
    %1284 = tpu.matmul %1283, %1272, %cst_476 {dimension_numbers = #tpu.dot_dimension_numbers<[2], [1], [1], [2], [0, 0, 0, 1, 1, 2], [0], [0]>} : vector<2x8x8xf32>, vector<2x8x8xf32>, vector<2x8x8xf32> -> vector<2x8x8xf32>
    "tpu.trace_stop"() : () -> ()
    %1285 = vector.extract_strided_slice %1252 {offsets = [0, 0, 16], sizes = [2, 8, 8], strides = [1, 1, 1]} : vector<2x8x32xf32> to vector<2x8x8xf32>
    %1286 = vector.extract_strided_slice %1253 {offsets = [0, 0, 16], sizes = [2, 8, 8], strides = [1, 1, 1]} : vector<2x8x32xf32> to vector<2x8x8xf32>
    %1287 = vector.extract_strided_slice %1254 {offsets = [0, 0, 16], sizes = [2, 8, 8], strides = [1, 1, 1]} : vector<2x8x32xf32> to vector<2x8x8xf32>
    "tpu.trace_start"() <{level = 10 : i32, message = "bqd,bkd->bqk"}> : () -> ()
    %cst_477 = arith.constant dense<0.000000e+00> : vector<2x8x8xf32>
    %1288 = tpu.matmul %1285, %1286, %cst_477 {dimension_numbers = #tpu.dot_dimension_numbers<[2], [2], [1], [1], [0, 0, 0, 1, 1, 1], [0], [0]>} : vector<2x8x8xf32>, vector<2x8x8xf32>, vector<2x8x8xf32> -> vector<2x8x8xf32>
    "tpu.trace_stop"() : () -> ()
    %cst_478 = arith.constant dense<0xFF800000> : vector<2x8xf32>
    %1289 = vector.multi_reduction <maximumf>, %1288, %cst_478 [2] : vector<2x8x8xf32> to vector<2x8xf32>
    %1290 = vector.shape_cast %1289 : vector<2x8xf32> to vector<2x8x1xf32>
    %1291 = vector.broadcast %1290 : vector<2x8x1xf32> to vector<2x8x8xf32>
    %1292 = arith.subf %1288, %1291 : vector<2x8x8xf32>
    %1293 = math.exp %1292 : vector<2x8x8xf32>
    %cst_479 = arith.constant dense<0.000000e+00> : vector<2x8xf32>
    %1294 = vector.multi_reduction <add>, %1293, %cst_479 [2] : vector<2x8x8xf32> to vector<2x8xf32>
    %1295 = vector.shape_cast %1294 : vector<2x8xf32> to vector<2x8x1xf32>
    %1296 = tpu.reciprocal %1295 {approx = true} : vector<2x8x1xf32> -> vector<2x8x1xf32>
    %1297 = vector.broadcast %1296 : vector<2x8x1xf32> to vector<2x8x8xf32>
    %1298 = arith.mulf %1293, %1297 : vector<2x8x8xf32>
    "tpu.trace_start"() <{level = 10 : i32, message = "bqk,bkd->bqd"}> : () -> ()
    %cst_480 = arith.constant dense<0.000000e+00> : vector<2x8x8xf32>
    %1299 = tpu.matmul %1298, %1287, %cst_480 {dimension_numbers = #tpu.dot_dimension_numbers<[2], [1], [1], [2], [0, 0, 0, 1, 1, 2], [0], [0]>} : vector<2x8x8xf32>, vector<2x8x8xf32>, vector<2x8x8xf32> -> vector<2x8x8xf32>
    "tpu.trace_stop"() : () -> ()
    %1300 = vector.extract_strided_slice %1252 {offsets = [0, 0, 24], sizes = [2, 8, 8], strides = [1, 1, 1]} : vector<2x8x32xf32> to vector<2x8x8xf32>
    %1301 = vector.extract_strided_slice %1253 {offsets = [0, 0, 24], sizes = [2, 8, 8], strides = [1, 1, 1]} : vector<2x8x32xf32> to vector<2x8x8xf32>
    %1302 = vector.extract_strided_slice %1254 {offsets = [0, 0, 24], sizes = [2, 8, 8], strides = [1, 1, 1]} : vector<2x8x32xf32> to vector<2x8x8xf32>
    "tpu.trace_start"() <{level = 10 : i32, message = "bqd,bkd->bqk"}> : () -> ()
    %cst_481 = arith.constant dense<0.000000e+00> : vector<2x8x8xf32>
    %1303 = tpu.matmul %1300, %1301, %cst_481 {dimension_numbers = #tpu.dot_dimension_numbers<[2], [2], [1], [1], [0, 0, 0, 1, 1, 1], [0], [0]>} : vector<2x8x8xf32>, vector<2x8x8xf32>, vector<2x8x8xf32> -> vector<2x8x8xf32>
    "tpu.trace_stop"() : () -> ()
    %cst_482 = arith.constant dense<0xFF800000> : vector<2x8xf32>
    %1304 = vector.multi_reduction <maximumf>, %1303, %cst_482 [2] : vector<2x8x8xf32> to vector<2x8xf32>
    %1305 = vector.shape_cast %1304 : vector<2x8xf32> to vector<2x8x1xf32>
    %1306 = vector.broadcast %1305 : vector<2x8x1xf32> to vector<2x8x8xf32>
    %1307 = arith.subf %1303, %1306 : vector<2x8x8xf32>
    %1308 = math.exp %1307 : vector<2x8x8xf32>
    %cst_483 = arith.constant dense<0.000000e+00> : vector<2x8xf32>
    %1309 = vector.multi_reduction <add>, %1308, %cst_483 [2] : vector<2x8x8xf32> to vector<2x8xf32>
    %1310 = vector.shape_cast %1309 : vector<2x8xf32> to vector<2x8x1xf32>
    %1311 = tpu.reciprocal %1310 {approx = true} : vector<2x8x1xf32> -> vector<2x8x1xf32>
    %1312 = vector.broadcast %1311 : vector<2x8x1xf32> to vector<2x8x8xf32>
    %1313 = arith.mulf %1308, %1312 : vector<2x8x8xf32>
    "tpu.trace_start"() <{level = 10 : i32, message = "bqk,bkd->bqd"}> : () -> ()
    %cst_484 = arith.constant dense<0.000000e+00> : vector<2x8x8xf32>
    %1314 = tpu.matmul %1313, %1302, %cst_484 {dimension_numbers = #tpu.dot_dimension_numbers<[2], [1], [1], [2], [0, 0, 0, 1, 1, 2], [0], [0]>} : vector<2x8x8xf32>, vector<2x8x8xf32>, vector<2x8x8xf32> -> vector<2x8x8xf32>
    "tpu.trace_stop"() : () -> ()
    %1315 = tpu.concatenate %1269, %1284, %1299, %1314 in 2 : vector<2x8x8xf32>, vector<2x8x8xf32>, vector<2x8x8xf32>, vector<2x8x8xf32> -> vector<2x8x32xf32>
    %1316 = vector.shape_cast %1315 : vector<2x8x32xf32> to vector<16x32xf32>
    %c4_485 = arith.constant 4 : index
    %c0_486 = arith.constant 0 : index
    %c0_487 = arith.constant 0 : index
    %1317 = vector.load %arg11[%c4_485, %c0_486, %c0_487] : memref<5x32x32xf32, #tpu.memory_space<vmem>>, vector<1x32x32xf32>
    %1318 = vector.shape_cast %1317 : vector<1x32x32xf32> to vector<32x32xf32>
    %cst_488 = arith.constant dense<0.000000e+00> : vector<16x32xf32>
    %1319 = tpu.matmul %1316, %1318, %cst_488 {dimension_numbers = #tpu.dot_dimension_numbers<[1], [0], [0], [1], [0, 0, 1, 1], [], []>} : vector<16x32xf32>, vector<32x32xf32>, vector<16x32xf32> -> vector<16x32xf32>
    %c4_489 = arith.constant 4 : index
    %c0_490 = arith.constant 0 : index
    %c0_491 = arith.constant 0 : index
    %1320 = vector.load %arg12[%c4_489, %c0_490, %c0_491] : memref<5x1x32xf32, #tpu.memory_space<vmem>>, vector<1x1x32xf32>
    %1321 = vector.shape_cast %1320 : vector<1x1x32xf32> to vector<1x32xf32>
    %1322 = vector.broadcast %1321 : vector<1x32xf32> to vector<16x32xf32>
    %1323 = arith.addf %1319, %1322 : vector<16x32xf32>
    %1324 = arith.addf %1235, %1323 : vector<16x32xf32>
    %1325 = vector.extract_strided_slice %1114 {offsets = [1, 0], sizes = [1, 32], strides = [1, 1]} : vector<3x32xf32> to vector<1x32xf32>
    %1326 = vector.extract_strided_slice %1116 {offsets = [1, 0], sizes = [1, 32], strides = [1, 1]} : vector<3x32xf32> to vector<1x32xf32>
    %cst_492 = arith.constant dense<0.000000e+00> : vector<16xf32>
    %1327 = vector.multi_reduction <add>, %1324, %cst_492 [1] : vector<16x32xf32> to vector<16xf32>
    %1328 = vector.shape_cast %1327 : vector<16xf32> to vector<16x1xf32>
    %cst_493 = arith.constant 3.200000e+01 : f32
    %1329 = vector.broadcast %cst_493 : f32 to vector<16x1xf32>
    %1330 = arith.divf %1328, %1329 : vector<16x1xf32>
    %1331 = vector.broadcast %1330 : vector<16x1xf32> to vector<16x32xf32>
    %1332 = arith.subf %1324, %1331 : vector<16x32xf32>
    %1333 = arith.mulf %1332, %1332 : vector<16x32xf32>
    %cst_494 = arith.constant dense<0.000000e+00> : vector<16xf32>
    %1334 = vector.multi_reduction <add>, %1333, %cst_494 [1] : vector<16x32xf32> to vector<16xf32>
    %1335 = vector.shape_cast %1334 : vector<16xf32> to vector<16x1xf32>
    %cst_495 = arith.constant 3.200000e+01 : f32
    %1336 = vector.broadcast %cst_495 : f32 to vector<16x1xf32>
    %1337 = arith.divf %1335, %1336 : vector<16x1xf32>
    %1338 = vector.broadcast %1330 : vector<16x1xf32> to vector<16x32xf32>
    %1339 = arith.subf %1324, %1338 : vector<16x32xf32>
    %cst_496 = arith.constant 9.99999974E-6 : f32
    %1340 = vector.broadcast %cst_496 : f32 to vector<16x1xf32>
    %1341 = arith.addf %1337, %1340 : vector<16x1xf32>
    %1342 = math.rsqrt %1341 : vector<16x1xf32>
    %1343 = vector.broadcast %1342 : vector<16x1xf32> to vector<16x32xf32>
    %1344 = arith.mulf %1339, %1343 : vector<16x32xf32>
    %1345 = vector.broadcast %1325 : vector<1x32xf32> to vector<16x32xf32>
    %1346 = arith.mulf %1344, %1345 : vector<16x32xf32>
    %1347 = vector.broadcast %1326 : vector<1x32xf32> to vector<16x32xf32>
    %1348 = arith.addf %1346, %1347 : vector<16x32xf32>
    %c4_497 = arith.constant 4 : index
    %c0_498 = arith.constant 0 : index
    %c0_499 = arith.constant 0 : index
    %1349 = vector.load %arg15[%c4_497, %c0_498, %c0_499] : memref<5x32x128xf32, #tpu.memory_space<vmem>>, vector<1x32x128xf32>
    %1350 = vector.shape_cast %1349 : vector<1x32x128xf32> to vector<32x128xf32>
    %cst_500 = arith.constant dense<0.000000e+00> : vector<16x128xf32>
    %1351 = tpu.matmul %1348, %1350, %cst_500 {dimension_numbers = #tpu.dot_dimension_numbers<[1], [0], [0], [1], [0, 0, 1, 1], [], []>} : vector<16x32xf32>, vector<32x128xf32>, vector<16x128xf32> -> vector<16x128xf32>
    %c4_501 = arith.constant 4 : index
    %c0_502 = arith.constant 0 : index
    %c0_503 = arith.constant 0 : index
    %1352 = vector.load %arg16[%c4_501, %c0_502, %c0_503] : memref<5x1x128xf32, #tpu.memory_space<vmem>>, vector<1x1x128xf32>
    %1353 = vector.shape_cast %1352 : vector<1x1x128xf32> to vector<1x128xf32>
    %1354 = vector.broadcast %1353 : vector<1x128xf32> to vector<16x128xf32>
    %1355 = arith.addf %1351, %1354 : vector<16x128xf32>
    %cst_504 = arith.constant 0.000000e+00 : f32
    %1356 = vector.broadcast %cst_504 : f32 to vector<16x128xf32>
    %1357 = arith.maximumf %1355, %1356 : vector<16x128xf32>
    %c4_505 = arith.constant 4 : index
    %c0_506 = arith.constant 0 : index
    %c0_507 = arith.constant 0 : index
    %1358 = vector.load %arg17[%c4_505, %c0_506, %c0_507] : memref<5x128x32xf32, #tpu.memory_space<vmem>>, vector<1x128x32xf32>
    %1359 = vector.shape_cast %1358 : vector<1x128x32xf32> to vector<128x32xf32>
    %cst_508 = arith.constant dense<0.000000e+00> : vector<16x32xf32>
    %1360 = tpu.matmul %1357, %1359, %cst_508 {dimension_numbers = #tpu.dot_dimension_numbers<[1], [0], [0], [1], [0, 0, 1, 1], [], []>} : vector<16x128xf32>, vector<128x32xf32>, vector<16x32xf32> -> vector<16x32xf32>
    %c4_509 = arith.constant 4 : index
    %c0_510 = arith.constant 0 : index
    %c0_511 = arith.constant 0 : index
    %1361 = vector.load %arg18[%c4_509, %c0_510, %c0_511] : memref<5x1x32xf32, #tpu.memory_space<vmem>>, vector<1x1x32xf32>
    %1362 = vector.shape_cast %1361 : vector<1x1x32xf32> to vector<1x32xf32>
    %1363 = vector.broadcast %1362 : vector<1x32xf32> to vector<16x32xf32>
    %1364 = arith.addf %1360, %1363 : vector<16x32xf32>
    %1365 = arith.addf %1348, %1364 : vector<16x32xf32>
    %1366 = vector.extract_strided_slice %1114 {offsets = [2, 0], sizes = [1, 32], strides = [1, 1]} : vector<3x32xf32> to vector<1x32xf32>
    %1367 = vector.extract_strided_slice %1116 {offsets = [2, 0], sizes = [1, 32], strides = [1, 1]} : vector<3x32xf32> to vector<1x32xf32>
    %cst_512 = arith.constant dense<0.000000e+00> : vector<16xf32>
    %1368 = vector.multi_reduction <add>, %1365, %cst_512 [1] : vector<16x32xf32> to vector<16xf32>
    %1369 = vector.shape_cast %1368 : vector<16xf32> to vector<16x1xf32>
    %cst_513 = arith.constant 3.200000e+01 : f32
    %1370 = vector.broadcast %cst_513 : f32 to vector<16x1xf32>
    %1371 = arith.divf %1369, %1370 : vector<16x1xf32>
    %1372 = vector.broadcast %1371 : vector<16x1xf32> to vector<16x32xf32>
    %1373 = arith.subf %1365, %1372 : vector<16x32xf32>
    %1374 = arith.mulf %1373, %1373 : vector<16x32xf32>
    %cst_514 = arith.constant dense<0.000000e+00> : vector<16xf32>
    %1375 = vector.multi_reduction <add>, %1374, %cst_514 [1] : vector<16x32xf32> to vector<16xf32>
    %1376 = vector.shape_cast %1375 : vector<16xf32> to vector<16x1xf32>
    %cst_515 = arith.constant 3.200000e+01 : f32
    %1377 = vector.broadcast %cst_515 : f32 to vector<16x1xf32>
    %1378 = arith.divf %1376, %1377 : vector<16x1xf32>
    %1379 = vector.broadcast %1371 : vector<16x1xf32> to vector<16x32xf32>
    %1380 = arith.subf %1365, %1379 : vector<16x32xf32>
    %cst_516 = arith.constant 9.99999974E-6 : f32
    %1381 = vector.broadcast %cst_516 : f32 to vector<16x1xf32>
    %1382 = arith.addf %1378, %1381 : vector<16x1xf32>
    %1383 = math.rsqrt %1382 : vector<16x1xf32>
    %1384 = vector.broadcast %1383 : vector<16x1xf32> to vector<16x32xf32>
    %1385 = arith.mulf %1380, %1384 : vector<16x32xf32>
    %1386 = vector.broadcast %1366 : vector<1x32xf32> to vector<16x32xf32>
    %1387 = arith.mulf %1385, %1386 : vector<16x32xf32>
    %1388 = vector.broadcast %1367 : vector<1x32xf32> to vector<16x32xf32>
    %1389 = arith.addf %1387, %1388 : vector<16x32xf32>
    %1390 = vector.shape_cast %1389 : vector<16x32xf32> to vector<2x8x32xf32>
    %c0_517 = arith.constant 0 : index
    %c0_518 = arith.constant 0 : index
    %c0_519 = arith.constant 0 : index
    %1391 = vector.load %arg19[%c0_517, %c0_518, %c0_519] : memref<2x8x32xf32, #tpu.memory_space<vmem>>, vector<2x8x32xf32>
    tpu.vector_store %arg19[%c0_517, %c0_518, %c0_519], %1390 {strides = array<i32>} : memref<2x8x32xf32, #tpu.memory_space<vmem>>, vector<2x8x32xf32>,
    return
  }
}

</mosaic_0001>

<bundles_post_ra>
// kernel: tpu_custom_call.1
= control target key start
LH: loop header
LB: loop body
LE: loop exit
PB: predicated region body
PF: predicated region fallthrough
CT: control target
= control target key end

     0   :  { %s23913_s0 = inlined_call_operand.hbm [shape: f32[2,8,32], index: 0, kind: input, shape index: {}]   ;;  %s23914_s1 = inlined_call_operand.hbm [shape: f32[2,8,32], index: 1, kind: input, shape index: {}]   ;;  %s23915_s2 = inlined_call_operand.hbm [shape: f32[8,8], index: 2, kind: input, shape index: {}]   ;;  %s23916_s3 = inlined_call_operand.vmem [shape: f32[5,32,96], index: 3, kind: input, shape index: {}]   ;;  %s23917_s4 = inlined_call_operand.hbm [shape: f32[5,1,96], index: 4, kind: input, shape index: {}]   ;;  %s23918_s5 = inlined_call_operand.vmem [shape: f32[5,32,32], index: 5, kind: input, shape index: {}]   ;;  %s23919_s6 = inlined_call_operand.hbm [shape: f32[5,1,32], index: 6, kind: input, shape index: {}]   ;;  %s23920_s7 = inlined_call_operand.vmem [shape: f32[5,32,32], index: 7, kind: input, shape index: {}]   ;;  %s23921_s8 = inlined_call_operand.hbm [shape: f32[5,1,32], index: 8, kind: input, shape index: {}]   ;;  %s23922_s9 = inlined_call_operand.vmem [shape: f32[5,32,64], index: 9, kind: input, shape index: {}]   ;;  %s23923_s10 = inlined_call_operand.vmem [shape: f32[5,1,64], index: 10, kind: input, shape index: {}]   ;;  %s23924_s11 = inlined_call_operand.vmem [shape: f32[5,32,32], index: 11, kind: input, shape index: {}]   ;;  %s23925_s12 = inlined_call_operand.hbm [shape: f32[5,1,32], index: 12, kind: input, shape index: {}]   ;;  %s23926_s13 = inlined_call_operand.vmem [shape: f32[5,3,32], index: 13, kind: input, shape index: {}]   ;;  %s23927_s14 = inlined_call_operand.vmem [shape: f32[5,3,32], index: 14, kind: input, shape index: {}]   ;;  %s23928_s15 = inlined_call_operand.hbm [shape: f32[5,32,128], index: 15, kind: input, shape index: {}]   ;;  %s23929_s16 = inlined_call_operand.vmem [shape: f32[5,1,128], index: 16, kind: input, shape index: {}]   ;;  %s23930_s17 = inlined_call_operand.vmem [shape: f32[5,128,32], index: 17, kind: input, shape index: {}]   ;;  %s23931_s18 = inlined_call_operand.vmem [shape: f32[5,1,32], index: 18, kind: input, shape index: {}]   ;;  %s23932_s19 = inlined_call_operand.hbm [shape: f32[2,8,32], index: 19, kind: output, shape index: {}]  }
   0x1   :  { %23982 = sst [smem:[#allocation23_spill]] %s23913_s0 }
   0x2   :  { %23983 = sst [smem:[#allocation24_spill]] %s23914_s1 }
   0x3   :  { %23984 = sst [smem:[#allocation25_spill]] %s23915_s2 }
   0x4   :  { %23985 = sst [smem:[#allocation26_spill]] %s23916_s3 }
   0x5   :  { %23986 = sst [smem:[#allocation27_spill]] %s23918_s5 }
   0x6   :  { %23987 = sst [smem:[#allocation28_spill]] %s23923_s10 }
   0x7   :  { %23988 = sst [smem:[#allocation29_spill]] %s23924_s11 }
   0x8   :  { %23989 = sst [smem:[#allocation30_spill]] %s23927_s14 }
   0x9   :  { %23990 = sst [smem:[#allocation31_spill]] %s23932_s19 }
   0xa   :  { %24 = vsyncpa [#allocation3], 0 }
   0xb   :  { %25 = vsyncpa [#allocation6], 0 }
   0xc   :  { %26 = vsyncpa [#allocation9], 0 }
   0xd   :  { %27 = vsyncpa [#allocation12], 0 }
   0xe   :  { %28 = vsyncpa [#allocation15], 0 }
   0xf   :  { %29 = vsyncpa [#allocation4], 0  ;;  %s21006_s0 = smov [#allocation5]   ;;  %s21007_s20 = smov [#allocation8]  }
  0x10   :  { %s47_s30 = sshll.u32 %s21006_s0, 4  ;;  %s71_s21 = sshll.u32 %s21007_s20, 4  ;;  %s48_s30 = int_to_ptr.vmem [resolvable:$true] %s47_s30  ;;  %s21133_s21 = int_to_ptr.vmem [resolvable:$true] %s71_s21 }
  0x11   :  { %s23991_s2 = sld [smem:[#allocation24_spill]] }
  0x17   :  { %s20796_s23 = scalar_lea.hbm %s23991_s2, 256 }
  0x18   :  { %p20797_p0 = scmp.ne.s32.totalorder %s23991_s2, %s20796_s23  ;;  %p20800_p1 = scmp.lt.u32.totalorder %s20796_s23, %s23991_s2 }
  0x1a   :  { %p20802_p2 = pnand %p20800_p1, %p20797_p0 }
  0x1c   :  { %20805 = shalt.err (!%p20802_p2)
}
  0x1d   :  { %s20806_s27 = scalar_lea.vmem %s48_s30, 256  ;;  %p20811_p4 = scmp.lt.s32.totalorder %s48_s30, %s48_s30 }
  0x1e   :  { %p20807_p3 = scmp.ne.s32.totalorder %s48_s30, %s20806_s27  ;;  %p20812_p5 = scmp.lt.s32.totalorder %s20806_s27, %s20806_s27 }
  0x20   :  { %p20813_p6 = por %p20812_p5, %p20811_p4 }
  0x22   :  { %p20814_p7 = pnand %p20813_p6, %p20807_p3 }
  0x24   :  { %20817 = shalt.err (!%p20814_p7)
}
  0x25   :  { %s23937_s28 = smov 128   ;;  %s23939_s29 = smov 8  }
  0x26   :  { %53 = dma.hbm_to_vmem [thread:$0]  %s23991_s2, 256, %s48_s30, [#allocation6], %s23937_s28, %s23937_s28, %s23939_s29  }
  0x27   :  { %s20818_s23 = scalar_lea.hbm %s23917_s4, 80 }
  0x28   :  { %p20819_p8 = scmp.ne.s32.totalorder %s23917_s4, %s20818_s23  ;;  %p20822_p9 = scmp.lt.u32.totalorder %s20818_s23, %s23917_s4 }
  0x2a   :  { %p20824_p10 = pnand %p20822_p9, %p20819_p8 }
  0x2c   :  { %20827 = shalt.err (!%p20824_p10)
}
  0x2d   :  { %s20828_s27 = scalar_lea.vmem %s21133_s21, 80  ;;  %s20832_s30 = scalar_lea.vmem %s21133_s21, 96 }
  0x2e   :  { %p20829_p11 = scmp.ne.s32.totalorder %s21133_s21, %s20828_s27  ;;  %p20833_p12 = scmp.lt.s32.totalorder %s21133_s21, %s21133_s21 }
  0x2f   :  { %p20834_p13 = scmp.lt.s32.totalorder %s20832_s30, %s20828_s27 }
  0x31   :  { %p20835_p0 = por %p20834_p13, %p20833_p12 }
  0x33   :  { %p20836_p1 = pnand %p20835_p0, %p20829_p11 }
  0x35   :  { %20839 = shalt.err (!%p20836_p1)
}
  0x36   :  { %s23942_s2 = smov 16   ;;  %s23944_s0 = smov 1  }
  0x37   :  { %77 = dma.hbm_to_vmem [thread:$0]  %s23917_s4, 80, %s21133_s21, [#allocation9], %s23942_s2, %s23942_s2, %s23944_s0  }
  0x38   :  { %s21012_s22 = smov [#allocation11]   ;;  %s21013_s24 = smov [#allocation2]  }
  0x39   :  { %s99_s23 = sshll.u32 %s21012_s22, 4  ;;  %s35_s25 = sshll.u32 %s21013_s24, 4  ;;  %s100_s23 = int_to_ptr.vmem [resolvable:$true] %s99_s23  ;;  %s21171_s25 = int_to_ptr.vmem [resolvable:$true] %s35_s25 }
  0x3a   :  { %s20840_s27 = scalar_lea.hbm %s23921_s8, 80 }
  0x3b   :  { %p20841_p2 = scmp.ne.s32.totalorder %s23921_s8, %s20840_s27  ;;  %p20844_p3 = scmp.lt.u32.totalorder %s20840_s27, %s23921_s8 }
  0x3d   :  { %p20846_p4 = pnand %p20844_p3, %p20841_p2 }
  0x3f   :  { %20849 = shalt.err (!%p20846_p4)
}
  0x40   :  { %s20850_s4 = scalar_lea.vmem %s100_s23, 80  ;;  %s20854_s21 = scalar_lea.vmem %s100_s23, 96 }
  0x41   :  { %p20851_p5 = scmp.ne.s32.totalorder %s100_s23, %s20850_s4  ;;  %p20855_p6 = scmp.lt.s32.totalorder %s100_s23, %s100_s23 }
  0x42   :  { %p20856_p7 = scmp.lt.s32.totalorder %s20854_s21, %s20850_s4 }
  0x44   :  { %p20857_p8 = por %p20856_p7, %p20855_p6 }
  0x46   :  { %p20858_p9 = pnand %p20857_p8, %p20851_p5 }
  0x48   :  { %20861 = shalt.err (!%p20858_p9)
}
  0x49   :  { %105 = dma.hbm_to_vmem [thread:$0]  %s23921_s8, 80, %s100_s23, [#allocation12], %s23942_s2, %s23942_s2, %s23944_s0  }
  0x4a   :  { %s23992_s29 = sld [smem:[#allocation23_spill]] }
  0x50   :  { %s20862_s22 = scalar_lea.hbm %s23992_s29, 256 }
  0x51   :  { %p20863_p10 = scmp.ne.s32.totalorder %s23992_s29, %s20862_s22  ;;  %p20866_p11 = scmp.lt.u32.totalorder %s20862_s22, %s23992_s29 }
  0x53   :  { %p20868_p12 = pnand %p20866_p11, %p20863_p10 }
  0x55   :  { %20871 = shalt.err (!%p20868_p12)
}
  0x56   :  { %s20872_s30 = scalar_lea.vmem %s21171_s25, 256  ;;  %p20877_p0 = scmp.lt.s32.totalorder %s21171_s25, %s21171_s25 }
  0x57   :  { %p20873_p13 = scmp.ne.s32.totalorder %s21171_s25, %s20872_s30  ;;  %p20878_p1 = scmp.lt.s32.totalorder %s20872_s30, %s20872_s30 }
  0x59   :  { %p20879_p2 = por %p20878_p1, %p20877_p0 }
  0x5b   :  { %p20880_p3 = pnand %p20879_p2, %p20873_p13 }
  0x5d   :  { %20883 = shalt.err (!%p20880_p3)
}
  0x5e   :  { %s23993_s8 = smov 8   ;;  %s23994_s23 = smov 128  }
  0x5f   :  { %41 = dma.hbm_to_vmem [thread:$0]  %s23992_s29, 256, %s21171_s25, [#allocation3], %s23994_s23, %s23994_s23, %s23993_s8  }
  0x60   :  { %s21014_s20 = smov [#allocation7]   ;;  %s21015_s1 = smov [#allocation10]  }
  0x61   :  { %s60_s28 = sshll.u32 %s21014_s20, 4  ;;  %s85_s19 = sshll.u32 %s21015_s1, 4  ;;  %s61_s28 = int_to_ptr.vmem [resolvable:$true] %s60_s28  ;;  %s21208_s19 = int_to_ptr.vmem [resolvable:$true] %s85_s19 }
  0x62   :  { %s23995_s3 = sld [smem:[#allocation25_spill]] }
  0x68   :  { %s20884_s26 = scalar_lea.hbm %s23995_s3, 128 }
  0x69   :  { %p20885_p4 = scmp.ne.s32.totalorder %s23995_s3, %s20884_s26  ;;  %p20888_p5 = scmp.lt.u32.totalorder %s20884_s26, %s23995_s3 }
  0x6b   :  { %p20890_p6 = pnand %p20888_p5, %p20885_p4 }
  0x6d   :  { %20893 = shalt.err (!%p20890_p6)
}
  0x6e   :  { %s20894_s25 = scalar_lea.vmem %s61_s28, 128  ;;  %p20899_p8 = scmp.lt.s32.totalorder %s61_s28, %s61_s28 }
  0x6f   :  { %p20895_p7 = scmp.ne.s32.totalorder %s61_s28, %s20894_s25  ;;  %p20900_p9 = scmp.lt.s32.totalorder %s20894_s25, %s20894_s25 }
  0x71   :  { %p20901_p10 = por %p20900_p9, %p20899_p8 }
  0x73   :  { %p20902_p11 = pnand %p20901_p10, %p20895_p7 }
  0x75   :  { %20905 = shalt.err (!%p20902_p11)
}
  0x76   :  { %63 = dma.hbm_to_vmem [thread:$0]  %s23995_s3, 128, %s61_s28, [#allocation6]  }
  0x77   :  { %s20906_s1 = scalar_lea.hbm %s23919_s6, 80 }
  0x78   :  { %p20907_p12 = scmp.ne.s32.totalorder %s23919_s6, %s20906_s1  ;;  %p20910_p13 = scmp.lt.u32.totalorder %s20906_s1, %s23919_s6 }
  0x7a   :  { %p20912_p0 = pnand %p20910_p13, %p20907_p12 }
  0x7c   :  { %20915 = shalt.err (!%p20912_p0)
}
  0x7d   :  { %s20916_s26 = scalar_lea.vmem %s21208_s19, 80  ;;  %s20920_s28 = scalar_lea.vmem %s21208_s19, 96 }
  0x7e   :  { %p20917_p1 = scmp.ne.s32.totalorder %s21208_s19, %s20916_s26  ;;  %p20921_p2 = scmp.lt.s32.totalorder %s21208_s19, %s21208_s19 }
  0x7f   :  { %p20922_p3 = scmp.lt.s32.totalorder %s20920_s28, %s20916_s26 }
  0x81   :  { %p20923_p4 = por %p20922_p3, %p20921_p2 }
  0x83   :  { %p20924_p5 = pnand %p20923_p4, %p20917_p1 }
  0x85   :  { %20927 = shalt.err (!%p20924_p5)
}
  0x86   :  { %s23996_s3 = smov 1   ;;  %s23997_s27 = smov 16  }
  0x87   :  { %91 = dma.hbm_to_vmem [thread:$0]  %s23919_s6, 80, %s21208_s19, [#allocation9], %s23997_s27, %s23997_s27, %s23996_s3  }
  0x88   :  { %s21016_s29 = smov [#allocation13]   ;;  %s21017_s21 = smov [#allocation14]  }
  0x89   :  { %s117_s4 = sshll.u32 %s21016_s29, 4  ;;  %s133_s20 = sshll.u32 %s21017_s21, 4  ;;  %s118_s4 = int_to_ptr.vmem [resolvable:$true] %s117_s4  ;;  %s21243_s20 = int_to_ptr.vmem [resolvable:$true] %s133_s20 }
  0x8a   :  { %s20928_s2 = scalar_lea.hbm %s23925_s12, 80 }
  0x8b   :  { %p20929_p6 = scmp.ne.s32.totalorder %s23925_s12, %s20928_s2  ;;  %p20932_p7 = scmp.lt.u32.totalorder %s20928_s2, %s23925_s12 }
  0x8d   :  { %p20934_p8 = pnand %p20932_p7, %p20929_p6 }
  0x8f   :  { %20937 = shalt.err (!%p20934_p8)
}
  0x90   :  { %s20938_s6 = scalar_lea.vmem %s118_s4, 80  ;;  %s20942_s19 = scalar_lea.vmem %s118_s4, 96 }
  0x91   :  { %p20939_p9 = scmp.ne.s32.totalorder %s118_s4, %s20938_s6  ;;  %p20943_p10 = scmp.lt.s32.totalorder %s118_s4, %s118_s4 }
  0x92   :  { %p20944_p11 = scmp.lt.s32.totalorder %s20942_s19, %s20938_s6 }
  0x94   :  { %p20945_p12 = por %p20944_p11, %p20943_p10 }
  0x96   :  { %p20946_p13 = pnand %p20945_p12, %p20939_p9 }
  0x98   :  { %20949 = shalt.err (!%p20946_p13)
}
  0x99   :  { %123 = dma.hbm_to_vmem [thread:$0]  %s23925_s12, 80, %s118_s4, [#allocation12], %s23997_s27, %s23997_s27, %s23996_s3  }
  0x9a   :  { %s20950_s1 = scalar_lea.hbm %s23928_s15, 2560 }
  0x9b   :  { %p20951_p0 = scmp.ne.s32.totalorder %s23928_s15, %s20950_s1  ;;  %p20954_p1 = scmp.lt.u32.totalorder %s20950_s1, %s23928_s15 }
  0x9d   :  { %p20956_p2 = pnand %p20954_p1, %p20951_p0 }
  0x9f   :  { %20959 = shalt.err (!%p20956_p2)
}
  0xa0   :  { %s20960_s26 = scalar_lea.vmem %s21243_s20, 2560  ;;  %p20965_p4 = scmp.lt.s32.totalorder %s21243_s20, %s21243_s20 }
  0xa1   :  { %p20961_p3 = scmp.ne.s32.totalorder %s21243_s20, %s20960_s26  ;;  %p20966_p5 = scmp.lt.s32.totalorder %s20960_s26, %s20960_s26 }
  0xa3   :  { %p20967_p6 = por %p20966_p5, %p20965_p4 }
  0xa5   :  { %p20968_p7 = pnand %p20967_p6, %p20961_p3 }
  0xa7   :  { %20971 = shalt.err (!%p20968_p7)
}
  0xa8   :  { %139 = dma.hbm_to_vmem [thread:$0]  %s23928_s15, 2560, %s21243_s20, [#allocation15], %s23994_s23, %s23994_s23, %s23993_s8  }
  0xa9   :  { %20994 = dma.done.wait [#allocation3], 256  }
  0xaa   :  { %20995 = vsyncadd [#allocation3], 4294967040 }
  0xab   :  { %20996 = dma.done.wait [#allocation6], 384  }
  0xac   :  { %20997 = vsyncadd [#allocation6], 4294966912 }
  0xad   :  { %20998 = dma.done.wait [#allocation9], 160  }
  0xae   :  { %20999 = vsyncadd [#allocation9], 4294967136 }
  0xaf   :  { %21000 = dma.done.wait [#allocation12], 160  }
  0xb0   :  { %21001 = vsyncadd [#allocation12], 4294967136 }
  0xb1   :  { %21002 = dma.done.wait [#allocation15], 2560  }
  0xb2   :  { %21003 = vsyncadd [#allocation15], 4294964736  ;;  %vm188_vm0 = vcmask 261120   ;;  %s23998_s6 = sld [smem:[#allocation26_spill]]  ;;  %v21292_v5 = vld [vmem:[#allocation5] sm:$0xff]  ;;  %v21296_v7 = vld [vmem:[#allocation5 + $0x8] sm:$0xff] }
  0xb3   :  { %18680 = vmatprep.mubr.msk.f32.mxu1 %vm188_vm0, %v21292_v5  ;;  %v21018_v8 = vmov 0.0   ;;  %vm21019_vm1 = vmmov 0   ;;  %v17583_v9 = vld [vmem:[#allocation8] ss:$0 sm:$0xff]  ;;  %s23968_s21 = smov 96   ;;  %vm273_vm2 = vcmask 64512  }
  0xb4   :  { %18693 = vmatprep.subr.mxu0 %v21018_v8  ;;  %18695 = vmatprep.mubr.msk.f32.mxu0 %vm21019_vm1, %v21018_v8  ;;  %v21326_v16 = vld [vmem:[#allocation7] sm:$0xff]  ;;  %s23952_s1 = smov 64   ;;  %s23964_s22 = smov 88   ;;  %vm1618_vm3 = vcmask 195584   ;;  %vm1615_vm4 = vcmask 130048  }
  0xb5   :  { %s23966_s2 = smov 120   ;;  %s23950_s0 = smov 56  }
  0xb6   :  { %s23960_s24 = smov 80   ;;  %s23962_s26 = smov 112  }
  0xb7   :  { %s23948_s12 = smov 48   ;;  %s23958_s3 = smov 72  }
  0xb8   :  { %v177_v0 = vld [vmem:[%s23998_s6] sm:$0xff]  ;;  %v178_v1 = vld [vmem:[%s23998_s6 + $0x8] sm:$0xff]  ;;  %v179_v2 = vld [vmem:[%s23998_s6 + $0x10] sm:$0xff]  ;;  %s23956_s4 = smov 104   ;;  %s23946_s28 = smov 40  }
  0xb9   :  { %v19977_v3 = vpack.c.bf16 %v178_v1, %v177_v0  ;;  %v180_v4 = vld [vmem:[%s23998_s6 + $0x18] sm:$0xff]  ;;  %s23954_s19 = smov 24   ;;  %s24000_s20 = smov 64  }
  0xba   :  { %v19981_v6 = vpack.c.bf16 %v180_v4, %v179_v2  ;;  %s24004_s25 = smov 40   ;;  %s24006_s29 = smov 88  }
  0xbb   :  { %19978 = vmatprep.subr.bf16.mxu1 %v19977_v3  ;;  %s24008_s30 = smov 80   ;;  %s24010_s15 = smov 96  }
  0xbc   :  { %19980 = vmatpush3.bf16.msra.mxu1 %v19977_v3 }
  0xbd   :  { %19982 = vmatprep.subr.bf16.mxu1 %v19981_v6 }
  0xc0   :  { %19984 = vmatpush3.bf16.msra.mxu1 %v19981_v6 }
  0xc1   :  { %18683 = vmatprep.subr.mxu1 %v21018_v8 }
  0xc3   :  { %18681 = vmatmul.mubr.msk.f32.vlgmr.msra.gmra.mrb[0].mxu1 %vm188_vm0, %v21296_v7 }
  0xc4   :  { %18685 = vmatprep.mubr.msk.f32.mxu1 %vm21019_vm1, %v21018_v8 }
 0x196   :  { %v18682_v10 = vpop.f32.mrb[0].mxu1 }
 0x197   :  { %v261_v11 = vpop.f32.mrb[1].mxu1  ;;  %v21310_v13 = vadd.f32 %v18682_v10, %v17583_v9 }
 0x198   :  { %v21306_v12 = vadd.f32 %v17583_v9, %v261_v11 }
 0x19a   :  { %271 = vrot.lane.b32.xlu0 %v21306_v12, %s23968_s21 }
 0x19e   :  { %349 = vrot.lane.b32.xlu0 %v21310_v13, %s23968_s21 }
 0x20c   :  { %v272_v14 = vpop.permute.xlu0 %271 }
 0x20d   :  { %18684 = vmatpush3.xpose.msk.msra.mxu1 %vm273_vm2, %v272_v14 }
 0x20e   :  { %18688 = vmatprep.subr.mxu1 %v21018_v8 }
 0x210   :  { %18686 = vmatmul.mubr.msk.f32.vlgmr.msra.gmra.mrb[2].mxu1 %vm273_vm2, %v21306_v12  ;;  %v350_v15 = vpop.permute.xlu0 %349 }
 0x211   :  { %18689 = vmatpush3.xpose.msk.msra.mxu1 %vm273_vm2, %v350_v15  ;;  %18690 = vmatprep.mubr.msk.f32.mxu1 %vm21019_vm1, %v21018_v8 }
 0x212   :  { %18698 = vmatprep.subr.mxu1 %v21018_v8 }
 0x214   :  { %18691 = vmatmul.mubr.msk.f32.vlgmr.msra.gmra.mrb[4].mxu1 %vm273_vm2, %v21310_v13 }
 0x215   :  { %18700 = vmatprep.mubr.msk.f32.mxu1 %vm21019_vm1, %v21018_v8 }
 0x2e3   :  { %v344_v17 = vpop.f32.mrb[2].mxu1 }
 0x2e4   :  { %v345_v18 = vadd.f32 %v344_v17, %v21326_v16  ;;  %v18687_v19 = vpop.f32.mrb[3].mxu1 }
 0x2e6   :  { %v425_v20 = vsel %vm273_vm2, %v345_v18, -inf }
 0x2e7   :  { %426 = vmax.xlane.f32.xlu1 %v425_v20  ;;  %v421_v21 = vpop.f32.mrb[4].mxu1 }
 0x2e8   :  { %v422_v22 = vadd.f32 %v421_v21, %v21326_v16  ;;  %v18692_v23 = vpop.f32.mrb[5].mxu1 }
 0x2ea   :  { %v428_v24 = vsel %vm273_vm2, %v422_v22, -inf }
 0x2eb   :  { %429 = vmax.xlane.f32.xlu1 %v428_v24 }
 0x2fc   :  { %447 = vrot.lane.b32.xlu1 %v21306_v12, %s23952_s1 }
 0x300   :  { %523 = vrot.lane.b32.xlu1 %v21310_v13, %s23952_s1  ;;  %s24001_s1 = smov 56  }
 0x304   :  { %601 = vrot.lane.b32.xlu1 %v21306_v12, %s23964_s22 }
 0x308   :  { %679 = vrot.lane.b32.xlu1 %v21310_v13, %s23964_s22 }
 0x374   :  { %v427_v25 = vpop.xlane.xlu1 %426 }
 0x375   :  { %v431_v26 = vsub.f32 %v345_v18, %v427_v25 }
 0x377   :  { %v433_v27 = vmul.f32 1.442695, %v431_v26 }
 0x378   :  { %v430_v28 = vpop.xlane.xlu1 %429 }
 0x379   :  { %20404 = vpow2.f32 %v433_v27  ;;  %v432_v29 = vsub.f32 %v422_v22, %v430_v28 }
 0x37b   :  { %v435_v30 = vmul.f32 1.442695, %v432_v29 }
 0x37c   :  { %v448_v31 = vpop.permute.xlu1 %447 }
 0x37d   :  { %20406 = vpow2.f32 %v435_v30  ;;  %18694 = vmatpush3.msra.mxu0 %v448_v31 }
 0x37e   :  { %18703 = vmatprep.subr.mxu0 %v21018_v8 }
 0x380   :  { %v524_v32 = vpop.permute.xlu1 %523 }
 0x381   :  { %18699 = vmatpush3.msra.mxu1 %v524_v32 }
 0x382   :  { %18708 = vmatprep.subr.mxu1 %v21018_v8 }
 0x383   :  { %v20405_v33 = vpop.eup %20404 }
 0x384   :  { %v437_v34 = vsel %vm273_vm2, %v20405_v33, 0.0  ;;  %v602_v37 = vpop.permute.xlu1 %601 }
 0x385   :  { %438 = vadd.xlane.f32.xlu0 %v437_v34 }
 0x387   :  { %v20407_v35 = vpop.eup %20406 }
 0x388   :  { %v440_v36 = vsel %vm273_vm2, %v20407_v35, 0.0  ;;  %v680_v38 = vpop.permute.xlu1 %679 }
 0x389   :  { %441 = vadd.xlane.f32.xlu1 %v440_v36 }
 0x39a   :  { %677 = vrot.lane.b32.xlu1 %v21310_v13, %s23966_s2 }
 0x39b   :  { %599 = vrot.lane.b32.xlu0 %v21306_v12, %s23966_s2 }
 0x412   :  { %v439_v39 = vpop.xlane.xlu0 %438 }
 0x413   :  { %20408 = vrcp.f32 %v439_v39 }
 0x416   :  { %v442_v40 = vpop.xlane.xlu1 %441  ;;  %v600_v45 = vpop.permute.xlu0 %599 }
 0x417   :  { %20410 = vrcp.f32 %v442_v40 }
 0x41a   :  { %v678_v46 = vpop.permute.xlu1 %677 }
 0x41d   :  { %v20409_v41 = vpop.eup %20408 }
 0x41e   :  { %v445_v42 = vmul.f32 %v20409_v41, %v20405_v33 }
 0x420   :  { %18696 = vmatmul.mubr.msk.f32.vlgmr.msra.gmra.mrb[0].mxu0 %vm273_vm2, %v445_v42 }
 0x421   :  { %v20411_v43 = vpop.eup %20410  ;;  %18704 = vmatpush3.xpose.msk.msra.mxu0 %vm273_vm2, %v602_v37  ;;  %18705 = vmatprep.mubr.msk.f32.mxu0 %vm21019_vm1, %v21018_v8 }
 0x422   :  { %v446_v44 = vmul.f32 %v20411_v43, %v20407_v35  ;;  %18713 = vmatprep.subr.mxu0 %v21018_v8 }
 0x424   :  { %18701 = vmatmul.mubr.msk.f32.vlgmr.msra.gmra.mrb[6].mxu1 %vm273_vm2, %v446_v44  ;;  %18706 = vmatmul.mubr.msk.f32.vlgmr.msra.gmra.mrb[2].mxu0 %vm273_vm2, %v600_v45 }
 0x425   :  { %18709 = vmatpush3.xpose.msk.msra.mxu1 %vm273_vm2, %v680_v38  ;;  %18710 = vmatprep.mubr.msk.f32.mxu1 %vm21019_vm1, %v21018_v8 }
 0x426   :  { %18718 = vmatprep.subr.mxu1 %v21018_v8  ;;  %18715 = vmatprep.mubr.msk.f32.mxu0 %vm21019_vm1, %v21018_v8 }
 0x428   :  { %18711 = vmatmul.mubr.msk.f32.vlgmr.msra.gmra.mrb[8].mxu1 %vm273_vm2, %v678_v46 }
 0x429   :  { %18720 = vmatprep.mubr.msk.f32.mxu1 %vm21019_vm1, %v21018_v8 }
 0x4f3   :  { %v21364_v47 = vpop.f32.mrb[0].mxu0 }
 0x4f4   :  { %v18697_v48 = vpop.f32.mrb[1].mxu0 }
 0x4f7   :  { %v21366_v49 = vpop.f32.mrb[6].mxu1  ;;  %v673_v50 = vpop.f32.mrb[2].mxu0 }
 0x4f8   :  { %v674_v51 = vadd.f32 %v673_v50, %v21326_v16  ;;  %v18702_v52 = vpop.f32.mrb[7].mxu1  ;;  %v18707_v53 = vpop.f32.mrb[3].mxu0 }
 0x4fa   :  { %v755_v54 = vsel %vm273_vm2, %v674_v51, -inf }
 0x4fb   :  { %v751_v55 = vpop.f32.mrb[8].mxu1  ;;  %756 = vmax.xlane.f32.xlu1 %v755_v54 }
 0x4fc   :  { %v752_v56 = vadd.f32 %v751_v55, %v21326_v16  ;;  %v18712_v57 = vpop.f32.mrb[9].mxu1 }
 0x4fe   :  { %v758_v58 = vsel %vm273_vm2, %v752_v56, -inf }
 0x4ff   :  { %759 = vmax.xlane.f32.xlu0 %v758_v58 }
 0x50c   :  { %777 = vrot.lane.b32.xlu1 %v21306_v12, %s23950_s0 }
 0x510   :  { %931 = vrot.lane.b32.xlu1 %v21306_v12, %s23960_s24 }
 0x514   :  { %1009 = vrot.lane.b32.xlu1 %v21310_v13, %s23960_s24 }
 0x515   :  { %853 = vrot.lane.b32.xlu0 %v21310_v13, %s23950_s0  ;;  %s24019_s0 = sld [smem:[#allocation30_spill]] }
 0x519   :  { %929 = vrot.lane.b32.xlu0 %v21306_v12, %s23962_s26 }
 0x588   :  { %v757_v59 = vpop.xlane.xlu1 %756 }
 0x589   :  { %v761_v60 = vsub.f32 %v674_v51, %v757_v59 }
 0x58b   :  { %v763_v61 = vmul.f32 1.442695, %v761_v60 }
 0x58c   :  { %v778_v62 = vpop.permute.xlu1 %777  ;;  %v760_v63 = vpop.xlane.xlu0 %759 }
 0x58d   :  { %20412 = vpow2.f32 %v763_v61  ;;  %v762_v0 = vsub.f32 %v752_v56, %v760_v63  ;;  %18714 = vmatpush3.msra.mxu0 %v778_v62 }
 0x58e   :  { %18723 = vmatprep.subr.mxu0 %v21018_v8 }
 0x58f   :  { %v765_v1 = vmul.f32 1.442695, %v762_v0 }
 0x590   :  { %v854_v2 = vpop.permute.xlu0 %853  ;;  %v932_v10 = vpop.permute.xlu1 %931 }
 0x591   :  { %20414 = vpow2.f32 %v765_v1  ;;  %18719 = vmatpush3.msra.mxu1 %v854_v2 }
 0x592   :  { %18728 = vmatprep.subr.mxu1 %v21018_v8 }
 0x594   :  { %v1010_v11 = vpop.permute.xlu1 %1009  ;;  %v930_v21 = vpop.permute.xlu0 %929 }
 0x597   :  { %v20413_v3 = vpop.eup %20412 }
 0x598   :  { %v767_v4 = vsel %vm273_vm2, %v20413_v3, 0.0 }
 0x599   :  { %768 = vadd.xlane.f32.xlu1 %v767_v4 }
 0x59b   :  { %v20415_v6 = vpop.eup %20414 }
 0x59c   :  { %v770_v9 = vsel %vm273_vm2, %v20415_v6, 0.0 }
 0x59d   :  { %771 = vadd.xlane.f32.xlu1 %v770_v9 }
 0x5ae   :  { %1007 = vrot.lane.b32.xlu1 %v21310_v13, %s23962_s26 }
 0x626   :  { %v769_v14 = vpop.xlane.xlu1 %768 }
 0x627   :  { %20416 = vrcp.f32 %v769_v14 }
 0x62a   :  { %v772_v15 = vpop.xlane.xlu1 %771 }
 0x62b   :  { %20418 = vrcp.f32 %v772_v15 }
 0x62e   :  { %v1008_v22 = vpop.permute.xlu1 %1007 }
 0x631   :  { %v20417_v17 = vpop.eup %20416 }
 0x632   :  { %v775_v18 = vmul.f32 %v20417_v17, %v20413_v3 }
 0x634   :  { %18716 = vmatmul.mubr.msk.f32.vlgmr.msra.gmra.mrb[4].mxu0 %vm273_vm2, %v775_v18 }
 0x635   :  { %v20419_v19 = vpop.eup %20418  ;;  %18724 = vmatpush3.xpose.msk.msra.mxu0 %vm273_vm2, %v932_v10  ;;  %18725 = vmatprep.mubr.msk.f32.mxu0 %vm21019_vm1, %v21018_v8 }
 0x636   :  { %v776_v20 = vmul.f32 %v20419_v19, %v20415_v6  ;;  %18733 = vmatprep.subr.mxu0 %v21018_v8 }
 0x638   :  { %18721 = vmatmul.mubr.msk.f32.vlgmr.msra.gmra.mrb[10].mxu1 %vm273_vm2, %v776_v20  ;;  %18726 = vmatmul.mubr.msk.f32.vlgmr.msra.gmra.mrb[6].mxu0 %vm273_vm2, %v930_v21 }
 0x639   :  { %18729 = vmatpush3.xpose.msk.msra.mxu1 %vm273_vm2, %v1010_v11  ;;  %18730 = vmatprep.mubr.msk.f32.mxu1 %vm21019_vm1, %v21018_v8 }
 0x63a   :  { %18738 = vmatprep.subr.mxu1 %v21018_v8  ;;  %18735 = vmatprep.mubr.msk.f32.mxu0 %vm21019_vm1, %v21018_v8 }
 0x63c   :  { %18731 = vmatmul.mubr.msk.f32.vlgmr.msra.gmra.mrb[12].mxu1 %vm273_vm2, %v1008_v22 }
 0x63d   :  { %18740 = vmatprep.mubr.msk.f32.mxu1 %vm21019_vm1, %v21018_v8 }
 0x707   :  { %v21404_v23 = vpop.f32.mrb[4].mxu0 }
 0x708   :  { %v18717_v24 = vpop.f32.mrb[5].mxu0 }
 0x70b   :  { %v21406_v25 = vpop.f32.mrb[10].mxu1  ;;  %v1003_v26 = vpop.f32.mrb[6].mxu0 }
 0x70c   :  { %v1004_v27 = vadd.f32 %v1003_v26, %v21326_v16  ;;  %v18722_v28 = vpop.f32.mrb[11].mxu1  ;;  %v18727_v29 = vpop.f32.mrb[7].mxu0 }
 0x70d   :  { %v1622_v29 = vld [vmem:[%s23918_s5 + $0x8] sm:$0xff] }
 0x70e   :  { %v1085_v30 = vsel %vm273_vm2, %v1004_v27, -inf }
 0x70f   :  { %v1081_v31 = vpop.f32.mrb[12].mxu1  ;;  %1086 = vmax.xlane.f32.xlu0 %v1085_v30 }
 0x710   :  { %v1082_v32 = vadd.f32 %v1081_v31, %v21326_v16  ;;  %v18732_v33 = vpop.f32.mrb[13].mxu1  ;;  %v1623_v31 = vld [vmem:[%s23918_s5 + $0x10] sm:$0xff] }
 0x712   :  { %v1088_v34 = vsel %vm273_vm2, %v1082_v32, -inf }
 0x713   :  { %1089 = vmax.xlane.f32.xlu1 %v1088_v34 }
 0x724   :  { %1107 = vrot.lane.b32.xlu1 %v21306_v12, %s23948_s12 }
 0x725   :  { %1183 = vrot.lane.b32.xlu0 %v21310_v13, %s23948_s12  ;;  %s23999_s12 = smov 24  }
 0x728   :  { %1261 = vrot.lane.b32.xlu1 %v21306_v12, %s23958_s3 }
 0x72c   :  { %1339 = vrot.lane.b32.xlu1 %v21310_v13, %s23958_s3 }
 0x730   :  { %1337 = vrot.lane.b32.xlu1 %v21310_v13, %s23956_s4 }
 0x79c   :  { %v1087_v35 = vpop.xlane.xlu0 %1086 }
 0x79d   :  { %v1091_v36 = vsub.f32 %v1004_v27, %v1087_v35 }
 0x79f   :  { %v1093_v37 = vmul.f32 1.442695, %v1091_v36 }
 0x7a0   :  { %v1090_v38 = vpop.xlane.xlu1 %1089  ;;  %v1184_v39 = vpop.permute.xlu0 %1183 }
 0x7a1   :  { %20420 = vpow2.f32 %v1093_v37  ;;  %v1092_v40 = vsub.f32 %v1082_v32, %v1090_v38  ;;  %18739 = vmatpush3.msra.mxu1 %v1184_v39  ;;  %v1624_v32 = vld [vmem:[%s23918_s5 + $0x18] sm:$0xff] }
 0x7a2   :  { %18748 = vmatprep.subr.mxu1 %v21018_v8  ;;  %v19989_v33 = vpack.c.bf16 %v1624_v32, %v1623_v31 }
 0x7a3   :  { %v1095_v41 = vmul.f32 1.442695, %v1092_v40 }
 0x7a4   :  { %v1108_v42 = vpop.permute.xlu1 %1107 }
 0x7a5   :  { %20422 = vpow2.f32 %v1095_v41  ;;  %18734 = vmatpush3.msra.mxu0 %v1108_v42 }
 0x7a6   :  { %18743 = vmatprep.subr.mxu0 %v21018_v8 }
 0x7a8   :  { %v1262_v51 = vpop.permute.xlu1 %1261 }
 0x7ab   :  { %v20421_v43 = vpop.eup %20420 }
 0x7ac   :  { %v1097_v44 = vsel %vm273_vm2, %v20421_v43, 0.0  ;;  %v1340_v55 = vpop.permute.xlu1 %1339 }
 0x7ad   :  { %1098 = vadd.xlane.f32.xlu0 %v1097_v44 }
 0x7af   :  { %v20423_v45 = vpop.eup %20422 }
 0x7b0   :  { %v1100_v46 = vsel %vm273_vm2, %v20423_v45, 0.0  ;;  %v1338_v58 = vpop.permute.xlu1 %1337 }
 0x7b1   :  { %1101 = vadd.xlane.f32.xlu0 %v1100_v46 }
 0x7c7   :  { %1259 = vrot.lane.b32.xlu0 %v21306_v12, %s23956_s4 }
 0x83a   :  { %v1099_v48 = vpop.xlane.xlu0 %1098 }
 0x83b   :  { %20424 = vrcp.f32 %v1099_v48 }
 0x83e   :  { %v1102_v50 = vpop.xlane.xlu0 %1101 }
 0x83f   :  { %20426 = vrcp.f32 %v1102_v50 }
 0x842   :  { %v1260_v57 = vpop.permute.xlu0 %1259 }
 0x845   :  { %v20425_v52 = vpop.eup %20424 }
 0x846   :  { %v1105_v53 = vmul.f32 %v20425_v52, %v20421_v43 }
 0x848   :  { %18736 = vmatmul.mubr.msk.f32.vlgmr.msra.gmra.mrb[8].mxu0 %vm273_vm2, %v1105_v53 }
 0x849   :  { %v20427_v54 = vpop.eup %20426  ;;  %18744 = vmatpush3.xpose.msk.msra.mxu0 %vm273_vm2, %v1262_v51  ;;  %18745 = vmatprep.mubr.msk.f32.mxu0 %vm21019_vm1, %v21018_v8 }
 0x84a   :  { %v1106_v56 = vmul.f32 %v20427_v54, %v20423_v45  ;;  %18753 = vmatprep.subr.mxu0 %v21018_v8 }
 0x84c   :  { %18741 = vmatmul.mubr.msk.f32.vlgmr.msra.gmra.mrb[14].mxu1 %vm273_vm2, %v1106_v56  ;;  %18746 = vmatmul.mubr.msk.f32.vlgmr.msra.gmra.mrb[10].mxu0 %vm273_vm2, %v1260_v57 }
 0x84d   :  { %18749 = vmatpush3.xpose.msk.msra.mxu1 %vm273_vm2, %v1340_v55  ;;  %18750 = vmatprep.mubr.msk.f32.mxu1 %vm21019_vm1, %v21018_v8 }
 0x84e   :  { %18758 = vmatprep.subr.mxu1 %v21018_v8  ;;  %18755 = vmatprep.mubr.msk.f32.mxu0 %vm21019_vm1, %v21018_v8 }
 0x850   :  { %18751 = vmatmul.mubr.msk.f32.vlgmr.msra.gmra.mrb[16].mxu1 %vm273_vm2, %v1338_v58 }
 0x851   :  { %18760 = vmatprep.mubr.msk.f32.mxu1 %vm21019_vm1, %v21018_v8 }
 0x91b   :  { %v1179_v59 = vpop.f32.mrb[8].mxu0 }
 0x91c   :  { %v18737_v60 = vpop.f32.mrb[9].mxu0 }
 0x91f   :  { %v1255_v61 = vpop.f32.mrb[14].mxu1  ;;  %v1333_v62 = vpop.f32.mrb[10].mxu0 }
 0x920   :  { %v1334_v63 = vadd.f32 %v1333_v62, %v21326_v16  ;;  %v18742_v0 = vpop.f32.mrb[15].mxu1  ;;  %v18747_v1 = vpop.f32.mrb[11].mxu0 }
 0x922   :  { %v1415_v2 = vsel %vm273_vm2, %v1334_v63, -inf }
 0x923   :  { %v1411_v3 = vpop.f32.mrb[16].mxu1  ;;  %1416 = vmax.xlane.f32.xlu0 %v1415_v2 }
 0x924   :  { %v1412_v4 = vadd.f32 %v1411_v3, %v21326_v16  ;;  %v18752_v6 = vpop.f32.mrb[17].mxu1 }
 0x926   :  { %v1418_v9 = vsel %vm273_vm2, %v1412_v4, -inf }
 0x927   :  { %1419 = vmax.xlane.f32.xlu1 %v1418_v9  ;;  %v1754_v9 = vld [vmem:[%s23920_s7] sm:$0xff] }
 0x938   :  { %1437 = vrot.lane.b32.xlu1 %v21306_v12, %s23946_s28 }
 0x93c   :  { %1591 = vrot.lane.b32.xlu1 %v21404_v23, %s23993_s8 }
 0x940   :  { %1593 = vrot.lane.b32.xlu1 %v21406_v25, %s23993_s8 }
 0x944   :  { %1601 = vrot.lane.b32.xlu1 %v1255_v61, %s23997_s27 }
 0x9b0   :  { %v1417_v10 = vpop.xlane.xlu0 %1416 }
 0x9b1   :  { %v1421_v11 = vsub.f32 %v1334_v63, %v1417_v10  ;;  %v1755_v10 = vld [vmem:[%s23920_s7 + $0x8] sm:$0xff] }
 0x9b3   :  { %v1423_v14 = vmul.f32 1.442695, %v1421_v11  ;;  %v1848_v11 = vld [vmem:[%s23922_s9 + $0x10] sm:$0xff] }
 0x9b4   :  { %v1420_v16 = vpop.xlane.xlu1 %1419 }
 0x9b5   :  { %20428 = vpow2.f32 %v1423_v14  ;;  %v1422_v15 = vsub.f32 %v1412_v4, %v1420_v16  ;;  %v1847_v4 = vld [vmem:[%s23922_s9 + $0x8] sm:$0xff]  ;;  %v19993_v14 = vpack.c.bf16 %v1755_v10, %v1754_v9  ;;  %v1849_v16 = vld [vmem:[%s23922_s9 + $0x18] sm:$0xff] }
 0x9b7   :  { %v1425_v17 = vmul.f32 1.442695, %v1422_v15  ;;  %v20005_v15 = vpack.c.bf16 %v1849_v16, %v1848_v11 }
 0x9b8   :  { %v1438_v18 = vpop.permute.xlu1 %1437 }
 0x9b9   :  { %20430 = vpow2.f32 %v1425_v17  ;;  %18754 = vmatpush3.msra.mxu0 %v1438_v18  ;;  %v170_v17 = vld [vmem:[#allocation2] sm:$0xff]  ;;  %v1756_v18 = vld [vmem:[%s23920_s7 + $0x10] sm:$0xff] }
 0x9bc   :  { %v1592_v38 = vpop.permute.xlu1 %1591 }
 0x9bd   :  { %v1613_v41 = vsel %vm273_vm2, %v21364_v47, %v1592_v38  ;;  %v17610_v47 = vld [vmem:[#allocation10] ss:$0 sm:$0xff] }
 0x9bf   :  { %v20429_v19 = vpop.eup %20428 }
 0x9c0   :  { %v1427_v12 = vsel %vm273_vm2, %v20429_v19, 0.0  ;;  %v1594_v39 = vpop.permute.xlu1 %1593 }
 0x9c1   :  { %1428 = vadd.xlane.f32.xlu0 %v1427_v12  ;;  %v1614_v46 = vsel %vm273_vm2, %v21366_v49, %v1594_v39 }
 0x9c3   :  { %v20431_v20 = vpop.eup %20430 }
 0x9c4   :  { %v1430_v21 = vsel %vm273_vm2, %v20431_v20, 0.0  ;;  %v1602_v42 = vpop.permute.xlu1 %1601 }
 0x9c5   :  { %1431 = vadd.xlane.f32.xlu0 %v1430_v21  ;;  %v1617_v48 = vsel %vm1615_vm4, %v1614_v46, %v1602_v42  ;;  %v17613_v46 = vld [vmem:[#allocation11] ss:$0 sm:$0xff] }
 0x9db   :  { %1513 = vrot.lane.b32.xlu0 %v21310_v13, %s23946_s28  ;;  %v1621_v13 = vld [vmem:[%s23918_s5] sm:$0xff]  ;;  %s24007_s28 = smov 112  }
 0x9dc   :  { %v19985_v30 = vpack.c.bf16 %v1622_v29, %v1621_v13  ;;  %v21530_v29 = vld [vmem:[%s23926_s13] sm:$0x7] }
 0x9df   :  { %1599 = vrot.lane.b32.xlu0 %v1179_v59, %s23997_s27 }
 0xa4e   :  { %v1429_v22 = vpop.xlane.xlu0 %1428 }
 0xa4f   :  { %20432 = vrcp.f32 %v1429_v22 }
 0xa52   :  { %v1432_v23 = vpop.xlane.xlu0 %1431 }
 0xa53   :  { %20434 = vrcp.f32 %v1432_v23  ;;  %v1742_v23 = vlaneseq }
 0xa56   :  { %v1514_v24 = vpop.permute.xlu0 %1513 }
 0xa57   :  { %18759 = vmatpush3.msra.mxu1 %v1514_v24 }
 0xa58   :  { %19986 = vmatprep.subr.bf16.mxu1 %v19985_v30 }
 0xa59   :  { %v20433_v25 = vpop.eup %20432 }
 0xa5a   :  { %v1435_v26 = vmul.f32 %v20433_v25, %v20429_v19  ;;  %v1600_v40 = vpop.permute.xlu0 %1599  ;;  %v1757_v19 = vld [vmem:[%s23920_s7 + $0x18] sm:$0xff] }
 0xa5b   :  { %v1616_v43 = vsel %vm1615_vm4, %v1613_v41, %v1600_v40  ;;  %v19997_v12 = vpack.c.bf16 %v1757_v19, %v1756_v18  ;;  %v17616_v41 = vld [vmem:[%s23923_s10] ss:$0 sm:$0xff] }
 0xa5c   :  { %18756 = vmatmul.mubr.msk.f32.vlgmr.msra.gmra.mrb[12].mxu0 %vm273_vm2, %v1435_v26 }
 0xa5d   :  { %v20435_v27 = vpop.eup %20434  ;;  %18793 = vmatprep.mubr.msk.f32.mxu0 %vm188_vm0, %v170_v17 }
 0xa5e   :  { %v1436_v28 = vmul.f32 %v20435_v27, %v20431_v20  ;;  %v171_v20 = vld [vmem:[#allocation2 + $0x8] sm:$0xff]  ;;  %v21522_v27 = vshrl.u32 %v1742_v23, 7 }
 0xa60   :  { %18761 = vmatmul.mubr.msk.f32.vlgmr.msra.gmra.mrb[18].mxu1 %vm273_vm2, %v1436_v28  ;;  %v21525_v13 = vsub.s32 0, %v21522_v27 }
 0xa61   :  { %19988 = vmatpush3.bf16.msra.mxu1 %v19985_v30  ;;  %v21535_v30 = vld [vmem:[%s23927_s14] sm:$0x7] }
 0xa62   :  { %19990 = vmatprep.subr.bf16.mxu1 %v19989_v33  ;;  %v1745_v31 = vrot.slane %v21530_v29, %v21525_v13 }
 0xa65   :  { %19992 = vmatpush3.bf16.msra.mxu1 %v19989_v33 }
 0xa66   :  { %19994 = vmatprep.subr.bf16.mxu1 %v19993_v14 }
 0xb2f   :  { %v1509_v34 = vpop.f32.mrb[12].mxu0 }
 0xb30   :  { %1607 = vrot.lane.b32.xlu0 %v1509_v34, %s23954_s19  ;;  %v18757_v35 = vpop.f32.mrb[13].mxu0  ;;  %v1751_v34 = vrot.slane %v21535_v30, %v21525_v13 }
 0xb33   :  { %v1585_v36 = vpop.f32.mrb[18].mxu1 }
 0xb34   :  { %1609 = vrot.lane.b32.xlu1 %v1585_v36, %s23954_s19  ;;  %v18762_v37 = vpop.f32.mrb[19].mxu1  ;;  %s24003_s19 = smov 104  }
 0xba2   :  { %v1608_v44 = vpop.permute.xlu0 %1607 }
 0xba3   :  { %v1619_v45 = vsel %vm1618_vm3, %v1616_v43, %v1608_v44 }
 0xba4   :  { %18771 = vmatprep.mubr.msk.f32.mxu1 %vm188_vm0, %v1619_v45 }
 0xba6   :  { %v1610_v50 = vpop.permute.xlu1 %1609 }
 0xba7   :  { %v1620_v51 = vsel %vm1618_vm3, %v1617_v48, %v1610_v50 }
 0xba8   :  { %18772 = vmatmul.mubr.msk.f32.vlgmr.msra.gmra.mrb[20].mxu1 %vm188_vm0, %v1620_v51 }
 0xba9   :  { %19996 = vmatpush3.bf16.msra.mxu1 %v19993_v14 }
 0xbaa   :  { %19998 = vmatprep.subr.bf16.mxu1 %v19997_v12 }
 0xbad   :  { %20000 = vmatpush3.bf16.msra.mxu1 %v19997_v12 }
 0xbae   :  { %18796 = vmatprep.subr.mxu1 %v21018_v8 }
 0xc7b   :  { %v18773_v52 = vpop.f32.mrb[20].mxu1 }
 0xc7c   :  { %v1710_v53 = vadd.f32 %v18773_v52, %v17610_v47  ;;  %v1704_v54 = vpop.f32.mrb[21].mxu1 }
 0xc7d   :  { %v1705_v55 = vadd.f32 %v17610_v47, %v1704_v54 }
 0xc7e   :  { %v1714_v56 = vadd.f32 %v1710_v53, %v21296_v7 }
 0xc7f   :  { %v1713_v57 = vadd.f32 %v1705_v55, %v21292_v5  ;;  %v1846_v5 = vld [vmem:[%s23922_s9] sm:$0xff] }
 0xc80   :  { %v1718_v58 = vsel %vm188_vm0, %v1714_v56, 0.0  ;;  %v20001_v6 = vpack.c.bf16 %v1847_v4, %v1846_v5 }
 0xc81   :  { %1719 = vadd.xlane.f32.xlu1 %v1718_v58  ;;  %v1715_v49 = vsel %vm188_vm0, %v1713_v57, 0.0 }
 0xc82   :  { %1716 = vadd.xlane.f32.xlu0 %v1715_v49  ;;  %20002 = vmatprep.subr.bf16.mxu0 %v20001_v6 }
 0xc83   :  { %20004 = vmatpush3.bf16.msra.mxu0 %v20001_v6 }
 0xc84   :  { %20006 = vmatprep.subr.bf16.mxu0 %v20005_v15 }
 0xc87   :  { %20008 = vmatpush3.bf16.msra.mxu0 %v20005_v15 }
 0xc88   :  { %18806 = vmatprep.subr.mxu0 %v21018_v8 }
 0xc8a   :  { %18794 = vmatmul.mubr.msk.f32.vlgmr.msra.gmra.mrb[14].mxu0 %vm188_vm0, %v171_v20 }
 0xc8b   :  { %18808 = vmatprep.mubr.msk.f32.mxu0 %vm21019_vm1, %v21018_v8 }
 0xd0e   :  { %v1720_v59 = vpop.xlane.xlu1 %1719 }
 0xd0f   :  { %v1723_v60 = vmul.f32 0.03125, %v1720_v59  ;;  %v1717_v61 = vpop.xlane.xlu0 %1716 }
 0xd10   :  { %v1722_v62 = vmul.f32 0.03125, %v1717_v61 }
 0xd11   :  { %v1725_v63 = vsub.f32 %v1714_v56, %v1723_v60 }
 0xd12   :  { %v1724_v0 = vsub.f32 %v1713_v57, %v1722_v62 }
 0xd13   :  { %v1727_v3 = vmul.f32 %v1725_v63, %v1725_v63 }
 0xd14   :  { %v1726_v1 = vmul.f32 %v1724_v0, %v1724_v0 }
 0xd15   :  { %v1731_v7 = vsel %vm188_vm0, %v1727_v3, 0.0 }
 0xd16   :  { %v1728_v2 = vsel %vm188_vm0, %v1726_v1, 0.0 }
 0xd17   :  { %1729 = vadd.xlane.f32.xlu0 %v1728_v2 }
 0xd1b   :  { %1732 = vadd.xlane.f32.xlu0 %v1731_v7 }
 0xd5d   :  { %v18795_v42 = vpop.f32.mrb[14].mxu0 }
 0xd5e   :  { %v21554_v43 = vadd.f32 %v18795_v42, %v17616_v41  ;;  %v1929_v44 = vpop.f32.mrb[15].mxu0 }
 0xd5f   :  { %v21556_v45 = vadd.f32 %v17616_v41, %v1929_v44 }
 0xda4   :  { %v1730_v21 = vpop.xlane.xlu0 %1729 }
 0xda5   :  { %v1734_v22 = vmul.f32 0.03125, %v1730_v21 }
 0xda7   :  { %v1736_v24 = vadd.f32 1e-05, %v1734_v22 }
 0xda8   :  { %v1733_v25 = vpop.xlane.xlu0 %1732 }
 0xda9   :  { %20436 = vrsqrt.f32 %v1736_v24  ;;  %v1735_v26 = vmul.f32 0.03125, %v1733_v25 }
 0xdab   :  { %v1737_v28 = vadd.f32 1e-05, %v1735_v26 }
 0xdad   :  { %20438 = vrsqrt.f32 %v1737_v28 }
 0xdb3   :  { %v20437_v32 = vpop.eup %20436 }
 0xdb4   :  { %v1740_v33 = vmul.f32 %v20437_v32, %v1724_v0 }
 0xdb6   :  { %v1746_v35 = vmul.f32 %v1745_v31, %v1740_v33 }
 0xdb7   :  { %v20439_v36 = vpop.eup %20438 }
 0xdb8   :  { %v1741_v37 = vmul.f32 %v20439_v36, %v1725_v63  ;;  %v21541_v38 = vadd.f32 %v1751_v34, %v1746_v35 }
 0xdba   :  { %v1747_v39 = vmul.f32 %v1745_v31, %v1741_v37  ;;  %18782 = vmatprep.mubr.msk.f32.mxu1 %vm188_vm0, %v21541_v38 }
 0xdbc   :  { %v21545_v40 = vadd.f32 %v1751_v34, %v1747_v39 }
 0xdbe   :  { %18783 = vmatmul.mubr.msk.f32.vlgmr.msra.gmra.mrb[22].mxu1 %vm188_vm0, %v21545_v40 }
 0xdbf   :  { %18798 = vmatprep.mubr.msk.f32.mxu1 %vm21019_vm1, %v21018_v8  ;;  %18797 = vmatpush3.xpose.msk.msra.mxu1 %vm273_vm2, %v21556_v45 }
 0xdc0   :  { %18801 = vmatprep.subr.mxu1 %v21018_v8 }
 0xe91   :  { %v18784_v48 = vpop.f32.mrb[22].mxu1 }
 0xe92   :  { %v1837_v50 = vpop.f32.mrb[23].mxu1  ;;  %v21569_v47 = vadd.f32 %v18784_v48, %v17613_v46 }
 0xe93   :  { %v21561_v51 = vadd.f32 %v17613_v46, %v1837_v50 }
 0xe95   :  { %18799 = vmatmul.mubr.msk.f32.vlgmr.msra.gmra.mrb[24].mxu1 %vm273_vm2, %v21561_v51 }
 0xe96   :  { %18802 = vmatpush3.xpose.msk.msra.mxu1 %vm273_vm2, %v21554_v43  ;;  %18803 = vmatprep.mubr.msk.f32.mxu1 %vm21019_vm1, %v21018_v8 }
 0xe97   :  { %18811 = vmatprep.subr.mxu1 %v21018_v8 }
 0xe99   :  { %18804 = vmatmul.mubr.msk.f32.vlgmr.msra.gmra.mrb[26].mxu1 %vm273_vm2, %v21569_v47 }
 0xe9a   :  { %18813 = vmatprep.mubr.msk.f32.mxu1 %vm21019_vm1, %v21018_v8 }
 0xf68   :  { %v2010_v52 = vpop.f32.mrb[24].mxu1 }
 0xf69   :  { %v18800_v53 = vpop.f32.mrb[25].mxu1  ;;  %v2090_v54 = vsel %vm273_vm2, %v2010_v52, -inf }
 0xf6a   :  { %2091 = vmax.xlane.f32.xlu1 %v2090_v54 }
 0xf6c   :  { %v2086_v55 = vpop.f32.mrb[26].mxu1 }
 0xf6d   :  { %v18805_v56 = vpop.f32.mrb[27].mxu1  ;;  %v2093_v57 = vsel %vm273_vm2, %v2086_v55, -inf }
 0xf6e   :  { %2094 = vmax.xlane.f32.xlu0 %v2093_v57 }
 0xf7b   :  { %2112 = vrot.lane.b32.xlu1 %v21556_v45, %s23968_s21 }
 0xf7f   :  { %2266 = vrot.lane.b32.xlu1 %v21556_v45, %s23966_s2 }
 0xf83   :  { %2344 = vrot.lane.b32.xlu1 %v21554_v43, %s23966_s2 }
 0xf84   :  { %2188 = vrot.lane.b32.xlu0 %v21554_v43, %s23968_s21 }
 0xff7   :  { %v2092_v58 = vpop.xlane.xlu1 %2091 }
 0xff8   :  { %v2096_v49 = vsub.f32 %v2010_v52, %v2092_v58 }
 0xffa   :  { %v2098_v59 = vmul.f32 1.442695, %v2096_v49 }
 0xffb   :  { %v2113_v60 = vpop.permute.xlu1 %2112  ;;  %v2095_v61 = vpop.xlane.xlu0 %2094 }
 0xffc   :  { %20440 = vpow2.f32 %v2098_v59  ;;  %v2097_v62 = vsub.f32 %v2086_v55, %v2095_v61  ;;  %18807 = vmatpush3.msra.mxu0 %v2113_v60 }
 0xffd   :  { %18816 = vmatprep.subr.mxu0 %v21018_v8 }
 0xffe   :  { %v2100_v63 = vmul.f32 1.442695, %v2097_v62 }
 0xfff   :  { %v2189_v0 = vpop.permute.xlu0 %2188  ;;  %v2267_v5 = vpop.permute.xlu1 %2266 }
0x1000   :  { %20442 = vpow2.f32 %v2100_v63  ;;  %18812 = vmatpush3.msra.mxu1 %v2189_v0 }
0x1001   :  { %18821 = vmatprep.subr.mxu1 %v21018_v8 }
0x1003   :  { %v2345_v4 = vpop.permute.xlu1 %2344 }
0x1006   :  { %v20441_v1 = vpop.eup %20440 }
0x1007   :  { %v2102_v2 = vsel %vm273_vm2, %v20441_v1, 0.0 }
0x1008   :  { %2103 = vadd.xlane.f32.xlu1 %v2102_v2 }
0x100a   :  { %v20443_v3 = vpop.eup %20442 }
0x100b   :  { %v2105_v7 = vsel %vm273_vm2, %v20443_v3, 0.0 }
0x100c   :  { %2106 = vadd.xlane.f32.xlu0 %v2105_v7 }
0x1019   :  { %2342 = vrot.lane.b32.xlu1 %v21569_v47, %s23966_s2 }
0x1022   :  { %2264 = vrot.lane.b32.xlu0 %v21561_v51, %s23966_s2 }
0x1095   :  { %v2104_v6 = vpop.xlane.xlu1 %2103 }
0x1096   :  { %20444 = vrcp.f32 %v2104_v6 }
0x1099   :  { %v2107_v9 = vpop.xlane.xlu0 %2106  ;;  %v2343_v17 = vpop.permute.xlu1 %2342 }
0x109a   :  { %20446 = vrcp.f32 %v2107_v9 }
0x109d   :  { %v2265_v15 = vpop.permute.xlu0 %2264 }
0x10a0   :  { %v20445_v10 = vpop.eup %20444 }
0x10a1   :  { %v2110_v11 = vmul.f32 %v20445_v10, %v20441_v1 }
0x10a3   :  { %18809 = vmatmul.mubr.msk.f32.vlgmr.msra.gmra.mrb[16].mxu0 %vm273_vm2, %v2110_v11 }
0x10a4   :  { %v20447_v14 = vpop.eup %20446  ;;  %18817 = vmatpush3.xpose.msk.msra.mxu0 %vm273_vm2, %v2267_v5  ;;  %18818 = vmatprep.mubr.msk.f32.mxu0 %vm21019_vm1, %v21018_v8 }
0x10a5   :  { %v2111_v16 = vmul.f32 %v20447_v14, %v20443_v3  ;;  %18826 = vmatprep.subr.mxu0 %v21018_v8 }
0x10a7   :  { %18814 = vmatmul.mubr.msk.f32.vlgmr.msra.gmra.mrb[28].mxu1 %vm273_vm2, %v2111_v16  ;;  %18819 = vmatmul.mubr.msk.f32.vlgmr.msra.gmra.mrb[18].mxu0 %vm273_vm2, %v2265_v15 }
0x10a8   :  { %18822 = vmatpush3.xpose.msk.msra.mxu1 %vm273_vm2, %v2345_v4  ;;  %18823 = vmatprep.mubr.msk.f32.mxu1 %vm21019_vm1, %v21018_v8 }
0x10a9   :  { %18831 = vmatprep.subr.mxu1 %v21018_v8  ;;  %18828 = vmatprep.mubr.msk.f32.mxu0 %vm21019_vm1, %v21018_v8 }
0x10ab   :  { %18824 = vmatmul.mubr.msk.f32.vlgmr.msra.gmra.mrb[30].mxu1 %vm273_vm2, %v2343_v17 }
0x10ac   :  { %18833 = vmatprep.mubr.msk.f32.mxu1 %vm21019_vm1, %v21018_v8 }
0x1176   :  { %v21610_v18 = vpop.f32.mrb[16].mxu0 }
0x1177   :  { %v18810_v19 = vpop.f32.mrb[17].mxu0 }
0x117a   :  { %v21612_v12 = vpop.f32.mrb[28].mxu1  ;;  %v2338_v20 = vpop.f32.mrb[18].mxu0 }
0x117b   :  { %v18815_v21 = vpop.f32.mrb[29].mxu1  ;;  %v18820_v22 = vpop.f32.mrb[19].mxu0  ;;  %v2420_v23 = vsel %vm273_vm2, %v2338_v20, -inf }
0x117c   :  { %2421 = vmax.xlane.f32.xlu0 %v2420_v23 }
0x117e   :  { %v2416_v24 = vpop.f32.mrb[30].mxu1 }
0x117f   :  { %v18825_v25 = vpop.f32.mrb[31].mxu1  ;;  %v2423_v26 = vsel %vm273_vm2, %v2416_v24, -inf }
0x1180   :  { %2424 = vmax.xlane.f32.xlu1 %v2423_v26 }
0x1191   :  { %2442 = vrot.lane.b32.xlu1 %v21556_v45, %s23964_s22 }
0x1192   :  { %2518 = vrot.lane.b32.xlu0 %v21554_v43, %s23964_s22 }
0x1195   :  { %2596 = vrot.lane.b32.xlu1 %v21556_v45, %s23962_s26 }
0x1199   :  { %2674 = vrot.lane.b32.xlu1 %v21554_v43, %s23962_s26 }
0x119d   :  { %2672 = vrot.lane.b32.xlu1 %v21569_v47, %s23962_s26 }
0x1209   :  { %v2422_v28 = vpop.xlane.xlu0 %2421 }
0x120a   :  { %v2426_v31 = vsub.f32 %v2338_v20, %v2422_v28 }
0x120c   :  { %v2428_v32 = vmul.f32 1.442695, %v2426_v31 }
0x120d   :  { %v2519_v33 = vpop.permute.xlu0 %2518  ;;  %v2425_v34 = vpop.xlane.xlu1 %2424 }
0x120e   :  { %20448 = vpow2.f32 %v2428_v32  ;;  %v2427_v35 = vsub.f32 %v2416_v24, %v2425_v34  ;;  %18832 = vmatpush3.msra.mxu1 %v2519_v33 }
0x120f   :  { %18841 = vmatprep.subr.mxu1 %v21018_v8 }
0x1210   :  { %v2430_v36 = vmul.f32 1.442695, %v2427_v35 }
0x1211   :  { %v2443_v37 = vpop.permute.xlu1 %2442 }
0x1212   :  { %20450 = vpow2.f32 %v2430_v36  ;;  %18827 = vmatpush3.msra.mxu0 %v2443_v37 }
0x1213   :  { %18836 = vmatprep.subr.mxu0 %v21018_v8 }
0x1215   :  { %v2597_v50 = vpop.permute.xlu1 %2596 }
0x1218   :  { %v20449_v39 = vpop.eup %20448 }
0x1219   :  { %v2432_v41 = vsel %vm273_vm2, %v20449_v39, 0.0  ;;  %v2675_v55 = vpop.permute.xlu1 %2674 }
0x121a   :  { %2433 = vadd.xlane.f32.xlu0 %v2432_v41 }
0x121c   :  { %v20451_v42 = vpop.eup %20450 }
0x121d   :  { %v2435_v44 = vsel %vm273_vm2, %v20451_v42, 0.0  ;;  %v2673_v58 = vpop.permute.xlu1 %2672 }
0x121e   :  { %2436 = vadd.xlane.f32.xlu0 %v2435_v44 }
0x1234   :  { %2594 = vrot.lane.b32.xlu0 %v21561_v51, %s23962_s26 }
0x12a7   :  { %v2434_v46 = vpop.xlane.xlu0 %2433 }
0x12a8   :  { %20452 = vrcp.f32 %v2434_v46 }
0x12ab   :  { %v2437_v48 = vpop.xlane.xlu0 %2436 }
0x12ac   :  { %20454 = vrcp.f32 %v2437_v48 }
0x12af   :  { %v2595_v57 = vpop.permute.xlu0 %2594 }
0x12b2   :  { %v20453_v52 = vpop.eup %20452 }
0x12b3   :  { %v2440_v53 = vmul.f32 %v20453_v52, %v20449_v39 }
0x12b5   :  { %18829 = vmatmul.mubr.msk.f32.vlgmr.msra.gmra.mrb[20].mxu0 %vm273_vm2, %v2440_v53 }
0x12b6   :  { %v20455_v54 = vpop.eup %20454  ;;  %18837 = vmatpush3.xpose.msk.msra.mxu0 %vm273_vm2, %v2597_v50  ;;  %18838 = vmatprep.mubr.msk.f32.mxu0 %vm21019_vm1, %v21018_v8 }
0x12b7   :  { %v2441_v56 = vmul.f32 %v20455_v54, %v20451_v42  ;;  %18846 = vmatprep.subr.mxu0 %v21018_v8 }
0x12b9   :  { %18834 = vmatmul.mubr.msk.f32.vlgmr.msra.gmra.mrb[32].mxu1 %vm273_vm2, %v2441_v56  ;;  %18839 = vmatmul.mubr.msk.f32.vlgmr.msra.gmra.mrb[22].mxu0 %vm273_vm2, %v2595_v57 }
0x12ba   :  { %18842 = vmatpush3.xpose.msk.msra.mxu1 %vm273_vm2, %v2675_v55  ;;  %18843 = vmatprep.mubr.msk.f32.mxu1 %vm21019_vm1, %v21018_v8 }
0x12bb   :  { %18851 = vmatprep.subr.mxu1 %v21018_v8  ;;  %18848 = vmatprep.mubr.msk.f32.mxu0 %vm21019_vm1, %v21018_v8 }
0x12bd   :  { %18844 = vmatmul.mubr.msk.f32.vlgmr.msra.gmra.mrb[34].mxu1 %vm273_vm2, %v2673_v58 }
0x12be   :  { %18853 = vmatprep.mubr.msk.f32.mxu1 %vm21019_vm1, %v21018_v8 }
0x1388   :  { %v21648_v49 = vpop.f32.mrb[20].mxu0 }
0x1389   :  { %v18830_v59 = vpop.f32.mrb[21].mxu0 }
0x138c   :  { %v21650_v60 = vpop.f32.mrb[32].mxu1  ;;  %v2668_v61 = vpop.f32.mrb[22].mxu0 }
0x138d   :  { %v18835_v62 = vpop.f32.mrb[33].mxu1  ;;  %v18840_v63 = vpop.f32.mrb[23].mxu0  ;;  %v2750_v0 = vsel %vm273_vm2, %v2668_v61, -inf }
0x138e   :  { %2751 = vmax.xlane.f32.xlu0 %v2750_v0  ;;  %v3285_v0 = vld [vmem:[%s23924_s11 + $0x8] sm:$0xff] }
0x1390   :  { %v2746_v1 = vpop.f32.mrb[34].mxu1 }
0x1391   :  { %v18845_v2 = vpop.f32.mrb[35].mxu1  ;;  %v2753_v3 = vsel %vm273_vm2, %v2746_v1, -inf }
0x1392   :  { %2754 = vmax.xlane.f32.xlu1 %v2753_v3  ;;  %v3286_v2 = vld [vmem:[%s23924_s11 + $0x10] sm:$0xff]  ;;  %v3287_v3 = vld [vmem:[%s23924_s11 + $0x18] sm:$0xff] }
0x13a3   :  { %2772 = vrot.lane.b32.xlu1 %v21556_v45, %s23960_s24 }
0x13a4   :  { %2848 = vrot.lane.b32.xlu0 %v21554_v43, %s23960_s24 }
0x13a7   :  { %2926 = vrot.lane.b32.xlu1 %v21556_v45, %s23956_s4 }
0x13ab   :  { %3004 = vrot.lane.b32.xlu1 %v21554_v43, %s23956_s4 }
0x13af   :  { %3002 = vrot.lane.b32.xlu1 %v21569_v47, %s23956_s4 }
0x141b   :  { %v2752_v7 = vpop.xlane.xlu0 %2751 }
0x141c   :  { %v2756_v5 = vsub.f32 %v2668_v61, %v2752_v7  ;;  %v20013_v7 = vpack.c.bf16 %v3287_v3, %v3286_v2  ;;  %v3520_v2 = vld [vmem:[%s23930_s17 + $0x50] sm:$0xff]  ;;  %v3521_v3 = vld [vmem:[%s23930_s17 + $0x58] sm:$0xff] }
0x141e   :  { %v2758_v4 = vmul.f32 1.442695, %v2756_v5 }
0x141f   :  { %v2849_v6 = vpop.permute.xlu0 %2848  ;;  %v2755_v9 = vpop.xlane.xlu1 %2754 }
0x1420   :  { %20456 = vpow2.f32 %v2758_v4  ;;  %v2757_v10 = vsub.f32 %v2746_v1, %v2755_v9  ;;  %18852 = vmatpush3.msra.mxu1 %v2849_v6 }
0x1421   :  { %18861 = vmatprep.subr.mxu1 %v21018_v8 }
0x1422   :  { %v2760_v11 = vmul.f32 1.442695, %v2757_v10 }
0x1423   :  { %v2773_v14 = vpop.permute.xlu1 %2772 }
0x1424   :  { %20458 = vpow2.f32 %v2760_v11  ;;  %18847 = vmatpush3.msra.mxu0 %v2773_v14 }
0x1425   :  { %18856 = vmatprep.subr.mxu0 %v21018_v8 }
0x1427   :  { %v2927_v21 = vpop.permute.xlu1 %2926 }
0x142a   :  { %v20457_v16 = vpop.eup %20456 }
0x142b   :  { %v2762_v15 = vsel %vm273_vm2, %v20457_v16, 0.0  ;;  %v3005_v25 = vpop.permute.xlu1 %3004 }
0x142c   :  { %2763 = vadd.xlane.f32.xlu0 %v2762_v15 }
0x142e   :  { %v20459_v47 = vpop.eup %20458 }
0x142f   :  { %v2765_v17 = vsel %vm273_vm2, %v20459_v47, 0.0  ;;  %v3003_v28 = vpop.permute.xlu1 %3002 }
0x1430   :  { %2766 = vadd.xlane.f32.xlu0 %v2765_v17 }
0x1446   :  { %2924 = vrot.lane.b32.xlu0 %v21561_v51, %s23956_s4  ;;  %s24002_s4 = smov 48  }
0x14b9   :  { %v2764_v19 = vpop.xlane.xlu0 %2763 }
0x14ba   :  { %20460 = vrcp.f32 %v2764_v19 }
0x14bd   :  { %v2767_v20 = vpop.xlane.xlu0 %2766 }
0x14be   :  { %20462 = vrcp.f32 %v2767_v20 }
0x14c1   :  { %v2925_v51 = vpop.permute.xlu0 %2924 }
0x14c4   :  { %v20461_v22 = vpop.eup %20460 }
0x14c5   :  { %v2770_v23 = vmul.f32 %v20461_v22, %v20457_v16 }
0x14c7   :  { %18849 = vmatmul.mubr.msk.f32.vlgmr.msra.gmra.mrb[24].mxu0 %vm273_vm2, %v2770_v23 }
0x14c8   :  { %v20463_v24 = vpop.eup %20462  ;;  %18857 = vmatpush3.xpose.msk.msra.mxu0 %vm273_vm2, %v2927_v21  ;;  %18858 = vmatprep.mubr.msk.f32.mxu0 %vm21019_vm1, %v21018_v8 }
0x14c9   :  { %v2771_v26 = vmul.f32 %v20463_v24, %v20459_v47  ;;  %18866 = vmatprep.subr.mxu0 %v21018_v8  ;;  %v17643_v24 = vld [vmem:[#allocation13] ss:$0 sm:$0xff] }
0x14cb   :  { %18854 = vmatmul.mubr.msk.f32.vlgmr.msra.gmra.mrb[36].mxu1 %vm273_vm2, %v2771_v26  ;;  %18859 = vmatmul.mubr.msk.f32.vlgmr.msra.gmra.mrb[26].mxu0 %vm273_vm2, %v2925_v51 }
0x14cc   :  { %18862 = vmatpush3.xpose.msk.msra.mxu1 %vm273_vm2, %v3005_v25  ;;  %18863 = vmatprep.mubr.msk.f32.mxu1 %vm21019_vm1, %v21018_v8 }
0x14cd   :  { %18871 = vmatprep.subr.mxu1 %v21018_v8  ;;  %18868 = vmatprep.mubr.msk.f32.mxu0 %vm21019_vm1, %v21018_v8 }
0x14cf   :  { %18864 = vmatmul.mubr.msk.f32.vlgmr.msra.gmra.mrb[38].mxu1 %vm273_vm2, %v3003_v28 }
0x14d0   :  { %18873 = vmatprep.mubr.msk.f32.mxu1 %vm21019_vm1, %v21018_v8 }
0x159a   :  { %v2844_v31 = vpop.f32.mrb[24].mxu0 }
0x159b   :  { %v18850_v32 = vpop.f32.mrb[25].mxu0 }
0x159e   :  { %v2920_v33 = vpop.f32.mrb[36].mxu1  ;;  %v2998_v34 = vpop.f32.mrb[26].mxu0 }
0x159f   :  { %v18855_v35 = vpop.f32.mrb[37].mxu1  ;;  %v18860_v36 = vpop.f32.mrb[27].mxu0  ;;  %v3080_v37 = vsel %vm273_vm2, %v2998_v34, -inf }
0x15a0   :  { %3081 = vmax.xlane.f32.xlu0 %v3080_v37 }
0x15a2   :  { %v3076_v39 = vpop.f32.mrb[38].mxu1 }
0x15a3   :  { %v18865_v41 = vpop.f32.mrb[39].mxu1  ;;  %v3083_v42 = vsel %vm273_vm2, %v3076_v39, -inf }
0x15a4   :  { %3084 = vmax.xlane.f32.xlu1 %v3083_v42 }
0x15b5   :  { %3102 = vrot.lane.b32.xlu1 %v21556_v45, %s23958_s3 }
0x15b9   :  { %3256 = vrot.lane.b32.xlu1 %v21648_v49, %s23993_s8 }
0x15bd   :  { %3258 = vrot.lane.b32.xlu1 %v21650_v60, %s23993_s8 }
0x15c1   :  { %3266 = vrot.lane.b32.xlu1 %v2920_v33, %s23997_s27 }
0x162d   :  { %v3082_v44 = vpop.xlane.xlu0 %3081 }
0x162e   :  { %v3086_v46 = vsub.f32 %v2998_v34, %v3082_v44  ;;  %v3416_v44 = vld [vmem:[#allocation14] sm:$0xff] }
0x1630   :  { %v3088_v48 = vmul.f32 1.442695, %v3086_v46  ;;  %v3417_v46 = vld [vmem:[#allocation14 + $0x8] sm:$0xff] }
0x1631   :  { %v3085_v50 = vpop.xlane.xlu1 %3084 }
0x1632   :  { %20464 = vpow2.f32 %v3088_v48  ;;  %v3087_v52 = vsub.f32 %v3076_v39, %v3085_v50  ;;  %v20017_v48 = vpack.c.bf16 %v3417_v46, %v3416_v44  ;;  %v3418_v50 = vld [vmem:[#allocation14 + $0x10] sm:$0xff] }
0x1634   :  { %v3090_v53 = vmul.f32 1.442695, %v3087_v52  ;;  %v3419_v52 = vld [vmem:[#allocation14 + $0x18] sm:$0xff] }
0x1635   :  { %v3103_v54 = vpop.permute.xlu1 %3102 }
0x1636   :  { %20466 = vpow2.f32 %v3090_v53  ;;  %18867 = vmatpush3.msra.mxu0 %v3103_v54  ;;  %v20021_v53 = vpack.c.bf16 %v3419_v52, %v3418_v50  ;;  %v3510_v54 = vld [vmem:[%s23930_s17] sm:$0xff] }
0x1639   :  { %v3257_v10 = vpop.permute.xlu1 %3256 }
0x163a   :  { %v3278_v16 = vsel %vm273_vm2, %v21610_v18, %v3257_v10 }
0x163c   :  { %v20465_v55 = vpop.eup %20464 }
0x163d   :  { %v3092_v45 = vsel %vm273_vm2, %v20465_v55, 0.0  ;;  %v3259_v11 = vpop.permute.xlu1 %3258 }
0x163e   :  { %3093 = vadd.xlane.f32.xlu0 %v3092_v45  ;;  %v3279_v20 = vsel %vm273_vm2, %v21612_v12, %v3259_v11  ;;  %v3512_v45 = vld [vmem:[%s23930_s17 + $0x10] sm:$0xff] }
0x1640   :  { %v20467_v56 = vpop.eup %20466 }
0x1641   :  { %v3095_v57 = vsel %vm273_vm2, %v20467_v56, 0.0  ;;  %v3267_v15 = vpop.permute.xlu1 %3266 }
0x1642   :  { %3096 = vadd.xlane.f32.xlu0 %v3095_v57  ;;  %v3281_v21 = vsel %vm1615_vm4, %v3279_v20, %v3267_v15  ;;  %v3513_v57 = vld [vmem:[%s23930_s17 + $0x18] sm:$0xff] }
0x1658   :  { %3178 = vrot.lane.b32.xlu0 %v21554_v43, %s23958_s3  ;;  %v3284_v43 = vld [vmem:[%s23924_s11] sm:$0xff] }
0x1659   :  { %v20009_v1 = vpack.c.bf16 %v3285_v0, %v3284_v43  ;;  %v3518_v43 = vld [vmem:[%s23930_s17 + $0x40] sm:$0xff]  ;;  %v3519_v0 = vld [vmem:[%s23930_s17 + $0x48] sm:$0xff] }
0x165b   :  { %20010 = vmatprep.subr.bf16.mxu0 %v20009_v1 }
0x165c   :  { %3264 = vrot.lane.b32.xlu0 %v2844_v31, %s23997_s27 }
0x16cb   :  { %v3094_v58 = vpop.xlane.xlu0 %3093 }
0x16cc   :  { %20468 = vrcp.f32 %v3094_v58  ;;  %v20029_v58 = vpack.c.bf16 %v3513_v57, %v3512_v45 }
0x16cf   :  { %v3097_v49 = vpop.xlane.xlu0 %3096 }
0x16d0   :  { %20470 = vrcp.f32 %v3097_v49  ;;  %v3514_v49 = vld [vmem:[%s23930_s17 + $0x20] sm:$0xff] }
0x16d3   :  { %v3179_v59 = vpop.permute.xlu0 %3178 }
0x16d4   :  { %18872 = vmatpush3.msra.mxu1 %v3179_v59  ;;  %v3515_v59 = vld [vmem:[%s23930_s17 + $0x28] sm:$0xff] }
0x16d5   :  { %20018 = vmatprep.subr.bf16.mxu1 %v20017_v48 }
0x16d6   :  { %v20469_v60 = vpop.eup %20468 }
0x16d7   :  { %v3100_v61 = vmul.f32 %v20469_v60, %v20465_v55  ;;  %v3265_v14 = vpop.permute.xlu0 %3264  ;;  %v3511_v55 = vld [vmem:[%s23930_s17 + $0x8] sm:$0xff]  ;;  %v20033_v60 = vpack.c.bf16 %v3515_v59, %v3514_v49 }
0x16d8   :  { %v3280_v47 = vsel %vm1615_vm4, %v3278_v16, %v3265_v14 }
0x16d9   :  { %18869 = vmatmul.mubr.msk.f32.vlgmr.msra.gmra.mrb[28].mxu0 %vm273_vm2, %v3100_v61  ;;  %v3516_v61 = vld [vmem:[%s23930_s17 + $0x30] sm:$0xff] }
0x16da   :  { %v20471_v62 = vpop.eup %20470  ;;  %20012 = vmatpush3.bf16.msra.mxu0 %v20009_v1  ;;  %v20041_v1 = vpack.c.bf16 %v3519_v0, %v3518_v43  ;;  %v17655_v43 = vld [vmem:[%s23998_s6 + $0x38] sm:$0xff] }
0x16db   :  { %v3101_v63 = vmul.f32 %v20471_v62, %v20467_v56  ;;  %20014 = vmatprep.subr.bf16.mxu0 %v20013_v7  ;;  %v20025_v56 = vpack.c.bf16 %v3511_v55, %v3510_v54  ;;  %v3517_v62 = vld [vmem:[%s23930_s17 + $0x38] sm:$0xff] }
0x16dd   :  { %18874 = vmatmul.mubr.msk.f32.vlgmr.msra.gmra.mrb[40].mxu1 %vm273_vm2, %v3101_v63  ;;  %v20037_v63 = vpack.c.bf16 %v3517_v62, %v3516_v61  ;;  %v17653_v61 = vld [vmem:[%s23998_s6 + $0x28] sm:$0xff] }
0x16de   :  { %20016 = vmatpush3.bf16.msra.mxu0 %v20013_v7  ;;  %20020 = vmatpush3.bf16.msra.mxu1 %v20017_v48  ;;  %v20045_v7 = vpack.c.bf16 %v3521_v3, %v3520_v2 }
0x16df   :  { %20022 = vmatprep.subr.bf16.mxu1 %v20021_v53  ;;  %20026 = vmatprep.subr.bf16.mxu0 %v20025_v56 }
0x16e2   :  { %20024 = vmatpush3.bf16.msra.mxu1 %v20021_v53 }
0x17ac   :  { %v3174_v5 = vpop.f32.mrb[28].mxu0 }
0x17ad   :  { %3272 = vrot.lane.b32.xlu0 %v3174_v5, %s23999_s12  ;;  %v18870_v4 = vpop.f32.mrb[29].mxu0  ;;  %v3522_v5 = vld [vmem:[%s23930_s17 + $0x60] sm:$0xff] }
0x17ae   :  { %v3523_v4 = vld [vmem:[%s23930_s17 + $0x68] sm:$0xff] }
0x17b0   :  { %v3250_v6 = vpop.f32.mrb[40].mxu1 }
0x17b1   :  { %3274 = vrot.lane.b32.xlu1 %v3250_v6, %s23999_s12  ;;  %v18875_v9 = vpop.f32.mrb[41].mxu1  ;;  %v20049_v6 = vpack.c.bf16 %v3523_v4, %v3522_v5 }
0x181f   :  { %v3273_v17 = vpop.permute.xlu0 %3272 }
0x1820   :  { %v3282_v19 = vsel %vm1618_vm3, %v3280_v47, %v3273_v17  ;;  %v21783_v47 = vsub.s32 1, %v21522_v27 }
0x1821   :  { %18884 = vmatprep.mubr.msk.f32.mxu0 %vm188_vm0, %v3282_v19 }
0x1822   :  { %v3407_v17 = vrot.slane %v21530_v29, %v21783_v47 }
0x1823   :  { %v3275_v22 = vpop.permute.xlu1 %3274 }
0x1824   :  { %v3283_v23 = vsel %vm1618_vm3, %v3281_v21, %v3275_v22  ;;  %v3413_v21 = vrot.slane %v21535_v30, %v21783_v47 }
0x1825   :  { %18885 = vmatmul.mubr.msk.f32.vlgmr.msra.gmra.mrb[30].mxu0 %vm188_vm0, %v3283_v23 }
0x1826   :  { %20028 = vmatpush3.bf16.msra.mxu0 %v20025_v56 }
0x1827   :  { %20030 = vmatprep.subr.bf16.mxu0 %v20029_v58 }
0x182a   :  { %20032 = vmatpush3.bf16.msra.mxu0 %v20029_v58 }
0x182b   :  { %20034 = vmatprep.subr.bf16.mxu0 %v20033_v60 }
0x182e   :  { %20036 = vmatpush3.bf16.msra.mxu0 %v20033_v60  ;;  %v17652_v60 = vld [vmem:[%s23998_s6 + $0x20] sm:$0xff] }
0x182f   :  { %20038 = vmatprep.subr.bf16.mxu0 %v20037_v63  ;;  %v20057_v62 = vpack.c.bf16 %v17653_v61, %v17652_v60 }
0x1831   :  { %20058 = vmatprep.subr.bf16.mxu1 %v20057_v62 }
0x1832   :  { %20040 = vmatpush3.bf16.msra.mxu0 %v20037_v63  ;;  %v17654_v63 = vld [vmem:[%s23998_s6 + $0x30] sm:$0xff] }
0x1833   :  { %20042 = vmatprep.subr.bf16.mxu0 %v20041_v1  ;;  %v20061_v0 = vpack.c.bf16 %v17655_v43, %v17654_v63 }
0x1836   :  { %20044 = vmatpush3.bf16.msra.mxu0 %v20041_v1 }
0x1837   :  { %20046 = vmatprep.subr.bf16.mxu0 %v20045_v7 }
0x183a   :  { %20048 = vmatpush3.bf16.msra.mxu0 %v20045_v7 }
0x183b   :  { %20050 = vmatprep.subr.bf16.mxu0 %v20049_v6 }
0x183e   :  { %20052 = vmatpush3.bf16.msra.mxu0 %v20049_v6  ;;  %v21826_v6 = vsub.s32 2, %v21522_v27  ;;  %v17656_v27 = vld [vmem:[#allocation8 + $0x1] ss:$0 sm:$0xff] }
0x18f8   :  { %v18886_v18 = vpop.f32.mrb[30].mxu0 }
0x18f9   :  { %v3373_v25 = vadd.f32 %v18886_v18, %v17643_v24  ;;  %v3367_v26 = vpop.f32.mrb[31].mxu0 }
0x18fa   :  { %v3368_v51 = vadd.f32 %v17643_v24, %v3367_v26 }
0x18fb   :  { %v3377_v28 = vadd.f32 %v3373_v25, %v21545_v40 }
0x18fc   :  { %v3376_v31 = vadd.f32 %v3368_v51, %v21541_v38  ;;  %v3524_v51 = vld [vmem:[%s23930_s17 + $0x70] sm:$0xff] }
0x18fd   :  { %v3381_v32 = vsel %vm188_vm0, %v3377_v28, 0.0 }
0x18fe   :  { %3382 = vadd.xlane.f32.xlu1 %v3381_v32  ;;  %v3378_v12 = vsel %vm188_vm0, %v3376_v31, 0.0  ;;  %v17646_v32 = vld [vmem:[%s23929_s16] ss:$0 sm:$0xff] }
0x18ff   :  { %3379 = vadd.xlane.f32.xlu0 %v3378_v12 }
0x198b   :  { %v3383_v33 = vpop.xlane.xlu1 %3382 }
0x198c   :  { %v3385_v34 = vmul.f32 0.03125, %v3383_v33  ;;  %v3380_v35 = vpop.xlane.xlu0 %3379 }
0x198d   :  { %v3384_v36 = vmul.f32 0.03125, %v3380_v35 }
0x198e   :  { %v21730_v37 = vsub.f32 %v3377_v28, %v3385_v34  ;;  %v3525_v28 = vld [vmem:[%s23930_s17 + $0x78] sm:$0xff] }
0x198f   :  { %v21732_v39 = vsub.f32 %v3376_v31, %v3384_v36  ;;  %v20053_v31 = vpack.c.bf16 %v3525_v28, %v3524_v51 }
0x1990   :  { %v3389_v38 = vmul.f32 %v21730_v37, %v21730_v37 }
0x1991   :  { %v3388_v41 = vmul.f32 %v21732_v39, %v21732_v39  ;;  %20054 = vmatprep.subr.bf16.mxu0 %v20053_v31 }
0x1992   :  { %v3393_v42 = vsel %vm188_vm0, %v3389_v38, 0.0  ;;  %20056 = vmatpush3.bf16.msra.mxu0 %v20053_v31 }
0x1993   :  { %v3390_v40 = vsel %vm188_vm0, %v3388_v41, 0.0  ;;  %18974 = vmatprep.subr.mxu0 %v21018_v8 }
0x1994   :  { %3391 = vadd.xlane.f32.xlu0 %v3390_v40 }
0x1998   :  { %3394 = vadd.xlane.f32.xlu0 %v3393_v42 }
0x1a21   :  { %v3392_v9 = vpop.xlane.xlu0 %3391 }
0x1a22   :  { %v3396_v10 = vmul.f32 0.03125, %v3392_v9  ;;  %v3639_v9 = vrot.slane %v21530_v29, %v21826_v6 }
0x1a24   :  { %v3398_v11 = vadd.f32 1e-05, %v3396_v10 }
0x1a25   :  { %v3395_v14 = vpop.xlane.xlu0 %3394 }
0x1a26   :  { %20472 = vrsqrt.f32 %v3398_v11  ;;  %v3397_v16 = vmul.f32 0.03125, %v3395_v14 }
0x1a28   :  { %v3399_v15 = vadd.f32 1e-05, %v3397_v16 }
0x1a2a   :  { %20474 = vrsqrt.f32 %v3399_v15  ;;  %v3645_v15 = vrot.slane %v21535_v30, %v21826_v6 }
0x1a30   :  { %v20473_v19 = vpop.eup %20472 }
0x1a31   :  { %v3402_v20 = vmul.f32 %v20473_v19, %v21732_v39  ;;  %v17649_v39 = vld [vmem:[%s23931_s18] ss:$0 sm:$0xff] }
0x1a33   :  { %v3408_v22 = vmul.f32 %v3407_v17, %v3402_v20 }
0x1a34   :  { %v20475_v23 = vpop.eup %20474 }
0x1a35   :  { %v3403_v24 = vmul.f32 %v20475_v23, %v21730_v37  ;;  %v3414_v18 = vadd.f32 %v3413_v21, %v3408_v22 }
0x1a37   :  { %v3409_v25 = vmul.f32 %v3407_v17, %v3403_v24  ;;  %18895 = vmatprep.mubr.msk.f32.mxu1 %vm188_vm0, %v3414_v18 }
0x1a39   :  { %v3415_v26 = vadd.f32 %v3413_v21, %v3409_v25 }
0x1a3b   :  { %18896 = vmatmul.mubr.msk.f32.vlgmr.msra.gmra.mrb[42].mxu1 %vm188_vm0, %v3415_v26 }
0x1a3c   :  { %20060 = vmatpush3.bf16.msra.mxu1 %v20057_v62 }
0x1a3d   :  { %20062 = vmatprep.subr.bf16.mxu1 %v20061_v0 }
0x1a40   :  { %20064 = vmatpush3.bf16.msra.mxu1 %v20061_v0 }
0x1a41   :  { %18944 = vmatprep.subr.mxu1 %v21018_v8 }
0x1b0e   :  { %v18897_v12 = vpop.f32.mrb[42].mxu1 }
0x1b0f   :  { %v3505_v33 = vadd.f32 %v18897_v12, %v17646_v32  ;;  %v3499_v34 = vpop.f32.mrb[43].mxu1 }
0x1b10   :  { %v3500_v35 = vadd.f32 %v17646_v32, %v3499_v34 }
0x1b11   :  { %v3509_v37 = vmax.f32 %v3505_v33, 0.0 }
0x1b12   :  { %v3508_v36 = vmax.f32 %v3500_v35, 0.0 }
0x1b14   :  { %18930 = vmatprep.mubr.f32.mxu0 %v3508_v36 }
0x1b15   :  { %18931 = vmatmul.mubr.f32.vlgmr.msra.gmra.mrb[32].mxu0 %v3509_v37 }
0x1b16   :  { %18976 = vmatprep.mubr.msk.f32.mxu0 %vm21019_vm1, %v21018_v8 }
0x1be8   :  { %v18932_v41 = vpop.f32.mrb[32].mxu0 }
0x1be9   :  { %v3605_v40 = vadd.f32 %v18932_v41, %v17649_v39  ;;  %v3599_v38 = vpop.f32.mrb[33].mxu0 }
0x1bea   :  { %v3600_v42 = vadd.f32 %v17649_v39, %v3599_v38 }
0x1beb   :  { %v3609_v44 = vadd.f32 %v3605_v40, %v3415_v26  ;;  %v21862_v26 = vld [vmem:[#allocation7] sm:$0xff] }
0x1bec   :  { %v3608_v46 = vadd.f32 %v3600_v42, %v3414_v18 }
0x1bed   :  { %v3613_v48 = vsel %vm188_vm0, %v3609_v44, 0.0 }
0x1bee   :  { %3614 = vadd.xlane.f32.xlu0 %v3613_v48  ;;  %v3610_v50 = vsel %vm188_vm0, %v3608_v46, 0.0 }
0x1bef   :  { %3611 = vadd.xlane.f32.xlu1 %v3610_v50 }
0x1c7b   :  { %v3615_v52 = vpop.xlane.xlu0 %3614 }
0x1c7c   :  { %v3617_v53 = vmul.f32 0.03125, %v3615_v52  ;;  %v3612_v54 = vpop.xlane.xlu1 %3611 }
0x1c7d   :  { %v3616_v55 = vmul.f32 0.03125, %v3612_v54 }
0x1c7e   :  { %v3619_v45 = vsub.f32 %v3609_v44, %v3617_v53 }
0x1c7f   :  { %v3618_v56 = vsub.f32 %v3608_v46, %v3616_v55 }
0x1c80   :  { %v3621_v57 = vmul.f32 %v3619_v45, %v3619_v45 }
0x1c81   :  { %v3620_v58 = vmul.f32 %v3618_v56, %v3618_v56 }
0x1c82   :  { %v3625_v49 = vsel %vm188_vm0, %v3621_v57, 0.0 }
0x1c83   :  { %3626 = vadd.xlane.f32.xlu0 %v3625_v49  ;;  %v3622_v59 = vsel %vm188_vm0, %v3620_v58, 0.0 }
0x1c84   :  { %3623 = vadd.xlane.f32.xlu1 %v3622_v59 }
0x1d10   :  { %v3627_v1 = vpop.xlane.xlu0 %3626 }
0x1d11   :  { %v3629_v2 = vmul.f32 0.03125, %v3627_v1  ;;  %v3624_v3 = vpop.xlane.xlu1 %3623 }
0x1d12   :  { %v3628_v7 = vmul.f32 0.03125, %v3624_v3 }
0x1d13   :  { %v3631_v5 = vadd.f32 1e-05, %v3629_v2 }
0x1d14   :  { %v3630_v4 = vadd.f32 1e-05, %v3628_v7 }
0x1d15   :  { %20476 = vrsqrt.f32 %v3631_v5 }
0x1d16   :  { %20478 = vrsqrt.f32 %v3630_v4 }
0x1d1f   :  { %v20477_v10 = vpop.eup %20476 }
0x1d20   :  { %v20479_v11 = vpop.eup %20478  ;;  %v3635_v14 = vmul.f32 %v20477_v10, %v3619_v45 }
0x1d21   :  { %v3634_v16 = vmul.f32 %v20479_v11, %v3618_v56 }
0x1d22   :  { %v3641_v17 = vmul.f32 %v3639_v9, %v3635_v14 }
0x1d23   :  { %v3640_v19 = vmul.f32 %v3639_v9, %v3634_v16 }
0x1d24   :  { %v21834_v21 = vadd.f32 %v3645_v15, %v3641_v17 }
0x1d25   :  { %v21832_v20 = vadd.f32 %v3645_v15, %v3640_v19 }
0x1d27   :  { %18941 = vmatprep.mubr.msk.f32.mxu1 %vm188_vm0, %v21832_v20 }
0x1d28   :  { %18942 = vmatmul.mubr.msk.f32.vlgmr.msra.gmra.mrb[44].mxu1 %vm188_vm0, %v21834_v21 }
0x1d29   :  { %18946 = vmatprep.mubr.msk.f32.mxu1 %vm21019_vm1, %v21018_v8 }
0x1dfb   :  { %v18943_v29 = vpop.f32.mrb[44].mxu1 }
0x1dfc   :  { %v21842_v22 = vadd.f32 %v18943_v29, %v17656_v27  ;;  %v3737_v30 = vpop.f32.mrb[45].mxu1 }
0x1dfd   :  { %v21844_v23 = vadd.f32 %v17656_v27, %v3737_v30 }
0x1dfe   :  { %3824 = vrot.lane.b32.xlu0 %v21842_v22, %s23968_s21 }
0x1dff   :  { %3747 = vrot.lane.b32.xlu1 %v21844_v23, %s23968_s21 }
0x1e70   :  { %v3825_v18 = vpop.permute.xlu0 %3824 }
0x1e71   :  { %v3748_v24 = vpop.permute.xlu1 %3747 }
0x1e72   :  { %18945 = vmatpush3.xpose.msk.msra.mxu1 %vm273_vm2, %v3748_v24 }
0x1e73   :  { %18949 = vmatprep.subr.mxu1 %v21018_v8 }
0x1e75   :  { %18947 = vmatmul.mubr.msk.f32.vlgmr.msra.gmra.mrb[46].mxu1 %vm273_vm2, %v21844_v23 }
0x1e76   :  { %18950 = vmatpush3.xpose.msk.msra.mxu1 %vm273_vm2, %v3825_v18  ;;  %18951 = vmatprep.mubr.msk.f32.mxu1 %vm21019_vm1, %v21018_v8 }
0x1e77   :  { %18954 = vmatprep.subr.mxu1 %v21018_v8 }
0x1e79   :  { %18952 = vmatmul.mubr.msk.f32.vlgmr.msra.gmra.mrb[48].mxu1 %vm273_vm2, %v21842_v22 }
0x1e7a   :  { %18956 = vmatprep.mubr.msk.f32.mxu1 %vm21019_vm1, %v21018_v8 }
0x1f48   :  { %v3819_v25 = vpop.f32.mrb[46].mxu1 }
0x1f49   :  { %v3820_v51 = vadd.f32 %v21862_v26, %v3819_v25  ;;  %v18948_v28 = vpop.f32.mrb[47].mxu1 }
0x1f4b   :  { %v3900_v31 = vsel %vm273_vm2, %v3820_v51, -inf }
0x1f4c   :  { %3901 = vmax.xlane.f32.xlu1 %v3900_v31  ;;  %v3896_v32 = vpop.f32.mrb[48].mxu1 }
0x1f4d   :  { %v3897_v12 = vadd.f32 %v21862_v26, %v3896_v32  ;;  %v18953_v33 = vpop.f32.mrb[49].mxu1 }
0x1f4f   :  { %v3903_v34 = vsel %vm273_vm2, %v3897_v12, -inf }
0x1f50   :  { %3904 = vmax.xlane.f32.xlu0 %v3903_v34 }
0x1f5d   :  { %3922 = vrot.lane.b32.xlu1 %v21844_v23, %s24000_s20 }
0x1fd9   :  { %v3902_v35 = vpop.xlane.xlu1 %3901 }
0x1fda   :  { %v3906_v36 = vsub.f32 %v3820_v51, %v3902_v35 }
0x1fdc   :  { %v3908_v37 = vmul.f32 1.442695, %v3906_v36 }
0x1fdd   :  { %v3923_v39 = vpop.permute.xlu1 %3922  ;;  %v3905_v41 = vpop.xlane.xlu0 %3904 }
0x1fde   :  { %20480 = vpow2.f32 %v3908_v37  ;;  %v3907_v40 = vsub.f32 %v3897_v12, %v3905_v41  ;;  %18955 = vmatpush3.msra.mxu1 %v3923_v39 }
0x1fdf   :  { %18959 = vmatprep.subr.mxu1 %v21018_v8 }
0x1fe0   :  { %v3910_v38 = vmul.f32 1.442695, %v3907_v40 }
0x1fe2   :  { %20482 = vpow2.f32 %v3910_v38 }
0x1fe8   :  { %v20481_v42 = vpop.eup %20480 }
0x1fe9   :  { %v3912_v44 = vsel %vm273_vm2, %v20481_v42, 0.0 }
0x1fea   :  { %3913 = vadd.xlane.f32.xlu1 %v3912_v44 }
0x1fec   :  { %v20483_v46 = vpop.eup %20482 }
0x1fed   :  { %v3915_v48 = vsel %vm273_vm2, %v20483_v46, 0.0 }
0x1fee   :  { %3916 = vadd.xlane.f32.xlu0 %v3915_v48 }
0x1ffb   :  { %4076 = vrot.lane.b32.xlu1 %v21844_v23, %s23964_s22 }
0x1fff   :  { %4074 = vrot.lane.b32.xlu1 %v21844_v23, %s23966_s2 }
0x2003   :  { %4152 = vrot.lane.b32.xlu1 %v21842_v22, %s23966_s2  ;;  %s24011_s2 = sld [smem:[#allocation30_spill]] }
0x2004   :  { %3998 = vrot.lane.b32.xlu0 %v21842_v22, %s24000_s20 }
0x2008   :  { %4154 = vrot.lane.b32.xlu0 %v21842_v22, %s23964_s22  ;;  %s24009_s22 = smov 72  }
0x2077   :  { %v3914_v50 = vpop.xlane.xlu1 %3913 }
0x2078   :  { %20484 = vrcp.f32 %v3914_v50 }
0x207b   :  { %v3917_v52 = vpop.xlane.xlu0 %3916  ;;  %v4077_v56 = vpop.permute.xlu1 %4076 }
0x207c   :  { %20486 = vrcp.f32 %v3917_v52 }
0x207f   :  { %v3999_v55 = vpop.permute.xlu0 %3998  ;;  %v4075_v58 = vpop.permute.xlu1 %4074 }
0x2082   :  { %v20485_v53 = vpop.eup %20484 }
0x2083   :  { %v3920_v54 = vmul.f32 %v20485_v53, %v20481_v42  ;;  %v4155_v49 = vpop.permute.xlu0 %4154  ;;  %v4153_v59 = vpop.permute.xlu1 %4152 }
0x2085   :  { %18957 = vmatmul.mubr.msk.f32.vlgmr.msra.gmra.mrb[50].mxu1 %vm273_vm2, %v3920_v54 }
0x2086   :  { %v20487_v45 = vpop.eup %20486  ;;  %18960 = vmatpush3.msra.mxu1 %v3999_v55  ;;  %18961 = vmatprep.mubr.msk.f32.mxu1 %vm21019_vm1, %v21018_v8 }
0x2087   :  { %v3921_v57 = vmul.f32 %v20487_v45, %v20483_v46  ;;  %18964 = vmatprep.subr.mxu1 %v21018_v8 }
0x2089   :  { %18962 = vmatmul.mubr.msk.f32.vlgmr.msra.gmra.mrb[52].mxu1 %vm273_vm2, %v3921_v57 }
0x208a   :  { %18966 = vmatprep.mubr.msk.f32.mxu1 %vm21019_vm1, %v21018_v8 }
0x208d   :  { %18965 = vmatpush3.xpose.msk.msra.mxu1 %vm273_vm2, %v4077_v56 }
0x208e   :  { %18969 = vmatprep.subr.mxu1 %v21018_v8 }
0x2090   :  { %18967 = vmatmul.mubr.msk.f32.vlgmr.msra.gmra.mrb[54].mxu1 %vm273_vm2, %v4075_v58 }
0x2091   :  { %18970 = vmatpush3.xpose.msk.msra.mxu1 %vm273_vm2, %v4155_v49  ;;  %18971 = vmatprep.mubr.msk.f32.mxu1 %vm21019_vm1, %v21018_v8 }
0x2092   :  { %18979 = vmatprep.subr.mxu1 %v21018_v8 }
0x2094   :  { %18972 = vmatmul.mubr.msk.f32.vlgmr.msra.gmra.mrb[56].mxu1 %vm273_vm2, %v4153_v59 }
0x2095   :  { %18981 = vmatprep.mubr.msk.f32.mxu1 %vm21019_vm1, %v21018_v8 }
0x2158   :  { %v21900_v60 = vpop.f32.mrb[50].mxu1 }
0x2159   :  { %v18958_v61 = vpop.f32.mrb[51].mxu1 }
0x215c   :  { %v21902_v62 = vpop.f32.mrb[52].mxu1 }
0x215d   :  { %v18963_v63 = vpop.f32.mrb[53].mxu1 }
0x2163   :  { %v4148_v43 = vpop.f32.mrb[54].mxu1 }
0x2164   :  { %v4149_v0 = vadd.f32 %v21862_v26, %v4148_v43  ;;  %v18968_v1 = vpop.f32.mrb[55].mxu1 }
0x2166   :  { %v4230_v2 = vsel %vm273_vm2, %v4149_v0, -inf }
0x2167   :  { %4231 = vmax.xlane.f32.xlu0 %v4230_v2  ;;  %v4226_v3 = vpop.f32.mrb[56].mxu1 }
0x2168   :  { %v4227_v7 = vadd.f32 %v21862_v26, %v4226_v3  ;;  %v18973_v5 = vpop.f32.mrb[57].mxu1 }
0x216a   :  { %v4233_v4 = vsel %vm273_vm2, %v4227_v7, -inf }
0x216b   :  { %4234 = vmax.xlane.f32.xlu1 %v4233_v4 }
0x217c   :  { %4252 = vrot.lane.b32.xlu1 %v21844_v23, %s24001_s1 }
0x217d   :  { %4328 = vrot.lane.b32.xlu0 %v21842_v22, %s24001_s1 }
0x2180   :  { %4406 = vrot.lane.b32.xlu1 %v21844_v23, %s23960_s24 }
0x2184   :  { %4484 = vrot.lane.b32.xlu1 %v21842_v22, %s23960_s24 }
0x2188   :  { %4482 = vrot.lane.b32.xlu1 %v21842_v22, %s23962_s26 }
0x21f4   :  { %v4232_v9 = vpop.xlane.xlu0 %4231 }
0x21f5   :  { %v4236_v10 = vsub.f32 %v4149_v0, %v4232_v9 }
0x21f7   :  { %v4238_v11 = vmul.f32 1.442695, %v4236_v10 }
0x21f8   :  { %v4329_v14 = vpop.permute.xlu0 %4328  ;;  %v4235_v16 = vpop.xlane.xlu1 %4234 }
0x21f9   :  { %20488 = vpow2.f32 %v4238_v11  ;;  %v4237_v15 = vsub.f32 %v4227_v7, %v4235_v16  ;;  %18980 = vmatpush3.msra.mxu1 %v4329_v14 }
0x21fa   :  { %18989 = vmatprep.subr.mxu1 %v21018_v8 }
0x21fb   :  { %v4240_v17 = vmul.f32 1.442695, %v4237_v15 }
0x21fc   :  { %v4253_v19 = vpop.permute.xlu1 %4252 }
0x21fd   :  { %20490 = vpow2.f32 %v4240_v17  ;;  %18975 = vmatpush3.msra.mxu0 %v4253_v19 }
0x21fe   :  { %18984 = vmatprep.subr.mxu0 %v21018_v8 }
0x2200   :  { %v4407_v51 = vpop.permute.xlu1 %4406 }
0x2203   :  { %v20489_v27 = vpop.eup %20488 }
0x2204   :  { %v4242_v29 = vsel %vm273_vm2, %v20489_v27, 0.0  ;;  %v4485_v12 = vpop.permute.xlu1 %4484 }
0x2205   :  { %4243 = vadd.xlane.f32.xlu0 %v4242_v29 }
0x2207   :  { %v20491_v30 = vpop.eup %20490 }
0x2208   :  { %v4245_v24 = vsel %vm273_vm2, %v20491_v30, 0.0  ;;  %v4483_v35 = vpop.permute.xlu1 %4482 }
0x2209   :  { %4246 = vadd.xlane.f32.xlu0 %v4245_v24 }
0x221f   :  { %4404 = vrot.lane.b32.xlu0 %v21844_v23, %s23962_s26 }
0x2292   :  { %v4244_v18 = vpop.xlane.xlu0 %4243 }
0x2293   :  { %20492 = vrcp.f32 %v4244_v18 }
0x2296   :  { %v4247_v25 = vpop.xlane.xlu0 %4246 }
0x2297   :  { %20494 = vrcp.f32 %v4247_v25 }
0x229a   :  { %v4405_v34 = vpop.permute.xlu0 %4404 }
0x229d   :  { %v20493_v28 = vpop.eup %20492 }
0x229e   :  { %v4250_v31 = vmul.f32 %v20493_v28, %v20489_v27 }
0x22a0   :  { %18977 = vmatmul.mubr.msk.f32.vlgmr.msra.gmra.mrb[34].mxu0 %vm273_vm2, %v4250_v31 }
0x22a1   :  { %v20495_v32 = vpop.eup %20494  ;;  %18985 = vmatpush3.xpose.msk.msra.mxu0 %vm273_vm2, %v4407_v51  ;;  %18986 = vmatprep.mubr.msk.f32.mxu0 %vm21019_vm1, %v21018_v8 }
0x22a2   :  { %v4251_v33 = vmul.f32 %v20495_v32, %v20491_v30  ;;  %18994 = vmatprep.subr.mxu0 %v21018_v8 }
0x22a4   :  { %18982 = vmatmul.mubr.msk.f32.vlgmr.msra.gmra.mrb[58].mxu1 %vm273_vm2, %v4251_v33  ;;  %18987 = vmatmul.mubr.msk.f32.vlgmr.msra.gmra.mrb[36].mxu0 %vm273_vm2, %v4405_v34 }
0x22a5   :  { %18990 = vmatpush3.xpose.msk.msra.mxu1 %vm273_vm2, %v4485_v12  ;;  %18991 = vmatprep.mubr.msk.f32.mxu1 %vm21019_vm1, %v21018_v8 }
0x22a6   :  { %18999 = vmatprep.subr.mxu1 %v21018_v8  ;;  %18996 = vmatprep.mubr.msk.f32.mxu0 %vm21019_vm1, %v21018_v8 }
0x22a8   :  { %18992 = vmatmul.mubr.msk.f32.vlgmr.msra.gmra.mrb[60].mxu1 %vm273_vm2, %v4483_v35 }
0x22a9   :  { %19001 = vmatprep.mubr.msk.f32.mxu1 %vm21019_vm1, %v21018_v8 }
0x2373   :  { %v21940_v36 = vpop.f32.mrb[34].mxu0 }
0x2374   :  { %v18978_v37 = vpop.f32.mrb[35].mxu0 }
0x2377   :  { %v21942_v39 = vpop.f32.mrb[58].mxu1  ;;  %v4478_v41 = vpop.f32.mrb[36].mxu0 }
0x2378   :  { %v4479_v40 = vadd.f32 %v21862_v26, %v4478_v41  ;;  %v18983_v38 = vpop.f32.mrb[59].mxu1  ;;  %v18988_v42 = vpop.f32.mrb[37].mxu0 }
0x237a   :  { %v4560_v44 = vsel %vm273_vm2, %v4479_v40, -inf }
0x237b   :  { %4561 = vmax.xlane.f32.xlu0 %v4560_v44  ;;  %v4556_v46 = vpop.f32.mrb[60].mxu1 }
0x237c   :  { %v4557_v48 = vadd.f32 %v21862_v26, %v4556_v46  ;;  %v18993_v50 = vpop.f32.mrb[61].mxu1 }
0x237e   :  { %v4563_v52 = vsel %vm273_vm2, %v4557_v48, -inf }
0x237f   :  { %4564 = vmax.xlane.f32.xlu1 %v4563_v52  ;;  %v17685_v52 = vld [vmem:[%s23918_s5 + $0x30] sm:$0xff] }
0x2390   :  { %4582 = vrot.lane.b32.xlu1 %v21844_v23, %s24002_s4 }
0x2391   :  { %4658 = vrot.lane.b32.xlu0 %v21842_v22, %s24002_s4 }
0x2394   :  { %4736 = vrot.lane.b32.xlu1 %v21844_v23, %s23958_s3 }
0x2398   :  { %4814 = vrot.lane.b32.xlu1 %v21842_v22, %s23958_s3  ;;  %s24005_s3 = smov 120  }
0x239c   :  { %4812 = vrot.lane.b32.xlu1 %v21842_v22, %s24003_s19 }
0x2408   :  { %v4562_v53 = vpop.xlane.xlu0 %4561 }
0x2409   :  { %v4566_v54 = vsub.f32 %v4479_v40, %v4562_v53  ;;  %v17686_v53 = vld [vmem:[%s23918_s5 + $0x38] sm:$0xff] }
0x240b   :  { %v4568_v55 = vmul.f32 1.442695, %v4566_v54  ;;  %v20069_v54 = vpack.c.bf16 %v17686_v53, %v17685_v52 }
0x240c   :  { %v4659_v45 = vpop.permute.xlu0 %4658  ;;  %v4565_v56 = vpop.xlane.xlu1 %4564 }
0x240d   :  { %20496 = vpow2.f32 %v4568_v55  ;;  %v4567_v57 = vsub.f32 %v4557_v48, %v4565_v56  ;;  %19000 = vmatpush3.msra.mxu1 %v4659_v45  ;;  %v17684_v48 = vld [vmem:[%s23918_s5 + $0x28] sm:$0xff] }
0x240e   :  { %19009 = vmatprep.subr.mxu1 %v21018_v8 }
0x240f   :  { %v4570_v58 = vmul.f32 1.442695, %v4567_v57 }
0x2410   :  { %v4583_v49 = vpop.permute.xlu1 %4582 }
0x2411   :  { %20498 = vpow2.f32 %v4570_v58  ;;  %18995 = vmatpush3.msra.mxu0 %v4583_v49 }
0x2412   :  { %19004 = vmatprep.subr.mxu0 %v21018_v8 }
0x2414   :  { %v4737_v2 = vpop.permute.xlu1 %4736 }
0x2417   :  { %v20497_v59 = vpop.eup %20496 }
0x2418   :  { %v4572_v61 = vsel %vm273_vm2, %v20497_v59, 0.0  ;;  %v4815_v4 = vpop.permute.xlu1 %4814 }
0x2419   :  { %4573 = vadd.xlane.f32.xlu0 %v4572_v61 }
0x241b   :  { %v20499_v63 = vpop.eup %20498 }
0x241c   :  { %v4575_v43 = vsel %vm273_vm2, %v20499_v63, 0.0  ;;  %v4813_v11 = vpop.permute.xlu1 %4812 }
0x241d   :  { %4576 = vadd.xlane.f32.xlu0 %v4575_v43 }
0x2433   :  { %4734 = vrot.lane.b32.xlu0 %v21844_v23, %s24003_s19 }
0x24a6   :  { %v4574_v0 = vpop.xlane.xlu0 %4573 }
0x24a7   :  { %20500 = vrcp.f32 %v4574_v0 }
0x24aa   :  { %v4577_v1 = vpop.xlane.xlu0 %4576 }
0x24ab   :  { %20502 = vrcp.f32 %v4577_v1 }
0x24ae   :  { %v4735_v10 = vpop.permute.xlu0 %4734 }
0x24b1   :  { %v20501_v3 = vpop.eup %20500 }
0x24b2   :  { %v4580_v7 = vmul.f32 %v20501_v3, %v20497_v59 }
0x24b4   :  { %18997 = vmatmul.mubr.msk.f32.vlgmr.msra.gmra.mrb[38].mxu0 %vm273_vm2, %v4580_v7 }
0x24b5   :  { %v20503_v5 = vpop.eup %20502  ;;  %19005 = vmatpush3.xpose.msk.msra.mxu0 %vm273_vm2, %v4737_v2  ;;  %19006 = vmatprep.mubr.msk.f32.mxu0 %vm21019_vm1, %v21018_v8 }
0x24b6   :  { %v4581_v9 = vmul.f32 %v20503_v5, %v20499_v63  ;;  %19014 = vmatprep.subr.mxu0 %v21018_v8 }
0x24b8   :  { %19002 = vmatmul.mubr.msk.f32.vlgmr.msra.gmra.mrb[62].mxu1 %vm273_vm2, %v4581_v9  ;;  %19007 = vmatmul.mubr.msk.f32.vlgmr.msra.gmra.mrb[40].mxu0 %vm273_vm2, %v4735_v10 }
0x24b9   :  { %19010 = vmatpush3.xpose.msk.msra.mxu1 %vm273_vm2, %v4815_v4  ;;  %19011 = vmatprep.mubr.msk.f32.mxu1 %vm21019_vm1, %v21018_v8  ;;  %v20785_v4 = vld [vmem:[#allocation2] sm:$0xff] }
0x24ba   :  { %19019 = vmatprep.subr.mxu1 %v21018_v8  ;;  %19016 = vmatprep.mubr.msk.f32.mxu0 %vm21019_vm1, %v21018_v8 }
0x24bc   :  { %19012 = vmatmul.mubr.msk.f32.vlgmr.msra.gmra.mrb[64].mxu1 %vm273_vm2, %v4813_v11 }
0x24bd   :  { %19021 = vmatprep.mubr.msk.f32.mxu1 %vm21019_vm1, %v21018_v8 }
0x2587   :  { %v4654_v14 = vpop.f32.mrb[38].mxu0 }
0x2588   :  { %v18998_v16 = vpop.f32.mrb[39].mxu0 }
0x258b   :  { %v4730_v15 = vpop.f32.mrb[62].mxu1  ;;  %v4808_v17 = vpop.f32.mrb[40].mxu0 }
0x258c   :  { %v4809_v19 = vadd.f32 %v21862_v26, %v4808_v17  ;;  %v19003_v27 = vpop.f32.mrb[63].mxu1  ;;  %v19008_v29 = vpop.f32.mrb[41].mxu0 }
0x258e   :  { %v4890_v30 = vsel %vm273_vm2, %v4809_v19, -inf }
0x258f   :  { %4891 = vmax.xlane.f32.xlu0 %v4890_v30  ;;  %v4886_v24 = vpop.f32.mrb[64].mxu1 }
0x2590   :  { %v4887_v18 = vadd.f32 %v21862_v26, %v4886_v24  ;;  %v19013_v25 = vpop.f32.mrb[65].mxu1 }
0x2592   :  { %v4893_v51 = vsel %vm273_vm2, %v4887_v18, -inf }
0x2593   :  { %4894 = vmax.xlane.f32.xlu1 %v4893_v51 }
0x25a4   :  { %4912 = vrot.lane.b32.xlu1 %v21844_v23, %s24004_s25 }
0x25a8   :  { %5066 = vrot.lane.b32.xlu1 %v21940_v36, %s23993_s8 }
0x25ac   :  { %5068 = vrot.lane.b32.xlu1 %v21942_v39, %s23993_s8 }
0x25b0   :  { %5076 = vrot.lane.b32.xlu1 %v4730_v15, %s23997_s27 }
0x261c   :  { %v4892_v28 = vpop.xlane.xlu0 %4891 }
0x261d   :  { %v4896_v31 = vsub.f32 %v4809_v19, %v4892_v28 }
0x261f   :  { %v4898_v32 = vmul.f32 1.442695, %v4896_v31  ;;  %v17698_v31 = vld [vmem:[%s23922_s9 + $0x28] sm:$0xff] }
0x2620   :  { %v4895_v12 = vpop.xlane.xlu1 %4894 }
0x2621   :  { %20504 = vpow2.f32 %v4898_v32  ;;  %v4897_v26 = vsub.f32 %v4887_v18, %v4895_v12  ;;  %v17690_v12 = vld [vmem:[%s23920_s7 + $0x20] sm:$0xff] }
0x2623   :  { %v4900_v33 = vmul.f32 1.442695, %v4897_v26  ;;  %v17691_v26 = vld [vmem:[%s23920_s7 + $0x28] sm:$0xff] }
0x2624   :  { %v4913_v34 = vpop.permute.xlu1 %4912 }
0x2625   :  { %20506 = vpow2.f32 %v4900_v33  ;;  %19015 = vmatpush3.msra.mxu0 %v4913_v34  ;;  %v17699_v33 = vld [vmem:[%s23922_s9 + $0x30] sm:$0xff]  ;;  %v20073_v34 = vpack.c.bf16 %v17691_v26, %v17690_v12 }
0x2628   :  { %v5067_v58 = vpop.permute.xlu1 %5066 }
0x2629   :  { %v5088_v61 = vsel %vm273_vm2, %v21900_v60, %v5067_v58  ;;  %v17687_v60 = vld [vmem:[#allocation10 + $0x1] ss:$0 sm:$0xff] }
0x262b   :  { %v20505_v35 = vpop.eup %20504 }
0x262c   :  { %v4902_v23 = vsel %vm273_vm2, %v20505_v35, 0.0  ;;  %v5069_v49 = vpop.permute.xlu1 %5068 }
0x262d   :  { %4903 = vadd.xlane.f32.xlu0 %v4902_v23  ;;  %v5089_v2 = vsel %vm273_vm2, %v21902_v62, %v5069_v49 }
0x262f   :  { %v20507_v36 = vpop.eup %20506 }
0x2630   :  { %v4905_v37 = vsel %vm273_vm2, %v20507_v36, 0.0  ;;  %v5077_v63 = vpop.permute.xlu1 %5076 }
0x2631   :  { %4906 = vadd.xlane.f32.xlu0 %v4905_v37  ;;  %v5091_v3 = vsel %vm1615_vm4, %v5089_v2, %v5077_v63  ;;  %v17693_v37 = vld [vmem:[%s23920_s7 + $0x38] sm:$0xff]  ;;  %v17694_v2 = vld [vmem:[#allocation11 + $0x1] ss:$0 sm:$0xff] }
0x2647   :  { %4988 = vrot.lane.b32.xlu0 %v21842_v22, %s24004_s25  ;;  %v17683_v22 = vld [vmem:[%s23918_s5 + $0x20] sm:$0xff] }
0x2648   :  { %v20065_v50 = vpack.c.bf16 %v17684_v48, %v17683_v22  ;;  %v22061_v48 = vld [vmem:[%s23926_s13 + $0x4] sm:$0x7] }
0x2649   :  { %v5219_v52 = vrot.slane %v22061_v48, %v21525_v13 }
0x264a   :  { %20066 = vmatprep.subr.bf16.mxu0 %v20065_v50 }
0x264b   :  { %5074 = vrot.lane.b32.xlu0 %v4654_v14, %s23997_s27 }
0x26ba   :  { %v4904_v39 = vpop.xlane.xlu0 %4903 }
0x26bb   :  { %20508 = vrcp.f32 %v4904_v39 }
0x26be   :  { %v4907_v41 = vpop.xlane.xlu0 %4906 }
0x26bf   :  { %20510 = vrcp.f32 %v4907_v41  ;;  %v20786_v41 = vld [vmem:[#allocation2 + $0x8] sm:$0xff] }
0x26c2   :  { %v4989_v40 = vpop.permute.xlu0 %4988 }
0x26c3   :  { %19020 = vmatpush3.msra.mxu1 %v4989_v40 }
0x26c4   :  { %20074 = vmatprep.subr.bf16.mxu1 %v20073_v34 }
0x26c5   :  { %v20509_v38 = vpop.eup %20508 }
0x26c6   :  { %v4910_v42 = vmul.f32 %v20509_v38, %v20505_v35  ;;  %v5075_v59 = vpop.permute.xlu0 %5074  ;;  %v17700_v35 = vld [vmem:[%s23922_s9 + $0x38] sm:$0xff] }
0x26c7   :  { %v5090_v43 = vsel %vm1615_vm4, %v5088_v61, %v5075_v59  ;;  %v20085_v23 = vpack.c.bf16 %v17700_v35, %v17699_v33  ;;  %v17702_v61 = vld [vmem:[%s23923_s10 + $0x1] ss:$0 sm:$0xff]  ;;  %s24015_s10 = sld [smem:[#allocation30_spill]] }
0x26c8   :  { %19017 = vmatmul.mubr.msk.f32.vlgmr.msra.gmra.mrb[42].mxu0 %vm273_vm2, %v4910_v42 }
0x26c9   :  { %v20511_v44 = vpop.eup %20510  ;;  %20068 = vmatpush3.bf16.msra.mxu0 %v20065_v50  ;;  %v22066_v50 = vld [vmem:[%s23927_s14 + $0x4] sm:$0x7]  ;;  %s24012_s14 = sld [smem:[#allocation28_spill]] }
0x26ca   :  { %v4911_v46 = vmul.f32 %v20511_v44, %v20507_v36  ;;  %20070 = vmatprep.subr.bf16.mxu0 %v20069_v54  ;;  %v17692_v36 = vld [vmem:[%s23920_s7 + $0x30] sm:$0xff] }
0x26cb   :  { %v20077_v39 = vpack.c.bf16 %v17693_v37, %v17692_v36 }
0x26cc   :  { %19022 = vmatmul.mubr.msk.f32.vlgmr.msra.gmra.mrb[66].mxu1 %vm273_vm2, %v4911_v46 }
0x26cd   :  { %20072 = vmatpush3.bf16.msra.mxu0 %v20069_v54  ;;  %20076 = vmatpush3.bf16.msra.mxu1 %v20073_v34 }
0x26ce   :  { %20078 = vmatprep.subr.bf16.mxu1 %v20077_v39 }
0x26d1   :  { %20080 = vmatpush3.bf16.msra.mxu1 %v20077_v39 }
0x26d2   :  { %19057 = vmatprep.subr.mxu1 %v21018_v8 }
0x279b   :  { %v4984_v55 = vpop.f32.mrb[42].mxu0 }
0x279c   :  { %5082 = vrot.lane.b32.xlu0 %v4984_v55, %s23999_s12  ;;  %v19018_v45 = vpop.f32.mrb[43].mxu0  ;;  %v5225_v55 = vrot.slane %v22066_v50, %v21525_v13 }
0x279f   :  { %v5060_v56 = vpop.f32.mrb[66].mxu1 }
0x27a0   :  { %5084 = vrot.lane.b32.xlu1 %v5060_v56, %s23999_s12  ;;  %v19023_v57 = vpop.f32.mrb[67].mxu1 }
0x280e   :  { %v5083_v0 = vpop.permute.xlu0 %5082 }
0x280f   :  { %v5092_v1 = vsel %vm1618_vm3, %v5090_v43, %v5083_v0 }
0x2810   :  { %19032 = vmatprep.mubr.msk.f32.mxu0 %vm188_vm0, %v5092_v1 }
0x2812   :  { %v5085_v7 = vpop.permute.xlu1 %5084 }
0x2813   :  { %v5093_v5 = vsel %vm1618_vm3, %v5091_v3, %v5085_v7 }
0x2814   :  { %19033 = vmatmul.mubr.msk.f32.vlgmr.msra.gmra.mrb[44].mxu0 %vm188_vm0, %v5093_v5 }
0x2815   :  { %19054 = vmatprep.mubr.msk.f32.mxu0 %vm188_vm0, %v20785_v4 }
0x28e7   :  { %v19034_v9 = vpop.f32.mrb[44].mxu0 }
0x28e8   :  { %v5185_v10 = vadd.f32 %v19034_v9, %v17687_v60  ;;  %v5179_v11 = vpop.f32.mrb[45].mxu0 }
0x28e9   :  { %v5180_v14 = vadd.f32 %v17687_v60, %v5179_v11 }
0x28ea   :  { %v5189_v16 = vadd.f32 %v5185_v10, %v21834_v21 }
0x28eb   :  { %v5188_v15 = vadd.f32 %v5180_v14, %v21832_v20  ;;  %v17697_v20 = vld [vmem:[%s23922_s9 + $0x20] sm:$0xff] }
0x28ec   :  { %v5193_v62 = vsel %vm188_vm0, %v5189_v16, 0.0  ;;  %v20081_v32 = vpack.c.bf16 %v17698_v31, %v17697_v20 }
0x28ed   :  { %5194 = vadd.xlane.f32.xlu1 %v5193_v62  ;;  %v5190_v17 = vsel %vm188_vm0, %v5188_v15, 0.0 }
0x28ee   :  { %5191 = vadd.xlane.f32.xlu0 %v5190_v17  ;;  %20082 = vmatprep.subr.bf16.mxu0 %v20081_v32 }
0x28ef   :  { %20084 = vmatpush3.bf16.msra.mxu0 %v20081_v32 }
0x28f0   :  { %20086 = vmatprep.subr.bf16.mxu0 %v20085_v23 }
0x28f3   :  { %20088 = vmatpush3.bf16.msra.mxu0 %v20085_v23 }
0x28f4   :  { %19067 = vmatprep.subr.mxu0 %v21018_v8 }
0x28f6   :  { %19055 = vmatmul.mubr.msk.f32.vlgmr.msra.gmra.mrb[46].mxu0 %vm188_vm0, %v20786_v41 }
0x28f7   :  { %19069 = vmatprep.mubr.msk.f32.mxu0 %vm21019_vm1, %v21018_v8 }
0x297a   :  { %v5195_v19 = vpop.xlane.xlu1 %5194 }
0x297b   :  { %v5197_v27 = vmul.f32 0.03125, %v5195_v19  ;;  %v5192_v29 = vpop.xlane.xlu0 %5191 }
0x297c   :  { %v5196_v30 = vmul.f32 0.03125, %v5192_v29 }
0x297d   :  { %v5199_v24 = vsub.f32 %v5189_v16, %v5197_v27 }
0x297e   :  { %v5198_v18 = vsub.f32 %v5188_v15, %v5196_v30 }
0x297f   :  { %v5201_v28 = vmul.f32 %v5199_v24, %v5199_v24 }
0x2980   :  { %v5200_v25 = vmul.f32 %v5198_v18, %v5198_v18 }
0x2981   :  { %v5205_v21 = vsel %vm188_vm0, %v5201_v28, 0.0 }
0x2982   :  { %v5202_v51 = vsel %vm188_vm0, %v5200_v25, 0.0 }
0x2983   :  { %5203 = vadd.xlane.f32.xlu0 %v5202_v51 }
0x2987   :  { %5206 = vadd.xlane.f32.xlu0 %v5205_v21 }
0x29c9   :  { %v19056_v63 = vpop.f32.mrb[46].mxu0 }
0x29ca   :  { %v22085_v43 = vadd.f32 %v19056_v63, %v17702_v61  ;;  %v5401_v0 = vpop.f32.mrb[47].mxu0 }
0x29cb   :  { %v22087_v1 = vadd.f32 %v17702_v61, %v5401_v0 }
0x2a10   :  { %v5204_v40 = vpop.xlane.xlu0 %5203 }
0x2a11   :  { %v5208_v38 = vmul.f32 0.03125, %v5204_v40 }
0x2a13   :  { %v5210_v42 = vadd.f32 1e-05, %v5208_v38 }
0x2a14   :  { %v5207_v44 = vpop.xlane.xlu0 %5206 }
0x2a15   :  { %20512 = vrsqrt.f32 %v5210_v42  ;;  %v5209_v46 = vmul.f32 0.03125, %v5207_v44 }
0x2a17   :  { %v5211_v22 = vadd.f32 1e-05, %v5209_v46 }
0x2a19   :  { %20514 = vrsqrt.f32 %v5211_v22 }
0x2a1f   :  { %v20513_v53 = vpop.eup %20512 }
0x2a20   :  { %v5214_v54 = vmul.f32 %v20513_v53, %v5198_v18 }
0x2a22   :  { %v5220_v45 = vmul.f32 %v5219_v52, %v5214_v54 }
0x2a23   :  { %v20515_v56 = vpop.eup %20514 }
0x2a24   :  { %v5215_v57 = vmul.f32 %v20515_v56, %v5199_v24  ;;  %v22072_v58 = vadd.f32 %v5225_v55, %v5220_v45 }
0x2a26   :  { %v5221_v49 = vmul.f32 %v5219_v52, %v5215_v57  ;;  %19043 = vmatprep.mubr.msk.f32.mxu1 %vm188_vm0, %v22072_v58 }
0x2a28   :  { %v22076_v59 = vadd.f32 %v5225_v55, %v5221_v49 }
0x2a2a   :  { %19044 = vmatmul.mubr.msk.f32.vlgmr.msra.gmra.mrb[68].mxu1 %vm188_vm0, %v22076_v59 }
0x2a2b   :  { %19059 = vmatprep.mubr.msk.f32.mxu1 %vm21019_vm1, %v21018_v8  ;;  %19058 = vmatpush3.xpose.msk.msra.mxu1 %vm273_vm2, %v22087_v1 }
0x2a2c   :  { %19062 = vmatprep.subr.mxu1 %v21018_v8 }
0x2afd   :  { %v19045_v3 = vpop.f32.mrb[68].mxu1 }
0x2afe   :  { %v5313_v7 = vpop.f32.mrb[69].mxu1  ;;  %v22100_v4 = vadd.f32 %v19045_v3, %v17694_v2 }
0x2aff   :  { %v22092_v5 = vadd.f32 %v17694_v2, %v5313_v7 }
0x2b01   :  { %19060 = vmatmul.mubr.msk.f32.vlgmr.msra.gmra.mrb[70].mxu1 %vm273_vm2, %v22092_v5 }
0x2b02   :  { %19063 = vmatpush3.xpose.msk.msra.mxu1 %vm273_vm2, %v22085_v43  ;;  %19064 = vmatprep.mubr.msk.f32.mxu1 %vm21019_vm1, %v21018_v8 }
0x2b03   :  { %19072 = vmatprep.subr.mxu1 %v21018_v8 }
0x2b05   :  { %19065 = vmatmul.mubr.msk.f32.vlgmr.msra.gmra.mrb[72].mxu1 %vm273_vm2, %v22100_v4 }
0x2b06   :  { %19074 = vmatprep.mubr.msk.f32.mxu1 %vm21019_vm1, %v21018_v8 }
0x2bd4   :  { %v5482_v60 = vpop.f32.mrb[70].mxu1 }
0x2bd5   :  { %v19061_v9 = vpop.f32.mrb[71].mxu1  ;;  %v5562_v10 = vsel %vm273_vm2, %v5482_v60, -inf }
0x2bd6   :  { %5563 = vmax.xlane.f32.xlu1 %v5562_v10 }
0x2bd8   :  { %v5558_v11 = vpop.f32.mrb[72].mxu1 }
0x2bd9   :  { %v19066_v14 = vpop.f32.mrb[73].mxu1  ;;  %v5565_v16 = vsel %vm273_vm2, %v5558_v11, -inf }
0x2bda   :  { %5566 = vmax.xlane.f32.xlu0 %v5565_v16 }
0x2be7   :  { %5584 = vrot.lane.b32.xlu1 %v22087_v1, %s23968_s21 }
0x2beb   :  { %5738 = vrot.lane.b32.xlu1 %v22087_v1, %s24005_s3 }
0x2bef   :  { %5816 = vrot.lane.b32.xlu1 %v22085_v43, %s24005_s3 }
0x2bf0   :  { %5660 = vrot.lane.b32.xlu0 %v22085_v43, %s23968_s21 }
0x2c63   :  { %v5564_v15 = vpop.xlane.xlu1 %5563 }
0x2c64   :  { %v5568_v62 = vsub.f32 %v5482_v60, %v5564_v15 }
0x2c66   :  { %v5570_v17 = vmul.f32 1.442695, %v5568_v62 }
0x2c67   :  { %v5585_v19 = vpop.permute.xlu1 %5584  ;;  %v5567_v27 = vpop.xlane.xlu0 %5566 }
0x2c68   :  { %20516 = vpow2.f32 %v5570_v17  ;;  %v5569_v29 = vsub.f32 %v5558_v11, %v5567_v27  ;;  %19068 = vmatpush3.msra.mxu0 %v5585_v19 }
0x2c69   :  { %19077 = vmatprep.subr.mxu0 %v21018_v8 }
0x2c6a   :  { %v5572_v30 = vmul.f32 1.442695, %v5569_v29 }
0x2c6b   :  { %v5661_v24 = vpop.permute.xlu0 %5660  ;;  %v5739_v21 = vpop.permute.xlu1 %5738 }
0x2c6c   :  { %20518 = vpow2.f32 %v5572_v30  ;;  %19073 = vmatpush3.msra.mxu1 %v5661_v24 }
0x2c6d   :  { %19082 = vmatprep.subr.mxu1 %v21018_v8 }
0x2c6f   :  { %v5817_v20 = vpop.permute.xlu1 %5816 }
0x2c72   :  { %v20517_v18 = vpop.eup %20516 }
0x2c73   :  { %v5574_v25 = vsel %vm273_vm2, %v20517_v18, 0.0 }
0x2c74   :  { %5575 = vadd.xlane.f32.xlu1 %v5574_v25 }
0x2c76   :  { %v20519_v51 = vpop.eup %20518 }
0x2c77   :  { %v5577_v28 = vsel %vm273_vm2, %v20519_v51, 0.0 }
0x2c78   :  { %5578 = vadd.xlane.f32.xlu0 %v5577_v28 }
0x2c85   :  { %5814 = vrot.lane.b32.xlu1 %v22100_v4, %s24005_s3 }
0x2c8e   :  { %5736 = vrot.lane.b32.xlu0 %v22092_v5, %s24005_s3 }
0x2d01   :  { %v5576_v31 = vpop.xlane.xlu1 %5575 }
0x2d02   :  { %20520 = vrcp.f32 %v5576_v31 }
0x2d05   :  { %v5579_v32 = vpop.xlane.xlu0 %5578  ;;  %v5815_v23 = vpop.permute.xlu1 %5814 }
0x2d06   :  { %20522 = vrcp.f32 %v5579_v32 }
0x2d09   :  { %v5737_v35 = vpop.permute.xlu0 %5736 }
0x2d0c   :  { %v20521_v12 = vpop.eup %20520 }
0x2d0d   :  { %v5582_v26 = vmul.f32 %v20521_v12, %v20517_v18 }
0x2d0f   :  { %19070 = vmatmul.mubr.msk.f32.vlgmr.msra.gmra.mrb[48].mxu0 %vm273_vm2, %v5582_v26 }
0x2d10   :  { %v20523_v33 = vpop.eup %20522  ;;  %19078 = vmatpush3.xpose.msk.msra.mxu0 %vm273_vm2, %v5739_v21  ;;  %19079 = vmatprep.mubr.msk.f32.mxu0 %vm21019_vm1, %v21018_v8 }
0x2d11   :  { %v5583_v34 = vmul.f32 %v20523_v33, %v20519_v51  ;;  %19087 = vmatprep.subr.mxu0 %v21018_v8 }
0x2d13   :  { %19075 = vmatmul.mubr.msk.f32.vlgmr.msra.gmra.mrb[74].mxu1 %vm273_vm2, %v5583_v34  ;;  %19080 = vmatmul.mubr.msk.f32.vlgmr.msra.gmra.mrb[50].mxu0 %vm273_vm2, %v5737_v35 }
0x2d14   :  { %19083 = vmatpush3.xpose.msk.msra.mxu1 %vm273_vm2, %v5817_v20  ;;  %19084 = vmatprep.mubr.msk.f32.mxu1 %vm21019_vm1, %v21018_v8 }
0x2d15   :  { %19092 = vmatprep.subr.mxu1 %v21018_v8  ;;  %19089 = vmatprep.mubr.msk.f32.mxu0 %vm21019_vm1, %v21018_v8 }
0x2d17   :  { %19085 = vmatmul.mubr.msk.f32.vlgmr.msra.gmra.mrb[76].mxu1 %vm273_vm2, %v5815_v23 }
0x2d18   :  { %19094 = vmatprep.mubr.msk.f32.mxu1 %vm21019_vm1, %v21018_v8 }
0x2de2   :  { %v22141_v36 = vpop.f32.mrb[48].mxu0 }
0x2de3   :  { %v19071_v37 = vpop.f32.mrb[49].mxu0 }
0x2de6   :  { %v22143_v39 = vpop.f32.mrb[74].mxu1  ;;  %v5810_v41 = vpop.f32.mrb[50].mxu0 }
0x2de7   :  { %v19076_v40 = vpop.f32.mrb[75].mxu1  ;;  %v19081_v38 = vpop.f32.mrb[51].mxu0  ;;  %v5892_v42 = vsel %vm273_vm2, %v5810_v41, -inf }
0x2de8   :  { %5893 = vmax.xlane.f32.xlu0 %v5892_v42 }
0x2dea   :  { %v5888_v44 = vpop.f32.mrb[76].mxu1 }
0x2deb   :  { %v19086_v46 = vpop.f32.mrb[77].mxu1  ;;  %v5895_v22 = vsel %vm273_vm2, %v5888_v44, -inf }
0x2dec   :  { %5896 = vmax.xlane.f32.xlu1 %v5895_v22 }
0x2dfd   :  { %5914 = vrot.lane.b32.xlu1 %v22087_v1, %s24006_s29 }
0x2dfe   :  { %5990 = vrot.lane.b32.xlu0 %v22085_v43, %s24006_s29 }
0x2e01   :  { %6068 = vrot.lane.b32.xlu1 %v22087_v1, %s24007_s28 }
0x2e05   :  { %6146 = vrot.lane.b32.xlu1 %v22085_v43, %s24007_s28 }
0x2e09   :  { %6144 = vrot.lane.b32.xlu1 %v22100_v4, %s24007_s28 }
0x2e75   :  { %v5894_v52 = vpop.xlane.xlu0 %5893 }
0x2e76   :  { %v5898_v53 = vsub.f32 %v5810_v41, %v5894_v52 }
0x2e78   :  { %v5900_v54 = vmul.f32 1.442695, %v5898_v53 }
0x2e79   :  { %v5991_v55 = vpop.permute.xlu0 %5990  ;;  %v5897_v45 = vpop.xlane.xlu1 %5896 }
0x2e7a   :  { %20524 = vpow2.f32 %v5900_v54  ;;  %v5899_v56 = vsub.f32 %v5888_v44, %v5897_v45  ;;  %19093 = vmatpush3.msra.mxu1 %v5991_v55 }
0x2e7b   :  { %19102 = vmatprep.subr.mxu1 %v21018_v8 }
0x2e7c   :  { %v5902_v57 = vmul.f32 1.442695, %v5899_v56 }
0x2e7d   :  { %v5915_v49 = vpop.permute.xlu1 %5914 }
0x2e7e   :  { %20526 = vpow2.f32 %v5902_v57  ;;  %19088 = vmatpush3.msra.mxu0 %v5915_v49 }
0x2e7f   :  { %19097 = vmatprep.subr.mxu0 %v21018_v8 }
0x2e81   :  { %v6069_v60 = vpop.permute.xlu1 %6068 }
0x2e84   :  { %v20525_v61 = vpop.eup %20524 }
0x2e85   :  { %v5904_v63 = vsel %vm273_vm2, %v20525_v61, 0.0  ;;  %v6147_v14 = vpop.permute.xlu1 %6146 }
0x2e86   :  { %5905 = vadd.xlane.f32.xlu0 %v5904_v63 }
0x2e88   :  { %v20527_v0 = vpop.eup %20526 }
0x2e89   :  { %v5907_v2 = vsel %vm273_vm2, %v20527_v0, 0.0  ;;  %v6145_v62 = vpop.permute.xlu1 %6144 }
0x2e8a   :  { %5908 = vadd.xlane.f32.xlu0 %v5907_v2 }
0x2ea0   :  { %6066 = vrot.lane.b32.xlu0 %v22092_v5, %s24007_s28 }
0x2f13   :  { %v5906_v3 = vpop.xlane.xlu0 %5905 }
0x2f14   :  { %20528 = vrcp.f32 %v5906_v3 }
0x2f17   :  { %v5909_v7 = vpop.xlane.xlu0 %5908 }
0x2f18   :  { %20530 = vrcp.f32 %v5909_v7 }
0x2f1b   :  { %v6067_v15 = vpop.permute.xlu0 %6066 }
0x2f1e   :  { %v20529_v9 = vpop.eup %20528 }
0x2f1f   :  { %v5912_v10 = vmul.f32 %v20529_v9, %v20525_v61 }
0x2f21   :  { %19090 = vmatmul.mubr.msk.f32.vlgmr.msra.gmra.mrb[52].mxu0 %vm273_vm2, %v5912_v10 }
0x2f22   :  { %v20531_v11 = vpop.eup %20530  ;;  %19098 = vmatpush3.xpose.msk.msra.mxu0 %vm273_vm2, %v6069_v60  ;;  %19099 = vmatprep.mubr.msk.f32.mxu0 %vm21019_vm1, %v21018_v8 }
0x2f23   :  { %v5913_v16 = vmul.f32 %v20531_v11, %v20527_v0  ;;  %19107 = vmatprep.subr.mxu0 %v21018_v8 }
0x2f25   :  { %19095 = vmatmul.mubr.msk.f32.vlgmr.msra.gmra.mrb[78].mxu1 %vm273_vm2, %v5913_v16  ;;  %19100 = vmatmul.mubr.msk.f32.vlgmr.msra.gmra.mrb[54].mxu0 %vm273_vm2, %v6067_v15 }
0x2f26   :  { %19103 = vmatpush3.xpose.msk.msra.mxu1 %vm273_vm2, %v6147_v14  ;;  %19104 = vmatprep.mubr.msk.f32.mxu1 %vm21019_vm1, %v21018_v8 }
0x2f27   :  { %19112 = vmatprep.subr.mxu1 %v21018_v8  ;;  %19109 = vmatprep.mubr.msk.f32.mxu0 %vm21019_vm1, %v21018_v8 }
0x2f29   :  { %19105 = vmatmul.mubr.msk.f32.vlgmr.msra.gmra.mrb[80].mxu1 %vm273_vm2, %v6145_v62 }
0x2f2a   :  { %19114 = vmatprep.mubr.msk.f32.mxu1 %vm21019_vm1, %v21018_v8 }
0x2ff4   :  { %v22179_v17 = vpop.f32.mrb[52].mxu0 }
0x2ff5   :  { %v19091_v19 = vpop.f32.mrb[53].mxu0 }
0x2ff8   :  { %v22181_v27 = vpop.f32.mrb[78].mxu1  ;;  %v6140_v29 = vpop.f32.mrb[54].mxu0 }
0x2ff9   :  { %v19096_v30 = vpop.f32.mrb[79].mxu1  ;;  %v19101_v24 = vpop.f32.mrb[55].mxu0  ;;  %v6222_v18 = vsel %vm273_vm2, %v6140_v29, -inf }
0x2ffa   :  { %6223 = vmax.xlane.f32.xlu0 %v6222_v18 }
0x2ffc   :  { %v6218_v25 = vpop.f32.mrb[80].mxu1 }
0x2ffd   :  { %v19106_v51 = vpop.f32.mrb[81].mxu1  ;;  %v6225_v28 = vsel %vm273_vm2, %v6218_v25, -inf }
0x2ffe   :  { %6226 = vmax.xlane.f32.xlu1 %v6225_v28  ;;  %v17731_v28 = vld [vmem:[%s23924_s11 + $0x30] sm:$0xff] }
0x300f   :  { %6244 = vrot.lane.b32.xlu1 %v22087_v1, %s24008_s30 }
0x3010   :  { %6320 = vrot.lane.b32.xlu0 %v22085_v43, %s24008_s30 }
0x3013   :  { %6398 = vrot.lane.b32.xlu1 %v22087_v1, %s24003_s19 }
0x3017   :  { %6476 = vrot.lane.b32.xlu1 %v22085_v43, %s24003_s19 }
0x301b   :  { %6474 = vrot.lane.b32.xlu1 %v22100_v4, %s24003_s19 }
0x3087   :  { %v6224_v21 = vpop.xlane.xlu0 %6223 }
0x3088   :  { %v6228_v20 = vsub.f32 %v6140_v29, %v6224_v21  ;;  %v17732_v21 = vld [vmem:[%s23924_s11 + $0x38] sm:$0xff] }
0x308a   :  { %v6230_v31 = vmul.f32 1.442695, %v6228_v20  ;;  %v20093_v20 = vpack.c.bf16 %v17732_v21, %v17731_v28  ;;  %v17750_v21 = vld [vmem:[%s23930_s17 + $0xd0] sm:$0xff] }
0x308b   :  { %v6321_v32 = vpop.permute.xlu0 %6320  ;;  %v6227_v12 = vpop.xlane.xlu1 %6226 }
0x308c   :  { %20532 = vpow2.f32 %v6230_v31  ;;  %v6229_v26 = vsub.f32 %v6218_v25, %v6227_v12  ;;  %19113 = vmatpush3.msra.mxu1 %v6321_v32  ;;  %v17730_v25 = vld [vmem:[%s23924_s11 + $0x28] sm:$0xff] }
0x308d   :  { %19122 = vmatprep.subr.mxu1 %v21018_v8 }
0x308e   :  { %v6232_v33 = vmul.f32 1.442695, %v6229_v26 }
0x308f   :  { %v6245_v34 = vpop.permute.xlu1 %6244 }
0x3090   :  { %20534 = vpow2.f32 %v6232_v33  ;;  %19108 = vmatpush3.msra.mxu0 %v6245_v34 }
0x3091   :  { %19117 = vmatprep.subr.mxu0 %v21018_v8 }
0x3093   :  { %v6399_v38 = vpop.permute.xlu1 %6398 }
0x3096   :  { %v20533_v35 = vpop.eup %20532 }
0x3097   :  { %v6234_v23 = vsel %vm273_vm2, %v20533_v35, 0.0  ;;  %v6477_v22 = vpop.permute.xlu1 %6476 }
0x3098   :  { %6235 = vadd.xlane.f32.xlu0 %v6234_v23 }
0x309a   :  { %v20535_v4 = vpop.eup %20534 }
0x309b   :  { %v6237_v37 = vsel %vm273_vm2, %v20535_v4, 0.0  ;;  %v6475_v53 = vpop.permute.xlu1 %6474 }
0x309c   :  { %6238 = vadd.xlane.f32.xlu0 %v6237_v37 }
0x30b2   :  { %6396 = vrot.lane.b32.xlu0 %v22092_v5, %s24003_s19 }
0x3125   :  { %v6236_v41 = vpop.xlane.xlu0 %6235 }
0x3126   :  { %20536 = vrcp.f32 %v6236_v41 }
0x3129   :  { %v6239_v40 = vpop.xlane.xlu0 %6238 }
0x312a   :  { %20538 = vrcp.f32 %v6239_v40 }
0x312d   :  { %v6397_v5 = vpop.permute.xlu0 %6396 }
0x3130   :  { %v20537_v42 = vpop.eup %20536 }
0x3131   :  { %v6242_v44 = vmul.f32 %v20537_v42, %v20533_v35 }
0x3133   :  { %19110 = vmatmul.mubr.msk.f32.vlgmr.msra.gmra.mrb[56].mxu0 %vm273_vm2, %v6242_v44 }
0x3134   :  { %v20539_v46 = vpop.eup %20538  ;;  %19118 = vmatpush3.xpose.msk.msra.mxu0 %vm273_vm2, %v6399_v38  ;;  %19119 = vmatprep.mubr.msk.f32.mxu0 %vm21019_vm1, %v21018_v8 }
0x3135   :  { %v6243_v52 = vmul.f32 %v20539_v46, %v20535_v4  ;;  %19127 = vmatprep.subr.mxu0 %v21018_v8 }
0x3137   :  { %19115 = vmatmul.mubr.msk.f32.vlgmr.msra.gmra.mrb[82].mxu1 %vm273_vm2, %v6243_v52  ;;  %19120 = vmatmul.mubr.msk.f32.vlgmr.msra.gmra.mrb[58].mxu0 %vm273_vm2, %v6397_v5 }
0x3138   :  { %19123 = vmatpush3.xpose.msk.msra.mxu1 %vm273_vm2, %v6477_v22  ;;  %19124 = vmatprep.mubr.msk.f32.mxu1 %vm21019_vm1, %v21018_v8  ;;  %v17733_v22 = vld [vmem:[#allocation13 + $0x1] ss:$0 sm:$0xff] }
0x3139   :  { %19132 = vmatprep.subr.mxu1 %v21018_v8  ;;  %19129 = vmatprep.mubr.msk.f32.mxu0 %vm21019_vm1, %v21018_v8 }
0x313b   :  { %19125 = vmatmul.mubr.msk.f32.vlgmr.msra.gmra.mrb[84].mxu1 %vm273_vm2, %v6475_v53 }
0x313c   :  { %19134 = vmatprep.mubr.msk.f32.mxu1 %vm21019_vm1, %v21018_v8 }
0x3206   :  { %v6316_v54 = vpop.f32.mrb[56].mxu0 }
0x3207   :  { %v19111_v55 = vpop.f32.mrb[57].mxu0 }
0x320a   :  { %v6392_v45 = vpop.f32.mrb[82].mxu1  ;;  %v6470_v56 = vpop.f32.mrb[58].mxu0 }
0x320b   :  { %v19116_v57 = vpop.f32.mrb[83].mxu1  ;;  %v19121_v49 = vpop.f32.mrb[59].mxu0  ;;  %v6552_v61 = vsel %vm273_vm2, %v6470_v56, -inf }
0x320c   :  { %6553 = vmax.xlane.f32.xlu0 %v6552_v61 }
0x320e   :  { %v6548_v63 = vpop.f32.mrb[84].mxu1 }
0x320f   :  { %v19126_v0 = vpop.f32.mrb[85].mxu1  ;;  %v6555_v2 = vsel %vm273_vm2, %v6548_v63, -inf }
0x3210   :  { %6556 = vmax.xlane.f32.xlu1 %v6555_v2 }
0x3221   :  { %6574 = vrot.lane.b32.xlu1 %v22087_v1, %s24009_s22 }
0x3225   :  { %6728 = vrot.lane.b32.xlu1 %v22179_v17, %s23993_s8 }
0x3229   :  { %6730 = vrot.lane.b32.xlu1 %v22181_v27, %s23993_s8 }
0x322d   :  { %6738 = vrot.lane.b32.xlu1 %v6392_v45, %s23997_s27 }
0x3299   :  { %v6554_v3 = vpop.xlane.xlu0 %6553 }
0x329a   :  { %v6558_v7 = vsub.f32 %v6470_v56, %v6554_v3 }
0x329c   :  { %v6560_v60 = vmul.f32 1.442695, %v6558_v7  ;;  %v6891_v7 = vld [vmem:[#allocation14 + $0x20] sm:$0xff] }
0x329d   :  { %v6557_v9 = vpop.xlane.xlu1 %6556 }
0x329e   :  { %20540 = vpow2.f32 %v6560_v60  ;;  %v6559_v10 = vsub.f32 %v6548_v63, %v6557_v9  ;;  %v6892_v60 = vld [vmem:[#allocation14 + $0x28] sm:$0xff] }
0x329f   :  { %v20097_v9 = vpack.c.bf16 %v6892_v60, %v6891_v7 }
0x32a0   :  { %v6562_v11 = vmul.f32 1.442695, %v6559_v10  ;;  %v6893_v10 = vld [vmem:[#allocation14 + $0x30] sm:$0xff] }
0x32a1   :  { %v6575_v14 = vpop.permute.xlu1 %6574 }
0x32a2   :  { %20542 = vpow2.f32 %v6562_v11  ;;  %19128 = vmatpush3.msra.mxu0 %v6575_v14  ;;  %v6894_v11 = vld [vmem:[#allocation14 + $0x38] sm:$0xff] }
0x32a3   :  { %v20101_v14 = vpack.c.bf16 %v6894_v11, %v6893_v10 }
0x32a5   :  { %v6729_v33 = vpop.permute.xlu1 %6728 }
0x32a6   :  { %v6750_v23 = vsel %vm273_vm2, %v22141_v36, %v6729_v33 }
0x32a8   :  { %v20541_v16 = vpop.eup %20540 }
0x32a9   :  { %v6564_v1 = vsel %vm273_vm2, %v20541_v16, 0.0  ;;  %v6731_v34 = vpop.permute.xlu1 %6730 }
0x32aa   :  { %6565 = vadd.xlane.f32.xlu0 %v6564_v1  ;;  %v6751_v38 = vsel %vm273_vm2, %v22143_v39, %v6731_v34  ;;  %v17741_v1 = vld [vmem:[%s23930_s17 + $0x88] sm:$0xff] }
0x32ac   :  { %v20543_v15 = vpop.eup %20542 }
0x32ad   :  { %v6567_v62 = vsel %vm273_vm2, %v20543_v15, 0.0  ;;  %v6739_v4 = vpop.permute.xlu1 %6738 }
0x32ae   :  { %6568 = vadd.xlane.f32.xlu0 %v6567_v62  ;;  %v6753_v42 = vsel %vm1615_vm4, %v6751_v38, %v6739_v4 }
0x32c4   :  { %6650 = vrot.lane.b32.xlu0 %v22085_v43, %s24009_s22  ;;  %v17729_v43 = vld [vmem:[%s23924_s11 + $0x20] sm:$0xff] }
0x32c5   :  { %v20089_v51 = vpack.c.bf16 %v17730_v25, %v17729_v43  ;;  %v17748_v25 = vld [vmem:[%s23930_s17 + $0xc0] sm:$0xff] }
0x32c7   :  { %20090 = vmatprep.subr.bf16.mxu0 %v20089_v51 }
0x32c8   :  { %6736 = vrot.lane.b32.xlu0 %v6316_v54, %s23997_s27 }
0x3337   :  { %v6566_v17 = vpop.xlane.xlu0 %6565 }
0x3338   :  { %20544 = vrcp.f32 %v6566_v17  ;;  %v17743_v17 = vld [vmem:[%s23930_s17 + $0x98] sm:$0xff] }
0x333b   :  { %v6569_v19 = vpop.xlane.xlu0 %6568 }
0x333c   :  { %20546 = vrcp.f32 %v6569_v19 }
0x333f   :  { %v6651_v27 = vpop.permute.xlu0 %6650 }
0x3340   :  { %19133 = vmatpush3.msra.mxu1 %v6651_v27  ;;  %v17744_v27 = vld [vmem:[%s23930_s17 + $0xa0] sm:$0xff] }
0x3341   :  { %20098 = vmatprep.subr.bf16.mxu1 %v20097_v9 }
0x3342   :  { %v20545_v29 = vpop.eup %20544 }
0x3343   :  { %v6572_v30 = vmul.f32 %v20545_v29, %v20541_v16  ;;  %v6737_v35 = vpop.permute.xlu0 %6736  ;;  %v17740_v16 = vld [vmem:[%s23930_s17 + $0x80] sm:$0xff]  ;;  %v17745_v29 = vld [vmem:[%s23930_s17 + $0xa8] sm:$0xff] }
0x3344   :  { %v6752_v37 = vsel %vm1615_vm4, %v6750_v23, %v6737_v35  ;;  %v20105_v62 = vpack.c.bf16 %v17741_v1, %v17740_v16 }
0x3345   :  { %19130 = vmatmul.mubr.msk.f32.vlgmr.msra.gmra.mrb[60].mxu0 %vm273_vm2, %v6572_v30  ;;  %v20113_v30 = vpack.c.bf16 %v17745_v29, %v17744_v27 }
0x3346   :  { %v20547_v24 = vpop.eup %20546  ;;  %20092 = vmatpush3.bf16.msra.mxu0 %v20089_v51  ;;  %v17749_v51 = vld [vmem:[%s23930_s17 + $0xc8] sm:$0xff] }
0x3347   :  { %v6573_v18 = vmul.f32 %v20547_v24, %v20543_v15  ;;  %20094 = vmatprep.subr.bf16.mxu0 %v20093_v20  ;;  %v17742_v15 = vld [vmem:[%s23930_s17 + $0x90] sm:$0xff]  ;;  %v20121_v28 = vpack.c.bf16 %v17749_v51, %v17748_v25  ;;  %v17763_v25 = vld [vmem:[%s23998_s6 + $0x58] sm:$0xff] }
0x3348   :  { %v20109_v19 = vpack.c.bf16 %v17743_v17, %v17742_v15  ;;  %v17746_v24 = vld [vmem:[%s23930_s17 + $0xb0] sm:$0xff] }
0x3349   :  { %19135 = vmatmul.mubr.msk.f32.vlgmr.msra.gmra.mrb[86].mxu1 %vm273_vm2, %v6573_v18  ;;  %v17747_v18 = vld [vmem:[%s23930_s17 + $0xb8] sm:$0xff] }
0x334a   :  { %20096 = vmatpush3.bf16.msra.mxu0 %v20093_v20  ;;  %20100 = vmatpush3.bf16.msra.mxu1 %v20097_v9  ;;  %v20117_v43 = vpack.c.bf16 %v17747_v18, %v17746_v24  ;;  %v17751_v20 = vld [vmem:[%s23930_s17 + $0xd8] sm:$0xff]  ;;  %v17761_v24 = vld [vmem:[%s23998_s6 + $0x48] sm:$0xff] }
0x334b   :  { %20102 = vmatprep.subr.bf16.mxu1 %v20101_v14  ;;  %20106 = vmatprep.subr.bf16.mxu0 %v20105_v62 }
0x334e   :  { %20104 = vmatpush3.bf16.msra.mxu1 %v20101_v14 }
0x3418   :  { %v6646_v31 = vpop.f32.mrb[60].mxu0 }
0x3419   :  { %6744 = vrot.lane.b32.xlu0 %v6646_v31, %s23999_s12  ;;  %v19131_v32 = vpop.f32.mrb[61].mxu0  ;;  %v20125_v31 = vpack.c.bf16 %v17751_v20, %v17750_v21 }
0x341a   :  { %v17752_v32 = vld [vmem:[%s23930_s17 + $0xe0] sm:$0xff] }
0x341c   :  { %v6722_v12 = vpop.f32.mrb[86].mxu1 }
0x341d   :  { %6746 = vrot.lane.b32.xlu1 %v6722_v12, %s23999_s12  ;;  %v19136_v26 = vpop.f32.mrb[87].mxu1  ;;  %v17753_v12 = vld [vmem:[%s23930_s17 + $0xe8] sm:$0xff] }
0x341e   :  { %v20129_v26 = vpack.c.bf16 %v17753_v12, %v17752_v32 }
0x348b   :  { %v6745_v41 = vpop.permute.xlu0 %6744 }
0x348c   :  { %v6754_v40 = vsel %vm1618_vm3, %v6752_v37, %v6745_v41  ;;  %v6881_v41 = vrot.slane %v22061_v48, %v21783_v47 }
0x348d   :  { %19145 = vmatprep.mubr.msk.f32.mxu0 %vm188_vm0, %v6754_v40 }
0x348f   :  { %v6747_v44 = vpop.permute.xlu1 %6746 }
0x3490   :  { %v6755_v46 = vsel %vm1618_vm3, %v6753_v42, %v6747_v44  ;;  %v6887_v42 = vrot.slane %v22066_v50, %v21783_v47 }
0x3491   :  { %19146 = vmatmul.mubr.msk.f32.vlgmr.msra.gmra.mrb[62].mxu0 %vm188_vm0, %v6755_v46 }
0x3492   :  { %20108 = vmatpush3.bf16.msra.mxu0 %v20105_v62 }
0x3493   :  { %20110 = vmatprep.subr.bf16.mxu0 %v20109_v19 }
0x3496   :  { %20112 = vmatpush3.bf16.msra.mxu0 %v20109_v19 }
0x3497   :  { %20114 = vmatprep.subr.bf16.mxu0 %v20113_v30 }
0x349a   :  { %20116 = vmatpush3.bf16.msra.mxu0 %v20113_v30  ;;  %v17760_v30 = vld [vmem:[%s23998_s6 + $0x40] sm:$0xff] }
0x349b   :  { %20118 = vmatprep.subr.bf16.mxu0 %v20117_v43  ;;  %v20137_v18 = vpack.c.bf16 %v17761_v24, %v17760_v30 }
0x349d   :  { %20138 = vmatprep.subr.bf16.mxu1 %v20137_v18 }
0x349e   :  { %20120 = vmatpush3.bf16.msra.mxu0 %v20117_v43  ;;  %v17762_v43 = vld [vmem:[%s23998_s6 + $0x50] sm:$0xff] }
0x349f   :  { %20122 = vmatprep.subr.bf16.mxu0 %v20121_v28  ;;  %v20141_v51 = vpack.c.bf16 %v17763_v25, %v17762_v43 }
0x34a2   :  { %20124 = vmatpush3.bf16.msra.mxu0 %v20121_v28 }
0x34a3   :  { %20126 = vmatprep.subr.bf16.mxu0 %v20125_v31 }
0x34a6   :  { %20128 = vmatpush3.bf16.msra.mxu0 %v20125_v31 }
0x34a7   :  { %20130 = vmatprep.subr.bf16.mxu0 %v20129_v26 }
0x34aa   :  { %20132 = vmatpush3.bf16.msra.mxu0 %v20129_v26  ;;  %v7117_v26 = vrot.slane %v22061_v48, %v21826_v6  ;;  %v17764_v48 = vld [vmem:[#allocation8 + $0x2] ss:$0 sm:$0xff] }
0x3564   :  { %v19147_v36 = vpop.f32.mrb[62].mxu0 }
0x3565   :  { %v6847_v52 = vadd.f32 %v19147_v36, %v17733_v22  ;;  %v6841_v5 = vpop.f32.mrb[63].mxu0 }
0x3566   :  { %v6842_v53 = vadd.f32 %v17733_v22, %v6841_v5 }
0x3567   :  { %v6851_v54 = vadd.f32 %v6847_v52, %v22076_v59 }
0x3568   :  { %v6850_v55 = vadd.f32 %v6842_v53, %v22072_v58  ;;  %v17754_v53 = vld [vmem:[%s23930_s17 + $0xf0] sm:$0xff] }
0x3569   :  { %v6855_v45 = vsel %vm188_vm0, %v6851_v54, 0.0 }
0x356a   :  { %6856 = vadd.xlane.f32.xlu1 %v6855_v45  ;;  %v6852_v39 = vsel %vm188_vm0, %v6850_v55, 0.0  ;;  %v17737_v45 = vld [vmem:[%s23929_s16 + $0x1] ss:$0 sm:$0xff] }
0x356b   :  { %6853 = vadd.xlane.f32.xlu0 %v6852_v39 }
0x35f7   :  { %v6857_v56 = vpop.xlane.xlu1 %6856 }
0x35f8   :  { %v6859_v57 = vmul.f32 0.03125, %v6857_v56  ;;  %v6854_v49 = vpop.xlane.xlu0 %6853 }
0x35f9   :  { %v6858_v61 = vmul.f32 0.03125, %v6854_v49 }
0x35fa   :  { %v22261_v63 = vsub.f32 %v6851_v54, %v6859_v57  ;;  %v17755_v54 = vld [vmem:[%s23930_s17 + $0xf8] sm:$0xff] }
0x35fb   :  { %v6860_v0 = vsub.f32 %v6850_v55, %v6858_v61  ;;  %v20133_v55 = vpack.c.bf16 %v17755_v54, %v17754_v53 }
0x35fc   :  { %v6863_v59 = vmul.f32 %v22261_v63, %v22261_v63 }
0x35fd   :  { %v6862_v2 = vmul.f32 %v6860_v0, %v6860_v0  ;;  %20134 = vmatprep.subr.bf16.mxu0 %v20133_v55 }
0x35fe   :  { %v6867_v58 = vsel %vm188_vm0, %v6863_v59, 0.0  ;;  %20136 = vmatpush3.bf16.msra.mxu0 %v20133_v55 }
0x35ff   :  { %v6864_v3 = vsel %vm188_vm0, %v6862_v2, 0.0  ;;  %19235 = vmatprep.subr.mxu0 %v21018_v8 }
0x3600   :  { %6865 = vadd.xlane.f32.xlu0 %v6864_v3 }
0x3604   :  { %6868 = vadd.xlane.f32.xlu0 %v6867_v58 }
0x368d   :  { %v6866_v33 = vpop.xlane.xlu0 %6865 }
0x368e   :  { %v6870_v34 = vmul.f32 0.03125, %v6866_v33 }
0x3690   :  { %v6872_v35 = vadd.f32 1e-05, %v6870_v34 }
0x3691   :  { %v6869_v23 = vpop.xlane.xlu0 %6868 }
0x3692   :  { %20548 = vrsqrt.f32 %v6872_v35  ;;  %v6871_v4 = vmul.f32 0.03125, %v6869_v23 }
0x3694   :  { %v6873_v37 = vadd.f32 1e-05, %v6871_v4  ;;  %v7123_v4 = vrot.slane %v22066_v50, %v21826_v6 }
0x3696   :  { %20550 = vrsqrt.f32 %v6873_v37 }
0x369c   :  { %v20549_v40 = vpop.eup %20548 }
0x369d   :  { %v6876_v38 = vmul.f32 %v20549_v40, %v6860_v0  ;;  %v17757_v0 = vld [vmem:[%s23931_s18 + $0x1] ss:$0 sm:$0xff] }
0x369f   :  { %v6882_v44 = vmul.f32 %v6881_v41, %v6876_v38 }
0x36a0   :  { %v20551_v46 = vpop.eup %20550 }
0x36a1   :  { %v6877_v22 = vmul.f32 %v20551_v46, %v22261_v63  ;;  %v6888_v36 = vadd.f32 %v6887_v42, %v6882_v44 }
0x36a3   :  { %v6883_v52 = vmul.f32 %v6881_v41, %v6877_v22  ;;  %19156 = vmatprep.mubr.msk.f32.mxu1 %vm188_vm0, %v6888_v36 }
0x36a5   :  { %v6889_v5 = vadd.f32 %v6887_v42, %v6883_v52 }
0x36a7   :  { %19157 = vmatmul.mubr.msk.f32.vlgmr.msra.gmra.mrb[88].mxu1 %vm188_vm0, %v6889_v5 }
0x36a8   :  { %20140 = vmatpush3.bf16.msra.mxu1 %v20137_v18 }
0x36a9   :  { %20142 = vmatprep.subr.bf16.mxu1 %v20141_v51 }
0x36ac   :  { %20144 = vmatpush3.bf16.msra.mxu1 %v20141_v51 }
0x36ad   :  { %19205 = vmatprep.subr.mxu1 %v21018_v8 }
0x377a   :  { %v19158_v39 = vpop.f32.mrb[88].mxu1 }
0x377b   :  { %v6981_v56 = vadd.f32 %v19158_v39, %v17737_v45  ;;  %v6975_v57 = vpop.f32.mrb[89].mxu1 }
0x377c   :  { %v6976_v49 = vadd.f32 %v17737_v45, %v6975_v57 }
0x377d   :  { %v6985_v63 = vmax.f32 %v6981_v56, 0.0 }
0x377e   :  { %v6984_v61 = vmax.f32 %v6976_v49, 0.0 }
0x3780   :  { %19191 = vmatprep.mubr.f32.mxu0 %v6984_v61 }
0x3781   :  { %19192 = vmatmul.mubr.f32.vlgmr.msra.gmra.mrb[64].mxu0 %v6985_v63 }
0x3782   :  { %19237 = vmatprep.mubr.msk.f32.mxu0 %vm21019_vm1, %v21018_v8 }
0x3854   :  { %v19193_v2 = vpop.f32.mrb[64].mxu0 }
0x3855   :  { %v7083_v3 = vadd.f32 %v19193_v2, %v17757_v0  ;;  %v7077_v59 = vpop.f32.mrb[65].mxu0 }
0x3856   :  { %v7078_v58 = vadd.f32 %v17757_v0, %v7077_v59 }
0x3857   :  { %v7087_v7 = vadd.f32 %v7083_v3, %v6889_v5  ;;  %v22382_v5 = vld [vmem:[#allocation7] sm:$0xff] }
0x3858   :  { %v7086_v60 = vadd.f32 %v7078_v58, %v6888_v36 }
0x3859   :  { %v7091_v9 = vsel %vm188_vm0, %v7087_v7, 0.0 }
0x385a   :  { %7092 = vadd.xlane.f32.xlu0 %v7091_v9  ;;  %v7088_v10 = vsel %vm188_vm0, %v7086_v60, 0.0 }
0x385b   :  { %7089 = vadd.xlane.f32.xlu1 %v7088_v10 }
0x38e7   :  { %v7093_v11 = vpop.xlane.xlu0 %7092 }
0x38e8   :  { %v7095_v14 = vmul.f32 0.03125, %v7093_v11  ;;  %v7090_v16 = vpop.xlane.xlu1 %7089 }
0x38e9   :  { %v7094_v1 = vmul.f32 0.03125, %v7090_v16 }
0x38ea   :  { %v7097_v15 = vsub.f32 %v7087_v7, %v7095_v14 }
0x38eb   :  { %v7096_v62 = vsub.f32 %v7086_v60, %v7094_v1 }
0x38ec   :  { %v7099_v17 = vmul.f32 %v7097_v15, %v7097_v15 }
0x38ed   :  { %v7098_v19 = vmul.f32 %v7096_v62, %v7096_v62 }
0x38ee   :  { %v7103_v27 = vsel %vm188_vm0, %v7099_v17, 0.0 }
0x38ef   :  { %7104 = vadd.xlane.f32.xlu0 %v7103_v27  ;;  %v7100_v29 = vsel %vm188_vm0, %v7098_v19, 0.0 }
0x38f0   :  { %7101 = vadd.xlane.f32.xlu1 %v7100_v29 }
0x397c   :  { %v7105_v28 = vpop.xlane.xlu0 %7104 }
0x397d   :  { %v7107_v21 = vmul.f32 0.03125, %v7105_v28  ;;  %v7102_v20 = vpop.xlane.xlu1 %7101 }
0x397e   :  { %v7106_v31 = vmul.f32 0.03125, %v7102_v20 }
0x397f   :  { %v7109_v32 = vadd.f32 1e-05, %v7107_v21 }
0x3980   :  { %v7108_v12 = vadd.f32 1e-05, %v7106_v31 }
0x3981   :  { %20552 = vrsqrt.f32 %v7109_v32 }
0x3982   :  { %20554 = vrsqrt.f32 %v7108_v12 }
0x398b   :  { %v20553_v33 = vpop.eup %20552 }
0x398c   :  { %v20555_v34 = vpop.eup %20554  ;;  %v7113_v35 = vmul.f32 %v20553_v33, %v7097_v15 }
0x398d   :  { %v7112_v23 = vmul.f32 %v20555_v34, %v7096_v62 }
0x398e   :  { %v7119_v37 = vmul.f32 %v7117_v26, %v7113_v35 }
0x398f   :  { %v7118_v41 = vmul.f32 %v7117_v26, %v7112_v23 }
0x3990   :  { %v22354_v38 = vadd.f32 %v7123_v4, %v7119_v37 }
0x3991   :  { %v22352_v40 = vadd.f32 %v7123_v4, %v7118_v41 }
0x3993   :  { %19202 = vmatprep.mubr.msk.f32.mxu1 %vm188_vm0, %v22352_v40 }
0x3994   :  { %19203 = vmatmul.mubr.msk.f32.vlgmr.msra.gmra.mrb[90].mxu1 %vm188_vm0, %v22354_v38 }
0x3995   :  { %19207 = vmatprep.mubr.msk.f32.mxu1 %vm21019_vm1, %v21018_v8 }
0x3a67   :  { %v19204_v42 = vpop.f32.mrb[90].mxu1 }
0x3a68   :  { %v22362_v44 = vadd.f32 %v19204_v42, %v17764_v48  ;;  %v7215_v50 = vpop.f32.mrb[91].mxu1 }
0x3a69   :  { %v22364_v46 = vadd.f32 %v17764_v48, %v7215_v50 }
0x3a6a   :  { %7302 = vrot.lane.b32.xlu0 %v22362_v44, %s24010_s15 }
0x3a6b   :  { %7225 = vrot.lane.b32.xlu1 %v22364_v46, %s24010_s15 }
0x3adc   :  { %v7303_v36 = vpop.permute.xlu0 %7302 }
0x3add   :  { %v7226_v22 = vpop.permute.xlu1 %7225 }
0x3ade   :  { %19206 = vmatpush3.xpose.msk.msra.mxu1 %vm273_vm2, %v7226_v22 }
0x3adf   :  { %19210 = vmatprep.subr.mxu1 %v21018_v8 }
0x3ae1   :  { %19208 = vmatmul.mubr.msk.f32.vlgmr.msra.gmra.mrb[92].mxu1 %vm273_vm2, %v22364_v46 }
0x3ae2   :  { %19211 = vmatpush3.xpose.msk.msra.mxu1 %vm273_vm2, %v7303_v36  ;;  %19212 = vmatprep.mubr.msk.f32.mxu1 %vm21019_vm1, %v21018_v8 }
0x3ae3   :  { %19215 = vmatprep.subr.mxu1 %v21018_v8 }
0x3ae5   :  { %19213 = vmatmul.mubr.msk.f32.vlgmr.msra.gmra.mrb[94].mxu1 %vm273_vm2, %v22362_v44 }
0x3ae6   :  { %19217 = vmatprep.mubr.msk.f32.mxu1 %vm21019_vm1, %v21018_v8 }
0x3bb4   :  { %v7297_v52 = vpop.f32.mrb[92].mxu1 }
0x3bb5   :  { %v7298_v53 = vadd.f32 %v22382_v5, %v7297_v52  ;;  %v19209_v54 = vpop.f32.mrb[93].mxu1 }
0x3bb7   :  { %v7378_v55 = vsel %vm273_vm2, %v7298_v53, -inf }
0x3bb8   :  { %7379 = vmax.xlane.f32.xlu1 %v7378_v55  ;;  %v7374_v45 = vpop.f32.mrb[94].mxu1 }
0x3bb9   :  { %v7375_v39 = vadd.f32 %v22382_v5, %v7374_v45  ;;  %v19214_v56 = vpop.f32.mrb[95].mxu1 }
0x3bbb   :  { %v7381_v57 = vsel %vm273_vm2, %v7375_v39, -inf }
0x3bbc   :  { %7382 = vmax.xlane.f32.xlu0 %v7381_v57 }
0x3bc9   :  { %7400 = vrot.lane.b32.xlu1 %v22364_v46, %s24000_s20 }
0x3c45   :  { %v7380_v49 = vpop.xlane.xlu1 %7379 }
0x3c46   :  { %v7384_v61 = vsub.f32 %v7298_v53, %v7380_v49 }
0x3c48   :  { %v7386_v63 = vmul.f32 1.442695, %v7384_v61 }
0x3c49   :  { %v7401_v0 = vpop.permute.xlu1 %7400  ;;  %v7383_v2 = vpop.xlane.xlu0 %7382 }
0x3c4a   :  { %20556 = vpow2.f32 %v7386_v63  ;;  %v7385_v3 = vsub.f32 %v7375_v39, %v7383_v2  ;;  %19216 = vmatpush3.msra.mxu1 %v7401_v0 }
0x3c4b   :  { %19220 = vmatprep.subr.mxu1 %v21018_v8 }
0x3c4c   :  { %v7388_v59 = vmul.f32 1.442695, %v7385_v3 }
0x3c4e   :  { %20558 = vpow2.f32 %v7388_v59 }
0x3c54   :  { %v20557_v58 = vpop.eup %20556 }
0x3c55   :  { %v7390_v7 = vsel %vm273_vm2, %v20557_v58, 0.0 }
0x3c56   :  { %7391 = vadd.xlane.f32.xlu1 %v7390_v7 }
0x3c58   :  { %v20559_v60 = vpop.eup %20558 }
0x3c59   :  { %v7393_v9 = vsel %vm273_vm2, %v20559_v60, 0.0 }
0x3c5a   :  { %7394 = vadd.xlane.f32.xlu0 %v7393_v9 }
0x3c67   :  { %7554 = vrot.lane.b32.xlu1 %v22364_v46, %s24006_s29 }
0x3c6b   :  { %7552 = vrot.lane.b32.xlu1 %v22364_v46, %s24005_s3 }
0x3c6f   :  { %7630 = vrot.lane.b32.xlu1 %v22362_v44, %s24005_s3 }
0x3c70   :  { %7476 = vrot.lane.b32.xlu0 %v22362_v44, %s24000_s20 }
0x3c74   :  { %7632 = vrot.lane.b32.xlu0 %v22362_v44, %s24006_s29 }
0x3ce3   :  { %v7392_v10 = vpop.xlane.xlu1 %7391 }
0x3ce4   :  { %20560 = vrcp.f32 %v7392_v10 }
0x3ce7   :  { %v7395_v11 = vpop.xlane.xlu0 %7394  ;;  %v7555_v62 = vpop.permute.xlu1 %7554 }
0x3ce8   :  { %20562 = vrcp.f32 %v7395_v11 }
0x3ceb   :  { %v7477_v1 = vpop.permute.xlu0 %7476  ;;  %v7553_v19 = vpop.permute.xlu1 %7552 }
0x3cee   :  { %v20561_v14 = vpop.eup %20560 }
0x3cef   :  { %v7398_v16 = vmul.f32 %v20561_v14, %v20557_v58  ;;  %v7633_v27 = vpop.permute.xlu0 %7632  ;;  %v7631_v29 = vpop.permute.xlu1 %7630 }
0x3cf1   :  { %19218 = vmatmul.mubr.msk.f32.vlgmr.msra.gmra.mrb[96].mxu1 %vm273_vm2, %v7398_v16 }
0x3cf2   :  { %v20563_v15 = vpop.eup %20562  ;;  %19221 = vmatpush3.msra.mxu1 %v7477_v1  ;;  %19222 = vmatprep.mubr.msk.f32.mxu1 %vm21019_vm1, %v21018_v8 }
0x3cf3   :  { %v7399_v17 = vmul.f32 %v20563_v15, %v20559_v60  ;;  %19225 = vmatprep.subr.mxu1 %v21018_v8 }
0x3cf5   :  { %19223 = vmatmul.mubr.msk.f32.vlgmr.msra.gmra.mrb[98].mxu1 %vm273_vm2, %v7399_v17 }
0x3cf6   :  { %19227 = vmatprep.mubr.msk.f32.mxu1 %vm21019_vm1, %v21018_v8 }
0x3cf9   :  { %19226 = vmatpush3.xpose.msk.msra.mxu1 %vm273_vm2, %v7555_v62 }
0x3cfa   :  { %19230 = vmatprep.subr.mxu1 %v21018_v8 }
0x3cfc   :  { %19228 = vmatmul.mubr.msk.f32.vlgmr.msra.gmra.mrb[100].mxu1 %vm273_vm2, %v7553_v19 }
0x3cfd   :  { %19231 = vmatpush3.xpose.msk.msra.mxu1 %vm273_vm2, %v7633_v27  ;;  %19232 = vmatprep.mubr.msk.f32.mxu1 %vm21019_vm1, %v21018_v8 }
0x3cfe   :  { %19240 = vmatprep.subr.mxu1 %v21018_v8 }
0x3d00   :  { %19233 = vmatmul.mubr.msk.f32.vlgmr.msra.gmra.mrb[102].mxu1 %vm273_vm2, %v7631_v29 }
0x3d01   :  { %19242 = vmatprep.mubr.msk.f32.mxu1 %vm21019_vm1, %v21018_v8 }
0x3dc4   :  { %v22420_v30 = vpop.f32.mrb[96].mxu1 }
0x3dc5   :  { %v19219_v24 = vpop.f32.mrb[97].mxu1 }
0x3dc8   :  { %v22422_v18 = vpop.f32.mrb[98].mxu1 }
0x3dc9   :  { %v19224_v43 = vpop.f32.mrb[99].mxu1 }
0x3dcf   :  { %v7626_v25 = vpop.f32.mrb[100].mxu1 }
0x3dd0   :  { %v7627_v51 = vadd.f32 %v22382_v5, %v7626_v25  ;;  %v19229_v28 = vpop.f32.mrb[101].mxu1 }
0x3dd2   :  { %v7708_v21 = vsel %vm273_vm2, %v7627_v51, -inf }
0x3dd3   :  { %7709 = vmax.xlane.f32.xlu0 %v7708_v21  ;;  %v7704_v20 = vpop.f32.mrb[102].mxu1 }
0x3dd4   :  { %v7705_v31 = vadd.f32 %v22382_v5, %v7704_v20  ;;  %v19234_v32 = vpop.f32.mrb[103].mxu1 }
0x3dd6   :  { %v7711_v12 = vsel %vm273_vm2, %v7705_v31, -inf }
0x3dd7   :  { %7712 = vmax.xlane.f32.xlu1 %v7711_v12 }
0x3de8   :  { %7730 = vrot.lane.b32.xlu1 %v22364_v46, %s24001_s1 }
0x3de9   :  { %7806 = vrot.lane.b32.xlu0 %v22362_v44, %s24001_s1 }
0x3dec   :  { %7884 = vrot.lane.b32.xlu1 %v22364_v46, %s24008_s30 }
0x3df0   :  { %7962 = vrot.lane.b32.xlu1 %v22362_v44, %s24008_s30 }
0x3df4   :  { %7960 = vrot.lane.b32.xlu1 %v22362_v44, %s24007_s28 }
0x3e60   :  { %v7710_v26 = vpop.xlane.xlu0 %7709 }
0x3e61   :  { %v7714_v33 = vsub.f32 %v7627_v51, %v7710_v26 }
0x3e63   :  { %v7716_v34 = vmul.f32 1.442695, %v7714_v33 }
0x3e64   :  { %v7807_v35 = vpop.permute.xlu0 %7806  ;;  %v7713_v23 = vpop.xlane.xlu1 %7712 }
0x3e65   :  { %20564 = vpow2.f32 %v7716_v34  ;;  %v7715_v4 = vsub.f32 %v7705_v31, %v7713_v23  ;;  %19241 = vmatpush3.msra.mxu1 %v7807_v35 }
0x3e66   :  { %19250 = vmatprep.subr.mxu1 %v21018_v8 }
0x3e67   :  { %v7718_v37 = vmul.f32 1.442695, %v7715_v4 }
0x3e68   :  { %v7731_v41 = vpop.permute.xlu1 %7730 }
0x3e69   :  { %20566 = vpow2.f32 %v7718_v37  ;;  %19236 = vmatpush3.msra.mxu0 %v7731_v41 }
0x3e6a   :  { %19245 = vmatprep.subr.mxu0 %v21018_v8 }
0x3e6c   :  { %v7885_v53 = vpop.permute.xlu1 %7884 }
0x3e6f   :  { %v20565_v48 = vpop.eup %20564 }
0x3e70   :  { %v7720_v42 = vsel %vm273_vm2, %v20565_v48, 0.0  ;;  %v7963_v39 = vpop.permute.xlu1 %7962 }
0x3e71   :  { %7721 = vadd.xlane.f32.xlu0 %v7720_v42 }
0x3e73   :  { %v20567_v50 = vpop.eup %20566 }
0x3e74   :  { %v7723_v22 = vsel %vm273_vm2, %v20567_v50, 0.0  ;;  %v7961_v49 = vpop.permute.xlu1 %7960 }
0x3e75   :  { %7724 = vadd.xlane.f32.xlu0 %v7723_v22 }
0x3e8b   :  { %7882 = vrot.lane.b32.xlu0 %v22364_v46, %s24007_s28 }
0x3efe   :  { %v7722_v36 = vpop.xlane.xlu0 %7721 }
0x3eff   :  { %20568 = vrcp.f32 %v7722_v36 }
0x3f02   :  { %v7725_v52 = vpop.xlane.xlu0 %7724 }
0x3f03   :  { %20570 = vrcp.f32 %v7725_v52 }
0x3f06   :  { %v7883_v57 = vpop.permute.xlu0 %7882 }
0x3f09   :  { %v20569_v54 = vpop.eup %20568 }
0x3f0a   :  { %v7728_v55 = vmul.f32 %v20569_v54, %v20565_v48 }
0x3f0c   :  { %19238 = vmatmul.mubr.msk.f32.vlgmr.msra.gmra.mrb[66].mxu0 %vm273_vm2, %v7728_v55 }
0x3f0d   :  { %v20571_v45 = vpop.eup %20570  ;;  %19246 = vmatpush3.xpose.msk.msra.mxu0 %vm273_vm2, %v7885_v53  ;;  %19247 = vmatprep.mubr.msk.f32.mxu0 %vm21019_vm1, %v21018_v8 }
0x3f0e   :  { %v7729_v56 = vmul.f32 %v20571_v45, %v20567_v50  ;;  %19255 = vmatprep.subr.mxu0 %v21018_v8 }
0x3f10   :  { %19243 = vmatmul.mubr.msk.f32.vlgmr.msra.gmra.mrb[104].mxu1 %vm273_vm2, %v7729_v56  ;;  %19248 = vmatmul.mubr.msk.f32.vlgmr.msra.gmra.mrb[68].mxu0 %vm273_vm2, %v7883_v57 }
0x3f11   :  { %19251 = vmatpush3.xpose.msk.msra.mxu1 %vm273_vm2, %v7963_v39  ;;  %19252 = vmatprep.mubr.msk.f32.mxu1 %vm21019_vm1, %v21018_v8 }
0x3f12   :  { %19260 = vmatprep.subr.mxu1 %v21018_v8  ;;  %19257 = vmatprep.mubr.msk.f32.mxu0 %vm21019_vm1, %v21018_v8 }
0x3f14   :  { %19253 = vmatmul.mubr.msk.f32.vlgmr.msra.gmra.mrb[106].mxu1 %vm273_vm2, %v7961_v49 }
0x3f15   :  { %19262 = vmatprep.mubr.msk.f32.mxu1 %vm21019_vm1, %v21018_v8 }
0x3fdf   :  { %v22460_v61 = vpop.f32.mrb[66].mxu0 }
0x3fe0   :  { %v19239_v63 = vpop.f32.mrb[67].mxu0 }
0x3fe3   :  { %v22462_v0 = vpop.f32.mrb[104].mxu1  ;;  %v7956_v2 = vpop.f32.mrb[68].mxu0 }
0x3fe4   :  { %v7957_v3 = vadd.f32 %v22382_v5, %v7956_v2  ;;  %v19244_v59 = vpop.f32.mrb[105].mxu1  ;;  %v19249_v58 = vpop.f32.mrb[69].mxu0 }
0x3fe6   :  { %v8038_v7 = vsel %vm273_vm2, %v7957_v3, -inf }
0x3fe7   :  { %8039 = vmax.xlane.f32.xlu0 %v8038_v7  ;;  %v8034_v60 = vpop.f32.mrb[106].mxu1 }
0x3fe8   :  { %v8035_v9 = vadd.f32 %v22382_v5, %v8034_v60  ;;  %v19254_v10 = vpop.f32.mrb[107].mxu1 }
0x3fea   :  { %v8041_v11 = vsel %vm273_vm2, %v8035_v9, -inf }
0x3feb   :  { %8042 = vmax.xlane.f32.xlu1 %v8041_v11  ;;  %v17793_v11 = vld [vmem:[%s23918_s5 + $0x50] sm:$0xff] }
0x3ffc   :  { %8060 = vrot.lane.b32.xlu1 %v22364_v46, %s24002_s4 }
0x3ffd   :  { %8136 = vrot.lane.b32.xlu0 %v22362_v44, %s24002_s4 }
0x4000   :  { %8214 = vrot.lane.b32.xlu1 %v22364_v46, %s24009_s22 }
0x4004   :  { %8292 = vrot.lane.b32.xlu1 %v22362_v44, %s24009_s22 }
0x4008   :  { %8290 = vrot.lane.b32.xlu1 %v22362_v44, %s24003_s19 }
0x4074   :  { %v8040_v14 = vpop.xlane.xlu0 %8039 }
0x4075   :  { %v8044_v16 = vsub.f32 %v7957_v3, %v8040_v14  ;;  %v17794_v14 = vld [vmem:[%s23918_s5 + $0x58] sm:$0xff] }
0x4077   :  { %v8046_v1 = vmul.f32 1.442695, %v8044_v16  ;;  %v20149_v16 = vpack.c.bf16 %v17794_v14, %v17793_v11 }
0x4078   :  { %v8137_v15 = vpop.permute.xlu0 %8136  ;;  %v8043_v62 = vpop.xlane.xlu1 %8042 }
0x4079   :  { %20572 = vpow2.f32 %v8046_v1  ;;  %v8045_v17 = vsub.f32 %v8035_v9, %v8043_v62  ;;  %19261 = vmatpush3.msra.mxu1 %v8137_v15  ;;  %v17792_v9 = vld [vmem:[%s23918_s5 + $0x48] sm:$0xff] }
0x407a   :  { %19270 = vmatprep.subr.mxu1 %v21018_v8 }
0x407b   :  { %v8048_v19 = vmul.f32 1.442695, %v8045_v17 }
0x407c   :  { %v8061_v27 = vpop.permute.xlu1 %8060 }
0x407d   :  { %20574 = vpow2.f32 %v8048_v19  ;;  %19256 = vmatpush3.msra.mxu0 %v8061_v27 }
0x407e   :  { %19265 = vmatprep.subr.mxu0 %v21018_v8 }
0x4080   :  { %v8215_v21 = vpop.permute.xlu1 %8214 }
0x4083   :  { %v20573_v29 = vpop.eup %20572 }
0x4084   :  { %v8050_v24 = vsel %vm273_vm2, %v20573_v29, 0.0  ;;  %v8293_v12 = vpop.permute.xlu1 %8292 }
0x4085   :  { %8051 = vadd.xlane.f32.xlu0 %v8050_v24 }
0x4087   :  { %v20575_v43 = vpop.eup %20574 }
0x4088   :  { %v8053_v25 = vsel %vm273_vm2, %v20575_v43, 0.0  ;;  %v8291_v34 = vpop.permute.xlu1 %8290 }
0x4089   :  { %8054 = vadd.xlane.f32.xlu0 %v8053_v25 }
0x409f   :  { %8212 = vrot.lane.b32.xlu0 %v22364_v46, %s24003_s19 }
0x4112   :  { %v8052_v51 = vpop.xlane.xlu0 %8051 }
0x4113   :  { %20576 = vrcp.f32 %v8052_v51 }
0x4116   :  { %v8055_v28 = vpop.xlane.xlu0 %8054 }
0x4117   :  { %20578 = vrcp.f32 %v8055_v28 }
0x411a   :  { %v8213_v33 = vpop.permute.xlu0 %8212 }
0x411d   :  { %v20577_v20 = vpop.eup %20576 }
0x411e   :  { %v8058_v31 = vmul.f32 %v20577_v20, %v20573_v29 }
0x4120   :  { %19258 = vmatmul.mubr.msk.f32.vlgmr.msra.gmra.mrb[70].mxu0 %vm273_vm2, %v8058_v31 }
0x4121   :  { %v20579_v32 = vpop.eup %20578  ;;  %19266 = vmatpush3.xpose.msk.msra.mxu0 %vm273_vm2, %v8215_v21  ;;  %19267 = vmatprep.mubr.msk.f32.mxu0 %vm21019_vm1, %v21018_v8 }
0x4122   :  { %v8059_v26 = vmul.f32 %v20579_v32, %v20575_v43  ;;  %19275 = vmatprep.subr.mxu0 %v21018_v8 }
0x4124   :  { %19263 = vmatmul.mubr.msk.f32.vlgmr.msra.gmra.mrb[108].mxu1 %vm273_vm2, %v8059_v26  ;;  %19268 = vmatmul.mubr.msk.f32.vlgmr.msra.gmra.mrb[72].mxu0 %vm273_vm2, %v8213_v33 }
0x4125   :  { %19271 = vmatpush3.xpose.msk.msra.mxu1 %vm273_vm2, %v8293_v12  ;;  %19272 = vmatprep.mubr.msk.f32.mxu1 %vm21019_vm1, %v21018_v8  ;;  %v20788_v12 = vld [vmem:[#allocation2] sm:$0xff] }
0x4126   :  { %19280 = vmatprep.subr.mxu1 %v21018_v8  ;;  %19277 = vmatprep.mubr.msk.f32.mxu0 %vm21019_vm1, %v21018_v8 }
0x4128   :  { %19273 = vmatmul.mubr.msk.f32.vlgmr.msra.gmra.mrb[110].mxu1 %vm273_vm2, %v8291_v34 }
0x4129   :  { %19282 = vmatprep.mubr.msk.f32.mxu1 %vm21019_vm1, %v21018_v8 }
0x41f3   :  { %v8132_v35 = vpop.f32.mrb[70].mxu0 }
0x41f4   :  { %v19259_v23 = vpop.f32.mrb[71].mxu0 }
0x41f7   :  { %v8208_v4 = vpop.f32.mrb[108].mxu1  ;;  %v8286_v37 = vpop.f32.mrb[72].mxu0 }
0x41f8   :  { %v8287_v41 = vadd.f32 %v22382_v5, %v8286_v37  ;;  %v19264_v48 = vpop.f32.mrb[109].mxu1  ;;  %v19269_v42 = vpop.f32.mrb[73].mxu0 }
0x41fa   :  { %v8368_v50 = vsel %vm273_vm2, %v8287_v41, -inf }
0x41fb   :  { %8369 = vmax.xlane.f32.xlu0 %v8368_v50  ;;  %v8364_v22 = vpop.f32.mrb[110].mxu1 }
0x41fc   :  { %v8365_v36 = vadd.f32 %v22382_v5, %v8364_v22  ;;  %v19274_v52 = vpop.f32.mrb[111].mxu1 }
0x41fe   :  { %v8371_v53 = vsel %vm273_vm2, %v8365_v36, -inf }
0x41ff   :  { %8372 = vmax.xlane.f32.xlu1 %v8371_v53 }
0x4210   :  { %8390 = vrot.lane.b32.xlu1 %v22364_v46, %s24004_s25 }
0x4214   :  { %8544 = vrot.lane.b32.xlu1 %v22460_v61, %s23993_s8 }
0x4218   :  { %8546 = vrot.lane.b32.xlu1 %v22462_v0, %s23993_s8 }
0x421c   :  { %8554 = vrot.lane.b32.xlu1 %v8208_v4, %s23997_s27 }
0x4288   :  { %v8370_v54 = vpop.xlane.xlu0 %8369 }
0x4289   :  { %v8374_v55 = vsub.f32 %v8287_v41, %v8370_v54 }
0x428b   :  { %v8376_v45 = vmul.f32 1.442695, %v8374_v55  ;;  %v17806_v55 = vld [vmem:[%s23922_s9 + $0x48] sm:$0xff] }
0x428c   :  { %v8373_v39 = vpop.xlane.xlu1 %8372 }
0x428d   :  { %20580 = vpow2.f32 %v8376_v45  ;;  %v8375_v5 = vsub.f32 %v8365_v36, %v8373_v39  ;;  %v17798_v39 = vld [vmem:[%s23920_s7 + $0x40] sm:$0xff] }
0x428f   :  { %v8378_v56 = vmul.f32 1.442695, %v8375_v5  ;;  %v17799_v5 = vld [vmem:[%s23920_s7 + $0x48] sm:$0xff] }
0x4290   :  { %v8391_v57 = vpop.permute.xlu1 %8390 }
0x4291   :  { %20582 = vpow2.f32 %v8378_v56  ;;  %19276 = vmatpush3.msra.mxu0 %v8391_v57  ;;  %v17807_v56 = vld [vmem:[%s23922_s9 + $0x50] sm:$0xff]  ;;  %v20153_v57 = vpack.c.bf16 %v17799_v5, %v17798_v39 }
0x4294   :  { %v8545_v19 = vpop.permute.xlu1 %8544 }
0x4295   :  { %v8566_v24 = vsel %vm273_vm2, %v22420_v30, %v8545_v19  ;;  %v17795_v30 = vld [vmem:[#allocation10 + $0x2] ss:$0 sm:$0xff] }
0x4297   :  { %v20581_v49 = vpop.eup %20580 }
0x4298   :  { %v8380_v46 = vsel %vm273_vm2, %v20581_v49, 0.0  ;;  %v8547_v27 = vpop.permute.xlu1 %8546 }
0x4299   :  { %8381 = vadd.xlane.f32.xlu0 %v8380_v46  ;;  %v8567_v21 = vsel %vm273_vm2, %v22422_v18, %v8547_v27 }
0x429b   :  { %v20583_v61 = vpop.eup %20582 }
0x429c   :  { %v8383_v63 = vsel %vm273_vm2, %v20583_v61, 0.0  ;;  %v8555_v43 = vpop.permute.xlu1 %8554 }
0x429d   :  { %8384 = vadd.xlane.f32.xlu0 %v8383_v63  ;;  %v8569_v20 = vsel %vm1615_vm4, %v8567_v21, %v8555_v43  ;;  %v17801_v63 = vld [vmem:[%s23920_s7 + $0x58] sm:$0xff]  ;;  %v17802_v21 = vld [vmem:[#allocation11 + $0x2] ss:$0 sm:$0xff] }
0x42b3   :  { %8466 = vrot.lane.b32.xlu0 %v22362_v44, %s24004_s25  ;;  %v17791_v44 = vld [vmem:[%s23918_s5 + $0x40] sm:$0xff]  ;;  %s24013_s5 = sld [smem:[#allocation29_spill]] }
0x42b4   :  { %v20145_v10 = vpack.c.bf16 %v17792_v9, %v17791_v44  ;;  %v22581_v9 = vld [vmem:[%s23926_s13 + $0x8] sm:$0x7] }
0x42b5   :  { %v8697_v11 = vrot.slane %v22581_v9, %v21525_v13 }
0x42b6   :  { %20146 = vmatprep.subr.bf16.mxu0 %v20145_v10 }
0x42b7   :  { %8552 = vrot.lane.b32.xlu0 %v8132_v35, %s23997_s27 }
0x4326   :  { %v8382_v0 = vpop.xlane.xlu0 %8381 }
0x4327   :  { %20584 = vrcp.f32 %v8382_v0 }
0x432a   :  { %v8385_v2 = vpop.xlane.xlu0 %8384 }
0x432b   :  { %20586 = vrcp.f32 %v8385_v2  ;;  %v20789_v2 = vld [vmem:[#allocation2 + $0x8] sm:$0xff] }
0x432e   :  { %v8467_v3 = vpop.permute.xlu0 %8466 }
0x432f   :  { %19281 = vmatpush3.msra.mxu1 %v8467_v3 }
0x4330   :  { %20154 = vmatprep.subr.bf16.mxu1 %v20153_v57 }
0x4331   :  { %v20585_v59 = vpop.eup %20584 }
0x4332   :  { %v8388_v58 = vmul.f32 %v20585_v59, %v20581_v49  ;;  %v8553_v29 = vpop.permute.xlu0 %8552  ;;  %v17808_v49 = vld [vmem:[%s23922_s9 + $0x58] sm:$0xff] }
0x4333   :  { %v8568_v25 = vsel %vm1615_vm4, %v8566_v24, %v8553_v29  ;;  %v20165_v46 = vpack.c.bf16 %v17808_v49, %v17807_v56  ;;  %v17810_v24 = vld [vmem:[%s24012_s14 + $0x2] ss:$0 sm:$0xff]  ;;  %s24020_s14 = sld [smem:[#allocation28_spill]] }
0x4334   :  { %19278 = vmatmul.mubr.msk.f32.vlgmr.msra.gmra.mrb[74].mxu0 %vm273_vm2, %v8388_v58 }
0x4335   :  { %v20587_v7 = vpop.eup %20586  ;;  %20148 = vmatpush3.bf16.msra.mxu0 %v20145_v10  ;;  %v22586_v10 = vld [vmem:[%s24011_s2 + $0x8] sm:$0x7]  ;;  %s24014_s2 = sld [smem:[#allocation27_spill]] }
0x4336   :  { %v8389_v60 = vmul.f32 %v20587_v7, %v20583_v61  ;;  %20150 = vmatprep.subr.bf16.mxu0 %v20149_v16  ;;  %v17800_v61 = vld [vmem:[%s23920_s7 + $0x50] sm:$0xff] }
0x4337   :  { %v20157_v0 = vpack.c.bf16 %v17801_v63, %v17800_v61 }
0x4338   :  { %19283 = vmatmul.mubr.msk.f32.vlgmr.msra.gmra.mrb[112].mxu1 %vm273_vm2, %v8389_v60 }
0x4339   :  { %20152 = vmatpush3.bf16.msra.mxu0 %v20149_v16  ;;  %20156 = vmatpush3.bf16.msra.mxu1 %v20153_v57 }
0x433a   :  { %20158 = vmatprep.subr.bf16.mxu1 %v20157_v0 }
0x433d   :  { %20160 = vmatpush3.bf16.msra.mxu1 %v20157_v0 }
0x433e   :  { %19318 = vmatprep.subr.mxu1 %v21018_v8 }
0x4407   :  { %v8462_v1 = vpop.f32.mrb[74].mxu0 }
0x4408   :  { %8560 = vrot.lane.b32.xlu0 %v8462_v1, %s23999_s12  ;;  %v19279_v15 = vpop.f32.mrb[75].mxu0  ;;  %v8703_v1 = vrot.slane %v22586_v10, %v21525_v13 }
0x440b   :  { %v8538_v62 = vpop.f32.mrb[112].mxu1 }
0x440c   :  { %8562 = vrot.lane.b32.xlu1 %v8538_v62, %s23999_s12  ;;  %v19284_v17 = vpop.f32.mrb[113].mxu1 }
0x447a   :  { %v8561_v51 = vpop.permute.xlu0 %8560 }
0x447b   :  { %v8570_v28 = vsel %vm1618_vm3, %v8568_v25, %v8561_v51 }
0x447c   :  { %19293 = vmatprep.mubr.msk.f32.mxu0 %vm188_vm0, %v8570_v28 }
0x447e   :  { %v8563_v31 = vpop.permute.xlu1 %8562 }
0x447f   :  { %v8571_v32 = vsel %vm1618_vm3, %v8569_v20, %v8563_v31 }
0x4480   :  { %19294 = vmatmul.mubr.msk.f32.vlgmr.msra.gmra.mrb[76].mxu0 %vm188_vm0, %v8571_v32 }
0x4481   :  { %19315 = vmatprep.mubr.msk.f32.mxu0 %vm188_vm0, %v20788_v12 }
0x4553   :  { %v19295_v26 = vpop.f32.mrb[76].mxu0 }
0x4554   :  { %v8663_v33 = vadd.f32 %v19295_v26, %v17795_v30  ;;  %v8657_v34 = vpop.f32.mrb[77].mxu0 }
0x4555   :  { %v8658_v35 = vadd.f32 %v17795_v30, %v8657_v34 }
0x4556   :  { %v8667_v23 = vadd.f32 %v8663_v33, %v22354_v38 }
0x4557   :  { %v8666_v4 = vadd.f32 %v8658_v35, %v22352_v40  ;;  %v17805_v40 = vld [vmem:[%s23922_s9 + $0x40] sm:$0xff] }
0x4558   :  { %v8671_v18 = vsel %vm188_vm0, %v8667_v23, 0.0  ;;  %v20161_v45 = vpack.c.bf16 %v17806_v55, %v17805_v40 }
0x4559   :  { %8672 = vadd.xlane.f32.xlu1 %v8671_v18  ;;  %v8668_v37 = vsel %vm188_vm0, %v8666_v4, 0.0 }
0x455a   :  { %8669 = vadd.xlane.f32.xlu0 %v8668_v37  ;;  %20162 = vmatprep.subr.bf16.mxu0 %v20161_v45 }
0x455b   :  { %20164 = vmatpush3.bf16.msra.mxu0 %v20161_v45 }
0x455c   :  { %20166 = vmatprep.subr.bf16.mxu0 %v20165_v46 }
0x455f   :  { %20168 = vmatpush3.bf16.msra.mxu0 %v20165_v46 }
0x4560   :  { %19328 = vmatprep.subr.mxu0 %v21018_v8 }
0x4562   :  { %19316 = vmatmul.mubr.msk.f32.vlgmr.msra.gmra.mrb[78].mxu0 %vm188_vm0, %v20789_v2 }
0x4563   :  { %19330 = vmatprep.mubr.msk.f32.mxu0 %vm21019_vm1, %v21018_v8 }
0x45e6   :  { %v8673_v41 = vpop.xlane.xlu1 %8672 }
0x45e7   :  { %v8675_v48 = vmul.f32 0.03125, %v8673_v41  ;;  %v8670_v42 = vpop.xlane.xlu0 %8669 }
0x45e8   :  { %v8674_v50 = vmul.f32 0.03125, %v8670_v42 }
0x45e9   :  { %v8677_v22 = vsub.f32 %v8667_v23, %v8675_v48 }
0x45ea   :  { %v8676_v36 = vsub.f32 %v8666_v4, %v8674_v50 }
0x45eb   :  { %v8679_v54 = vmul.f32 %v8677_v22, %v8677_v22 }
0x45ec   :  { %v8678_v52 = vmul.f32 %v8676_v36, %v8676_v36 }
0x45ed   :  { %v8683_v38 = vsel %vm188_vm0, %v8679_v54, 0.0 }
0x45ee   :  { %v8680_v53 = vsel %vm188_vm0, %v8678_v52, 0.0 }
0x45ef   :  { %8681 = vadd.xlane.f32.xlu0 %v8680_v53 }
0x45f3   :  { %8684 = vadd.xlane.f32.xlu0 %v8683_v38 }
0x4635   :  { %v19317_v43 = vpop.f32.mrb[78].mxu0 }
0x4636   :  { %v22605_v25 = vadd.f32 %v19317_v43, %v17810_v24  ;;  %v8879_v51 = vpop.f32.mrb[79].mxu0 }
0x4637   :  { %v22607_v28 = vadd.f32 %v17810_v24, %v8879_v51 }
0x467c   :  { %v8682_v3 = vpop.xlane.xlu0 %8681 }
0x467d   :  { %v8686_v59 = vmul.f32 0.03125, %v8682_v3 }
0x467f   :  { %v8688_v58 = vadd.f32 1e-05, %v8686_v59 }
0x4680   :  { %v8685_v7 = vpop.xlane.xlu0 %8684 }
0x4681   :  { %20588 = vrsqrt.f32 %v8688_v58  ;;  %v8687_v60 = vmul.f32 0.03125, %v8685_v7 }
0x4683   :  { %v8689_v44 = vadd.f32 1e-05, %v8687_v60 }
0x4685   :  { %20590 = vrsqrt.f32 %v8689_v44 }
0x468b   :  { %v20589_v14 = vpop.eup %20588 }
0x468c   :  { %v8692_v16 = vmul.f32 %v20589_v14, %v8676_v36 }
0x468e   :  { %v8698_v15 = vmul.f32 %v8697_v11, %v8692_v16 }
0x468f   :  { %v20591_v62 = vpop.eup %20590 }
0x4690   :  { %v8693_v17 = vmul.f32 %v20591_v62, %v8677_v22  ;;  %v22592_v19 = vadd.f32 %v8703_v1, %v8698_v15 }
0x4692   :  { %v8699_v27 = vmul.f32 %v8697_v11, %v8693_v17  ;;  %19304 = vmatprep.mubr.msk.f32.mxu1 %vm188_vm0, %v22592_v19 }
0x4694   :  { %v22596_v29 = vadd.f32 %v8703_v1, %v8699_v27 }
0x4696   :  { %19305 = vmatmul.mubr.msk.f32.vlgmr.msra.gmra.mrb[114].mxu1 %vm188_vm0, %v22596_v29 }
0x4697   :  { %19320 = vmatprep.mubr.msk.f32.mxu1 %vm21019_vm1, %v21018_v8  ;;  %19319 = vmatpush3.xpose.msk.msra.mxu1 %vm273_vm2, %v22607_v28 }
0x4698   :  { %19323 = vmatprep.subr.mxu1 %v21018_v8 }
0x4769   :  { %v19306_v20 = vpop.f32.mrb[114].mxu1 }
0x476a   :  { %v8791_v31 = vpop.f32.mrb[115].mxu1  ;;  %v22620_v12 = vadd.f32 %v19306_v20, %v17802_v21 }
0x476b   :  { %v22612_v32 = vadd.f32 %v17802_v21, %v8791_v31 }
0x476d   :  { %19321 = vmatmul.mubr.msk.f32.vlgmr.msra.gmra.mrb[116].mxu1 %vm273_vm2, %v22612_v32 }
0x476e   :  { %19324 = vmatpush3.xpose.msk.msra.mxu1 %vm273_vm2, %v22605_v25  ;;  %19325 = vmatprep.mubr.msk.f32.mxu1 %vm21019_vm1, %v21018_v8 }
0x476f   :  { %19333 = vmatprep.subr.mxu1 %v21018_v8 }
0x4771   :  { %19326 = vmatmul.mubr.msk.f32.vlgmr.msra.gmra.mrb[118].mxu1 %vm273_vm2, %v22620_v12 }
0x4772   :  { %19335 = vmatprep.mubr.msk.f32.mxu1 %vm21019_vm1, %v21018_v8 }
0x4840   :  { %v8960_v30 = vpop.f32.mrb[116].mxu1 }
0x4841   :  { %v19322_v26 = vpop.f32.mrb[117].mxu1  ;;  %v9040_v33 = vsel %vm273_vm2, %v8960_v30, -inf }
0x4842   :  { %9041 = vmax.xlane.f32.xlu1 %v9040_v33 }
0x4844   :  { %v9036_v34 = vpop.f32.mrb[118].mxu1 }
0x4845   :  { %v19327_v35 = vpop.f32.mrb[119].mxu1  ;;  %v9043_v23 = vsel %vm273_vm2, %v9036_v34, -inf }
0x4846   :  { %9044 = vmax.xlane.f32.xlu0 %v9043_v23 }
0x4853   :  { %9062 = vrot.lane.b32.xlu1 %v22607_v28, %s24010_s15 }
0x4857   :  { %9216 = vrot.lane.b32.xlu1 %v22607_v28, %s24005_s3 }
0x485b   :  { %9294 = vrot.lane.b32.xlu1 %v22605_v25, %s24005_s3 }
0x485c   :  { %9138 = vrot.lane.b32.xlu0 %v22605_v25, %s24010_s15 }
0x48cf   :  { %v9042_v4 = vpop.xlane.xlu1 %9041 }
0x48d0   :  { %v9046_v18 = vsub.f32 %v8960_v30, %v9042_v4 }
0x48d2   :  { %v9048_v37 = vmul.f32 1.442695, %v9046_v18 }
0x48d3   :  { %v9063_v41 = vpop.permute.xlu1 %9062  ;;  %v9045_v48 = vpop.xlane.xlu0 %9044 }
0x48d4   :  { %20592 = vpow2.f32 %v9048_v37  ;;  %v9047_v42 = vsub.f32 %v9036_v34, %v9045_v48  ;;  %19329 = vmatpush3.msra.mxu0 %v9063_v41 }
0x48d5   :  { %19338 = vmatprep.subr.mxu0 %v21018_v8 }
0x48d6   :  { %v9050_v50 = vmul.f32 1.442695, %v9047_v42 }
0x48d7   :  { %v9139_v22 = vpop.permute.xlu0 %9138  ;;  %v9217_v38 = vpop.permute.xlu1 %9216 }
0x48d8   :  { %20594 = vpow2.f32 %v9050_v50  ;;  %19334 = vmatpush3.msra.mxu1 %v9139_v22 }
0x48d9   :  { %19343 = vmatprep.subr.mxu1 %v21018_v8 }
0x48db   :  { %v9295_v40 = vpop.permute.xlu1 %9294 }
0x48de   :  { %v20593_v36 = vpop.eup %20592 }
0x48df   :  { %v9052_v52 = vsel %vm273_vm2, %v20593_v36, 0.0 }
0x48e0   :  { %9053 = vadd.xlane.f32.xlu1 %v9052_v52 }
0x48e2   :  { %v20595_v53 = vpop.eup %20594 }
0x48e3   :  { %v9055_v54 = vsel %vm273_vm2, %v20595_v53, 0.0 }
0x48e4   :  { %9056 = vadd.xlane.f32.xlu0 %v9055_v54 }
0x48f1   :  { %9292 = vrot.lane.b32.xlu1 %v22620_v12, %s24005_s3 }
0x48fa   :  { %9214 = vrot.lane.b32.xlu0 %v22612_v32, %s24005_s3 }
0x496d   :  { %v9054_v55 = vpop.xlane.xlu1 %9053 }
0x496e   :  { %20596 = vrcp.f32 %v9054_v55 }
0x4971   :  { %v9057_v45 = vpop.xlane.xlu0 %9056  ;;  %v9293_v46 = vpop.permute.xlu1 %9292 }
0x4972   :  { %20598 = vrcp.f32 %v9057_v45 }
0x4975   :  { %v9215_v49 = vpop.permute.xlu0 %9214 }
0x4978   :  { %v20597_v39 = vpop.eup %20596 }
0x4979   :  { %v9060_v5 = vmul.f32 %v20597_v39, %v20593_v36 }
0x497b   :  { %19331 = vmatmul.mubr.msk.f32.vlgmr.msra.gmra.mrb[80].mxu0 %vm273_vm2, %v9060_v5 }
0x497c   :  { %v20599_v56 = vpop.eup %20598  ;;  %19339 = vmatpush3.xpose.msk.msra.mxu0 %vm273_vm2, %v9217_v38  ;;  %19340 = vmatprep.mubr.msk.f32.mxu0 %vm21019_vm1, %v21018_v8 }
0x497d   :  { %v9061_v57 = vmul.f32 %v20599_v56, %v20595_v53  ;;  %19348 = vmatprep.subr.mxu0 %v21018_v8 }
0x497f   :  { %19336 = vmatmul.mubr.msk.f32.vlgmr.msra.gmra.mrb[120].mxu1 %vm273_vm2, %v9061_v57  ;;  %19341 = vmatmul.mubr.msk.f32.vlgmr.msra.gmra.mrb[82].mxu0 %vm273_vm2, %v9215_v49 }
0x4980   :  { %19344 = vmatpush3.xpose.msk.msra.mxu1 %vm273_vm2, %v9295_v40  ;;  %19345 = vmatprep.mubr.msk.f32.mxu1 %vm21019_vm1, %v21018_v8 }
0x4981   :  { %19353 = vmatprep.subr.mxu1 %v21018_v8  ;;  %19350 = vmatprep.mubr.msk.f32.mxu0 %vm21019_vm1, %v21018_v8 }
0x4983   :  { %19346 = vmatmul.mubr.msk.f32.vlgmr.msra.gmra.mrb[122].mxu1 %vm273_vm2, %v9293_v46 }
0x4984   :  { %19355 = vmatprep.mubr.msk.f32.mxu1 %vm21019_vm1, %v21018_v8 }
0x4a4e   :  { %v22661_v61 = vpop.f32.mrb[80].mxu0 }
0x4a4f   :  { %v19332_v63 = vpop.f32.mrb[81].mxu0 }
0x4a52   :  { %v22663_v0 = vpop.f32.mrb[120].mxu1  ;;  %v9288_v2 = vpop.f32.mrb[82].mxu0 }
0x4a53   :  { %v19337_v3 = vpop.f32.mrb[121].mxu1  ;;  %v19342_v59 = vpop.f32.mrb[83].mxu0  ;;  %v9370_v58 = vsel %vm273_vm2, %v9288_v2, -inf }
0x4a54   :  { %9371 = vmax.xlane.f32.xlu0 %v9370_v58 }
0x4a56   :  { %v9366_v7 = vpop.f32.mrb[122].mxu1 }
0x4a57   :  { %v19347_v60 = vpop.f32.mrb[123].mxu1  ;;  %v9373_v44 = vsel %vm273_vm2, %v9366_v7, -inf }
0x4a58   :  { %9374 = vmax.xlane.f32.xlu1 %v9373_v44 }
0x4a69   :  { %9392 = vrot.lane.b32.xlu1 %v22607_v28, %s24006_s29 }
0x4a6a   :  { %9468 = vrot.lane.b32.xlu0 %v22605_v25, %s24006_s29 }
0x4a6d   :  { %9546 = vrot.lane.b32.xlu1 %v22607_v28, %s24007_s28 }
0x4a71   :  { %9624 = vrot.lane.b32.xlu1 %v22605_v25, %s24007_s28 }
0x4a75   :  { %9622 = vrot.lane.b32.xlu1 %v22620_v12, %s24007_s28 }
0x4ae1   :  { %v9372_v11 = vpop.xlane.xlu0 %9371 }
0x4ae2   :  { %v9376_v14 = vsub.f32 %v9288_v2, %v9372_v11 }
0x4ae4   :  { %v9378_v16 = vmul.f32 1.442695, %v9376_v14 }
0x4ae5   :  { %v9469_v1 = vpop.permute.xlu0 %9468  ;;  %v9375_v15 = vpop.xlane.xlu1 %9374 }
0x4ae6   :  { %20600 = vpow2.f32 %v9378_v16  ;;  %v9377_v62 = vsub.f32 %v9366_v7, %v9375_v15  ;;  %19354 = vmatpush3.msra.mxu1 %v9469_v1 }
0x4ae7   :  { %19363 = vmatprep.subr.mxu1 %v21018_v8 }
0x4ae8   :  { %v9380_v17 = vmul.f32 1.442695, %v9377_v62 }
0x4ae9   :  { %v9393_v27 = vpop.permute.xlu1 %9392 }
0x4aea   :  { %20602 = vpow2.f32 %v9380_v17  ;;  %19349 = vmatpush3.msra.mxu0 %v9393_v27 }
0x4aeb   :  { %19358 = vmatprep.subr.mxu0 %v21018_v8 }
0x4aed   :  { %v9547_v30 = vpop.permute.xlu1 %9546 }
0x4af0   :  { %v20601_v24 = vpop.eup %20600 }
0x4af1   :  { %v9382_v43 = vsel %vm273_vm2, %v20601_v24, 0.0  ;;  %v9625_v35 = vpop.permute.xlu1 %9624 }
0x4af2   :  { %9383 = vadd.xlane.f32.xlu0 %v9382_v43 }
0x4af4   :  { %v20603_v51 = vpop.eup %20602 }
0x4af5   :  { %v9385_v21 = vsel %vm273_vm2, %v20603_v51, 0.0  ;;  %v9623_v18 = vpop.permute.xlu1 %9622 }
0x4af6   :  { %9386 = vadd.xlane.f32.xlu0 %v9385_v21 }
0x4b0c   :  { %9544 = vrot.lane.b32.xlu0 %v22612_v32, %s24007_s28 }
0x4b7f   :  { %v9384_v20 = vpop.xlane.xlu0 %9383 }
0x4b80   :  { %20604 = vrcp.f32 %v9384_v20 }
0x4b83   :  { %v9387_v31 = vpop.xlane.xlu0 %9386 }
0x4b84   :  { %20606 = vrcp.f32 %v9387_v31 }
0x4b87   :  { %v9545_v4 = vpop.permute.xlu0 %9544 }
0x4b8a   :  { %v20605_v26 = vpop.eup %20604 }
0x4b8b   :  { %v9390_v33 = vmul.f32 %v20605_v26, %v20601_v24 }
0x4b8d   :  { %19351 = vmatmul.mubr.msk.f32.vlgmr.msra.gmra.mrb[84].mxu0 %vm273_vm2, %v9390_v33 }
0x4b8e   :  { %v20607_v34 = vpop.eup %20606  ;;  %19359 = vmatpush3.xpose.msk.msra.mxu0 %vm273_vm2, %v9547_v30  ;;  %19360 = vmatprep.mubr.msk.f32.mxu0 %vm21019_vm1, %v21018_v8 }
0x4b8f   :  { %v9391_v23 = vmul.f32 %v20607_v34, %v20603_v51  ;;  %19368 = vmatprep.subr.mxu0 %v21018_v8 }
0x4b91   :  { %19356 = vmatmul.mubr.msk.f32.vlgmr.msra.gmra.mrb[124].mxu1 %vm273_vm2, %v9391_v23  ;;  %19361 = vmatmul.mubr.msk.f32.vlgmr.msra.gmra.mrb[86].mxu0 %vm273_vm2, %v9545_v4 }
0x4b92   :  { %19364 = vmatpush3.xpose.msk.msra.mxu1 %vm273_vm2, %v9625_v35  ;;  %19365 = vmatprep.mubr.msk.f32.mxu1 %vm21019_vm1, %v21018_v8 }
0x4b93   :  { %19373 = vmatprep.subr.mxu1 %v21018_v8  ;;  %19370 = vmatprep.mubr.msk.f32.mxu0 %vm21019_vm1, %v21018_v8 }
0x4b95   :  { %19366 = vmatmul.mubr.msk.f32.vlgmr.msra.gmra.mrb[126].mxu1 %vm273_vm2, %v9623_v18 }
0x4b96   :  { %19375 = vmatprep.mubr.msk.f32.mxu1 %vm21019_vm1, %v21018_v8 }
0x4c60   :  { %v22699_v37 = vpop.f32.mrb[84].mxu0 }
0x4c61   :  { %v19352_v41 = vpop.f32.mrb[85].mxu0 }
0x4c64   :  { %v22701_v48 = vpop.f32.mrb[124].mxu1  ;;  %v9618_v42 = vpop.f32.mrb[86].mxu0 }
0x4c65   :  { %v19357_v50 = vpop.f32.mrb[125].mxu1  ;;  %v19362_v22 = vpop.f32.mrb[87].mxu0  ;;  %v9700_v36 = vsel %vm273_vm2, %v9618_v42, -inf }
0x4c66   :  { %9701 = vmax.xlane.f32.xlu0 %v9700_v36 }
0x4c68   :  { %v9696_v52 = vpop.f32.mrb[126].mxu1 }
0x4c69   :  { %v19367_v53 = vpop.f32.mrb[127].mxu1  ;;  %v9703_v54 = vsel %vm273_vm2, %v9696_v52, -inf }
0x4c6a   :  { %9704 = vmax.xlane.f32.xlu1 %v9703_v54  ;;  %v17839_v54 = vld [vmem:[%s24013_s5 + $0x50] sm:$0xff] }
0x4c7b   :  { %9722 = vrot.lane.b32.xlu1 %v22607_v28, %s24008_s30 }
0x4c7c   :  { %9798 = vrot.lane.b32.xlu0 %v22605_v25, %s24008_s30 }
0x4c7f   :  { %9876 = vrot.lane.b32.xlu1 %v22607_v28, %s24003_s19 }
0x4c83   :  { %9954 = vrot.lane.b32.xlu1 %v22605_v25, %s24003_s19 }
0x4c87   :  { %9952 = vrot.lane.b32.xlu1 %v22620_v12, %s24003_s19 }
0x4cf3   :  { %v9702_v38 = vpop.xlane.xlu0 %9701 }
0x4cf4   :  { %v9706_v40 = vsub.f32 %v9618_v42, %v9702_v38  ;;  %v17840_v38 = vld [vmem:[%s24013_s5 + $0x58] sm:$0xff] }
0x4cf6   :  { %v9708_v55 = vmul.f32 1.442695, %v9706_v40  ;;  %v20173_v40 = vpack.c.bf16 %v17840_v38, %v17839_v54  ;;  %v17858_v38 = vld [vmem:[%s23930_s17 + $0x150] sm:$0xff] }
0x4cf7   :  { %v9799_v45 = vpop.permute.xlu0 %9798  ;;  %v9705_v39 = vpop.xlane.xlu1 %9704 }
0x4cf8   :  { %20608 = vpow2.f32 %v9708_v55  ;;  %v9707_v5 = vsub.f32 %v9696_v52, %v9705_v39  ;;  %19374 = vmatpush3.msra.mxu1 %v9799_v45  ;;  %v17838_v52 = vld [vmem:[%s24013_s5 + $0x48] sm:$0xff] }
0x4cf9   :  { %19383 = vmatprep.subr.mxu1 %v21018_v8 }
0x4cfa   :  { %v9710_v56 = vmul.f32 1.442695, %v9707_v5 }
0x4cfb   :  { %v9723_v57 = vpop.permute.xlu1 %9722 }
0x4cfc   :  { %20610 = vpow2.f32 %v9710_v56  ;;  %19369 = vmatpush3.msra.mxu0 %v9723_v57 }
0x4cfd   :  { %19378 = vmatprep.subr.mxu0 %v21018_v8 }
0x4cff   :  { %v9877_v59 = vpop.permute.xlu1 %9876 }
0x4d02   :  { %v20609_v49 = vpop.eup %20608 }
0x4d03   :  { %v9712_v46 = vsel %vm273_vm2, %v20609_v49, 0.0  ;;  %v9955_v44 = vpop.permute.xlu1 %9954 }
0x4d04   :  { %9713 = vadd.xlane.f32.xlu0 %v9712_v46 }
0x4d06   :  { %v20611_v12 = vpop.eup %20610 }
0x4d07   :  { %v9715_v63 = vsel %vm273_vm2, %v20611_v12, 0.0  ;;  %v9953_v14 = vpop.permute.xlu1 %9952 }
0x4d08   :  { %9716 = vadd.xlane.f32.xlu0 %v9715_v63 }
0x4d1e   :  { %9874 = vrot.lane.b32.xlu0 %v22612_v32, %s24003_s19 }
0x4d91   :  { %v9714_v2 = vpop.xlane.xlu0 %9713 }
0x4d92   :  { %20612 = vrcp.f32 %v9714_v2 }
0x4d95   :  { %v9717_v3 = vpop.xlane.xlu0 %9716 }
0x4d96   :  { %20614 = vrcp.f32 %v9717_v3 }
0x4d99   :  { %v9875_v32 = vpop.permute.xlu0 %9874 }
0x4d9c   :  { %v20613_v58 = vpop.eup %20612 }
0x4d9d   :  { %v9720_v7 = vmul.f32 %v20613_v58, %v20609_v49 }
0x4d9f   :  { %19371 = vmatmul.mubr.msk.f32.vlgmr.msra.gmra.mrb[88].mxu0 %vm273_vm2, %v9720_v7 }
0x4da0   :  { %v20615_v60 = vpop.eup %20614  ;;  %19379 = vmatpush3.xpose.msk.msra.mxu0 %vm273_vm2, %v9877_v59  ;;  %19380 = vmatprep.mubr.msk.f32.mxu0 %vm21019_vm1, %v21018_v8 }
0x4da1   :  { %v9721_v11 = vmul.f32 %v20615_v60, %v20611_v12  ;;  %19388 = vmatprep.subr.mxu0 %v21018_v8 }
0x4da3   :  { %19376 = vmatmul.mubr.msk.f32.vlgmr.msra.gmra.mrb[128].mxu1 %vm273_vm2, %v9721_v11  ;;  %19381 = vmatmul.mubr.msk.f32.vlgmr.msra.gmra.mrb[90].mxu0 %vm273_vm2, %v9875_v32 }
0x4da4   :  { %19384 = vmatpush3.xpose.msk.msra.mxu1 %vm273_vm2, %v9955_v44  ;;  %19385 = vmatprep.mubr.msk.f32.mxu1 %vm21019_vm1, %v21018_v8  ;;  %v17841_v44 = vld [vmem:[#allocation13 + $0x2] ss:$0 sm:$0xff] }
0x4da5   :  { %19393 = vmatprep.subr.mxu1 %v21018_v8  ;;  %19390 = vmatprep.mubr.msk.f32.mxu0 %vm21019_vm1, %v21018_v8 }
0x4da7   :  { %19386 = vmatmul.mubr.msk.f32.vlgmr.msra.gmra.mrb[130].mxu1 %vm273_vm2, %v9953_v14 }
0x4da8   :  { %19395 = vmatprep.mubr.msk.f32.mxu1 %vm21019_vm1, %v21018_v8 }
0x4e72   :  { %v9794_v16 = vpop.f32.mrb[88].mxu0 }
0x4e73   :  { %v19372_v1 = vpop.f32.mrb[89].mxu0 }
0x4e76   :  { %v9870_v15 = vpop.f32.mrb[128].mxu1  ;;  %v9948_v62 = vpop.f32.mrb[90].mxu0 }
0x4e77   :  { %v19377_v17 = vpop.f32.mrb[129].mxu1  ;;  %v19382_v27 = vpop.f32.mrb[91].mxu0  ;;  %v10030_v24 = vsel %vm273_vm2, %v9948_v62, -inf }
0x4e78   :  { %10031 = vmax.xlane.f32.xlu0 %v10030_v24 }
0x4e7a   :  { %v10026_v43 = vpop.f32.mrb[130].mxu1 }
0x4e7b   :  { %v19387_v51 = vpop.f32.mrb[131].mxu1  ;;  %v10033_v21 = vsel %vm273_vm2, %v10026_v43, -inf }
0x4e7c   :  { %10034 = vmax.xlane.f32.xlu1 %v10033_v21 }
0x4e8d   :  { %10052 = vrot.lane.b32.xlu1 %v22607_v28, %s24009_s22 }
0x4e91   :  { %10206 = vrot.lane.b32.xlu1 %v22699_v37, %s23993_s8 }
0x4e95   :  { %10208 = vrot.lane.b32.xlu1 %v22701_v48, %s23993_s8 }
0x4e99   :  { %10216 = vrot.lane.b32.xlu1 %v9870_v15, %s23997_s27 }
0x4f05   :  { %v10032_v20 = vpop.xlane.xlu0 %10031 }
0x4f06   :  { %v10036_v31 = vsub.f32 %v9948_v62, %v10032_v20 }
0x4f08   :  { %v10038_v30 = vmul.f32 1.442695, %v10036_v31  ;;  %v10369_v31 = vld [vmem:[#allocation14 + $0x40] sm:$0xff] }
0x4f09   :  { %v10035_v26 = vpop.xlane.xlu1 %10034 }
0x4f0a   :  { %20616 = vpow2.f32 %v10038_v30  ;;  %v10037_v33 = vsub.f32 %v10026_v43, %v10035_v26  ;;  %v10370_v30 = vld [vmem:[#allocation14 + $0x48] sm:$0xff] }
0x4f0b   :  { %v20177_v26 = vpack.c.bf16 %v10370_v30, %v10369_v31 }
0x4f0c   :  { %v10040_v34 = vmul.f32 1.442695, %v10037_v33  ;;  %v10371_v33 = vld [vmem:[#allocation14 + $0x50] sm:$0xff] }
0x4f0d   :  { %v10053_v35 = vpop.permute.xlu1 %10052 }
0x4f0e   :  { %20618 = vpow2.f32 %v10040_v34  ;;  %19389 = vmatpush3.msra.mxu0 %v10053_v35  ;;  %v10372_v34 = vld [vmem:[#allocation14 + $0x58] sm:$0xff] }
0x4f0f   :  { %v20181_v35 = vpack.c.bf16 %v10372_v34, %v10371_v33 }
0x4f11   :  { %v10207_v56 = vpop.permute.xlu1 %10206 }
0x4f12   :  { %v10228_v46 = vsel %vm273_vm2, %v22661_v61, %v10207_v56 }
0x4f14   :  { %v20617_v23 = vpop.eup %20616 }
0x4f15   :  { %v10042_v28 = vsel %vm273_vm2, %v20617_v23, 0.0  ;;  %v10209_v57 = vpop.permute.xlu1 %10208 }
0x4f16   :  { %10043 = vadd.xlane.f32.xlu0 %v10042_v28  ;;  %v10229_v59 = vsel %vm273_vm2, %v22663_v0, %v10209_v57  ;;  %v17849_v28 = vld [vmem:[%s23930_s17 + $0x108] sm:$0xff] }
0x4f18   :  { %v20619_v4 = vpop.eup %20618 }
0x4f19   :  { %v10045_v18 = vsel %vm273_vm2, %v20619_v4, 0.0  ;;  %v10217_v12 = vpop.permute.xlu1 %10216 }
0x4f1a   :  { %10046 = vadd.xlane.f32.xlu0 %v10045_v18  ;;  %v10231_v58 = vsel %vm1615_vm4, %v10229_v59, %v10217_v12 }
0x4f30   :  { %10128 = vrot.lane.b32.xlu0 %v22605_v25, %s24009_s22  ;;  %v17837_v25 = vld [vmem:[%s24013_s5 + $0x40] sm:$0xff]  ;;  %s24016_s5 = sld [smem:[#allocation28_spill]] }
0x4f31   :  { %v20169_v53 = vpack.c.bf16 %v17838_v52, %v17837_v25  ;;  %v17856_v52 = vld [vmem:[%s23930_s17 + $0x140] sm:$0xff] }
0x4f33   :  { %20170 = vmatprep.subr.bf16.mxu0 %v20169_v53 }
0x4f34   :  { %10214 = vrot.lane.b32.xlu0 %v9794_v16, %s23997_s27 }
0x4fa3   :  { %v10044_v37 = vpop.xlane.xlu0 %10043 }
0x4fa4   :  { %20620 = vrcp.f32 %v10044_v37  ;;  %v17851_v37 = vld [vmem:[%s23930_s17 + $0x118] sm:$0xff] }
0x4fa7   :  { %v10047_v41 = vpop.xlane.xlu0 %10046 }
0x4fa8   :  { %20622 = vrcp.f32 %v10047_v41 }
0x4fab   :  { %v10129_v48 = vpop.permute.xlu0 %10128 }
0x4fac   :  { %19394 = vmatpush3.msra.mxu1 %v10129_v48  ;;  %v17852_v48 = vld [vmem:[%s23930_s17 + $0x120] sm:$0xff] }
0x4fad   :  { %20178 = vmatprep.subr.bf16.mxu1 %v20177_v26 }
0x4fae   :  { %v20621_v42 = vpop.eup %20620 }
0x4faf   :  { %v10050_v50 = vmul.f32 %v20621_v42, %v20617_v23  ;;  %v10215_v49 = vpop.permute.xlu0 %10214  ;;  %v17848_v23 = vld [vmem:[%s23930_s17 + $0x100] sm:$0xff]  ;;  %v17853_v42 = vld [vmem:[%s23930_s17 + $0x128] sm:$0xff] }
0x4fb0   :  { %v10230_v63 = vsel %vm1615_vm4, %v10228_v46, %v10215_v49  ;;  %v20185_v18 = vpack.c.bf16 %v17849_v28, %v17848_v23 }
0x4fb1   :  { %19391 = vmatmul.mubr.msk.f32.vlgmr.msra.gmra.mrb[92].mxu0 %vm273_vm2, %v10050_v50  ;;  %v20193_v50 = vpack.c.bf16 %v17853_v42, %v17852_v48 }
0x4fb2   :  { %v20623_v22 = vpop.eup %20622  ;;  %20172 = vmatpush3.bf16.msra.mxu0 %v20169_v53  ;;  %v17857_v53 = vld [vmem:[%s23930_s17 + $0x148] sm:$0xff] }
0x4fb3   :  { %v10051_v36 = vmul.f32 %v20623_v22, %v20619_v4  ;;  %20174 = vmatprep.subr.bf16.mxu0 %v20173_v40  ;;  %v17850_v4 = vld [vmem:[%s23930_s17 + $0x110] sm:$0xff]  ;;  %v20201_v54 = vpack.c.bf16 %v17857_v53, %v17856_v52  ;;  %v17871_v52 = vld [vmem:[%s23998_s6 + $0x78] sm:$0xff] }
0x4fb4   :  { %v20189_v41 = vpack.c.bf16 %v17851_v37, %v17850_v4  ;;  %v17854_v22 = vld [vmem:[%s23930_s17 + $0x130] sm:$0xff] }
0x4fb5   :  { %19396 = vmatmul.mubr.msk.f32.vlgmr.msra.gmra.mrb[132].mxu1 %vm273_vm2, %v10051_v36  ;;  %v17855_v36 = vld [vmem:[%s23930_s17 + $0x138] sm:$0xff] }
0x4fb6   :  { %20176 = vmatpush3.bf16.msra.mxu0 %v20173_v40  ;;  %20180 = vmatpush3.bf16.msra.mxu1 %v20177_v26  ;;  %v20197_v25 = vpack.c.bf16 %v17855_v36, %v17854_v22  ;;  %v17859_v40 = vld [vmem:[%s23930_s17 + $0x158] sm:$0xff]  ;;  %v17869_v22 = vld [vmem:[%s23998_s6 + $0x68] sm:$0xff] }
0x4fb7   :  { %20182 = vmatprep.subr.bf16.mxu1 %v20181_v35  ;;  %20186 = vmatprep.subr.bf16.mxu0 %v20185_v18 }
0x4fba   :  { %20184 = vmatpush3.bf16.msra.mxu1 %v20181_v35 }
0x5084   :  { %v10124_v55 = vpop.f32.mrb[92].mxu0 }
0x5085   :  { %10222 = vrot.lane.b32.xlu0 %v10124_v55, %s23999_s12  ;;  %v19392_v45 = vpop.f32.mrb[93].mxu0  ;;  %v20205_v55 = vpack.c.bf16 %v17859_v40, %v17858_v38 }
0x5086   :  { %v17860_v45 = vld [vmem:[%s23930_s17 + $0x160] sm:$0xff] }
0x5088   :  { %v10200_v39 = vpop.f32.mrb[132].mxu1 }
0x5089   :  { %10224 = vrot.lane.b32.xlu1 %v10200_v39, %s23999_s12  ;;  %v19397_v5 = vpop.f32.mrb[133].mxu1  ;;  %v17861_v39 = vld [vmem:[%s23930_s17 + $0x168] sm:$0xff] }
0x508a   :  { %v20209_v5 = vpack.c.bf16 %v17861_v39, %v17860_v45 }
0x50f7   :  { %v10223_v2 = vpop.permute.xlu0 %10222 }
0x50f8   :  { %v10232_v3 = vsel %vm1618_vm3, %v10230_v63, %v10223_v2  ;;  %v10359_v2 = vrot.slane %v22581_v9, %v21783_v47 }
0x50f9   :  { %19406 = vmatprep.mubr.msk.f32.mxu0 %vm188_vm0, %v10232_v3 }
0x50fb   :  { %v10225_v7 = vpop.permute.xlu1 %10224 }
0x50fc   :  { %v10233_v60 = vsel %vm1618_vm3, %v10231_v58, %v10225_v7  ;;  %v10365_v58 = vrot.slane %v22586_v10, %v21783_v47 }
0x50fd   :  { %19407 = vmatmul.mubr.msk.f32.vlgmr.msra.gmra.mrb[94].mxu0 %vm188_vm0, %v10233_v60 }
0x50fe   :  { %20188 = vmatpush3.bf16.msra.mxu0 %v20185_v18 }
0x50ff   :  { %20190 = vmatprep.subr.bf16.mxu0 %v20189_v41 }
0x5102   :  { %20192 = vmatpush3.bf16.msra.mxu0 %v20189_v41 }
0x5103   :  { %20194 = vmatprep.subr.bf16.mxu0 %v20193_v50 }
0x5106   :  { %20196 = vmatpush3.bf16.msra.mxu0 %v20193_v50  ;;  %v17868_v50 = vld [vmem:[%s23998_s6 + $0x60] sm:$0xff] }
0x5107   :  { %20198 = vmatprep.subr.bf16.mxu0 %v20197_v25  ;;  %v20217_v36 = vpack.c.bf16 %v17869_v22, %v17868_v50 }
0x5109   :  { %20218 = vmatprep.subr.bf16.mxu1 %v20217_v36 }
0x510a   :  { %20200 = vmatpush3.bf16.msra.mxu0 %v20197_v25  ;;  %v17870_v25 = vld [vmem:[%s23998_s6 + $0x70] sm:$0xff] }
0x510b   :  { %20202 = vmatprep.subr.bf16.mxu0 %v20201_v54  ;;  %v20221_v53 = vpack.c.bf16 %v17871_v52, %v17870_v25 }
0x510e   :  { %20204 = vmatpush3.bf16.msra.mxu0 %v20201_v54 }
0x510f   :  { %20206 = vmatprep.subr.bf16.mxu0 %v20205_v55 }
0x5112   :  { %20208 = vmatpush3.bf16.msra.mxu0 %v20205_v55 }
0x5113   :  { %20210 = vmatprep.subr.bf16.mxu0 %v20209_v5 }
0x5116   :  { %20212 = vmatpush3.bf16.msra.mxu0 %v20209_v5  ;;  %v10595_v5 = vrot.slane %v22581_v9, %v21826_v6  ;;  %v17872_v9 = vld [vmem:[#allocation8 + $0x3] ss:$0 sm:$0xff] }
0x51d0   :  { %v19408_v61 = vpop.f32.mrb[94].mxu0 }
0x51d1   :  { %v10325_v11 = vadd.f32 %v19408_v61, %v17841_v44  ;;  %v10319_v32 = vpop.f32.mrb[95].mxu0 }
0x51d2   :  { %v10320_v14 = vadd.f32 %v17841_v44, %v10319_v32 }
0x51d3   :  { %v10329_v16 = vadd.f32 %v10325_v11, %v22596_v29 }
0x51d4   :  { %v10328_v1 = vadd.f32 %v10320_v14, %v22592_v19  ;;  %v17862_v14 = vld [vmem:[%s23930_s17 + $0x170] sm:$0xff] }
0x51d5   :  { %v10333_v15 = vsel %vm188_vm0, %v10329_v16, 0.0 }
0x51d6   :  { %10334 = vadd.xlane.f32.xlu1 %v10333_v15  ;;  %v10330_v0 = vsel %vm188_vm0, %v10328_v1, 0.0  ;;  %v17845_v15 = vld [vmem:[%s23929_s16 + $0x2] ss:$0 sm:$0xff] }
0x51d7   :  { %10331 = vadd.xlane.f32.xlu0 %v10330_v0 }
0x5263   :  { %v10335_v62 = vpop.xlane.xlu1 %10334 }
0x5264   :  { %v10337_v17 = vmul.f32 0.03125, %v10335_v62  ;;  %v10332_v27 = vpop.xlane.xlu0 %10331 }
0x5265   :  { %v10336_v24 = vmul.f32 0.03125, %v10332_v27 }
0x5266   :  { %v22781_v43 = vsub.f32 %v10329_v16, %v10337_v17  ;;  %v17863_v16 = vld [vmem:[%s23930_s17 + $0x178] sm:$0xff] }
0x5267   :  { %v10338_v51 = vsub.f32 %v10328_v1, %v10336_v24  ;;  %v20213_v1 = vpack.c.bf16 %v17863_v16, %v17862_v14 }
0x5268   :  { %v10341_v29 = vmul.f32 %v22781_v43, %v22781_v43 }
0x5269   :  { %v10340_v21 = vmul.f32 %v10338_v51, %v10338_v51  ;;  %20214 = vmatprep.subr.bf16.mxu0 %v20213_v1 }
0x526a   :  { %v10345_v19 = vsel %vm188_vm0, %v10341_v29, 0.0  ;;  %20216 = vmatpush3.bf16.msra.mxu0 %v20213_v1 }
0x526b   :  { %v10342_v20 = vsel %vm188_vm0, %v10340_v21, 0.0  ;;  %19496 = vmatprep.subr.mxu0 %v21018_v8 }
0x526c   :  { %10343 = vadd.xlane.f32.xlu0 %v10342_v20 }
0x5270   :  { %10346 = vadd.xlane.f32.xlu0 %v10345_v19 }
0x52f9   :  { %v10344_v56 = vpop.xlane.xlu0 %10343 }
0x52fa   :  { %v10348_v57 = vmul.f32 0.03125, %v10344_v56 }
0x52fc   :  { %v10350_v49 = vadd.f32 1e-05, %v10348_v57 }
0x52fd   :  { %v10347_v46 = vpop.xlane.xlu0 %10346 }
0x52fe   :  { %20624 = vrsqrt.f32 %v10350_v49  ;;  %v10349_v12 = vmul.f32 0.03125, %v10347_v46 }
0x5300   :  { %v10351_v63 = vadd.f32 1e-05, %v10349_v12  ;;  %v10601_v12 = vrot.slane %v22586_v10, %v21826_v6 }
0x5302   :  { %20626 = vrsqrt.f32 %v10351_v63 }
0x5308   :  { %v20625_v3 = vpop.eup %20624 }
0x5309   :  { %v10354_v59 = vmul.f32 %v20625_v3, %v10338_v51  ;;  %v17865_v51 = vld [vmem:[%s23931_s18 + $0x2] ss:$0 sm:$0xff] }
0x530b   :  { %v10360_v7 = vmul.f32 %v10359_v2, %v10354_v59 }
0x530c   :  { %v20627_v60 = vpop.eup %20626 }
0x530d   :  { %v10355_v44 = vmul.f32 %v20627_v60, %v22781_v43  ;;  %v10366_v61 = vadd.f32 %v10365_v58, %v10360_v7 }
0x530f   :  { %v10361_v11 = vmul.f32 %v10359_v2, %v10355_v44  ;;  %19417 = vmatprep.mubr.msk.f32.mxu1 %vm188_vm0, %v10366_v61 }
0x5311   :  { %v10367_v32 = vadd.f32 %v10365_v58, %v10361_v11 }
0x5313   :  { %19418 = vmatmul.mubr.msk.f32.vlgmr.msra.gmra.mrb[134].mxu1 %vm188_vm0, %v10367_v32 }
0x5314   :  { %20220 = vmatpush3.bf16.msra.mxu1 %v20217_v36 }
0x5315   :  { %20222 = vmatprep.subr.bf16.mxu1 %v20221_v53 }
0x5318   :  { %20224 = vmatpush3.bf16.msra.mxu1 %v20221_v53 }
0x5319   :  { %19466 = vmatprep.subr.mxu1 %v21018_v8 }
0x53e6   :  { %v19419_v0 = vpop.f32.mrb[134].mxu1 }
0x53e7   :  { %v10459_v62 = vadd.f32 %v19419_v0, %v17845_v15  ;;  %v10453_v17 = vpop.f32.mrb[135].mxu1 }
0x53e8   :  { %v10454_v27 = vadd.f32 %v17845_v15, %v10453_v17 }
0x53e9   :  { %v10463_v43 = vmax.f32 %v10459_v62, 0.0 }
0x53ea   :  { %v10462_v24 = vmax.f32 %v10454_v27, 0.0 }
0x53ec   :  { %19452 = vmatprep.mubr.f32.mxu0 %v10462_v24 }
0x53ed   :  { %19453 = vmatmul.mubr.f32.vlgmr.msra.gmra.mrb[96].mxu0 %v10463_v43 }
0x53ee   :  { %19498 = vmatprep.mubr.msk.f32.mxu0 %vm21019_vm1, %v21018_v8 }
0x54c0   :  { %v19454_v21 = vpop.f32.mrb[96].mxu0 }
0x54c1   :  { %v10561_v20 = vadd.f32 %v19454_v21, %v17865_v51  ;;  %v10555_v29 = vpop.f32.mrb[97].mxu0 }
0x54c2   :  { %v10556_v19 = vadd.f32 %v17865_v51, %v10555_v29 }
0x54c3   :  { %v10565_v31 = vadd.f32 %v10561_v20, %v10367_v32  ;;  %v22902_v32 = vld [vmem:[#allocation7] sm:$0xff] }
0x54c4   :  { %v10564_v30 = vadd.f32 %v10556_v19, %v10366_v61 }
0x54c5   :  { %v10569_v26 = vsel %vm188_vm0, %v10565_v31, 0.0 }
0x54c6   :  { %10570 = vadd.xlane.f32.xlu0 %v10569_v26  ;;  %v10566_v33 = vsel %vm188_vm0, %v10564_v30, 0.0 }
0x54c7   :  { %10567 = vadd.xlane.f32.xlu1 %v10566_v33 }
0x5553   :  { %v10571_v34 = vpop.xlane.xlu0 %10570 }
0x5554   :  { %v10573_v35 = vmul.f32 0.03125, %v10571_v34  ;;  %v10568_v23 = vpop.xlane.xlu1 %10567 }
0x5555   :  { %v10572_v28 = vmul.f32 0.03125, %v10568_v23 }
0x5556   :  { %v10575_v4 = vsub.f32 %v10565_v31, %v10573_v35 }
0x5557   :  { %v10574_v18 = vsub.f32 %v10564_v30, %v10572_v28 }
0x5558   :  { %v10577_v37 = vmul.f32 %v10575_v4, %v10575_v4 }
0x5559   :  { %v10576_v41 = vmul.f32 %v10574_v18, %v10574_v18 }
0x555a   :  { %v10581_v48 = vsel %vm188_vm0, %v10577_v37, 0.0 }
0x555b   :  { %10582 = vadd.xlane.f32.xlu0 %v10581_v48  ;;  %v10578_v42 = vsel %vm188_vm0, %v10576_v41, 0.0 }
0x555c   :  { %10579 = vadd.xlane.f32.xlu1 %v10578_v42 }
0x55e8   :  { %v10583_v54 = vpop.xlane.xlu0 %10582 }
0x55e9   :  { %v10585_v38 = vmul.f32 0.03125, %v10583_v54  ;;  %v10580_v40 = vpop.xlane.xlu1 %10579 }
0x55ea   :  { %v10584_v55 = vmul.f32 0.03125, %v10580_v40 }
0x55eb   :  { %v10587_v45 = vadd.f32 1e-05, %v10585_v38 }
0x55ec   :  { %v10586_v39 = vadd.f32 1e-05, %v10584_v55 }
0x55ed   :  { %20628 = vrsqrt.f32 %v10587_v45 }
0x55ee   :  { %20630 = vrsqrt.f32 %v10586_v39 }
0x55f7   :  { %v20629_v56 = vpop.eup %20628 }
0x55f8   :  { %v20631_v57 = vpop.eup %20630  ;;  %v10591_v49 = vmul.f32 %v20629_v56, %v10575_v4 }
0x55f9   :  { %v10590_v46 = vmul.f32 %v20631_v57, %v10574_v18 }
0x55fa   :  { %v10597_v63 = vmul.f32 %v10595_v5, %v10591_v49 }
0x55fb   :  { %v10596_v2 = vmul.f32 %v10595_v5, %v10590_v46 }
0x55fc   :  { %v22874_v59 = vadd.f32 %v10601_v12, %v10597_v63 }
0x55fd   :  { %v22872_v3 = vadd.f32 %v10601_v12, %v10596_v2 }
0x55ff   :  { %19463 = vmatprep.mubr.msk.f32.mxu1 %vm188_vm0, %v22872_v3 }
0x5600   :  { %19464 = vmatmul.mubr.msk.f32.vlgmr.msra.gmra.mrb[136].mxu1 %vm188_vm0, %v22874_v59 }
0x5601   :  { %19468 = vmatprep.mubr.msk.f32.mxu1 %vm21019_vm1, %v21018_v8 }
0x56d3   :  { %v19465_v58 = vpop.f32.mrb[136].mxu1 }
0x56d4   :  { %v22882_v7 = vadd.f32 %v19465_v58, %v17872_v9  ;;  %v10693_v10 = vpop.f32.mrb[137].mxu1 }
0x56d5   :  { %v22884_v60 = vadd.f32 %v17872_v9, %v10693_v10 }
0x56d6   :  { %10780 = vrot.lane.b32.xlu0 %v22882_v7, %s24010_s15 }
0x56d7   :  { %10703 = vrot.lane.b32.xlu1 %v22884_v60, %s24010_s15 }
0x5748   :  { %v10781_v61 = vpop.permute.xlu0 %10780 }
0x5749   :  { %v10704_v44 = vpop.permute.xlu1 %10703 }
0x574a   :  { %19467 = vmatpush3.xpose.msk.msra.mxu1 %vm273_vm2, %v10704_v44 }
0x574b   :  { %19471 = vmatprep.subr.mxu1 %v21018_v8 }
0x574d   :  { %19469 = vmatmul.mubr.msk.f32.vlgmr.msra.gmra.mrb[138].mxu1 %vm273_vm2, %v22884_v60 }
0x574e   :  { %19472 = vmatpush3.xpose.msk.msra.mxu1 %vm273_vm2, %v10781_v61  ;;  %19473 = vmatprep.mubr.msk.f32.mxu1 %vm21019_vm1, %v21018_v8 }
0x574f   :  { %19476 = vmatprep.subr.mxu1 %v21018_v8 }
0x5751   :  { %19474 = vmatmul.mubr.msk.f32.vlgmr.msra.gmra.mrb[140].mxu1 %vm273_vm2, %v22882_v7 }
0x5752   :  { %19478 = vmatprep.mubr.msk.f32.mxu1 %vm21019_vm1, %v21018_v8 }
0x5820   :  { %v10775_v11 = vpop.f32.mrb[138].mxu1 }
0x5821   :  { %v10776_v14 = vadd.f32 %v22902_v32, %v10775_v11  ;;  %v19470_v16 = vpop.f32.mrb[139].mxu1 }
0x5823   :  { %v10856_v1 = vsel %vm273_vm2, %v10776_v14, -inf }
0x5824   :  { %10857 = vmax.xlane.f32.xlu1 %v10856_v1  ;;  %v10852_v15 = vpop.f32.mrb[140].mxu1 }
0x5825   :  { %v10853_v0 = vadd.f32 %v22902_v32, %v10852_v15  ;;  %v19475_v62 = vpop.f32.mrb[141].mxu1 }
0x5827   :  { %v10859_v17 = vsel %vm273_vm2, %v10853_v0, -inf }
0x5828   :  { %10860 = vmax.xlane.f32.xlu0 %v10859_v17 }
0x5835   :  { %10878 = vrot.lane.b32.xlu1 %v22884_v60, %s24000_s20 }
0x58b1   :  { %v10858_v27 = vpop.xlane.xlu1 %10857 }
0x58b2   :  { %v10862_v24 = vsub.f32 %v10776_v14, %v10858_v27 }
0x58b4   :  { %v10864_v43 = vmul.f32 1.442695, %v10862_v24 }
0x58b5   :  { %v10879_v51 = vpop.permute.xlu1 %10878  ;;  %v10861_v21 = vpop.xlane.xlu0 %10860 }
0x58b6   :  { %20632 = vpow2.f32 %v10864_v43  ;;  %v10863_v20 = vsub.f32 %v10853_v0, %v10861_v21  ;;  %19477 = vmatpush3.msra.mxu1 %v10879_v51 }
0x58b7   :  { %19481 = vmatprep.subr.mxu1 %v21018_v8 }
0x58b8   :  { %v10866_v29 = vmul.f32 1.442695, %v10863_v20 }
0x58ba   :  { %20634 = vpow2.f32 %v10866_v29 }
0x58c0   :  { %v20633_v19 = vpop.eup %20632 }
0x58c1   :  { %v10868_v31 = vsel %vm273_vm2, %v20633_v19, 0.0 }
0x58c2   :  { %10869 = vadd.xlane.f32.xlu1 %v10868_v31 }
0x58c4   :  { %v20635_v30 = vpop.eup %20634 }
0x58c5   :  { %v10871_v26 = vsel %vm273_vm2, %v20635_v30, 0.0 }
0x58c6   :  { %10872 = vadd.xlane.f32.xlu0 %v10871_v26 }
0x58d3   :  { %11032 = vrot.lane.b32.xlu1 %v22884_v60, %s24006_s29 }
0x58d7   :  { %11030 = vrot.lane.b32.xlu1 %v22884_v60, %s24005_s3 }
0x58db   :  { %11108 = vrot.lane.b32.xlu1 %v22882_v7, %s24005_s3 }
0x58dc   :  { %10954 = vrot.lane.b32.xlu0 %v22882_v7, %s24000_s20 }
0x58e0   :  { %11110 = vrot.lane.b32.xlu0 %v22882_v7, %s24006_s29 }
0x594f   :  { %v10870_v33 = vpop.xlane.xlu1 %10869 }
0x5950   :  { %20636 = vrcp.f32 %v10870_v33 }
0x5953   :  { %v10873_v34 = vpop.xlane.xlu0 %10872  ;;  %v11033_v18 = vpop.permute.xlu1 %11032 }
0x5954   :  { %20638 = vrcp.f32 %v10873_v34 }
0x5957   :  { %v10955_v28 = vpop.permute.xlu0 %10954  ;;  %v11031_v41 = vpop.permute.xlu1 %11030 }
0x595a   :  { %v20637_v35 = vpop.eup %20636 }
0x595b   :  { %v10876_v23 = vmul.f32 %v20637_v35, %v20633_v19  ;;  %v11111_v48 = vpop.permute.xlu0 %11110  ;;  %v11109_v42 = vpop.permute.xlu1 %11108 }
0x595d   :  { %19479 = vmatmul.mubr.msk.f32.vlgmr.msra.gmra.mrb[142].mxu1 %vm273_vm2, %v10876_v23 }
0x595e   :  { %v20639_v4 = vpop.eup %20638  ;;  %19482 = vmatpush3.msra.mxu1 %v10955_v28  ;;  %19483 = vmatprep.mubr.msk.f32.mxu1 %vm21019_vm1, %v21018_v8 }
0x595f   :  { %v10877_v37 = vmul.f32 %v20639_v4, %v20635_v30  ;;  %19486 = vmatprep.subr.mxu1 %v21018_v8 }
0x5961   :  { %19484 = vmatmul.mubr.msk.f32.vlgmr.msra.gmra.mrb[144].mxu1 %vm273_vm2, %v10877_v37 }
0x5962   :  { %19488 = vmatprep.mubr.msk.f32.mxu1 %vm21019_vm1, %v21018_v8 }
0x5965   :  { %19487 = vmatpush3.xpose.msk.msra.mxu1 %vm273_vm2, %v11033_v18 }
0x5966   :  { %19491 = vmatprep.subr.mxu1 %v21018_v8 }
0x5968   :  { %19489 = vmatmul.mubr.msk.f32.vlgmr.msra.gmra.mrb[146].mxu1 %vm273_vm2, %v11031_v41 }
0x5969   :  { %19492 = vmatpush3.xpose.msk.msra.mxu1 %vm273_vm2, %v11111_v48  ;;  %19493 = vmatprep.mubr.msk.f32.mxu1 %vm21019_vm1, %v21018_v8 }
0x596a   :  { %19501 = vmatprep.subr.mxu1 %v21018_v8 }
0x596c   :  { %19494 = vmatmul.mubr.msk.f32.vlgmr.msra.gmra.mrb[148].mxu1 %vm273_vm2, %v11109_v42 }
0x596d   :  { %19503 = vmatprep.mubr.msk.f32.mxu1 %vm21019_vm1, %v21018_v8 }
0x5a30   :  { %v22940_v50 = vpop.f32.mrb[142].mxu1 }
0x5a31   :  { %v19480_v22 = vpop.f32.mrb[143].mxu1 }
0x5a34   :  { %v22942_v36 = vpop.f32.mrb[144].mxu1 }
0x5a35   :  { %v19485_v25 = vpop.f32.mrb[145].mxu1 }
0x5a3b   :  { %v11104_v52 = vpop.f32.mrb[146].mxu1 }
0x5a3c   :  { %v11105_v53 = vadd.f32 %v22902_v32, %v11104_v52  ;;  %v19490_v54 = vpop.f32.mrb[147].mxu1 }
0x5a3e   :  { %v11186_v38 = vsel %vm273_vm2, %v11105_v53, -inf }
0x5a3f   :  { %11187 = vmax.xlane.f32.xlu0 %v11186_v38  ;;  %v11182_v40 = vpop.f32.mrb[148].mxu1 }
0x5a40   :  { %v11183_v55 = vadd.f32 %v22902_v32, %v11182_v40  ;;  %v19495_v45 = vpop.f32.mrb[149].mxu1 }
0x5a42   :  { %v11189_v39 = vsel %vm273_vm2, %v11183_v55, -inf }
0x5a43   :  { %11190 = vmax.xlane.f32.xlu1 %v11189_v39 }
0x5a54   :  { %11208 = vrot.lane.b32.xlu1 %v22884_v60, %s24001_s1 }
0x5a55   :  { %11284 = vrot.lane.b32.xlu0 %v22882_v7, %s24001_s1 }
0x5a58   :  { %11362 = vrot.lane.b32.xlu1 %v22884_v60, %s24008_s30 }
0x5a5c   :  { %11440 = vrot.lane.b32.xlu1 %v22882_v7, %s24008_s30 }
0x5a60   :  { %11438 = vrot.lane.b32.xlu1 %v22882_v7, %s24007_s28 }
0x5acc   :  { %v11188_v5 = vpop.xlane.xlu0 %11187 }
0x5acd   :  { %v11192_v56 = vsub.f32 %v11105_v53, %v11188_v5 }
0x5acf   :  { %v11194_v57 = vmul.f32 1.442695, %v11192_v56 }
0x5ad0   :  { %v11285_v49 = vpop.permute.xlu0 %11284  ;;  %v11191_v46 = vpop.xlane.xlu1 %11190 }
0x5ad1   :  { %20640 = vpow2.f32 %v11194_v57  ;;  %v11193_v12 = vsub.f32 %v11183_v55, %v11191_v46  ;;  %19502 = vmatpush3.msra.mxu1 %v11285_v49 }
0x5ad2   :  { %19511 = vmatprep.subr.mxu1 %v21018_v8 }
0x5ad3   :  { %v11196_v63 = vmul.f32 1.442695, %v11193_v12 }
0x5ad4   :  { %v11209_v2 = vpop.permute.xlu1 %11208 }
0x5ad5   :  { %20642 = vpow2.f32 %v11196_v63  ;;  %19497 = vmatpush3.msra.mxu0 %v11209_v2 }
0x5ad6   :  { %19506 = vmatprep.subr.mxu0 %v21018_v8 }
0x5ad8   :  { %v11363_v14 = vpop.permute.xlu1 %11362 }
0x5adb   :  { %v20641_v9 = vpop.eup %20640 }
0x5adc   :  { %v11198_v58 = vsel %vm273_vm2, %v20641_v9, 0.0  ;;  %v11441_v0 = vpop.permute.xlu1 %11440 }
0x5add   :  { %11199 = vadd.xlane.f32.xlu0 %v11198_v58 }
0x5adf   :  { %v20643_v10 = vpop.eup %20642 }
0x5ae0   :  { %v11201_v44 = vsel %vm273_vm2, %v20643_v10, 0.0  ;;  %v11439_v27 = vpop.permute.xlu1 %11438 }
0x5ae1   :  { %11202 = vadd.xlane.f32.xlu0 %v11201_v44 }
0x5af7   :  { %11360 = vrot.lane.b32.xlu0 %v22884_v60, %s24007_s28 }
0x5b6a   :  { %v11200_v61 = vpop.xlane.xlu0 %11199 }
0x5b6b   :  { %20644 = vrcp.f32 %v11200_v61 }
0x5b6e   :  { %v11203_v11 = vpop.xlane.xlu0 %11202 }
0x5b6f   :  { %20646 = vrcp.f32 %v11203_v11 }
0x5b72   :  { %v11361_v17 = vpop.permute.xlu0 %11360 }
0x5b75   :  { %v20645_v16 = vpop.eup %20644 }
0x5b76   :  { %v11206_v1 = vmul.f32 %v20645_v16, %v20641_v9 }
0x5b78   :  { %19499 = vmatmul.mubr.msk.f32.vlgmr.msra.gmra.mrb[98].mxu0 %vm273_vm2, %v11206_v1 }
0x5b79   :  { %v20647_v15 = vpop.eup %20646  ;;  %19507 = vmatpush3.xpose.msk.msra.mxu0 %vm273_vm2, %v11363_v14  ;;  %19508 = vmatprep.mubr.msk.f32.mxu0 %vm21019_vm1, %v21018_v8 }
0x5b7a   :  { %v11207_v62 = vmul.f32 %v20647_v15, %v20643_v10  ;;  %19516 = vmatprep.subr.mxu0 %v21018_v8 }
0x5b7c   :  { %19504 = vmatmul.mubr.msk.f32.vlgmr.msra.gmra.mrb[150].mxu1 %vm273_vm2, %v11207_v62  ;;  %19509 = vmatmul.mubr.msk.f32.vlgmr.msra.gmra.mrb[100].mxu0 %vm273_vm2, %v11361_v17 }
0x5b7d   :  { %19512 = vmatpush3.xpose.msk.msra.mxu1 %vm273_vm2, %v11441_v0  ;;  %19513 = vmatprep.mubr.msk.f32.mxu1 %vm21019_vm1, %v21018_v8 }
0x5b7e   :  { %19521 = vmatprep.subr.mxu1 %v21018_v8  ;;  %19518 = vmatprep.mubr.msk.f32.mxu0 %vm21019_vm1, %v21018_v8 }
0x5b80   :  { %19514 = vmatmul.mubr.msk.f32.vlgmr.msra.gmra.mrb[152].mxu1 %vm273_vm2, %v11439_v27 }
0x5b81   :  { %19523 = vmatprep.mubr.msk.f32.mxu1 %vm21019_vm1, %v21018_v8 }
0x5c4b   :  { %v22980_v24 = vpop.f32.mrb[98].mxu0 }
0x5c4c   :  { %v19500_v43 = vpop.f32.mrb[99].mxu0 }
0x5c4f   :  { %v22982_v51 = vpop.f32.mrb[150].mxu1  ;;  %v11434_v21 = vpop.f32.mrb[100].mxu0 }
0x5c50   :  { %v11435_v20 = vadd.f32 %v22902_v32, %v11434_v21  ;;  %v19505_v29 = vpop.f32.mrb[151].mxu1  ;;  %v19510_v19 = vpop.f32.mrb[101].mxu0 }
0x5c52   :  { %v11516_v31 = vsel %vm273_vm2, %v11435_v20, -inf }
0x5c53   :  { %11517 = vmax.xlane.f32.xlu0 %v11516_v31  ;;  %v11512_v30 = vpop.f32.mrb[152].mxu1 }
0x5c54   :  { %v11513_v26 = vadd.f32 %v22902_v32, %v11512_v30  ;;  %v19515_v33 = vpop.f32.mrb[153].mxu1 }
0x5c56   :  { %v11519_v34 = vsel %vm273_vm2, %v11513_v26, -inf }
0x5c57   :  { %11520 = vmax.xlane.f32.xlu1 %v11519_v34  ;;  %v17901_v34 = vld [vmem:[%s24014_s2 + $0x70] sm:$0xff] }
0x5c68   :  { %11538 = vrot.lane.b32.xlu1 %v22884_v60, %s24002_s4 }
0x5c69   :  { %11614 = vrot.lane.b32.xlu0 %v22882_v7, %s24002_s4 }
0x5c6c   :  { %11692 = vrot.lane.b32.xlu1 %v22884_v60, %s24009_s22 }
0x5c70   :  { %11770 = vrot.lane.b32.xlu1 %v22882_v7, %s24009_s22 }
0x5c74   :  { %11768 = vrot.lane.b32.xlu1 %v22882_v7, %s24003_s19 }
0x5ce0   :  { %v11518_v35 = vpop.xlane.xlu0 %11517 }
0x5ce1   :  { %v11522_v23 = vsub.f32 %v11435_v20, %v11518_v35  ;;  %v17902_v35 = vld [vmem:[%s24014_s2 + $0x78] sm:$0xff] }
0x5ce3   :  { %v11524_v28 = vmul.f32 1.442695, %v11522_v23  ;;  %v20229_v23 = vpack.c.bf16 %v17902_v35, %v17901_v34 }
0x5ce4   :  { %v11615_v4 = vpop.permute.xlu0 %11614  ;;  %v11521_v18 = vpop.xlane.xlu1 %11520 }
0x5ce5   :  { %20648 = vpow2.f32 %v11524_v28  ;;  %v11523_v37 = vsub.f32 %v11513_v26, %v11521_v18  ;;  %19522 = vmatpush3.msra.mxu1 %v11615_v4  ;;  %v17900_v26 = vld [vmem:[%s24014_s2 + $0x68] sm:$0xff] }
0x5ce6   :  { %19531 = vmatprep.subr.mxu1 %v21018_v8 }
0x5ce7   :  { %v11526_v41 = vmul.f32 1.442695, %v11523_v37 }
0x5ce8   :  { %v11539_v48 = vpop.permute.xlu1 %11538 }
0x5ce9   :  { %20650 = vpow2.f32 %v11526_v41  ;;  %19517 = vmatpush3.msra.mxu0 %v11539_v48 }
0x5cea   :  { %19526 = vmatprep.subr.mxu0 %v21018_v8 }
0x5cec   :  { %v11693_v38 = vpop.permute.xlu1 %11692 }
0x5cef   :  { %v20649_v42 = vpop.eup %20648 }
0x5cf0   :  { %v11528_v22 = vsel %vm273_vm2, %v20649_v42, 0.0  ;;  %v11771_v39 = vpop.permute.xlu1 %11770 }
0x5cf1   :  { %11529 = vadd.xlane.f32.xlu0 %v11528_v22 }
0x5cf3   :  { %v20651_v25 = vpop.eup %20650 }
0x5cf4   :  { %v11531_v52 = vsel %vm273_vm2, %v20651_v25, 0.0  ;;  %v11769_v57 = vpop.permute.xlu1 %11768 }
0x5cf5   :  { %11532 = vadd.xlane.f32.xlu0 %v11531_v52 }
0x5d0b   :  { %11690 = vrot.lane.b32.xlu0 %v22884_v60, %s24003_s19 }
0x5d7e   :  { %v11530_v53 = vpop.xlane.xlu0 %11529 }
0x5d7f   :  { %20652 = vrcp.f32 %v11530_v53 }
0x5d82   :  { %v11533_v54 = vpop.xlane.xlu0 %11532 }
0x5d83   :  { %20654 = vrcp.f32 %v11533_v54 }
0x5d86   :  { %v11691_v56 = vpop.permute.xlu0 %11690 }
0x5d89   :  { %v20653_v40 = vpop.eup %20652 }
0x5d8a   :  { %v11536_v55 = vmul.f32 %v20653_v40, %v20649_v42 }
0x5d8c   :  { %19519 = vmatmul.mubr.msk.f32.vlgmr.msra.gmra.mrb[102].mxu0 %vm273_vm2, %v11536_v55 }
0x5d8d   :  { %v20655_v45 = vpop.eup %20654  ;;  %19527 = vmatpush3.xpose.msk.msra.mxu0 %vm273_vm2, %v11693_v38  ;;  %19528 = vmatprep.mubr.msk.f32.mxu0 %vm21019_vm1, %v21018_v8 }
0x5d8e   :  { %v11537_v5 = vmul.f32 %v20655_v45, %v20651_v25  ;;  %19536 = vmatprep.subr.mxu0 %v21018_v8 }
0x5d90   :  { %19524 = vmatmul.mubr.msk.f32.vlgmr.msra.gmra.mrb[154].mxu1 %vm273_vm2, %v11537_v5  ;;  %19529 = vmatmul.mubr.msk.f32.vlgmr.msra.gmra.mrb[104].mxu0 %vm273_vm2, %v11691_v56 }
0x5d91   :  { %19532 = vmatpush3.xpose.msk.msra.mxu1 %vm273_vm2, %v11771_v39  ;;  %19533 = vmatprep.mubr.msk.f32.mxu1 %vm21019_vm1, %v21018_v8  ;;  %v20791_v39 = vld [vmem:[#allocation2] sm:$0xff] }
0x5d92   :  { %19541 = vmatprep.subr.mxu1 %v21018_v8  ;;  %19538 = vmatprep.mubr.msk.f32.mxu0 %vm21019_vm1, %v21018_v8 }
0x5d94   :  { %19534 = vmatmul.mubr.msk.f32.vlgmr.msra.gmra.mrb[156].mxu1 %vm273_vm2, %v11769_v57 }
0x5d95   :  { %19543 = vmatprep.mubr.msk.f32.mxu1 %vm21019_vm1, %v21018_v8 }
0x5e5f   :  { %v11610_v49 = vpop.f32.mrb[102].mxu0 }
0x5e60   :  { %v19520_v46 = vpop.f32.mrb[103].mxu0 }
0x5e63   :  { %v11686_v12 = vpop.f32.mrb[154].mxu1  ;;  %v11764_v63 = vpop.f32.mrb[104].mxu0 }
0x5e64   :  { %v11765_v2 = vadd.f32 %v22902_v32, %v11764_v63  ;;  %v19525_v9 = vpop.f32.mrb[155].mxu1  ;;  %v19530_v58 = vpop.f32.mrb[105].mxu0 }
0x5e66   :  { %v11846_v10 = vsel %vm273_vm2, %v11765_v2, -inf }
0x5e67   :  { %11847 = vmax.xlane.f32.xlu0 %v11846_v10  ;;  %v11842_v44 = vpop.f32.mrb[156].mxu1 }
0x5e68   :  { %v11843_v61 = vadd.f32 %v22902_v32, %v11842_v44  ;;  %v19535_v11 = vpop.f32.mrb[157].mxu1 }
0x5e6a   :  { %v11849_v14 = vsel %vm273_vm2, %v11843_v61, -inf }
0x5e6b   :  { %11850 = vmax.xlane.f32.xlu1 %v11849_v14 }
0x5e7c   :  { %11868 = vrot.lane.b32.xlu1 %v22884_v60, %s24004_s25 }
0x5e80   :  { %12022 = vrot.lane.b32.xlu1 %v22980_v24, %s23993_s8 }
0x5e84   :  { %12024 = vrot.lane.b32.xlu1 %v22982_v51, %s23993_s8 }
0x5e88   :  { %12032 = vrot.lane.b32.xlu1 %v11686_v12, %s23997_s27 }
0x5ef4   :  { %v11848_v16 = vpop.xlane.xlu0 %11847 }
0x5ef5   :  { %v11852_v1 = vsub.f32 %v11765_v2, %v11848_v16 }
0x5ef7   :  { %v11854_v15 = vmul.f32 1.442695, %v11852_v1  ;;  %v17914_v1 = vld [vmem:[%s23922_s9 + $0x68] sm:$0xff] }
0x5ef8   :  { %v11851_v0 = vpop.xlane.xlu1 %11850 }
0x5ef9   :  { %20656 = vpow2.f32 %v11854_v15  ;;  %v11853_v32 = vsub.f32 %v11843_v61, %v11851_v0  ;;  %v17906_v0 = vld [vmem:[%s23920_s7 + $0x60] sm:$0xff] }
0x5efb   :  { %v11856_v62 = vmul.f32 1.442695, %v11853_v32  ;;  %v17907_v32 = vld [vmem:[%s23920_s7 + $0x68] sm:$0xff] }
0x5efc   :  { %v11869_v17 = vpop.permute.xlu1 %11868 }
0x5efd   :  { %20658 = vpow2.f32 %v11856_v62  ;;  %19537 = vmatpush3.msra.mxu0 %v11869_v17  ;;  %v17915_v62 = vld [vmem:[%s23922_s9 + $0x70] sm:$0xff]  ;;  %v20233_v17 = vpack.c.bf16 %v17907_v32, %v17906_v0 }
0x5f00   :  { %v12023_v41 = vpop.permute.xlu1 %12022 }
0x5f01   :  { %v12044_v22 = vsel %vm273_vm2, %v22940_v50, %v12023_v41  ;;  %v17903_v50 = vld [vmem:[#allocation10 + $0x3] ss:$0 sm:$0xff] }
0x5f03   :  { %v20657_v27 = vpop.eup %20656 }
0x5f04   :  { %v11858_v60 = vsel %vm273_vm2, %v20657_v27, 0.0  ;;  %v12025_v48 = vpop.permute.xlu1 %12024 }
0x5f05   :  { %11859 = vadd.xlane.f32.xlu0 %v11858_v60  ;;  %v12045_v38 = vsel %vm273_vm2, %v22942_v36, %v12025_v48 }
0x5f07   :  { %v20659_v24 = vpop.eup %20658 }
0x5f08   :  { %v11861_v43 = vsel %vm273_vm2, %v20659_v24, 0.0  ;;  %v12033_v25 = vpop.permute.xlu1 %12032 }
0x5f09   :  { %11862 = vadd.xlane.f32.xlu0 %v11861_v43  ;;  %v12047_v40 = vsel %vm1615_vm4, %v12045_v38, %v12033_v25  ;;  %v17909_v43 = vld [vmem:[%s23920_s7 + $0x78] sm:$0xff]  ;;  %v17910_v38 = vld [vmem:[#allocation11 + $0x3] ss:$0 sm:$0xff] }
0x5f1f   :  { %11944 = vrot.lane.b32.xlu0 %v22882_v7, %s24004_s25  ;;  %v17899_v7 = vld [vmem:[%s24014_s2 + $0x60] sm:$0xff]  ;;  %s24017_s2 = sld [smem:[#allocation29_spill]] }
0x5f20   :  { %v20225_v33 = vpack.c.bf16 %v17900_v26, %v17899_v7  ;;  %v23101_v26 = vld [vmem:[%s23926_s13 + $0xc] sm:$0x7] }
0x5f21   :  { %v12175_v34 = vrot.slane %v23101_v26, %v21525_v13 }
0x5f22   :  { %20226 = vmatprep.subr.bf16.mxu0 %v20225_v33 }
0x5f23   :  { %12030 = vrot.lane.b32.xlu0 %v11610_v49, %s23997_s27 }
0x5f92   :  { %v11860_v51 = vpop.xlane.xlu0 %11859 }
0x5f93   :  { %20660 = vrcp.f32 %v11860_v51 }
0x5f96   :  { %v11863_v21 = vpop.xlane.xlu0 %11862 }
0x5f97   :  { %20662 = vrcp.f32 %v11863_v21  ;;  %v20792_v21 = vld [vmem:[#allocation2 + $0x8] sm:$0xff] }
0x5f9a   :  { %v11945_v20 = vpop.permute.xlu0 %11944 }
0x5f9b   :  { %19542 = vmatpush3.msra.mxu1 %v11945_v20 }
0x5f9c   :  { %20234 = vmatprep.subr.bf16.mxu1 %v20233_v17 }
0x5f9d   :  { %v20661_v29 = vpop.eup %20660 }
0x5f9e   :  { %v11866_v19 = vmul.f32 %v20661_v29, %v20657_v27  ;;  %v12031_v42 = vpop.permute.xlu0 %12030  ;;  %v17916_v27 = vld [vmem:[%s23922_s9 + $0x78] sm:$0xff] }
0x5f9f   :  { %v12046_v52 = vsel %vm1615_vm4, %v12044_v22, %v12031_v42  ;;  %v20245_v60 = vpack.c.bf16 %v17916_v27, %v17915_v62  ;;  %v17918_v22 = vld [vmem:[%s24016_s5 + $0x3] ss:$0 sm:$0xff] }
0x5fa0   :  { %19539 = vmatmul.mubr.msk.f32.vlgmr.msra.gmra.mrb[106].mxu0 %vm273_vm2, %v11866_v19 }
0x5fa1   :  { %v20663_v31 = vpop.eup %20662  ;;  %20228 = vmatpush3.bf16.msra.mxu0 %v20225_v33  ;;  %v23106_v33 = vld [vmem:[%s24015_s10 + $0xc] sm:$0x7] }
0x5fa2   :  { %v11867_v30 = vmul.f32 %v20663_v31, %v20659_v24  ;;  %20230 = vmatprep.subr.bf16.mxu0 %v20229_v23  ;;  %v17908_v24 = vld [vmem:[%s23920_s7 + $0x70] sm:$0xff] }
0x5fa3   :  { %v20237_v51 = vpack.c.bf16 %v17909_v43, %v17908_v24 }
0x5fa4   :  { %19544 = vmatmul.mubr.msk.f32.vlgmr.msra.gmra.mrb[158].mxu1 %vm273_vm2, %v11867_v30 }
0x5fa5   :  { %20232 = vmatpush3.bf16.msra.mxu0 %v20229_v23  ;;  %20236 = vmatpush3.bf16.msra.mxu1 %v20233_v17 }
0x5fa6   :  { %20238 = vmatprep.subr.bf16.mxu1 %v20237_v51 }
0x5fa9   :  { %20240 = vmatpush3.bf16.msra.mxu1 %v20237_v51 }
0x5faa   :  { %19579 = vmatprep.subr.mxu1 %v21018_v8 }
0x6073   :  { %v11940_v28 = vpop.f32.mrb[106].mxu0 }
0x6074   :  { %12038 = vrot.lane.b32.xlu0 %v11940_v28, %s23999_s12  ;;  %v19540_v4 = vpop.f32.mrb[107].mxu0  ;;  %v12181_v28 = vrot.slane %v23106_v33, %v21525_v13 }
0x6077   :  { %v12016_v18 = vpop.f32.mrb[158].mxu1 }
0x6078   :  { %12040 = vrot.lane.b32.xlu1 %v12016_v18, %s23999_s12  ;;  %v19545_v37 = vpop.f32.mrb[159].mxu1 }
0x60e6   :  { %v12039_v53 = vpop.permute.xlu0 %12038 }
0x60e7   :  { %v12048_v54 = vsel %vm1618_vm3, %v12046_v52, %v12039_v53 }
0x60e8   :  { %19554 = vmatprep.mubr.msk.f32.mxu0 %vm188_vm0, %v12048_v54 }
0x60ea   :  { %v12041_v55 = vpop.permute.xlu1 %12040 }
0x60eb   :  { %v12049_v45 = vsel %vm1618_vm3, %v12047_v40, %v12041_v55 }
0x60ec   :  { %19555 = vmatmul.mubr.msk.f32.vlgmr.msra.gmra.mrb[108].mxu0 %vm188_vm0, %v12049_v45 }
0x60ed   :  { %19576 = vmatprep.mubr.msk.f32.mxu0 %vm188_vm0, %v20791_v39 }
0x61bf   :  { %v19556_v5 = vpop.f32.mrb[108].mxu0 }
0x61c0   :  { %v12141_v56 = vadd.f32 %v19556_v5, %v17903_v50  ;;  %v12135_v57 = vpop.f32.mrb[109].mxu0 }
0x61c1   :  { %v12136_v49 = vadd.f32 %v17903_v50, %v12135_v57 }
0x61c2   :  { %v12145_v46 = vadd.f32 %v12141_v56, %v22874_v59 }
0x61c3   :  { %v12144_v12 = vadd.f32 %v12136_v49, %v22872_v3  ;;  %v17913_v3 = vld [vmem:[%s23922_s9 + $0x60] sm:$0xff] }
0x61c4   :  { %v12149_v36 = vsel %vm188_vm0, %v12145_v46, 0.0  ;;  %v20241_v15 = vpack.c.bf16 %v17914_v1, %v17913_v3 }
0x61c5   :  { %12150 = vadd.xlane.f32.xlu1 %v12149_v36  ;;  %v12146_v63 = vsel %vm188_vm0, %v12144_v12, 0.0 }
0x61c6   :  { %12147 = vadd.xlane.f32.xlu0 %v12146_v63  ;;  %20242 = vmatprep.subr.bf16.mxu0 %v20241_v15 }
0x61c7   :  { %20244 = vmatpush3.bf16.msra.mxu0 %v20241_v15 }
0x61c8   :  { %20246 = vmatprep.subr.bf16.mxu0 %v20245_v60 }
0x61cb   :  { %20248 = vmatpush3.bf16.msra.mxu0 %v20245_v60 }
0x61cc   :  { %19589 = vmatprep.subr.mxu0 %v21018_v8 }
0x61ce   :  { %19577 = vmatmul.mubr.msk.f32.vlgmr.msra.gmra.mrb[110].mxu0 %vm188_vm0, %v20792_v21 }
0x61cf   :  { %19591 = vmatprep.mubr.msk.f32.mxu0 %vm21019_vm1, %v21018_v8 }
0x6252   :  { %v12151_v2 = vpop.xlane.xlu1 %12150 }
0x6253   :  { %v12153_v9 = vmul.f32 0.03125, %v12151_v2  ;;  %v12148_v58 = vpop.xlane.xlu0 %12147 }
0x6254   :  { %v12152_v10 = vmul.f32 0.03125, %v12148_v58 }
0x6255   :  { %v12155_v44 = vsub.f32 %v12145_v46, %v12153_v9 }
0x6256   :  { %v12154_v61 = vsub.f32 %v12144_v12, %v12152_v10 }
0x6257   :  { %v12157_v16 = vmul.f32 %v12155_v44, %v12155_v44 }
0x6258   :  { %v12156_v11 = vmul.f32 %v12154_v61, %v12154_v61 }
0x6259   :  { %v12161_v59 = vsel %vm188_vm0, %v12157_v16, 0.0 }
0x625a   :  { %v12158_v14 = vsel %vm188_vm0, %v12156_v11, 0.0 }
0x625b   :  { %12159 = vadd.xlane.f32.xlu0 %v12158_v14 }
0x625f   :  { %12162 = vadd.xlane.f32.xlu0 %v12161_v59 }
0x62a1   :  { %v19578_v25 = vpop.f32.mrb[110].mxu0 }
0x62a2   :  { %v23125_v52 = vadd.f32 %v19578_v25, %v17918_v22  ;;  %v12357_v53 = vpop.f32.mrb[111].mxu0 }
0x62a3   :  { %v23127_v54 = vadd.f32 %v17918_v22, %v12357_v53 }
0x62e8   :  { %v12160_v20 = vpop.xlane.xlu0 %12159 }
0x62e9   :  { %v12164_v29 = vmul.f32 0.03125, %v12160_v20 }
0x62eb   :  { %v12166_v19 = vadd.f32 1e-05, %v12164_v29 }
0x62ec   :  { %v12163_v31 = vpop.xlane.xlu0 %12162 }
0x62ed   :  { %20664 = vrsqrt.f32 %v12166_v19  ;;  %v12165_v30 = vmul.f32 0.03125, %v12163_v31 }
0x62ef   :  { %v12167_v7 = vadd.f32 1e-05, %v12165_v30 }
0x62f1   :  { %20666 = vrsqrt.f32 %v12167_v7 }
0x62f7   :  { %v20665_v35 = vpop.eup %20664 }
0x62f8   :  { %v12170_v23 = vmul.f32 %v20665_v35, %v12154_v61 }
0x62fa   :  { %v12176_v4 = vmul.f32 %v12175_v34, %v12170_v23 }
0x62fb   :  { %v20667_v18 = vpop.eup %20666 }
0x62fc   :  { %v12171_v37 = vmul.f32 %v20667_v18, %v12155_v44  ;;  %v23112_v41 = vadd.f32 %v12181_v28, %v12176_v4 }
0x62fe   :  { %v12177_v48 = vmul.f32 %v12175_v34, %v12171_v37  ;;  %19565 = vmatprep.mubr.msk.f32.mxu1 %vm188_vm0, %v23112_v41 }
0x6300   :  { %v23116_v42 = vadd.f32 %v12181_v28, %v12177_v48 }
0x6302   :  { %19566 = vmatmul.mubr.msk.f32.vlgmr.msra.gmra.mrb[160].mxu1 %vm188_vm0, %v23116_v42 }
0x6303   :  { %19581 = vmatprep.mubr.msk.f32.mxu1 %vm21019_vm1, %v21018_v8  ;;  %19580 = vmatpush3.xpose.msk.msra.mxu1 %vm273_vm2, %v23127_v54 }
0x6304   :  { %19584 = vmatprep.subr.mxu1 %v21018_v8 }
0x63d5   :  { %v19567_v40 = vpop.f32.mrb[160].mxu1 }
0x63d6   :  { %v12269_v55 = vpop.f32.mrb[161].mxu1  ;;  %v23140_v39 = vadd.f32 %v19567_v40, %v17910_v38 }
0x63d7   :  { %v23132_v45 = vadd.f32 %v17910_v38, %v12269_v55 }
0x63d9   :  { %19582 = vmatmul.mubr.msk.f32.vlgmr.msra.gmra.mrb[162].mxu1 %vm273_vm2, %v23132_v45 }
0x63da   :  { %19585 = vmatpush3.xpose.msk.msra.mxu1 %vm273_vm2, %v23125_v52  ;;  %19586 = vmatprep.mubr.msk.f32.mxu1 %vm21019_vm1, %v21018_v8 }
0x63db   :  { %19594 = vmatprep.subr.mxu1 %v21018_v8 }
0x63dd   :  { %19587 = vmatmul.mubr.msk.f32.vlgmr.msra.gmra.mrb[164].mxu1 %vm273_vm2, %v23140_v39 }
0x63de   :  { %19596 = vmatprep.mubr.msk.f32.mxu1 %vm21019_vm1, %v21018_v8 }
0x64ac   :  { %v12438_v50 = vpop.f32.mrb[162].mxu1 }
0x64ad   :  { %v19583_v5 = vpop.f32.mrb[163].mxu1  ;;  %v12518_v56 = vsel %vm273_vm2, %v12438_v50, -inf }
0x64ae   :  { %12519 = vmax.xlane.f32.xlu1 %v12518_v56 }
0x64b0   :  { %v12514_v57 = vpop.f32.mrb[164].mxu1 }
0x64b1   :  { %v19588_v49 = vpop.f32.mrb[165].mxu1  ;;  %v12521_v46 = vsel %vm273_vm2, %v12514_v57, -inf }
0x64b2   :  { %12522 = vmax.xlane.f32.xlu0 %v12521_v46 }
0x64bf   :  { %12540 = vrot.lane.b32.xlu1 %v23127_v54, %s24010_s15 }
0x64c3   :  { %12694 = vrot.lane.b32.xlu1 %v23127_v54, %s24005_s3 }
0x64c7   :  { %12772 = vrot.lane.b32.xlu1 %v23125_v52, %s24005_s3 }
0x64c8   :  { %12616 = vrot.lane.b32.xlu0 %v23125_v52, %s24010_s15 }
0x653b   :  { %v12520_v12 = vpop.xlane.xlu1 %12519 }
0x653c   :  { %v12524_v36 = vsub.f32 %v12438_v50, %v12520_v12 }
0x653e   :  { %v12526_v63 = vmul.f32 1.442695, %v12524_v36 }
0x653f   :  { %v12541_v2 = vpop.permute.xlu1 %12540  ;;  %v12523_v9 = vpop.xlane.xlu0 %12522 }
0x6540   :  { %20668 = vpow2.f32 %v12526_v63  ;;  %v12525_v58 = vsub.f32 %v12514_v57, %v12523_v9  ;;  %19590 = vmatpush3.msra.mxu0 %v12541_v2 }
0x6541   :  { %19599 = vmatprep.subr.mxu0 %v21018_v8 }
0x6542   :  { %v12528_v10 = vmul.f32 1.442695, %v12525_v58 }
0x6543   :  { %v12617_v44 = vpop.permute.xlu0 %12616  ;;  %v12695_v59 = vpop.permute.xlu1 %12694 }
0x6544   :  { %20670 = vpow2.f32 %v12528_v10  ;;  %19595 = vmatpush3.msra.mxu1 %v12617_v44 }
0x6545   :  { %19604 = vmatprep.subr.mxu1 %v21018_v8 }
0x6547   :  { %v12773_v3 = vpop.permute.xlu1 %12772 }
0x654a   :  { %v20669_v61 = vpop.eup %20668 }
0x654b   :  { %v12530_v11 = vsel %vm273_vm2, %v20669_v61, 0.0 }
0x654c   :  { %12531 = vadd.xlane.f32.xlu1 %v12530_v11 }
0x654e   :  { %v20671_v14 = vpop.eup %20670 }
0x654f   :  { %v12533_v16 = vsel %vm273_vm2, %v20671_v14, 0.0 }
0x6550   :  { %12534 = vadd.xlane.f32.xlu0 %v12533_v16 }
0x655d   :  { %12770 = vrot.lane.b32.xlu1 %v23140_v39, %s24005_s3 }
0x6566   :  { %12692 = vrot.lane.b32.xlu0 %v23132_v45, %s24005_s3 }
0x65d9   :  { %v12532_v1 = vpop.xlane.xlu1 %12531 }
0x65da   :  { %20672 = vrcp.f32 %v12532_v1 }
0x65dd   :  { %v12535_v15 = vpop.xlane.xlu0 %12534  ;;  %v12771_v60 = vpop.permute.xlu1 %12770 }
0x65de   :  { %20674 = vrcp.f32 %v12535_v15 }
0x65e1   :  { %v12693_v27 = vpop.permute.xlu0 %12692 }
0x65e4   :  { %v20673_v0 = vpop.eup %20672 }
0x65e5   :  { %v12538_v32 = vmul.f32 %v20673_v0, %v20669_v61 }
0x65e7   :  { %19592 = vmatmul.mubr.msk.f32.vlgmr.msra.gmra.mrb[112].mxu0 %vm273_vm2, %v12538_v32 }
0x65e8   :  { %v20675_v62 = vpop.eup %20674  ;;  %19600 = vmatpush3.xpose.msk.msra.mxu0 %vm273_vm2, %v12695_v59  ;;  %19601 = vmatprep.mubr.msk.f32.mxu0 %vm21019_vm1, %v21018_v8 }
0x65e9   :  { %v12539_v17 = vmul.f32 %v20675_v62, %v20671_v14  ;;  %19609 = vmatprep.subr.mxu0 %v21018_v8 }
0x65eb   :  { %19597 = vmatmul.mubr.msk.f32.vlgmr.msra.gmra.mrb[166].mxu1 %vm273_vm2, %v12539_v17  ;;  %19602 = vmatmul.mubr.msk.f32.vlgmr.msra.gmra.mrb[114].mxu0 %vm273_vm2, %v12693_v27 }
0x65ec   :  { %19605 = vmatpush3.xpose.msk.msra.mxu1 %vm273_vm2, %v12773_v3  ;;  %19606 = vmatprep.mubr.msk.f32.mxu1 %vm21019_vm1, %v21018_v8 }
0x65ed   :  { %19614 = vmatprep.subr.mxu1 %v21018_v8  ;;  %19611 = vmatprep.mubr.msk.f32.mxu0 %vm21019_vm1, %v21018_v8 }
0x65ef   :  { %19607 = vmatmul.mubr.msk.f32.vlgmr.msra.gmra.mrb[168].mxu1 %vm273_vm2, %v12771_v60 }
0x65f0   :  { %19616 = vmatprep.mubr.msk.f32.mxu1 %vm21019_vm1, %v21018_v8 }
0x66ba   :  { %v23181_v24 = vpop.f32.mrb[112].mxu0 }
0x66bb   :  { %v19593_v43 = vpop.f32.mrb[113].mxu0 }
0x66be   :  { %v23183_v51 = vpop.f32.mrb[166].mxu1  ;;  %v12766_v21 = vpop.f32.mrb[114].mxu0 }
0x66bf   :  { %v19598_v20 = vpop.f32.mrb[167].mxu1  ;;  %v19603_v29 = vpop.f32.mrb[115].mxu0  ;;  %v12848_v19 = vsel %vm273_vm2, %v12766_v21, -inf }
0x66c0   :  { %12849 = vmax.xlane.f32.xlu0 %v12848_v19 }
0x66c2   :  { %v12844_v31 = vpop.f32.mrb[168].mxu1 }
0x66c3   :  { %v19608_v30 = vpop.f32.mrb[169].mxu1  ;;  %v12851_v7 = vsel %vm273_vm2, %v12844_v31, -inf }
0x66c4   :  { %12852 = vmax.xlane.f32.xlu1 %v12851_v7 }
0x66d5   :  { %12870 = vrot.lane.b32.xlu1 %v23127_v54, %s24006_s29 }
0x66d6   :  { %12946 = vrot.lane.b32.xlu0 %v23125_v52, %s24006_s29 }
0x66d9   :  { %13024 = vrot.lane.b32.xlu1 %v23127_v54, %s24007_s28 }
0x66dd   :  { %13102 = vrot.lane.b32.xlu1 %v23125_v52, %s24007_s28 }
0x66e1   :  { %13100 = vrot.lane.b32.xlu1 %v23140_v39, %s24007_s28 }
0x674d   :  { %v12850_v34 = vpop.xlane.xlu0 %12849 }
0x674e   :  { %v12854_v35 = vsub.f32 %v12766_v21, %v12850_v34 }
0x6750   :  { %v12856_v23 = vmul.f32 1.442695, %v12854_v35 }
0x6751   :  { %v12947_v28 = vpop.permute.xlu0 %12946  ;;  %v12853_v4 = vpop.xlane.xlu1 %12852 }
0x6752   :  { %20676 = vpow2.f32 %v12856_v23  ;;  %v12855_v18 = vsub.f32 %v12844_v31, %v12853_v4  ;;  %19615 = vmatpush3.msra.mxu1 %v12947_v28 }
0x6753   :  { %19624 = vmatprep.subr.mxu1 %v21018_v8 }
0x6754   :  { %v12858_v37 = vmul.f32 1.442695, %v12855_v18 }
0x6755   :  { %v12871_v48 = vpop.permute.xlu1 %12870 }
0x6756   :  { %20678 = vpow2.f32 %v12858_v37  ;;  %19610 = vmatpush3.msra.mxu0 %v12871_v48 }
0x6757   :  { %19619 = vmatprep.subr.mxu0 %v21018_v8 }
0x6759   :  { %v13025_v50 = vpop.permute.xlu1 %13024 }
0x675c   :  { %v20677_v22 = vpop.eup %20676 }
0x675d   :  { %v12860_v25 = vsel %vm273_vm2, %v20677_v22, 0.0  ;;  %v13103_v49 = vpop.permute.xlu1 %13102 }
0x675e   :  { %12861 = vadd.xlane.f32.xlu0 %v12860_v25 }
0x6760   :  { %v20679_v53 = vpop.eup %20678 }
0x6761   :  { %v12863_v38 = vsel %vm273_vm2, %v20679_v53, 0.0  ;;  %v13101_v36 = vpop.permute.xlu1 %13100 }
0x6762   :  { %12864 = vadd.xlane.f32.xlu0 %v12863_v38 }
0x6778   :  { %13022 = vrot.lane.b32.xlu0 %v23132_v45, %s24007_s28 }
0x67eb   :  { %v12862_v40 = vpop.xlane.xlu0 %12861 }
0x67ec   :  { %20680 = vrcp.f32 %v12862_v40 }
0x67ef   :  { %v12865_v55 = vpop.xlane.xlu0 %12864 }
0x67f0   :  { %20682 = vrcp.f32 %v12865_v55 }
0x67f3   :  { %v13023_v12 = vpop.permute.xlu0 %13022 }
0x67f6   :  { %v20681_v5 = vpop.eup %20680 }
0x67f7   :  { %v12868_v56 = vmul.f32 %v20681_v5, %v20677_v22 }
0x67f9   :  { %19612 = vmatmul.mubr.msk.f32.vlgmr.msra.gmra.mrb[116].mxu0 %vm273_vm2, %v12868_v56 }
0x67fa   :  { %v20683_v57 = vpop.eup %20682  ;;  %19620 = vmatpush3.xpose.msk.msra.mxu0 %vm273_vm2, %v13025_v50  ;;  %19621 = vmatprep.mubr.msk.f32.mxu0 %vm21019_vm1, %v21018_v8 }
0x67fb   :  { %v12869_v46 = vmul.f32 %v20683_v57, %v20679_v53  ;;  %19629 = vmatprep.subr.mxu0 %v21018_v8 }
0x67fd   :  { %19617 = vmatmul.mubr.msk.f32.vlgmr.msra.gmra.mrb[170].mxu1 %vm273_vm2, %v12869_v46  ;;  %19622 = vmatmul.mubr.msk.f32.vlgmr.msra.gmra.mrb[118].mxu0 %vm273_vm2, %v13023_v12 }
0x67fe   :  { %19625 = vmatpush3.xpose.msk.msra.mxu1 %vm273_vm2, %v13103_v49  ;;  %19626 = vmatprep.mubr.msk.f32.mxu1 %vm21019_vm1, %v21018_v8 }
0x67ff   :  { %19634 = vmatprep.subr.mxu1 %v21018_v8  ;;  %19631 = vmatprep.mubr.msk.f32.mxu0 %vm21019_vm1, %v21018_v8 }
0x6801   :  { %19627 = vmatmul.mubr.msk.f32.vlgmr.msra.gmra.mrb[172].mxu1 %vm273_vm2, %v13101_v36 }
0x6802   :  { %19636 = vmatprep.mubr.msk.f32.mxu1 %vm21019_vm1, %v21018_v8 }
0x68cc   :  { %v23219_v63 = vpop.f32.mrb[116].mxu0 }
0x68cd   :  { %v19613_v2 = vpop.f32.mrb[117].mxu0 }
0x68d0   :  { %v23221_v9 = vpop.f32.mrb[170].mxu1  ;;  %v13096_v58 = vpop.f32.mrb[118].mxu0 }
0x68d1   :  { %v19618_v10 = vpop.f32.mrb[171].mxu1  ;;  %v19623_v44 = vpop.f32.mrb[119].mxu0  ;;  %v13178_v61 = vsel %vm273_vm2, %v13096_v58, -inf }
0x68d2   :  { %13179 = vmax.xlane.f32.xlu0 %v13178_v61 }
0x68d4   :  { %v13174_v11 = vpop.f32.mrb[172].mxu1 }
0x68d5   :  { %v19628_v14 = vpop.f32.mrb[173].mxu1  ;;  %v13181_v16 = vsel %vm273_vm2, %v13174_v11, -inf }
0x68d6   :  { %13182 = vmax.xlane.f32.xlu1 %v13181_v16  ;;  %v17947_v16 = vld [vmem:[%s24017_s2 + $0x70] sm:$0xff] }
0x68e7   :  { %13200 = vrot.lane.b32.xlu1 %v23127_v54, %s24008_s30 }
0x68e8   :  { %13276 = vrot.lane.b32.xlu0 %v23125_v52, %s24008_s30 }
0x68eb   :  { %13354 = vrot.lane.b32.xlu1 %v23127_v54, %s24003_s19 }
0x68ef   :  { %13432 = vrot.lane.b32.xlu1 %v23125_v52, %s24003_s19 }
0x68f3   :  { %13430 = vrot.lane.b32.xlu1 %v23140_v39, %s24003_s19 }
0x695f   :  { %v13180_v59 = vpop.xlane.xlu0 %13179 }
0x6960   :  { %v13184_v3 = vsub.f32 %v13096_v58, %v13180_v59  ;;  %v17948_v59 = vld [vmem:[%s24017_s2 + $0x78] sm:$0xff] }
0x6962   :  { %v13186_v1 = vmul.f32 1.442695, %v13184_v3  ;;  %v20253_v3 = vpack.c.bf16 %v17948_v59, %v17947_v16  ;;  %v17966_v59 = vld [vmem:[%s23930_s17 + $0x1d0] sm:$0xff] }
0x6963   :  { %v13277_v15 = vpop.permute.xlu0 %13276  ;;  %v13183_v0 = vpop.xlane.xlu1 %13182 }
0x6964   :  { %20684 = vpow2.f32 %v13186_v1  ;;  %v13185_v32 = vsub.f32 %v13174_v11, %v13183_v0  ;;  %19635 = vmatpush3.msra.mxu1 %v13277_v15  ;;  %v17946_v11 = vld [vmem:[%s24017_s2 + $0x68] sm:$0xff] }
0x6965   :  { %19644 = vmatprep.subr.mxu1 %v21018_v8 }
0x6966   :  { %v13188_v62 = vmul.f32 1.442695, %v13185_v32 }
0x6967   :  { %v13201_v17 = vpop.permute.xlu1 %13200 }
0x6968   :  { %20686 = vpow2.f32 %v13188_v62  ;;  %19630 = vmatpush3.msra.mxu0 %v13201_v17 }
0x6969   :  { %19639 = vmatprep.subr.mxu0 %v21018_v8 }
0x696b   :  { %v13355_v29 = vpop.permute.xlu1 %13354 }
0x696e   :  { %v20685_v27 = vpop.eup %20684 }
0x696f   :  { %v13190_v60 = vsel %vm273_vm2, %v20685_v27, 0.0  ;;  %v13433_v7 = vpop.permute.xlu1 %13432 }
0x6970   :  { %13191 = vadd.xlane.f32.xlu0 %v13190_v60 }
0x6972   :  { %v20687_v39 = vpop.eup %20686 }
0x6973   :  { %v13193_v43 = vsel %vm273_vm2, %v20687_v39, 0.0  ;;  %v13431_v35 = vpop.permute.xlu1 %13430 }
0x6974   :  { %13194 = vadd.xlane.f32.xlu0 %v13193_v43 }
0x698a   :  { %13352 = vrot.lane.b32.xlu0 %v23132_v45, %s24003_s19 }
0x69fd   :  { %v13192_v21 = vpop.xlane.xlu0 %13191 }
0x69fe   :  { %20688 = vrcp.f32 %v13192_v21 }
0x6a01   :  { %v13195_v20 = vpop.xlane.xlu0 %13194 }
0x6a02   :  { %20690 = vrcp.f32 %v13195_v20 }
0x6a05   :  { %v13353_v45 = vpop.permute.xlu0 %13352 }
0x6a08   :  { %v20689_v19 = vpop.eup %20688 }
0x6a09   :  { %v13198_v31 = vmul.f32 %v20689_v19, %v20685_v27 }
0x6a0b   :  { %19632 = vmatmul.mubr.msk.f32.vlgmr.msra.gmra.mrb[120].mxu0 %vm273_vm2, %v13198_v31 }
0x6a0c   :  { %v20691_v30 = vpop.eup %20690  ;;  %19640 = vmatpush3.xpose.msk.msra.mxu0 %vm273_vm2, %v13355_v29  ;;  %19641 = vmatprep.mubr.msk.f32.mxu0 %vm21019_vm1, %v21018_v8 }
0x6a0d   :  { %v13199_v34 = vmul.f32 %v20691_v30, %v20687_v39  ;;  %19649 = vmatprep.subr.mxu0 %v21018_v8 }
0x6a0f   :  { %19637 = vmatmul.mubr.msk.f32.vlgmr.msra.gmra.mrb[174].mxu1 %vm273_vm2, %v13199_v34  ;;  %19642 = vmatmul.mubr.msk.f32.vlgmr.msra.gmra.mrb[122].mxu0 %vm273_vm2, %v13353_v45 }
0x6a10   :  { %19645 = vmatpush3.xpose.msk.msra.mxu1 %vm273_vm2, %v13433_v7  ;;  %19646 = vmatprep.mubr.msk.f32.mxu1 %vm21019_vm1, %v21018_v8  ;;  %v17949_v7 = vld [vmem:[#allocation13 + $0x3] ss:$0 sm:$0xff] }
0x6a11   :  { %19654 = vmatprep.subr.mxu1 %v21018_v8  ;;  %19651 = vmatprep.mubr.msk.f32.mxu0 %vm21019_vm1, %v21018_v8 }
0x6a13   :  { %19647 = vmatmul.mubr.msk.f32.vlgmr.msra.gmra.mrb[176].mxu1 %vm273_vm2, %v13431_v35 }
0x6a14   :  { %19656 = vmatprep.mubr.msk.f32.mxu1 %vm21019_vm1, %v21018_v8 }
0x6ade   :  { %v13272_v23 = vpop.f32.mrb[120].mxu0 }
0x6adf   :  { %v19633_v28 = vpop.f32.mrb[121].mxu0 }
0x6ae2   :  { %v13348_v4 = vpop.f32.mrb[174].mxu1  ;;  %v13426_v18 = vpop.f32.mrb[122].mxu0 }
0x6ae3   :  { %v19638_v37 = vpop.f32.mrb[175].mxu1  ;;  %v19643_v48 = vpop.f32.mrb[123].mxu0  ;;  %v13508_v22 = vsel %vm273_vm2, %v13426_v18, -inf }
0x6ae4   :  { %13509 = vmax.xlane.f32.xlu0 %v13508_v22 }
0x6ae6   :  { %v13504_v25 = vpop.f32.mrb[176].mxu1 }
0x6ae7   :  { %v19648_v53 = vpop.f32.mrb[177].mxu1  ;;  %v13511_v38 = vsel %vm273_vm2, %v13504_v25, -inf }
0x6ae8   :  { %13512 = vmax.xlane.f32.xlu1 %v13511_v38 }
0x6af9   :  { %13530 = vrot.lane.b32.xlu1 %v23127_v54, %s24009_s22 }
0x6afd   :  { %13684 = vrot.lane.b32.xlu1 %v23219_v63, %s23993_s8 }
0x6b01   :  { %13686 = vrot.lane.b32.xlu1 %v23221_v9, %s23993_s8 }
0x6b05   :  { %13694 = vrot.lane.b32.xlu1 %v13348_v4, %s23997_s27 }
0x6b71   :  { %v13510_v40 = vpop.xlane.xlu0 %13509 }
0x6b72   :  { %v13514_v55 = vsub.f32 %v13426_v18, %v13510_v40 }
0x6b74   :  { %v13516_v50 = vmul.f32 1.442695, %v13514_v55  ;;  %v13847_v55 = vld [vmem:[#allocation14 + $0x60] sm:$0xff] }
0x6b75   :  { %v13513_v5 = vpop.xlane.xlu1 %13512 }
0x6b76   :  { %20692 = vpow2.f32 %v13516_v50  ;;  %v13515_v56 = vsub.f32 %v13504_v25, %v13513_v5  ;;  %v13848_v50 = vld [vmem:[#allocation14 + $0x68] sm:$0xff] }
0x6b77   :  { %v20257_v5 = vpack.c.bf16 %v13848_v50, %v13847_v55 }
0x6b78   :  { %v13518_v57 = vmul.f32 1.442695, %v13515_v56  ;;  %v13849_v56 = vld [vmem:[#allocation14 + $0x70] sm:$0xff] }
0x6b79   :  { %v13531_v49 = vpop.permute.xlu1 %13530 }
0x6b7a   :  { %20694 = vpow2.f32 %v13518_v57  ;;  %19650 = vmatpush3.msra.mxu0 %v13531_v49  ;;  %v13850_v57 = vld [vmem:[#allocation14 + $0x78] sm:$0xff] }
0x6b7b   :  { %v20261_v49 = vpack.c.bf16 %v13850_v57, %v13849_v56 }
0x6b7d   :  { %v13685_v62 = vpop.permute.xlu1 %13684 }
0x6b7e   :  { %v13706_v60 = vsel %vm273_vm2, %v23181_v24, %v13685_v62 }
0x6b80   :  { %v20693_v46 = vpop.eup %20692 }
0x6b81   :  { %v13520_v54 = vsel %vm273_vm2, %v20693_v46, 0.0  ;;  %v13687_v17 = vpop.permute.xlu1 %13686 }
0x6b82   :  { %13521 = vadd.xlane.f32.xlu0 %v13520_v54  ;;  %v13707_v29 = vsel %vm273_vm2, %v23183_v51, %v13687_v17  ;;  %v17957_v54 = vld [vmem:[%s23930_s17 + $0x188] sm:$0xff] }
0x6b84   :  { %v20695_v12 = vpop.eup %20694 }
0x6b85   :  { %v13523_v36 = vsel %vm273_vm2, %v20695_v12, 0.0  ;;  %v13695_v39 = vpop.permute.xlu1 %13694 }
0x6b86   :  { %13524 = vadd.xlane.f32.xlu0 %v13523_v36  ;;  %v13709_v19 = vsel %vm1615_vm4, %v13707_v29, %v13695_v39 }
0x6b9c   :  { %13606 = vrot.lane.b32.xlu0 %v23125_v52, %s24009_s22  ;;  %v17945_v52 = vld [vmem:[%s24017_s2 + $0x60] sm:$0xff] }
0x6b9d   :  { %v20249_v14 = vpack.c.bf16 %v17946_v11, %v17945_v52  ;;  %v17964_v11 = vld [vmem:[%s23930_s17 + $0x1c0] sm:$0xff] }
0x6b9f   :  { %20250 = vmatprep.subr.bf16.mxu0 %v20249_v14 }
0x6ba0   :  { %13692 = vrot.lane.b32.xlu0 %v13272_v23, %s23997_s27 }
0x6c0f   :  { %v13522_v63 = vpop.xlane.xlu0 %13521 }
0x6c10   :  { %20696 = vrcp.f32 %v13522_v63  ;;  %v17959_v63 = vld [vmem:[%s23930_s17 + $0x198] sm:$0xff] }
0x6c13   :  { %v13525_v2 = vpop.xlane.xlu0 %13524 }
0x6c14   :  { %20698 = vrcp.f32 %v13525_v2 }
0x6c17   :  { %v13607_v9 = vpop.permute.xlu0 %13606 }
0x6c18   :  { %19655 = vmatpush3.msra.mxu1 %v13607_v9  ;;  %v17960_v9 = vld [vmem:[%s23930_s17 + $0x1a0] sm:$0xff] }
0x6c19   :  { %20258 = vmatprep.subr.bf16.mxu1 %v20257_v5 }
0x6c1a   :  { %v20697_v58 = vpop.eup %20696 }
0x6c1b   :  { %v13528_v10 = vmul.f32 %v20697_v58, %v20693_v46  ;;  %v13693_v27 = vpop.permute.xlu0 %13692  ;;  %v17956_v46 = vld [vmem:[%s23930_s17 + $0x180] sm:$0xff]  ;;  %v17961_v58 = vld [vmem:[%s23930_s17 + $0x1a8] sm:$0xff] }
0x6c1c   :  { %v13708_v43 = vsel %vm1615_vm4, %v13706_v60, %v13693_v27  ;;  %v20265_v36 = vpack.c.bf16 %v17957_v54, %v17956_v46 }
0x6c1d   :  { %19652 = vmatmul.mubr.msk.f32.vlgmr.msra.gmra.mrb[124].mxu0 %vm273_vm2, %v13528_v10  ;;  %v20273_v10 = vpack.c.bf16 %v17961_v58, %v17960_v9 }
0x6c1e   :  { %v20699_v44 = vpop.eup %20698  ;;  %20252 = vmatpush3.bf16.msra.mxu0 %v20249_v14  ;;  %v17965_v14 = vld [vmem:[%s23930_s17 + $0x1c8] sm:$0xff] }
0x6c1f   :  { %v13529_v61 = vmul.f32 %v20699_v44, %v20695_v12  ;;  %20254 = vmatprep.subr.bf16.mxu0 %v20253_v3  ;;  %v17958_v12 = vld [vmem:[%s23930_s17 + $0x190] sm:$0xff]  ;;  %v20281_v16 = vpack.c.bf16 %v17965_v14, %v17964_v11  ;;  %v17979_v11 = vld [vmem:[%s23998_s6 + $0x98] sm:$0xff] }
0x6c20   :  { %v20269_v2 = vpack.c.bf16 %v17959_v63, %v17958_v12  ;;  %v17962_v44 = vld [vmem:[%s23930_s17 + $0x1b0] sm:$0xff] }
0x6c21   :  { %19657 = vmatmul.mubr.msk.f32.vlgmr.msra.gmra.mrb[178].mxu1 %vm273_vm2, %v13529_v61  ;;  %v17963_v61 = vld [vmem:[%s23930_s17 + $0x1b8] sm:$0xff] }
0x6c22   :  { %20256 = vmatpush3.bf16.msra.mxu0 %v20253_v3  ;;  %20260 = vmatpush3.bf16.msra.mxu1 %v20257_v5  ;;  %v20277_v52 = vpack.c.bf16 %v17963_v61, %v17962_v44  ;;  %v17967_v3 = vld [vmem:[%s23930_s17 + $0x1d8] sm:$0xff]  ;;  %v17977_v44 = vld [vmem:[%s23998_s6 + $0x88] sm:$0xff] }
0x6c23   :  { %20262 = vmatprep.subr.bf16.mxu1 %v20261_v49  ;;  %20266 = vmatprep.subr.bf16.mxu0 %v20265_v36 }
0x6c26   :  { %20264 = vmatpush3.bf16.msra.mxu1 %v20261_v49 }
0x6cf0   :  { %v13602_v1 = vpop.f32.mrb[124].mxu0 }
0x6cf1   :  { %13700 = vrot.lane.b32.xlu0 %v13602_v1, %s23999_s12  ;;  %v19653_v15 = vpop.f32.mrb[125].mxu0  ;;  %v20285_v1 = vpack.c.bf16 %v17967_v3, %v17966_v59 }
0x6cf2   :  { %v17968_v15 = vld [vmem:[%s23930_s17 + $0x1e0] sm:$0xff] }
0x6cf4   :  { %v13678_v0 = vpop.f32.mrb[178].mxu1 }
0x6cf5   :  { %13702 = vrot.lane.b32.xlu1 %v13678_v0, %s23999_s12  ;;  %v19658_v32 = vpop.f32.mrb[179].mxu1  ;;  %v17969_v0 = vld [vmem:[%s23930_s17 + $0x1e8] sm:$0xff] }
0x6cf6   :  { %v20289_v32 = vpack.c.bf16 %v17969_v0, %v17968_v15 }
0x6d63   :  { %v13701_v21 = vpop.permute.xlu0 %13700 }
0x6d64   :  { %v13710_v20 = vsel %vm1618_vm3, %v13708_v43, %v13701_v21  ;;  %v13837_v21 = vrot.slane %v23101_v26, %v21783_v47 }
0x6d65   :  { %19667 = vmatprep.mubr.msk.f32.mxu0 %vm188_vm0, %v13710_v20 }
0x6d67   :  { %v13703_v31 = vpop.permute.xlu1 %13702 }
0x6d68   :  { %v13711_v30 = vsel %vm1618_vm3, %v13709_v19, %v13703_v31  ;;  %v13843_v19 = vrot.slane %v23106_v33, %v21783_v47 }
0x6d69   :  { %19668 = vmatmul.mubr.msk.f32.vlgmr.msra.gmra.mrb[126].mxu0 %vm188_vm0, %v13711_v30 }
0x6d6a   :  { %20268 = vmatpush3.bf16.msra.mxu0 %v20265_v36 }
0x6d6b   :  { %20270 = vmatprep.subr.bf16.mxu0 %v20269_v2 }
0x6d6e   :  { %20272 = vmatpush3.bf16.msra.mxu0 %v20269_v2 }
0x6d6f   :  { %20274 = vmatprep.subr.bf16.mxu0 %v20273_v10 }
0x6d72   :  { %20276 = vmatpush3.bf16.msra.mxu0 %v20273_v10  ;;  %v17976_v10 = vld [vmem:[%s23998_s6 + $0x80] sm:$0xff] }
0x6d73   :  { %20278 = vmatprep.subr.bf16.mxu0 %v20277_v52  ;;  %v20297_v61 = vpack.c.bf16 %v17977_v44, %v17976_v10 }
0x6d75   :  { %20298 = vmatprep.subr.bf16.mxu1 %v20297_v61 }
0x6d76   :  { %20280 = vmatpush3.bf16.msra.mxu0 %v20277_v52  ;;  %v17978_v52 = vld [vmem:[%s23998_s6 + $0x90] sm:$0xff] }
0x6d77   :  { %20282 = vmatprep.subr.bf16.mxu0 %v20281_v16  ;;  %v20301_v14 = vpack.c.bf16 %v17979_v11, %v17978_v52 }
0x6d7a   :  { %20284 = vmatpush3.bf16.msra.mxu0 %v20281_v16 }
0x6d7b   :  { %20286 = vmatprep.subr.bf16.mxu0 %v20285_v1 }
0x6d7e   :  { %20288 = vmatpush3.bf16.msra.mxu0 %v20285_v1 }
0x6d7f   :  { %20290 = vmatprep.subr.bf16.mxu0 %v20289_v32 }
0x6d82   :  { %20292 = vmatpush3.bf16.msra.mxu0 %v20289_v32  ;;  %v14073_v32 = vrot.slane %v23101_v26, %v21826_v6  ;;  %v17980_v26 = vld [vmem:[#allocation8 + $0x4] ss:$0 sm:$0xff] }
0x6e3c   :  { %v19669_v24 = vpop.f32.mrb[126].mxu0 }
0x6e3d   :  { %v13803_v34 = vadd.f32 %v19669_v24, %v17949_v7  ;;  %v13797_v45 = vpop.f32.mrb[127].mxu0 }
0x6e3e   :  { %v13798_v35 = vadd.f32 %v17949_v7, %v13797_v45 }
0x6e3f   :  { %v13807_v23 = vadd.f32 %v13803_v34, %v23116_v42 }
0x6e40   :  { %v13806_v28 = vadd.f32 %v13798_v35, %v23112_v41  ;;  %v17970_v35 = vld [vmem:[%s23930_s17 + $0x1f0] sm:$0xff] }
0x6e41   :  { %v13811_v4 = vsel %vm188_vm0, %v13807_v23, 0.0 }
0x6e42   :  { %13812 = vadd.xlane.f32.xlu1 %v13811_v4  ;;  %v13808_v51 = vsel %vm188_vm0, %v13806_v28, 0.0  ;;  %v17953_v4 = vld [vmem:[%s23929_s16 + $0x3] ss:$0 sm:$0xff] }
0x6e43   :  { %13809 = vadd.xlane.f32.xlu0 %v13808_v51 }
0x6ecf   :  { %v13813_v18 = vpop.xlane.xlu1 %13812 }
0x6ed0   :  { %v13815_v37 = vmul.f32 0.03125, %v13813_v18  ;;  %v13810_v48 = vpop.xlane.xlu0 %13809 }
0x6ed1   :  { %v13814_v22 = vmul.f32 0.03125, %v13810_v48 }
0x6ed2   :  { %v23301_v25 = vsub.f32 %v13807_v23, %v13815_v37  ;;  %v17971_v23 = vld [vmem:[%s23930_s17 + $0x1f8] sm:$0xff] }
0x6ed3   :  { %v13816_v53 = vsub.f32 %v13806_v28, %v13814_v22  ;;  %v20293_v28 = vpack.c.bf16 %v17971_v23, %v17970_v35 }
0x6ed4   :  { %v13819_v42 = vmul.f32 %v23301_v25, %v23301_v25 }
0x6ed5   :  { %v13818_v38 = vmul.f32 %v13816_v53, %v13816_v53  ;;  %20294 = vmatprep.subr.bf16.mxu0 %v20293_v28 }
0x6ed6   :  { %v13823_v41 = vsel %vm188_vm0, %v13819_v42, 0.0  ;;  %20296 = vmatpush3.bf16.msra.mxu0 %v20293_v28 }
0x6ed7   :  { %v13820_v40 = vsel %vm188_vm0, %v13818_v38, 0.0  ;;  %19757 = vmatprep.subr.mxu0 %v21018_v8 }
0x6ed8   :  { %13821 = vadd.xlane.f32.xlu0 %v13820_v40 }
0x6edc   :  { %13824 = vadd.xlane.f32.xlu0 %v13823_v41 }
0x6f65   :  { %v13822_v62 = vpop.xlane.xlu0 %13821 }
0x6f66   :  { %v13826_v17 = vmul.f32 0.03125, %v13822_v62 }
0x6f68   :  { %v13828_v27 = vadd.f32 1e-05, %v13826_v17 }
0x6f69   :  { %v13825_v60 = vpop.xlane.xlu0 %13824 }
0x6f6a   :  { %20700 = vrsqrt.f32 %v13828_v27  ;;  %v13827_v39 = vmul.f32 0.03125, %v13825_v60 }
0x6f6c   :  { %v13829_v43 = vadd.f32 1e-05, %v13827_v39  ;;  %v14079_v39 = vrot.slane %v23106_v33, %v21826_v6 }
0x6f6e   :  { %20702 = vrsqrt.f32 %v13829_v43 }
0x6f74   :  { %v20701_v20 = vpop.eup %20700 }
0x6f75   :  { %v13832_v29 = vmul.f32 %v20701_v20, %v13816_v53  ;;  %v17973_v53 = vld [vmem:[%s23931_s18 + $0x3] ss:$0 sm:$0xff] }
0x6f77   :  { %v13838_v31 = vmul.f32 %v13837_v21, %v13832_v29 }
0x6f78   :  { %v20703_v30 = vpop.eup %20702 }
0x6f79   :  { %v13833_v7 = vmul.f32 %v20703_v30, %v23301_v25  ;;  %v13844_v24 = vadd.f32 %v13843_v19, %v13838_v31 }
0x6f7b   :  { %v13839_v34 = vmul.f32 %v13837_v21, %v13833_v7  ;;  %19678 = vmatprep.mubr.msk.f32.mxu1 %vm188_vm0, %v13844_v24 }
0x6f7d   :  { %v13845_v45 = vadd.f32 %v13843_v19, %v13839_v34 }
0x6f7f   :  { %19679 = vmatmul.mubr.msk.f32.vlgmr.msra.gmra.mrb[180].mxu1 %vm188_vm0, %v13845_v45 }
0x6f80   :  { %20300 = vmatpush3.bf16.msra.mxu1 %v20297_v61 }
0x6f81   :  { %20302 = vmatprep.subr.bf16.mxu1 %v20301_v14 }
0x6f84   :  { %20304 = vmatpush3.bf16.msra.mxu1 %v20301_v14 }
0x6f85   :  { %19727 = vmatprep.subr.mxu1 %v21018_v8 }
0x7052   :  { %v19680_v51 = vpop.f32.mrb[180].mxu1 }
0x7053   :  { %v13937_v18 = vadd.f32 %v19680_v51, %v17953_v4  ;;  %v13931_v37 = vpop.f32.mrb[181].mxu1 }
0x7054   :  { %v13932_v48 = vadd.f32 %v17953_v4, %v13931_v37 }
0x7055   :  { %v13941_v25 = vmax.f32 %v13937_v18, 0.0 }
0x7056   :  { %v13940_v22 = vmax.f32 %v13932_v48, 0.0 }
0x7058   :  { %19713 = vmatprep.mubr.f32.mxu0 %v13940_v22 }
0x7059   :  { %19714 = vmatmul.mubr.f32.vlgmr.msra.gmra.mrb[128].mxu0 %v13941_v25 }
0x705a   :  { %19759 = vmatprep.mubr.msk.f32.mxu0 %vm21019_vm1, %v21018_v8 }
0x712c   :  { %v19715_v38 = vpop.f32.mrb[128].mxu0 }
0x712d   :  { %v14039_v40 = vadd.f32 %v19715_v38, %v17973_v53  ;;  %v14033_v42 = vpop.f32.mrb[129].mxu0 }
0x712e   :  { %v14034_v41 = vadd.f32 %v17973_v53, %v14033_v42 }
0x712f   :  { %v14043_v55 = vadd.f32 %v14039_v40, %v13845_v45  ;;  %v23422_v45 = vld [vmem:[#allocation7] sm:$0xff] }
0x7130   :  { %v14042_v50 = vadd.f32 %v14034_v41, %v13844_v24 }
0x7131   :  { %v14047_v5 = vsel %vm188_vm0, %v14043_v55, 0.0 }
0x7132   :  { %14048 = vadd.xlane.f32.xlu0 %v14047_v5  ;;  %v14044_v56 = vsel %vm188_vm0, %v14042_v50, 0.0 }
0x7133   :  { %14045 = vadd.xlane.f32.xlu1 %v14044_v56 }
0x71bf   :  { %v14049_v57 = vpop.xlane.xlu0 %14048 }
0x71c0   :  { %v14051_v49 = vmul.f32 0.03125, %v14049_v57  ;;  %v14046_v46 = vpop.xlane.xlu1 %14045 }
0x71c1   :  { %v14050_v54 = vmul.f32 0.03125, %v14046_v46 }
0x71c2   :  { %v14053_v12 = vsub.f32 %v14043_v55, %v14051_v49 }
0x71c3   :  { %v14052_v36 = vsub.f32 %v14042_v50, %v14050_v54 }
0x71c4   :  { %v14055_v63 = vmul.f32 %v14053_v12, %v14053_v12 }
0x71c5   :  { %v14054_v2 = vmul.f32 %v14052_v36, %v14052_v36 }
0x71c6   :  { %v14059_v9 = vsel %vm188_vm0, %v14055_v63, 0.0 }
0x71c7   :  { %14060 = vadd.xlane.f32.xlu0 %v14059_v9  ;;  %v14056_v58 = vsel %vm188_vm0, %v14054_v2, 0.0 }
0x71c8   :  { %14057 = vadd.xlane.f32.xlu1 %v14056_v58 }
0x7254   :  { %v14061_v16 = vpop.xlane.xlu0 %14060 }
0x7255   :  { %v14063_v59 = vmul.f32 0.03125, %v14061_v16  ;;  %v14058_v3 = vpop.xlane.xlu1 %14057 }
0x7256   :  { %v14062_v1 = vmul.f32 0.03125, %v14058_v3 }
0x7257   :  { %v14065_v15 = vadd.f32 1e-05, %v14063_v59 }
0x7258   :  { %v14064_v0 = vadd.f32 1e-05, %v14062_v1 }
0x7259   :  { %20704 = vrsqrt.f32 %v14065_v15 }
0x725a   :  { %20706 = vrsqrt.f32 %v14064_v0 }
0x7263   :  { %v20705_v62 = vpop.eup %20704 }
0x7264   :  { %v20707_v17 = vpop.eup %20706  ;;  %v14069_v27 = vmul.f32 %v20705_v62, %v14053_v12 }
0x7265   :  { %v14068_v60 = vmul.f32 %v20707_v17, %v14052_v36 }
0x7266   :  { %v14075_v43 = vmul.f32 %v14073_v32, %v14069_v27 }
0x7267   :  { %v14074_v21 = vmul.f32 %v14073_v32, %v14068_v60 }
0x7268   :  { %v23394_v29 = vadd.f32 %v14079_v39, %v14075_v43 }
0x7269   :  { %v23392_v20 = vadd.f32 %v14079_v39, %v14074_v21 }
0x726b   :  { %19724 = vmatprep.mubr.msk.f32.mxu1 %vm188_vm0, %v23392_v20 }
0x726c   :  { %19725 = vmatmul.mubr.msk.f32.vlgmr.msra.gmra.mrb[182].mxu1 %vm188_vm0, %v23394_v29 }
0x726d   :  { %19729 = vmatprep.mubr.msk.f32.mxu1 %vm21019_vm1, %v21018_v8 }
0x733f   :  { %v19726_v19 = vpop.f32.mrb[182].mxu1 }
0x7340   :  { %v23402_v31 = vadd.f32 %v19726_v19, %v17980_v26  ;;  %v14171_v33 = vpop.f32.mrb[183].mxu1 }
0x7341   :  { %v23404_v30 = vadd.f32 %v17980_v26, %v14171_v33 }
0x7342   :  { %14258 = vrot.lane.b32.xlu0 %v23402_v31, %s24010_s15 }
0x7343   :  { %14181 = vrot.lane.b32.xlu1 %v23404_v30, %s24010_s15 }
0x73b4   :  { %v14259_v24 = vpop.permute.xlu0 %14258 }
0x73b5   :  { %v14182_v7 = vpop.permute.xlu1 %14181 }
0x73b6   :  { %19728 = vmatpush3.xpose.msk.msra.mxu1 %vm273_vm2, %v14182_v7 }
0x73b7   :  { %19732 = vmatprep.subr.mxu1 %v21018_v8 }
0x73b9   :  { %19730 = vmatmul.mubr.msk.f32.vlgmr.msra.gmra.mrb[184].mxu1 %vm273_vm2, %v23404_v30 }
0x73ba   :  { %19733 = vmatpush3.xpose.msk.msra.mxu1 %vm273_vm2, %v14259_v24  ;;  %19734 = vmatprep.mubr.msk.f32.mxu1 %vm21019_vm1, %v21018_v8 }
0x73bb   :  { %19737 = vmatprep.subr.mxu1 %v21018_v8 }
0x73bd   :  { %19735 = vmatmul.mubr.msk.f32.vlgmr.msra.gmra.mrb[186].mxu1 %vm273_vm2, %v23402_v31 }
0x73be   :  { %19739 = vmatprep.mubr.msk.f32.mxu1 %vm21019_vm1, %v21018_v8 }
0x748c   :  { %v14253_v34 = vpop.f32.mrb[184].mxu1 }
0x748d   :  { %v14254_v35 = vadd.f32 %v23422_v45, %v14253_v34  ;;  %v19731_v23 = vpop.f32.mrb[185].mxu1 }
0x748f   :  { %v14334_v28 = vsel %vm273_vm2, %v14254_v35, -inf }
0x7490   :  { %14335 = vmax.xlane.f32.xlu1 %v14334_v28  ;;  %v14330_v4 = vpop.f32.mrb[186].mxu1 }
0x7491   :  { %v14331_v51 = vadd.f32 %v23422_v45, %v14330_v4  ;;  %v19736_v18 = vpop.f32.mrb[187].mxu1 }
0x7493   :  { %v14337_v37 = vsel %vm273_vm2, %v14331_v51, -inf }
0x7494   :  { %14338 = vmax.xlane.f32.xlu0 %v14337_v37 }
0x74a1   :  { %14356 = vrot.lane.b32.xlu1 %v23404_v30, %s24000_s20 }
0x751d   :  { %v14336_v48 = vpop.xlane.xlu1 %14335 }
0x751e   :  { %v14340_v22 = vsub.f32 %v14254_v35, %v14336_v48 }
0x7520   :  { %v14342_v25 = vmul.f32 1.442695, %v14340_v22 }
0x7521   :  { %v14357_v53 = vpop.permute.xlu1 %14356  ;;  %v14339_v38 = vpop.xlane.xlu0 %14338 }
0x7522   :  { %20708 = vpow2.f32 %v14342_v25  ;;  %v14341_v40 = vsub.f32 %v14331_v51, %v14339_v38  ;;  %19738 = vmatpush3.msra.mxu1 %v14357_v53 }
0x7523   :  { %19742 = vmatprep.subr.mxu1 %v21018_v8 }
0x7524   :  { %v14344_v42 = vmul.f32 1.442695, %v14341_v40 }
0x7526   :  { %20710 = vpow2.f32 %v14344_v42 }
0x752c   :  { %v20709_v41 = vpop.eup %20708 }
0x752d   :  { %v14346_v55 = vsel %vm273_vm2, %v20709_v41, 0.0 }
0x752e   :  { %14347 = vadd.xlane.f32.xlu1 %v14346_v55 }
0x7530   :  { %v20711_v50 = vpop.eup %20710 }
0x7531   :  { %v14349_v5 = vsel %vm273_vm2, %v20711_v50, 0.0 }
0x7532   :  { %14350 = vadd.xlane.f32.xlu0 %v14349_v5 }
0x753f   :  { %14510 = vrot.lane.b32.xlu1 %v23404_v30, %s24006_s29 }
0x7543   :  { %14508 = vrot.lane.b32.xlu1 %v23404_v30, %s24005_s3 }
0x7547   :  { %14586 = vrot.lane.b32.xlu1 %v23402_v31, %s24005_s3 }
0x7548   :  { %14432 = vrot.lane.b32.xlu0 %v23402_v31, %s24000_s20 }
0x754c   :  { %14588 = vrot.lane.b32.xlu0 %v23402_v31, %s24006_s29 }
0x75bb   :  { %v14348_v56 = vpop.xlane.xlu1 %14347 }
0x75bc   :  { %20712 = vrcp.f32 %v14348_v56 }
0x75bf   :  { %v14351_v57 = vpop.xlane.xlu0 %14350  ;;  %v14511_v36 = vpop.permute.xlu1 %14510 }
0x75c0   :  { %20714 = vrcp.f32 %v14351_v57 }
0x75c3   :  { %v14433_v54 = vpop.permute.xlu0 %14432  ;;  %v14509_v2 = vpop.permute.xlu1 %14508 }
0x75c6   :  { %v20713_v49 = vpop.eup %20712 }
0x75c7   :  { %v14354_v46 = vmul.f32 %v20713_v49, %v20709_v41  ;;  %v14589_v9 = vpop.permute.xlu0 %14588  ;;  %v14587_v58 = vpop.permute.xlu1 %14586 }
0x75c9   :  { %19740 = vmatmul.mubr.msk.f32.vlgmr.msra.gmra.mrb[188].mxu1 %vm273_vm2, %v14354_v46 }
0x75ca   :  { %v20715_v12 = vpop.eup %20714  ;;  %19743 = vmatpush3.msra.mxu1 %v14433_v54  ;;  %19744 = vmatprep.mubr.msk.f32.mxu1 %vm21019_vm1, %v21018_v8 }
0x75cb   :  { %v14355_v63 = vmul.f32 %v20715_v12, %v20711_v50  ;;  %19747 = vmatprep.subr.mxu1 %v21018_v8 }
0x75cd   :  { %19745 = vmatmul.mubr.msk.f32.vlgmr.msra.gmra.mrb[190].mxu1 %vm273_vm2, %v14355_v63 }
0x75ce   :  { %19749 = vmatprep.mubr.msk.f32.mxu1 %vm21019_vm1, %v21018_v8 }
0x75d1   :  { %19748 = vmatpush3.xpose.msk.msra.mxu1 %vm273_vm2, %v14511_v36 }
0x75d2   :  { %19752 = vmatprep.subr.mxu1 %v21018_v8 }
0x75d4   :  { %19750 = vmatmul.mubr.msk.f32.vlgmr.msra.gmra.mrb[192].mxu1 %vm273_vm2, %v14509_v2 }
0x75d5   :  { %19753 = vmatpush3.xpose.msk.msra.mxu1 %vm273_vm2, %v14589_v9  ;;  %19754 = vmatprep.mubr.msk.f32.mxu1 %vm21019_vm1, %v21018_v8 }
0x75d6   :  { %19762 = vmatprep.subr.mxu1 %v21018_v8 }
0x75d8   :  { %19755 = vmatmul.mubr.msk.f32.vlgmr.msra.gmra.mrb[194].mxu1 %vm273_vm2, %v14587_v58 }
0x75d9   :  { %19764 = vmatprep.mubr.msk.f32.mxu1 %vm21019_vm1, %v21018_v8 }
0x769c   :  { %v23460_v10 = vpop.f32.mrb[188].mxu1 }
0x769d   :  { %v19741_v44 = vpop.f32.mrb[189].mxu1 }
0x76a0   :  { %v23462_v61 = vpop.f32.mrb[190].mxu1 }
0x76a1   :  { %v19746_v52 = vpop.f32.mrb[191].mxu1 }
0x76a7   :  { %v14582_v11 = vpop.f32.mrb[192].mxu1 }
0x76a8   :  { %v14583_v14 = vadd.f32 %v23422_v45, %v14582_v11  ;;  %v19751_v16 = vpop.f32.mrb[193].mxu1 }
0x76aa   :  { %v14664_v59 = vsel %vm273_vm2, %v14583_v14, -inf }
0x76ab   :  { %14665 = vmax.xlane.f32.xlu0 %v14664_v59  ;;  %v14660_v3 = vpop.f32.mrb[194].mxu1 }
0x76ac   :  { %v14661_v1 = vadd.f32 %v23422_v45, %v14660_v3  ;;  %v19756_v15 = vpop.f32.mrb[195].mxu1 }
0x76ae   :  { %v14667_v0 = vsel %vm273_vm2, %v14661_v1, -inf }
0x76af   :  { %14668 = vmax.xlane.f32.xlu1 %v14667_v0 }
0x76c0   :  { %14686 = vrot.lane.b32.xlu1 %v23404_v30, %s24001_s1 }
0x76c1   :  { %14762 = vrot.lane.b32.xlu0 %v23402_v31, %s24001_s1  ;;  %s24018_s1 = sld [smem:[#allocation27_spill]] }
0x76c4   :  { %14840 = vrot.lane.b32.xlu1 %v23404_v30, %s24008_s30 }
0x76c8   :  { %14918 = vrot.lane.b32.xlu1 %v23402_v31, %s24008_s30 }
0x76cc   :  { %14916 = vrot.lane.b32.xlu1 %v23402_v31, %s24007_s28 }
0x7738   :  { %v14666_v32 = vpop.xlane.xlu0 %14665 }
0x7739   :  { %v14670_v62 = vsub.f32 %v14583_v14, %v14666_v32 }
0x773b   :  { %v14672_v17 = vmul.f32 1.442695, %v14670_v62 }
0x773c   :  { %v14763_v27 = vpop.permute.xlu0 %14762  ;;  %v14669_v60 = vpop.xlane.xlu1 %14668 }
0x773d   :  { %20716 = vpow2.f32 %v14672_v17  ;;  %v14671_v39 = vsub.f32 %v14661_v1, %v14669_v60  ;;  %19763 = vmatpush3.msra.mxu1 %v14763_v27 }
0x773e   :  { %19772 = vmatprep.subr.mxu1 %v21018_v8 }
0x773f   :  { %v14674_v43 = vmul.f32 1.442695, %v14671_v39 }
0x7740   :  { %v14687_v21 = vpop.permute.xlu1 %14686 }
0x7741   :  { %20718 = vpow2.f32 %v14674_v43  ;;  %19758 = vmatpush3.msra.mxu0 %v14687_v21 }
0x7742   :  { %19767 = vmatprep.subr.mxu0 %v21018_v8 }
0x7744   :  { %v14841_v35 = vpop.permute.xlu1 %14840 }
0x7747   :  { %v20717_v26 = vpop.eup %20716 }
0x7748   :  { %v14676_v19 = vsel %vm273_vm2, %v20717_v26, 0.0  ;;  %v14919_v51 = vpop.permute.xlu1 %14918 }
0x7749   :  { %14677 = vadd.xlane.f32.xlu0 %v14676_v19 }
0x774b   :  { %v20719_v33 = vpop.eup %20718 }
0x774c   :  { %v14679_v7 = vsel %vm273_vm2, %v20719_v33, 0.0  ;;  %v14917_v48 = vpop.permute.xlu1 %14916 }
0x774d   :  { %14680 = vadd.xlane.f32.xlu0 %v14679_v7 }
0x7763   :  { %14838 = vrot.lane.b32.xlu0 %v23404_v30, %s24007_s28 }
0x77d6   :  { %v14678_v24 = vpop.xlane.xlu0 %14677 }
0x77d7   :  { %20720 = vrcp.f32 %v14678_v24 }
0x77da   :  { %v14681_v34 = vpop.xlane.xlu0 %14680 }
0x77db   :  { %20722 = vrcp.f32 %v14681_v34 }
0x77de   :  { %v14839_v37 = vpop.permute.xlu0 %14838 }
0x77e1   :  { %v20721_v23 = vpop.eup %20720 }
0x77e2   :  { %v14684_v28 = vmul.f32 %v20721_v23, %v20717_v26 }
0x77e4   :  { %19760 = vmatmul.mubr.msk.f32.vlgmr.msra.gmra.mrb[130].mxu0 %vm273_vm2, %v14684_v28 }
0x77e5   :  { %v20723_v4 = vpop.eup %20722  ;;  %19768 = vmatpush3.xpose.msk.msra.mxu0 %vm273_vm2, %v14841_v35  ;;  %19769 = vmatprep.mubr.msk.f32.mxu0 %vm21019_vm1, %v21018_v8 }
0x77e6   :  { %v14685_v18 = vmul.f32 %v20723_v4, %v20719_v33  ;;  %19777 = vmatprep.subr.mxu0 %v21018_v8 }
0x77e8   :  { %19765 = vmatmul.mubr.msk.f32.vlgmr.msra.gmra.mrb[196].mxu1 %vm273_vm2, %v14685_v18  ;;  %19770 = vmatmul.mubr.msk.f32.vlgmr.msra.gmra.mrb[132].mxu0 %vm273_vm2, %v14839_v37 }
0x77e9   :  { %19773 = vmatpush3.xpose.msk.msra.mxu1 %vm273_vm2, %v14919_v51  ;;  %19774 = vmatprep.mubr.msk.f32.mxu1 %vm21019_vm1, %v21018_v8 }
0x77ea   :  { %19782 = vmatprep.subr.mxu1 %v21018_v8  ;;  %19779 = vmatprep.mubr.msk.f32.mxu0 %vm21019_vm1, %v21018_v8 }
0x77ec   :  { %19775 = vmatmul.mubr.msk.f32.vlgmr.msra.gmra.mrb[198].mxu1 %vm273_vm2, %v14917_v48 }
0x77ed   :  { %19784 = vmatprep.mubr.msk.f32.mxu1 %vm21019_vm1, %v21018_v8 }
0x78b7   :  { %v23500_v22 = vpop.f32.mrb[130].mxu0 }
0x78b8   :  { %v19761_v25 = vpop.f32.mrb[131].mxu0 }
0x78bb   :  { %v23502_v53 = vpop.f32.mrb[196].mxu1  ;;  %v14912_v38 = vpop.f32.mrb[132].mxu0 }
0x78bc   :  { %v14913_v40 = vadd.f32 %v23422_v45, %v14912_v38  ;;  %v19766_v42 = vpop.f32.mrb[197].mxu1  ;;  %v19771_v41 = vpop.f32.mrb[133].mxu0 }
0x78be   :  { %v14994_v55 = vsel %vm273_vm2, %v14913_v40, -inf }
0x78bf   :  { %14995 = vmax.xlane.f32.xlu0 %v14994_v55  ;;  %v14990_v50 = vpop.f32.mrb[198].mxu1 }
0x78c0   :  { %v14991_v5 = vadd.f32 %v23422_v45, %v14990_v50  ;;  %v19776_v56 = vpop.f32.mrb[199].mxu1 }
0x78c2   :  { %v14997_v57 = vsel %vm273_vm2, %v14991_v5, -inf }
0x78c3   :  { %14998 = vmax.xlane.f32.xlu1 %v14997_v57  ;;  %v18009_v57 = vld [vmem:[%s24018_s1 + $0x90] sm:$0xff] }
0x78d4   :  { %15016 = vrot.lane.b32.xlu1 %v23404_v30, %s24002_s4 }
0x78d5   :  { %15092 = vrot.lane.b32.xlu0 %v23402_v31, %s24002_s4 }
0x78d8   :  { %15170 = vrot.lane.b32.xlu1 %v23404_v30, %s24009_s22 }
0x78dc   :  { %15248 = vrot.lane.b32.xlu1 %v23402_v31, %s24009_s22 }
0x78e0   :  { %15246 = vrot.lane.b32.xlu1 %v23402_v31, %s24003_s19 }
0x794c   :  { %v14996_v49 = vpop.xlane.xlu0 %14995 }
0x794d   :  { %v15000_v46 = vsub.f32 %v14913_v40, %v14996_v49  ;;  %v18010_v49 = vld [vmem:[%s24018_s1 + $0x98] sm:$0xff] }
0x794f   :  { %v15002_v54 = vmul.f32 1.442695, %v15000_v46  ;;  %v20309_v46 = vpack.c.bf16 %v18010_v49, %v18009_v57 }
0x7950   :  { %v15093_v12 = vpop.permute.xlu0 %15092  ;;  %v14999_v36 = vpop.xlane.xlu1 %14998 }
0x7951   :  { %20724 = vpow2.f32 %v15002_v54  ;;  %v15001_v63 = vsub.f32 %v14991_v5, %v14999_v36  ;;  %19783 = vmatpush3.msra.mxu1 %v15093_v12  ;;  %v18008_v5 = vld [vmem:[%s24018_s1 + $0x88] sm:$0xff] }
0x7952   :  { %19792 = vmatprep.subr.mxu1 %v21018_v8 }
0x7953   :  { %v15004_v2 = vmul.f32 1.442695, %v15001_v63 }
0x7954   :  { %v15017_v9 = vpop.permute.xlu1 %15016 }
0x7955   :  { %20726 = vpow2.f32 %v15004_v2  ;;  %19778 = vmatpush3.msra.mxu0 %v15017_v9 }
0x7956   :  { %19787 = vmatprep.subr.mxu0 %v21018_v8 }
0x7958   :  { %v15171_v59 = vpop.permute.xlu1 %15170 }
0x795b   :  { %v20725_v58 = vpop.eup %20724 }
0x795c   :  { %v15006_v44 = vsel %vm273_vm2, %v20725_v58, 0.0  ;;  %v15249_v0 = vpop.permute.xlu1 %15248 }
0x795d   :  { %15007 = vadd.xlane.f32.xlu0 %v15006_v44 }
0x795f   :  { %v20727_v52 = vpop.eup %20726 }
0x7960   :  { %v15009_v11 = vsel %vm273_vm2, %v20727_v52, 0.0  ;;  %v15247_v17 = vpop.permute.xlu1 %15246 }
0x7961   :  { %15010 = vadd.xlane.f32.xlu0 %v15009_v11 }
0x7977   :  { %15168 = vrot.lane.b32.xlu0 %v23404_v30, %s24003_s19 }
0x79ea   :  { %v15008_v14 = vpop.xlane.xlu0 %15007 }
0x79eb   :  { %20728 = vrcp.f32 %v15008_v14 }
0x79ee   :  { %v15011_v16 = vpop.xlane.xlu0 %15010 }
0x79ef   :  { %20730 = vrcp.f32 %v15011_v16 }
0x79f2   :  { %v15169_v62 = vpop.permute.xlu0 %15168 }
0x79f5   :  { %v20729_v3 = vpop.eup %20728 }
0x79f6   :  { %v15014_v1 = vmul.f32 %v20729_v3, %v20725_v58 }
0x79f8   :  { %19780 = vmatmul.mubr.msk.f32.vlgmr.msra.gmra.mrb[134].mxu0 %vm273_vm2, %v15014_v1 }
0x79f9   :  { %v20731_v15 = vpop.eup %20730  ;;  %19788 = vmatpush3.xpose.msk.msra.mxu0 %vm273_vm2, %v15171_v59  ;;  %19789 = vmatprep.mubr.msk.f32.mxu0 %vm21019_vm1, %v21018_v8 }
0x79fa   :  { %v15015_v32 = vmul.f32 %v20731_v15, %v20727_v52  ;;  %19797 = vmatprep.subr.mxu0 %v21018_v8 }
0x79fc   :  { %19785 = vmatmul.mubr.msk.f32.vlgmr.msra.gmra.mrb[200].mxu1 %vm273_vm2, %v15015_v32  ;;  %19790 = vmatmul.mubr.msk.f32.vlgmr.msra.gmra.mrb[136].mxu0 %vm273_vm2, %v15169_v62 }
0x79fd   :  { %19793 = vmatpush3.xpose.msk.msra.mxu1 %vm273_vm2, %v15249_v0  ;;  %19794 = vmatprep.mubr.msk.f32.mxu1 %vm21019_vm1, %v21018_v8  ;;  %v20794_v0 = vld [vmem:[#allocation2] sm:$0xff] }
0x79fe   :  { %19802 = vmatprep.subr.mxu1 %v21018_v8  ;;  %19799 = vmatprep.mubr.msk.f32.mxu0 %vm21019_vm1, %v21018_v8 }
0x7a00   :  { %19795 = vmatmul.mubr.msk.f32.vlgmr.msra.gmra.mrb[202].mxu1 %vm273_vm2, %v15247_v17 }
0x7a01   :  { %19804 = vmatprep.mubr.msk.f32.mxu1 %vm21019_vm1, %v21018_v8 }
0x7acb   :  { %v15088_v27 = vpop.f32.mrb[134].mxu0 }
0x7acc   :  { %v19781_v60 = vpop.f32.mrb[135].mxu0 }
0x7acf   :  { %v15164_v39 = vpop.f32.mrb[200].mxu1  ;;  %v15242_v43 = vpop.f32.mrb[136].mxu0 }
0x7ad0   :  { %v15243_v21 = vadd.f32 %v23422_v45, %v15242_v43  ;;  %v19786_v26 = vpop.f32.mrb[201].mxu1  ;;  %v19791_v19 = vpop.f32.mrb[137].mxu0 }
0x7ad2   :  { %v15324_v33 = vsel %vm273_vm2, %v15243_v21, -inf }
0x7ad3   :  { %15325 = vmax.xlane.f32.xlu0 %v15324_v33  ;;  %v15320_v7 = vpop.f32.mrb[202].mxu1 }
0x7ad4   :  { %v15321_v24 = vadd.f32 %v23422_v45, %v15320_v7  ;;  %v19796_v34 = vpop.f32.mrb[203].mxu1 }
0x7ad6   :  { %v15327_v35 = vsel %vm273_vm2, %v15321_v24, -inf }
0x7ad7   :  { %15328 = vmax.xlane.f32.xlu1 %v15327_v35 }
0x7ae8   :  { %15346 = vrot.lane.b32.xlu1 %v23404_v30, %s24004_s25 }
0x7aec   :  { %15500 = vrot.lane.b32.xlu1 %v23500_v22, %s23993_s8 }
0x7af0   :  { %15502 = vrot.lane.b32.xlu1 %v23502_v53, %s23993_s8 }
0x7af4   :  { %15510 = vrot.lane.b32.xlu1 %v15164_v39, %s23997_s27 }
0x7b60   :  { %v15326_v23 = vpop.xlane.xlu0 %15325 }
0x7b61   :  { %v15330_v28 = vsub.f32 %v15243_v21, %v15326_v23 }
0x7b63   :  { %v15332_v4 = vmul.f32 1.442695, %v15330_v28  ;;  %v18022_v28 = vld [vmem:[%s23922_s9 + $0x88] sm:$0xff] }
0x7b64   :  { %v15329_v51 = vpop.xlane.xlu1 %15328 }
0x7b65   :  { %20732 = vpow2.f32 %v15332_v4  ;;  %v15331_v45 = vsub.f32 %v15321_v24, %v15329_v51  ;;  %v18014_v51 = vld [vmem:[%s23920_s7 + $0x80] sm:$0xff] }
0x7b67   :  { %v15334_v18 = vmul.f32 1.442695, %v15331_v45  ;;  %v18015_v45 = vld [vmem:[%s23920_s7 + $0x88] sm:$0xff] }
0x7b68   :  { %v15347_v37 = vpop.permute.xlu1 %15346 }
0x7b69   :  { %20734 = vpow2.f32 %v15334_v18  ;;  %19798 = vmatpush3.msra.mxu0 %v15347_v37  ;;  %v18023_v18 = vld [vmem:[%s23922_s9 + $0x90] sm:$0xff]  ;;  %v20313_v37 = vpack.c.bf16 %v18015_v45, %v18014_v51 }
0x7b6c   :  { %v15501_v2 = vpop.permute.xlu1 %15500 }
0x7b6d   :  { %v15522_v44 = vsel %vm273_vm2, %v23460_v10, %v15501_v2  ;;  %v18011_v10 = vld [vmem:[#allocation10 + $0x4] ss:$0 sm:$0xff] }
0x7b6f   :  { %v20733_v48 = vpop.eup %20732 }
0x7b70   :  { %v15336_v30 = vsel %vm273_vm2, %v20733_v48, 0.0  ;;  %v15503_v9 = vpop.permute.xlu1 %15502 }
0x7b71   :  { %15337 = vadd.xlane.f32.xlu0 %v15336_v30  ;;  %v15523_v59 = vsel %vm273_vm2, %v23462_v61, %v15503_v9 }
0x7b73   :  { %v20735_v22 = vpop.eup %20734 }
0x7b74   :  { %v15339_v25 = vsel %vm273_vm2, %v20735_v22, 0.0  ;;  %v15511_v52 = vpop.permute.xlu1 %15510 }
0x7b75   :  { %15340 = vadd.xlane.f32.xlu0 %v15339_v25  ;;  %v15525_v3 = vsel %vm1615_vm4, %v15523_v59, %v15511_v52  ;;  %v18017_v25 = vld [vmem:[%s23920_s7 + $0x98] sm:$0xff] }
0x7b8b   :  { %15422 = vrot.lane.b32.xlu0 %v23402_v31, %s24004_s25  ;;  %v18007_v31 = vld [vmem:[%s24018_s1 + $0x80] sm:$0xff] }
0x7b8c   :  { %v20305_v56 = vpack.c.bf16 %v18008_v5, %v18007_v31  ;;  %v23621_v5 = vld [vmem:[%s23926_s13 + $0x10] sm:$0x7] }
0x7b8d   :  { %v15653_v57 = vrot.slane %v23621_v5, %v21525_v13 }
0x7b8e   :  { %20306 = vmatprep.subr.bf16.mxu0 %v20305_v56 }
0x7b8f   :  { %15508 = vrot.lane.b32.xlu0 %v15088_v27, %s23997_s27 }
0x7bfe   :  { %v15338_v53 = vpop.xlane.xlu0 %15337 }
0x7bff   :  { %20736 = vrcp.f32 %v15338_v53 }
0x7c02   :  { %v15341_v38 = vpop.xlane.xlu0 %15340 }
0x7c03   :  { %20738 = vrcp.f32 %v15341_v38  ;;  %v20795_v38 = vld [vmem:[#allocation2 + $0x8] sm:$0xff] }
0x7c06   :  { %v15423_v40 = vpop.permute.xlu0 %15422 }
0x7c07   :  { %19803 = vmatpush3.msra.mxu1 %v15423_v40 }
0x7c08   :  { %20314 = vmatprep.subr.bf16.mxu1 %v20313_v37 }
0x7c09   :  { %v20737_v42 = vpop.eup %20736 }
0x7c0a   :  { %v15344_v41 = vmul.f32 %v20737_v42, %v20733_v48  ;;  %v15509_v58 = vpop.permute.xlu0 %15508  ;;  %v18024_v48 = vld [vmem:[%s23922_s9 + $0x98] sm:$0xff] }
0x7c0b   :  { %v15524_v11 = vsel %vm1615_vm4, %v15522_v44, %v15509_v58  ;;  %v20325_v30 = vpack.c.bf16 %v18024_v48, %v18023_v18 }
0x7c0c   :  { %19800 = vmatmul.mubr.msk.f32.vlgmr.msra.gmra.mrb[138].mxu0 %vm273_vm2, %v15344_v41 }
0x7c0d   :  { %v20739_v55 = vpop.eup %20738  ;;  %20308 = vmatpush3.bf16.msra.mxu0 %v20305_v56  ;;  %v23626_v56 = vld [vmem:[%s24019_s0 + $0x10] sm:$0x7] }
0x7c0e   :  { %v15345_v50 = vmul.f32 %v20739_v55, %v20735_v22  ;;  %20310 = vmatprep.subr.bf16.mxu0 %v20309_v46  ;;  %v18016_v22 = vld [vmem:[%s23920_s7 + $0x90] sm:$0xff] }
0x7c0f   :  { %v20317_v53 = vpack.c.bf16 %v18017_v25, %v18016_v22 }
0x7c10   :  { %19805 = vmatmul.mubr.msk.f32.vlgmr.msra.gmra.mrb[204].mxu1 %vm273_vm2, %v15345_v50 }
0x7c11   :  { %20312 = vmatpush3.bf16.msra.mxu0 %v20309_v46  ;;  %20316 = vmatpush3.bf16.msra.mxu1 %v20313_v37 }
0x7c12   :  { %20318 = vmatprep.subr.bf16.mxu1 %v20317_v53 }
0x7c15   :  { %20320 = vmatpush3.bf16.msra.mxu1 %v20317_v53 }
0x7c16   :  { %19840 = vmatprep.subr.mxu1 %v21018_v8 }
0x7cdf   :  { %v15418_v54 = vpop.f32.mrb[138].mxu0 }
0x7ce0   :  { %15516 = vrot.lane.b32.xlu0 %v15418_v54, %s23999_s12  ;;  %v19801_v12 = vpop.f32.mrb[139].mxu0  ;;  %v15659_v54 = vrot.slane %v23626_v56, %v21525_v13  ;;  %v18026_v13 = vld [vmem:[%s24020_s14 + $0x4] ss:$0 sm:$0xff] }
0x7ce3   :  { %v15494_v36 = vpop.f32.mrb[204].mxu1 }
0x7ce4   :  { %15518 = vrot.lane.b32.xlu1 %v15494_v36, %s23999_s12  ;;  %v19806_v63 = vpop.f32.mrb[205].mxu1 }
0x7d52   :  { %v15517_v14 = vpop.permute.xlu0 %15516 }
0x7d53   :  { %v15526_v16 = vsel %vm1618_vm3, %v15524_v11, %v15517_v14 }
0x7d54   :  { %19815 = vmatprep.mubr.msk.f32.mxu0 %vm188_vm0, %v15526_v16  ;;  %v18018_v16 = vld [vmem:[#allocation11 + $0x4] ss:$0 sm:$0xff] }
0x7d56   :  { %v15519_v1 = vpop.permute.xlu1 %15518 }
0x7d57   :  { %v15527_v15 = vsel %vm1618_vm3, %v15525_v3, %v15519_v1 }
0x7d58   :  { %19816 = vmatmul.mubr.msk.f32.vlgmr.msra.gmra.mrb[140].mxu0 %vm188_vm0, %v15527_v15 }
0x7d59   :  { %19837 = vmatprep.mubr.msk.f32.mxu0 %vm188_vm0, %v20794_v0 }
0x7e2b   :  { %v19817_v32 = vpop.f32.mrb[140].mxu0 }
0x7e2c   :  { %v15619_v62 = vadd.f32 %v19817_v32, %v18011_v10  ;;  %v15613_v17 = vpop.f32.mrb[141].mxu0 }
0x7e2d   :  { %v15614_v27 = vadd.f32 %v18011_v10, %v15613_v17 }
0x7e2e   :  { %v15623_v60 = vadd.f32 %v15619_v62, %v23394_v29 }
0x7e2f   :  { %v15622_v39 = vadd.f32 %v15614_v27, %v23392_v20  ;;  %v18021_v20 = vld [vmem:[%s23922_s9 + $0x80] sm:$0xff] }
0x7e30   :  { %v15627_v61 = vsel %vm188_vm0, %v15623_v60, 0.0  ;;  %v20321_v4 = vpack.c.bf16 %v18022_v28, %v18021_v20 }
0x7e31   :  { %15628 = vadd.xlane.f32.xlu1 %v15627_v61  ;;  %v15624_v43 = vsel %vm188_vm0, %v15622_v39, 0.0 }
0x7e32   :  { %15625 = vadd.xlane.f32.xlu0 %v15624_v43  ;;  %20322 = vmatprep.subr.bf16.mxu0 %v20321_v4 }
0x7e33   :  { %20324 = vmatpush3.bf16.msra.mxu0 %v20321_v4 }
0x7e34   :  { %20326 = vmatprep.subr.bf16.mxu0 %v20325_v30 }
0x7e37   :  { %20328 = vmatpush3.bf16.msra.mxu0 %v20325_v30 }
0x7e38   :  { %19850 = vmatprep.subr.mxu0 %v21018_v8 }
0x7e3a   :  { %19838 = vmatmul.mubr.msk.f32.vlgmr.msra.gmra.mrb[142].mxu0 %vm188_vm0, %v20795_v38 }
0x7e3b   :  { %19852 = vmatprep.mubr.msk.f32.mxu0 %vm21019_vm1, %v21018_v8 }
0x7ebe   :  { %v15629_v21 = vpop.xlane.xlu1 %15628 }
0x7ebf   :  { %v15631_v26 = vmul.f32 0.03125, %v15629_v21  ;;  %v15626_v19 = vpop.xlane.xlu0 %15625 }
0x7ec0   :  { %v15630_v33 = vmul.f32 0.03125, %v15626_v19 }
0x7ec1   :  { %v15633_v7 = vsub.f32 %v15623_v60, %v15631_v26 }
0x7ec2   :  { %v15632_v24 = vsub.f32 %v15622_v39, %v15630_v33 }
0x7ec3   :  { %v15635_v23 = vmul.f32 %v15633_v7, %v15633_v7 }
0x7ec4   :  { %v15634_v34 = vmul.f32 %v15632_v24, %v15632_v24 }
0x7ec5   :  { %v15639_v29 = vsel %vm188_vm0, %v15635_v23, 0.0 }
0x7ec6   :  { %v15636_v35 = vsel %vm188_vm0, %v15634_v34, 0.0 }
0x7ec7   :  { %15637 = vadd.xlane.f32.xlu0 %v15636_v35 }
0x7ecb   :  { %15640 = vadd.xlane.f32.xlu0 %v15639_v29 }
0x7f0d   :  { %v19839_v44 = vpop.f32.mrb[142].mxu0 }
0x7f0e   :  { %v23645_v52 = vadd.f32 %v19839_v44, %v18026_v13  ;;  %v15835_v11 = vpop.f32.mrb[143].mxu0 }
0x7f0f   :  { %v23647_v14 = vadd.f32 %v18026_v13, %v15835_v11 }
0x7f54   :  { %v15638_v40 = vpop.xlane.xlu0 %15637 }
0x7f55   :  { %v15642_v42 = vmul.f32 0.03125, %v15638_v40 }
0x7f57   :  { %v15644_v41 = vadd.f32 1e-05, %v15642_v42 }
0x7f58   :  { %v15641_v55 = vpop.xlane.xlu0 %15640 }
0x7f59   :  { %20740 = vrsqrt.f32 %v15644_v41  ;;  %v15643_v50 = vmul.f32 0.03125, %v15641_v55 }
0x7f5b   :  { %v15645_v31 = vadd.f32 1e-05, %v15643_v50 }
0x7f5d   :  { %20742 = vrsqrt.f32 %v15645_v31 }
0x7f63   :  { %v20741_v49 = vpop.eup %20740 }
0x7f64   :  { %v15648_v46 = vmul.f32 %v20741_v49, %v15632_v24 }
0x7f66   :  { %v15654_v12 = vmul.f32 %v15653_v57, %v15648_v46 }
0x7f67   :  { %v20743_v36 = vpop.eup %20742 }
0x7f68   :  { %v15649_v63 = vmul.f32 %v20743_v36, %v15633_v7  ;;  %v23632_v2 = vadd.f32 %v15659_v54, %v15654_v12 }
0x7f6a   :  { %v15655_v9 = vmul.f32 %v15653_v57, %v15649_v63  ;;  %19826 = vmatprep.mubr.msk.f32.mxu1 %vm188_vm0, %v23632_v2 }
0x7f6c   :  { %v23636_v58 = vadd.f32 %v15659_v54, %v15655_v9 }
0x7f6e   :  { %19827 = vmatmul.mubr.msk.f32.vlgmr.msra.gmra.mrb[206].mxu1 %vm188_vm0, %v23636_v58 }
0x7f6f   :  { %19842 = vmatprep.mubr.msk.f32.mxu1 %vm21019_vm1, %v21018_v8  ;;  %19841 = vmatpush3.xpose.msk.msra.mxu1 %vm273_vm2, %v23647_v14 }
0x7f70   :  { %19845 = vmatprep.subr.mxu1 %v21018_v8 }
0x8041   :  { %v19828_v59 = vpop.f32.mrb[206].mxu1 }
0x8042   :  { %v15747_v3 = vpop.f32.mrb[207].mxu1  ;;  %v23660_v15 = vadd.f32 %v19828_v59, %v18018_v16 }
0x8043   :  { %v23652_v1 = vadd.f32 %v18018_v16, %v15747_v3 }
0x8045   :  { %19843 = vmatmul.mubr.msk.f32.vlgmr.msra.gmra.mrb[208].mxu1 %vm273_vm2, %v23652_v1 }
0x8046   :  { %19846 = vmatpush3.xpose.msk.msra.mxu1 %vm273_vm2, %v23645_v52  ;;  %19847 = vmatprep.mubr.msk.f32.mxu1 %vm21019_vm1, %v21018_v8 }
0x8047   :  { %19855 = vmatprep.subr.mxu1 %v21018_v8 }
0x8049   :  { %19848 = vmatmul.mubr.msk.f32.vlgmr.msra.gmra.mrb[210].mxu1 %vm273_vm2, %v23660_v15 }
0x804a   :  { %19857 = vmatprep.mubr.msk.f32.mxu1 %vm21019_vm1, %v21018_v8 }
0x8118   :  { %v15916_v0 = vpop.f32.mrb[208].mxu1 }
0x8119   :  { %v19844_v10 = vpop.f32.mrb[209].mxu1  ;;  %v15996_v32 = vsel %vm273_vm2, %v15916_v0, -inf }
0x811a   :  { %15997 = vmax.xlane.f32.xlu1 %v15996_v32 }
0x811c   :  { %v15992_v62 = vpop.f32.mrb[210].mxu1 }
0x811d   :  { %v19849_v17 = vpop.f32.mrb[211].mxu1  ;;  %v15999_v27 = vsel %vm273_vm2, %v15992_v62, -inf }
0x811e   :  { %16000 = vmax.xlane.f32.xlu0 %v15999_v27 }
0x812b   :  { %16018 = vrot.lane.b32.xlu1 %v23647_v14, %s24010_s15 }
0x812f   :  { %16172 = vrot.lane.b32.xlu1 %v23647_v14, %s24005_s3 }
0x8133   :  { %16250 = vrot.lane.b32.xlu1 %v23645_v52, %s24005_s3 }
0x8134   :  { %16094 = vrot.lane.b32.xlu0 %v23645_v52, %s24010_s15 }
0x81a7   :  { %v15998_v60 = vpop.xlane.xlu1 %15997 }
0x81a8   :  { %v16002_v39 = vsub.f32 %v15916_v0, %v15998_v60 }
0x81aa   :  { %v16004_v61 = vmul.f32 1.442695, %v16002_v39 }
0x81ab   :  { %v16019_v43 = vpop.permute.xlu1 %16018  ;;  %v16001_v21 = vpop.xlane.xlu0 %16000 }
0x81ac   :  { %20744 = vpow2.f32 %v16004_v61  ;;  %v16003_v26 = vsub.f32 %v15992_v62, %v16001_v21  ;;  %19851 = vmatpush3.msra.mxu0 %v16019_v43 }
0x81ad   :  { %19860 = vmatprep.subr.mxu0 %v21018_v8 }
0x81ae   :  { %v16006_v19 = vmul.f32 1.442695, %v16003_v26 }
0x81af   :  { %v16095_v33 = vpop.permute.xlu0 %16094  ;;  %v16173_v23 = vpop.permute.xlu1 %16172 }
0x81b0   :  { %20746 = vpow2.f32 %v16006_v19  ;;  %19856 = vmatpush3.msra.mxu1 %v16095_v33 }
0x81b1   :  { %19865 = vmatprep.subr.mxu1 %v21018_v8 }
0x81b3   :  { %v16251_v29 = vpop.permute.xlu1 %16250 }
0x81b6   :  { %v20745_v7 = vpop.eup %20744 }
0x81b7   :  { %v16008_v24 = vsel %vm273_vm2, %v20745_v7, 0.0 }
0x81b8   :  { %16009 = vadd.xlane.f32.xlu1 %v16008_v24 }
0x81ba   :  { %v20747_v34 = vpop.eup %20746 }
0x81bb   :  { %v16011_v35 = vsel %vm273_vm2, %v20747_v34, 0.0 }
0x81bc   :  { %16012 = vadd.xlane.f32.xlu0 %v16011_v35 }
0x81c9   :  { %16248 = vrot.lane.b32.xlu1 %v23660_v15, %s24005_s3 }
0x81d2   :  { %16170 = vrot.lane.b32.xlu0 %v23652_v1, %s24005_s3 }
0x8245   :  { %v16010_v20 = vpop.xlane.xlu1 %16009 }
0x8246   :  { %20748 = vrcp.f32 %v16010_v20 }
0x8249   :  { %v16013_v28 = vpop.xlane.xlu0 %16012  ;;  %v16249_v48 = vpop.permute.xlu1 %16248 }
0x824a   :  { %20750 = vrcp.f32 %v16013_v28 }
0x824d   :  { %v16171_v37 = vpop.permute.xlu0 %16170 }
0x8250   :  { %v20749_v4 = vpop.eup %20748 }
0x8251   :  { %v16016_v51 = vmul.f32 %v20749_v4, %v20745_v7 }
0x8253   :  { %19853 = vmatmul.mubr.msk.f32.vlgmr.msra.gmra.mrb[144].mxu0 %vm273_vm2, %v16016_v51 }
0x8254   :  { %v20751_v45 = vpop.eup %20750  ;;  %19861 = vmatpush3.xpose.msk.msra.mxu0 %vm273_vm2, %v16173_v23  ;;  %19862 = vmatprep.mubr.msk.f32.mxu0 %vm21019_vm1, %v21018_v8 }
0x8255   :  { %v16017_v18 = vmul.f32 %v20751_v45, %v20747_v34  ;;  %19870 = vmatprep.subr.mxu0 %v21018_v8 }
0x8257   :  { %19858 = vmatmul.mubr.msk.f32.vlgmr.msra.gmra.mrb[212].mxu1 %vm273_vm2, %v16017_v18  ;;  %19863 = vmatmul.mubr.msk.f32.vlgmr.msra.gmra.mrb[146].mxu0 %vm273_vm2, %v16171_v37 }
0x8258   :  { %19866 = vmatpush3.xpose.msk.msra.mxu1 %vm273_vm2, %v16251_v29  ;;  %19867 = vmatprep.mubr.msk.f32.mxu1 %vm21019_vm1, %v21018_v8 }
0x8259   :  { %19875 = vmatprep.subr.mxu1 %v21018_v8  ;;  %19872 = vmatprep.mubr.msk.f32.mxu0 %vm21019_vm1, %v21018_v8 }
0x825b   :  { %19868 = vmatmul.mubr.msk.f32.vlgmr.msra.gmra.mrb[214].mxu1 %vm273_vm2, %v16249_v48 }
0x825c   :  { %19877 = vmatprep.mubr.msk.f32.mxu1 %vm21019_vm1, %v21018_v8 }
0x8326   :  { %v23701_v30 = vpop.f32.mrb[144].mxu0 }
0x8327   :  { %v19854_v22 = vpop.f32.mrb[145].mxu0 }
0x832a   :  { %v23703_v25 = vpop.f32.mrb[212].mxu1  ;;  %v16244_v53 = vpop.f32.mrb[146].mxu0 }
0x832b   :  { %v19859_v38 = vpop.f32.mrb[213].mxu1  ;;  %v19864_v40 = vpop.f32.mrb[147].mxu0  ;;  %v16326_v42 = vsel %vm273_vm2, %v16244_v53, -inf }
0x832c   :  { %16327 = vmax.xlane.f32.xlu0 %v16326_v42 }
0x832e   :  { %v16322_v41 = vpop.f32.mrb[214].mxu1 }
0x832f   :  { %v19869_v55 = vpop.f32.mrb[215].mxu1  ;;  %v16329_v50 = vsel %vm273_vm2, %v16322_v41, -inf }
0x8330   :  { %16330 = vmax.xlane.f32.xlu1 %v16329_v50 }
0x8341   :  { %16348 = vrot.lane.b32.xlu1 %v23647_v14, %s24006_s29 }
0x8342   :  { %16424 = vrot.lane.b32.xlu0 %v23645_v52, %s24006_s29  ;;  %s24021_s29 = sld [smem:[#allocation29_spill]] }
0x8345   :  { %16502 = vrot.lane.b32.xlu1 %v23647_v14, %s24007_s28 }
0x8349   :  { %16580 = vrot.lane.b32.xlu1 %v23645_v52, %s24007_s28 }
0x834d   :  { %16578 = vrot.lane.b32.xlu1 %v23660_v15, %s24007_s28 }
0x83b9   :  { %v16328_v31 = vpop.xlane.xlu0 %16327 }
0x83ba   :  { %v16332_v57 = vsub.f32 %v16244_v53, %v16328_v31 }
0x83bc   :  { %v16334_v49 = vmul.f32 1.442695, %v16332_v57 }
0x83bd   :  { %v16425_v46 = vpop.permute.xlu0 %16424  ;;  %v16331_v54 = vpop.xlane.xlu1 %16330 }
0x83be   :  { %20752 = vpow2.f32 %v16334_v49  ;;  %v16333_v12 = vsub.f32 %v16322_v41, %v16331_v54  ;;  %19876 = vmatpush3.msra.mxu1 %v16425_v46 }
0x83bf   :  { %19885 = vmatprep.subr.mxu1 %v21018_v8 }
0x83c0   :  { %v16336_v36 = vmul.f32 1.442695, %v16333_v12 }
0x83c1   :  { %v16349_v63 = vpop.permute.xlu1 %16348 }
0x83c2   :  { %20754 = vpow2.f32 %v16336_v36  ;;  %19871 = vmatpush3.msra.mxu0 %v16349_v63 }
0x83c3   :  { %19880 = vmatprep.subr.mxu0 %v21018_v8 }
0x83c5   :  { %v16503_v3 = vpop.permute.xlu1 %16502 }
0x83c8   :  { %v20753_v9 = vpop.eup %20752 }
0x83c9   :  { %v16338_v13 = vsel %vm273_vm2, %v20753_v9, 0.0  ;;  %v16581_v62 = vpop.permute.xlu1 %16580 }
0x83ca   :  { %16339 = vadd.xlane.f32.xlu0 %v16338_v13 }
0x83cc   :  { %v20755_v44 = vpop.eup %20754 }
0x83cd   :  { %v16341_v11 = vsel %vm273_vm2, %v20755_v44, 0.0  ;;  %v16579_v60 = vpop.permute.xlu1 %16578 }
0x83ce   :  { %16342 = vadd.xlane.f32.xlu0 %v16341_v11 }
0x83e4   :  { %16500 = vrot.lane.b32.xlu0 %v23652_v1, %s24007_s28 }
0x8457   :  { %v16340_v16 = vpop.xlane.xlu0 %16339 }
0x8458   :  { %20756 = vrcp.f32 %v16340_v16 }
0x845b   :  { %v16343_v59 = vpop.xlane.xlu0 %16342 }
0x845c   :  { %20758 = vrcp.f32 %v16343_v59 }
0x845f   :  { %v16501_v27 = vpop.permute.xlu0 %16500 }
0x8462   :  { %v20757_v0 = vpop.eup %20756 }
0x8463   :  { %v16346_v10 = vmul.f32 %v20757_v0, %v20753_v9 }
0x8465   :  { %19873 = vmatmul.mubr.msk.f32.vlgmr.msra.gmra.mrb[148].mxu0 %vm273_vm2, %v16346_v10 }
0x8466   :  { %v20759_v32 = vpop.eup %20758  ;;  %19881 = vmatpush3.xpose.msk.msra.mxu0 %vm273_vm2, %v16503_v3  ;;  %19882 = vmatprep.mubr.msk.f32.mxu0 %vm21019_vm1, %v21018_v8 }
0x8467   :  { %v16347_v17 = vmul.f32 %v20759_v32, %v20755_v44  ;;  %19890 = vmatprep.subr.mxu0 %v21018_v8 }
0x8469   :  { %19878 = vmatmul.mubr.msk.f32.vlgmr.msra.gmra.mrb[216].mxu1 %vm273_vm2, %v16347_v17  ;;  %19883 = vmatmul.mubr.msk.f32.vlgmr.msra.gmra.mrb[150].mxu0 %vm273_vm2, %v16501_v27 }
0x846a   :  { %19886 = vmatpush3.xpose.msk.msra.mxu1 %vm273_vm2, %v16581_v62  ;;  %19887 = vmatprep.mubr.msk.f32.mxu1 %vm21019_vm1, %v21018_v8 }
0x846b   :  { %19895 = vmatprep.subr.mxu1 %v21018_v8  ;;  %19892 = vmatprep.mubr.msk.f32.mxu0 %vm21019_vm1, %v21018_v8 }
0x846d   :  { %19888 = vmatmul.mubr.msk.f32.vlgmr.msra.gmra.mrb[218].mxu1 %vm273_vm2, %v16579_v60 }
0x846e   :  { %19897 = vmatprep.mubr.msk.f32.mxu1 %vm21019_vm1, %v21018_v8 }
0x8538   :  { %v23739_v39 = vpop.f32.mrb[148].mxu0 }
0x8539   :  { %v19874_v61 = vpop.f32.mrb[149].mxu0 }
0x853c   :  { %v23741_v43 = vpop.f32.mrb[216].mxu1  ;;  %v16574_v21 = vpop.f32.mrb[150].mxu0 }
0x853d   :  { %v19879_v26 = vpop.f32.mrb[217].mxu1  ;;  %v19884_v19 = vpop.f32.mrb[151].mxu0  ;;  %v16656_v33 = vsel %vm273_vm2, %v16574_v21, -inf }
0x853e   :  { %16657 = vmax.xlane.f32.xlu0 %v16656_v33  ;;  %v18054_v19 = vld [vmem:[%s24021_s29 + $0x88] sm:$0xff] }
0x8540   :  { %v16652_v7 = vpop.f32.mrb[218].mxu1 }
0x8541   :  { %v19889_v24 = vpop.f32.mrb[219].mxu1  ;;  %v16659_v34 = vsel %vm273_vm2, %v16652_v7, -inf }
0x8542   :  { %16660 = vmax.xlane.f32.xlu1 %v16659_v34  ;;  %v18056_v24 = vld [vmem:[%s24021_s29 + $0x98] sm:$0xff] }
0x8553   :  { %16678 = vrot.lane.b32.xlu1 %v23647_v14, %s24008_s30 }
0x8554   :  { %16754 = vrot.lane.b32.xlu0 %v23645_v52, %s24008_s30 }
0x8557   :  { %16832 = vrot.lane.b32.xlu1 %v23647_v14, %s24003_s19 }
0x855b   :  { %16910 = vrot.lane.b32.xlu1 %v23645_v52, %s24003_s19 }
0x855f   :  { %16908 = vrot.lane.b32.xlu1 %v23660_v15, %s24003_s19 }
0x85cb   :  { %v16658_v35 = vpop.xlane.xlu0 %16657 }
0x85cc   :  { %v16662_v23 = vsub.f32 %v16574_v21, %v16658_v35 }
0x85ce   :  { %v16664_v29 = vmul.f32 1.442695, %v16662_v23 }
0x85cf   :  { %v16755_v20 = vpop.permute.xlu0 %16754  ;;  %v16661_v28 = vpop.xlane.xlu1 %16660 }
0x85d0   :  { %20760 = vpow2.f32 %v16664_v29  ;;  %v16663_v4 = vsub.f32 %v16652_v7, %v16661_v28  ;;  %19896 = vmatpush3.msra.mxu1 %v16755_v20  ;;  %v18055_v7 = vld [vmem:[%s24021_s29 + $0x90] sm:$0xff] }
0x85d1   :  { %19905 = vmatprep.subr.mxu1 %v21018_v8  ;;  %v20333_v34 = vpack.c.bf16 %v18056_v24, %v18055_v7  ;;  %v18075_v7 = vld [vmem:[%s23930_s17 + $0x258] sm:$0xff] }
0x85d2   :  { %v16666_v51 = vmul.f32 1.442695, %v16663_v4 }
0x85d3   :  { %v16679_v45 = vpop.permute.xlu1 %16678 }
0x85d4   :  { %20762 = vpow2.f32 %v16666_v51  ;;  %19891 = vmatpush3.msra.mxu0 %v16679_v45 }
0x85d5   :  { %19900 = vmatprep.subr.mxu0 %v21018_v8 }
0x85d7   :  { %v16833_v38 = vpop.permute.xlu1 %16832 }
0x85da   :  { %v20761_v18 = vpop.eup %20760 }
0x85db   :  { %v16668_v37 = vsel %vm273_vm2, %v20761_v18, 0.0  ;;  %v16911_v55 = vpop.permute.xlu1 %16910 }
0x85dc   :  { %16669 = vadd.xlane.f32.xlu0 %v16668_v37 }
0x85de   :  { %v20763_v15 = vpop.eup %20762 }
0x85df   :  { %v16671_v48 = vsel %vm273_vm2, %v20763_v15, 0.0  ;;  %v16909_v31 = vpop.permute.xlu1 %16908 }
0x85e0   :  { %16672 = vadd.xlane.f32.xlu0 %v16671_v48 }
0x85f6   :  { %16830 = vrot.lane.b32.xlu0 %v23652_v1, %s24003_s19 }
0x8669   :  { %v16670_v22 = vpop.xlane.xlu0 %16669 }
0x866a   :  { %20764 = vrcp.f32 %v16670_v22 }
0x866d   :  { %v16673_v53 = vpop.xlane.xlu0 %16672 }
0x866e   :  { %20766 = vrcp.f32 %v16673_v53 }
0x8671   :  { %v16831_v1 = vpop.permute.xlu0 %16830 }
0x8674   :  { %v20765_v40 = vpop.eup %20764 }
0x8675   :  { %v16676_v42 = vmul.f32 %v20765_v40, %v20761_v18 }
0x8677   :  { %19893 = vmatmul.mubr.msk.f32.vlgmr.msra.gmra.mrb[152].mxu0 %vm273_vm2, %v16676_v42  ;;  %v18057_v42 = vld [vmem:[#allocation13 + $0x4] ss:$0 sm:$0xff] }
0x8678   :  { %v20767_v41 = vpop.eup %20766  ;;  %19901 = vmatpush3.xpose.msk.msra.mxu0 %vm273_vm2, %v16833_v38  ;;  %19902 = vmatprep.mubr.msk.f32.mxu0 %vm21019_vm1, %v21018_v8 }
0x8679   :  { %v16677_v50 = vmul.f32 %v20767_v41, %v20763_v15  ;;  %19910 = vmatprep.subr.mxu0 %v21018_v8 }
0x867b   :  { %19898 = vmatmul.mubr.msk.f32.vlgmr.msra.gmra.mrb[220].mxu1 %vm273_vm2, %v16677_v50  ;;  %19903 = vmatmul.mubr.msk.f32.vlgmr.msra.gmra.mrb[154].mxu0 %vm273_vm2, %v16831_v1 }
0x867c   :  { %19906 = vmatpush3.xpose.msk.msra.mxu1 %vm273_vm2, %v16911_v55  ;;  %19907 = vmatprep.mubr.msk.f32.mxu1 %vm21019_vm1, %v21018_v8 }
0x867d   :  { %19915 = vmatprep.subr.mxu1 %v21018_v8  ;;  %19912 = vmatprep.mubr.msk.f32.mxu0 %vm21019_vm1, %v21018_v8 }
0x867f   :  { %19908 = vmatmul.mubr.msk.f32.vlgmr.msra.gmra.mrb[222].mxu1 %vm273_vm2, %v16909_v31 }
0x8680   :  { %19917 = vmatprep.mubr.msk.f32.mxu1 %vm21019_vm1, %v21018_v8 }
0x874a   :  { %v16750_v57 = vpop.f32.mrb[152].mxu0 }
0x874b   :  { %v19894_v49 = vpop.f32.mrb[153].mxu0 }
0x874e   :  { %v16826_v46 = vpop.f32.mrb[220].mxu1  ;;  %v16904_v54 = vpop.f32.mrb[154].mxu0 }
0x874f   :  { %v19899_v12 = vpop.f32.mrb[221].mxu1  ;;  %v19904_v36 = vpop.f32.mrb[155].mxu0  ;;  %v16986_v63 = vsel %vm273_vm2, %v16904_v54, -inf }
0x8750   :  { %16987 = vmax.xlane.f32.xlu0 %v16986_v63 }
0x8752   :  { %v16982_v9 = vpop.f32.mrb[222].mxu1 }
0x8753   :  { %v19909_v13 = vpop.f32.mrb[223].mxu1  ;;  %v16989_v44 = vsel %vm273_vm2, %v16982_v9, -inf }
0x8754   :  { %16990 = vmax.xlane.f32.xlu1 %v16989_v44  ;;  %v17325_v44 = vld [vmem:[#allocation14 + $0x80] sm:$0xff] }
0x8765   :  { %17008 = vrot.lane.b32.xlu1 %v23647_v14, %s24009_s22 }
0x8769   :  { %17162 = vrot.lane.b32.xlu1 %v23739_v39, %s23993_s8 }
0x876d   :  { %17164 = vrot.lane.b32.xlu1 %v23741_v43, %s23993_s8 }
0x8771   :  { %17172 = vrot.lane.b32.xlu1 %v16826_v46, %s23997_s27 }
0x87dd   :  { %v16988_v8 = vpop.xlane.xlu0 %16987 }
0x87de   :  { %v16992_v11 = vsub.f32 %v16904_v54, %v16988_v8  ;;  %v17326_v8 = vld [vmem:[#allocation14 + $0x88] sm:$0xff] }
0x87e0   :  { %v16994_v16 = vmul.f32 1.442695, %v16992_v11  ;;  %v20337_v11 = vpack.c.bf16 %v17326_v8, %v17325_v44 }
0x87e1   :  { %v16991_v59 = vpop.xlane.xlu1 %16990 }
0x87e2   :  { %20768 = vpow2.f32 %v16994_v16  ;;  %v16993_v3 = vsub.f32 %v16982_v9, %v16991_v59  ;;  %v17327_v16 = vld [vmem:[#allocation14 + $0x90] sm:$0xff]  ;;  %v17328_v59 = vld [vmem:[#allocation14 + $0x98] sm:$0xff] }
0x87e4   :  { %v16996_v0 = vmul.f32 1.442695, %v16993_v3  ;;  %v20341_v3 = vpack.c.bf16 %v17328_v59, %v17327_v16 }
0x87e5   :  { %v17009_v10 = vpop.permute.xlu1 %17008 }
0x87e6   :  { %20770 = vpow2.f32 %v16996_v0  ;;  %19911 = vmatpush3.msra.mxu0 %v17009_v10  ;;  %v18064_v0 = vld [vmem:[%s23930_s17 + $0x200] sm:$0xff]  ;;  %v18065_v10 = vld [vmem:[%s23930_s17 + $0x208] sm:$0xff] }
0x87e9   :  { %v17163_v28 = vpop.permute.xlu1 %17162 }
0x87ea   :  { %v17184_v45 = vsel %vm273_vm2, %v23701_v30, %v17163_v28 }
0x87ec   :  { %v20769_v32 = vpop.eup %20768 }
0x87ed   :  { %v16998_v14 = vsel %vm273_vm2, %v20769_v32, 0.0  ;;  %v17165_v4 = vpop.permute.xlu1 %17164 }
0x87ee   :  { %16999 = vadd.xlane.f32.xlu0 %v16998_v14  ;;  %v17185_v22 = vsel %vm273_vm2, %v23703_v25, %v17165_v4  ;;  %v20345_v14 = vpack.c.bf16 %v18065_v10, %v18064_v0 }
0x87f0   :  { %v20771_v62 = vpop.eup %20770 }
0x87f1   :  { %v17001_v17 = vsel %vm273_vm2, %v20771_v62, 0.0  ;;  %v17173_v18 = vpop.permute.xlu1 %17172 }
0x87f2   :  { %17002 = vadd.xlane.f32.xlu0 %v17001_v17  ;;  %v17187_v53 = vsel %vm1615_vm4, %v17185_v22, %v17173_v18  ;;  %v17315_v18 = vrot.slane %v23621_v5, %v21783_v47 }
0x8808   :  { %17084 = vrot.lane.b32.xlu0 %v23645_v52, %s24009_s22  ;;  %v18053_v52 = vld [vmem:[%s24021_s29 + $0x80] sm:$0xff] }
0x8809   :  { %v20329_v33 = vpack.c.bf16 %v18054_v19, %v18053_v52  ;;  %v18073_v52 = vld [vmem:[%s23930_s17 + $0x248] sm:$0xff] }
0x880b   :  { %20330 = vmatprep.subr.bf16.mxu0 %v20329_v33 }
0x880c   :  { %17170 = vrot.lane.b32.xlu0 %v16750_v57, %s23997_s27 }
0x887b   :  { %v17000_v27 = vpop.xlane.xlu0 %16999 }
0x887c   :  { %20772 = vrcp.f32 %v17000_v27  ;;  %v18068_v27 = vld [vmem:[%s23930_s17 + $0x220] sm:$0xff] }
0x887f   :  { %v17003_v60 = vpop.xlane.xlu0 %17002 }
0x8880   :  { %20774 = vrcp.f32 %v17003_v60  ;;  %v18069_v60 = vld [vmem:[%s23930_s17 + $0x228] sm:$0xff] }
0x8883   :  { %v17085_v39 = vpop.permute.xlu0 %17084 }
0x8884   :  { %19916 = vmatpush3.msra.mxu1 %v17085_v39  ;;  %v20353_v39 = vpack.c.bf16 %v18069_v60, %v18068_v27 }
0x8885   :  { %20338 = vmatprep.subr.bf16.mxu1 %v20337_v11 }
0x8886   :  { %v20773_v61 = vpop.eup %20772 }
0x8887   :  { %v17006_v43 = vmul.f32 %v20773_v61, %v20769_v32  ;;  %v17171_v51 = vpop.permute.xlu0 %17170  ;;  %v18066_v32 = vld [vmem:[%s23930_s17 + $0x210] sm:$0xff] }
0x8888   :  { %v17186_v37 = vsel %vm1615_vm4, %v17184_v45, %v17171_v51  ;;  %v18070_v61 = vld [vmem:[%s23930_s17 + $0x230] sm:$0xff] }
0x8889   :  { %19913 = vmatmul.mubr.msk.f32.vlgmr.msra.gmra.mrb[156].mxu0 %vm273_vm2, %v17006_v43  ;;  %v18071_v43 = vld [vmem:[%s23930_s17 + $0x238] sm:$0xff] }
0x888a   :  { %v20775_v21 = vpop.eup %20774  ;;  %20332 = vmatpush3.bf16.msra.mxu0 %v20329_v33  ;;  %v18074_v33 = vld [vmem:[%s23930_s17 + $0x250] sm:$0xff] }
0x888b   :  { %v17007_v26 = vmul.f32 %v20775_v21, %v20771_v62  ;;  %20334 = vmatprep.subr.bf16.mxu0 %v20333_v34  ;;  %v18067_v62 = vld [vmem:[%s23930_s17 + $0x218] sm:$0xff]  ;;  %v20357_v21 = vpack.c.bf16 %v18071_v43, %v18070_v61  ;;  %v20365_v24 = vpack.c.bf16 %v18075_v7, %v18074_v33  ;;  %v17557_v33 = vrot.slane %v23626_v56, %v21826_v6 }
0x888c   :  { %v20349_v17 = vpack.c.bf16 %v18067_v62, %v18066_v32 }
0x888d   :  { %19918 = vmatmul.mubr.msk.f32.vlgmr.msra.gmra.mrb[224].mxu1 %vm273_vm2, %v17007_v26  ;;  %v18072_v26 = vld [vmem:[%s23930_s17 + $0x240] sm:$0xff] }
0x888e   :  { %20336 = vmatpush3.bf16.msra.mxu0 %v20333_v34  ;;  %20340 = vmatpush3.bf16.msra.mxu1 %v20337_v11  ;;  %v20361_v19 = vpack.c.bf16 %v18073_v52, %v18072_v26  ;;  %v18076_v34 = vld [vmem:[%s23930_s17 + $0x260] sm:$0xff] }
0x888f   :  { %20342 = vmatprep.subr.bf16.mxu1 %v20341_v3  ;;  %20346 = vmatprep.subr.bf16.mxu0 %v20345_v14 }
0x8892   :  { %20344 = vmatpush3.bf16.msra.mxu1 %v20341_v3 }
0x895c   :  { %v17080_v35 = vpop.f32.mrb[156].mxu0 }
0x895d   :  { %17178 = vrot.lane.b32.xlu0 %v17080_v35, %s23999_s12  ;;  %v19914_v23 = vpop.f32.mrb[157].mxu0  ;;  %v18077_v35 = vld [vmem:[%s23930_s17 + $0x268] sm:$0xff] }
0x895e   :  { %v20369_v23 = vpack.c.bf16 %v18077_v35, %v18076_v34 }
0x8960   :  { %v17156_v29 = vpop.f32.mrb[224].mxu1 }
0x8961   :  { %17180 = vrot.lane.b32.xlu1 %v17156_v29, %s23999_s12  ;;  %v19919_v20 = vpop.f32.mrb[225].mxu1 }
0x89cf   :  { %v17179_v15 = vpop.permute.xlu0 %17178 }
0x89d0   :  { %v17188_v48 = vsel %vm1618_vm3, %v17186_v37, %v17179_v15 }
0x89d1   :  { %19928 = vmatprep.mubr.msk.f32.mxu0 %vm188_vm0, %v17188_v48  ;;  %v17321_v48 = vrot.slane %v23626_v56, %v21783_v47 }
0x89d3   :  { %v17181_v38 = vpop.permute.xlu1 %17180 }
0x89d4   :  { %v17189_v40 = vsel %vm1618_vm3, %v17187_v53, %v17181_v38 }
0x89d5   :  { %19929 = vmatmul.mubr.msk.f32.vlgmr.msra.gmra.mrb[158].mxu0 %vm188_vm0, %v17189_v40 }
0x89d6   :  { %20348 = vmatpush3.bf16.msra.mxu0 %v20345_v14 }
0x89d7   :  { %20350 = vmatprep.subr.bf16.mxu0 %v20349_v17 }
0x89da   :  { %20352 = vmatpush3.bf16.msra.mxu0 %v20349_v17 }
0x89db   :  { %20354 = vmatprep.subr.bf16.mxu0 %v20353_v39 }
0x89de   :  { %20356 = vmatpush3.bf16.msra.mxu0 %v20353_v39 }
0x89df   :  { %20358 = vmatprep.subr.bf16.mxu0 %v20357_v21 }
0x89e2   :  { %20360 = vmatpush3.bf16.msra.mxu0 %v20357_v21  ;;  %v17551_v21 = vrot.slane %v23621_v5, %v21826_v6 }
0x89e3   :  { %20362 = vmatprep.subr.bf16.mxu0 %v20361_v19 }
0x89e6   :  { %20364 = vmatpush3.bf16.msra.mxu0 %v20361_v19 }
0x89e7   :  { %20366 = vmatprep.subr.bf16.mxu0 %v20365_v24 }
0x89ea   :  { %20368 = vmatpush3.bf16.msra.mxu0 %v20365_v24 }
0x89eb   :  { %20370 = vmatprep.subr.bf16.mxu0 %v20369_v23 }
0x89ee   :  { %20372 = vmatpush3.bf16.msra.mxu0 %v20369_v23 }
0x8aa8   :  { %v19930_v30 = vpop.f32.mrb[158].mxu0 }
0x8aa9   :  { %v17281_v41 = vadd.f32 %v19930_v30, %v18057_v42  ;;  %v17275_v55 = vpop.f32.mrb[159].mxu0 }
0x8aaa   :  { %v17276_v50 = vadd.f32 %v18057_v42, %v17275_v55  ;;  %v18079_v55 = vld [vmem:[%s23930_s17 + $0x278] sm:$0xff] }
0x8aab   :  { %v17285_v1 = vadd.f32 %v17281_v41, %v23636_v58  ;;  %v18078_v41 = vld [vmem:[%s23930_s17 + $0x270] sm:$0xff] }
0x8aac   :  { %v17284_v31 = vadd.f32 %v17276_v50, %v23632_v2  ;;  %v20373_v47 = vpack.c.bf16 %v18079_v55, %v18078_v41  ;;  %v18061_v50 = vld [vmem:[%s23929_s16 + $0x4] ss:$0 sm:$0xff]  ;;  %s21032_s16 = smov [#allocation16]  }
0x8aad   :  { %v17289_v57 = vsel %vm188_vm0, %v17285_v1, 0.0  ;;  %s17567_s17 = sshll.u32 %s21032_s16, 4  ;;  %s17568_s17 = int_to_ptr.vmem [resolvable:$true] %s17567_s17 }
0x8aae   :  { %17290 = vadd.xlane.f32.xlu1 %v17289_v57  ;;  %v17286_v25 = vsel %vm188_vm0, %v17284_v31, 0.0  ;;  %20374 = vmatprep.subr.bf16.mxu0 %v20373_v47  ;;  %p20977_p9 = scmp.lt.s32.totalorder %s17568_s17, %s17568_s17 }
0x8aaf   :  { %17287 = vadd.xlane.f32.xlu0 %v17286_v25  ;;  %20376 = vmatpush3.bf16.msra.mxu0 %v20373_v47 }
0x8b3b   :  { %v17291_v49 = vpop.xlane.xlu1 %17290 }
0x8b3c   :  { %v17293_v46 = vmul.f32 0.03125, %v17291_v49  ;;  %v17288_v54 = vpop.xlane.xlu0 %17287 }
0x8b3d   :  { %v17292_v12 = vmul.f32 0.03125, %v17288_v54  ;;  %v18081_v54 = vld [vmem:[%s23931_s18 + $0x4] ss:$0 sm:$0xff]  ;;  %s20972_s18 = scalar_lea.vmem %s17568_s17, 256 }
0x8b3e   :  { %v23821_v36 = vsub.f32 %v17285_v1, %v17293_v46  ;;  %p20973_p8 = scmp.ne.s32.totalorder %s17568_s17, %s20972_s18  ;;  %p20978_p10 = scmp.lt.s32.totalorder %s20972_s18, %s20972_s18 }
0x8b3f   :  { %v17294_v63 = vsub.f32 %v17284_v31, %v17292_v12 }
0x8b40   :  { %v17297_v58 = vmul.f32 %v23821_v36, %v23821_v36  ;;  %p20979_p11 = por %p20978_p10, %p20977_p9 }
0x8b41   :  { %v17296_v9 = vmul.f32 %v17294_v63, %v17294_v63 }
0x8b42   :  { %v17301_v2 = vsel %vm188_vm0, %v17297_v58, 0.0  ;;  %p20980_p12 = pnand %p20979_p11, %p20973_p8 }
0x8b43   :  { %v17298_v13 = vsel %vm188_vm0, %v17296_v9, 0.0 }
0x8b44   :  { %17299 = vadd.xlane.f32.xlu0 %v17298_v13 }
0x8b48   :  { %17302 = vadd.xlane.f32.xlu0 %v17301_v2 }
0x8bd1   :  { %v17300_v29 = vpop.xlane.xlu0 %17299 }
0x8bd2   :  { %v17304_v20 = vmul.f32 0.03125, %v17300_v29 }
0x8bd4   :  { %v17306_v28 = vadd.f32 1e-05, %v17304_v20 }
0x8bd5   :  { %v17303_v4 = vpop.xlane.xlu0 %17302 }
0x8bd6   :  { %20776 = vrsqrt.f32 %v17306_v28  ;;  %v17305_v51 = vmul.f32 0.03125, %v17303_v4 }
0x8bd8   :  { %v17307_v45 = vadd.f32 1e-05, %v17305_v51 }
0x8bda   :  { %20778 = vrsqrt.f32 %v17307_v45 }
0x8be0   :  { %v20777_v37 = vpop.eup %20776 }
0x8be1   :  { %v17310_v15 = vmul.f32 %v20777_v37, %v17294_v63 }
0x8be3   :  { %v17316_v22 = vmul.f32 %v17315_v18, %v17310_v15 }
0x8be4   :  { %v20779_v53 = vpop.eup %20778 }
0x8be5   :  { %v17311_v38 = vmul.f32 %v20779_v53, %v23821_v36  ;;  %v17322_v40 = vadd.f32 %v17321_v48, %v17316_v22 }
0x8be7   :  { %v17317_v42 = vmul.f32 %v17315_v18, %v17311_v38  ;;  %19939 = vmatprep.mubr.msk.f32.mxu1 %vm188_vm0, %v17322_v40 }
0x8be9   :  { %v17323_v30 = vadd.f32 %v17321_v48, %v17317_v42 }
0x8beb   :  { %19940 = vmatmul.mubr.msk.f32.vlgmr.msra.gmra.mrb[226].mxu1 %vm188_vm0, %v17323_v30 }
0x8cbe   :  { %v19941_v1 = vpop.f32.mrb[226].mxu1 }
0x8cbf   :  { %v17415_v31 = vadd.f32 %v19941_v1, %v18061_v50  ;;  %v17409_v57 = vpop.f32.mrb[227].mxu1 }
0x8cc0   :  { %v17410_v25 = vadd.f32 %v18061_v50, %v17409_v57 }
0x8cc1   :  { %v17419_v46 = vmax.f32 %v17415_v31, 0.0 }
0x8cc2   :  { %v17418_v49 = vmax.f32 %v17410_v25, 0.0 }
0x8cc4   :  { %19974 = vmatprep.mubr.f32.mxu0 %v17418_v49 }
0x8cc5   :  { %19975 = vmatmul.mubr.f32.vlgmr.msra.gmra.mrb[160].mxu0 %v17419_v46 }
0x8d98   :  { %v19976_v12 = vpop.f32.mrb[160].mxu0 }
0x8d99   :  { %v17517_v36 = vadd.f32 %v19976_v12, %v18081_v54  ;;  %v17511_v63 = vpop.f32.mrb[161].mxu0 }
0x8d9a   :  { %v17512_v9 = vadd.f32 %v18081_v54, %v17511_v63 }
0x8d9b   :  { %v17521_v13 = vadd.f32 %v17517_v36, %v17323_v30 }
0x8d9c   :  { %v17520_v58 = vadd.f32 %v17512_v9, %v17322_v40 }
0x8d9d   :  { %v17525_v2 = vsel %vm188_vm0, %v17521_v13, 0.0 }
0x8d9e   :  { %17526 = vadd.xlane.f32.xlu0 %v17525_v2  ;;  %v17522_v44 = vsel %vm188_vm0, %v17520_v58, 0.0 }
0x8d9f   :  { %17523 = vadd.xlane.f32.xlu1 %v17522_v44 }
0x8e2b   :  { %v17527_v8 = vpop.xlane.xlu0 %17526 }
0x8e2c   :  { %v17529_v11 = vmul.f32 0.03125, %v17527_v8  ;;  %v17524_v16 = vpop.xlane.xlu1 %17523 }
0x8e2d   :  { %v17528_v59 = vmul.f32 0.03125, %v17524_v16 }
0x8e2e   :  { %v17531_v3 = vsub.f32 %v17521_v13, %v17529_v11 }
0x8e2f   :  { %v17530_v0 = vsub.f32 %v17520_v58, %v17528_v59 }
0x8e30   :  { %v17533_v10 = vmul.f32 %v17531_v3, %v17531_v3 }
0x8e31   :  { %v17532_v32 = vmul.f32 %v17530_v0, %v17530_v0 }
0x8e32   :  { %v17537_v14 = vsel %vm188_vm0, %v17533_v10, 0.0 }
0x8e33   :  { %17538 = vadd.xlane.f32.xlu0 %v17537_v14  ;;  %v17534_v62 = vsel %vm188_vm0, %v17532_v32, 0.0 }
0x8e34   :  { %17535 = vadd.xlane.f32.xlu1 %v17534_v62 }
0x8ec0   :  { %v17539_v17 = vpop.xlane.xlu0 %17538 }
0x8ec1   :  { %v17541_v27 = vmul.f32 0.03125, %v17539_v17  ;;  %v17536_v60 = vpop.xlane.xlu1 %17535 }
0x8ec2   :  { %v17540_v39 = vmul.f32 0.03125, %v17536_v60 }
0x8ec3   :  { %v17543_v61 = vadd.f32 1e-05, %v17541_v27 }
0x8ec4   :  { %v17542_v43 = vadd.f32 1e-05, %v17540_v39 }
0x8ec5   :  { %20780 = vrsqrt.f32 %v17543_v61 }
0x8ec6   :  { %20782 = vrsqrt.f32 %v17542_v43 }
0x8ecf   :  { %v20781_v26 = vpop.eup %20780 }
0x8ed0   :  { %v20783_v52 = vpop.eup %20782  ;;  %v17547_v19 = vmul.f32 %v20781_v26, %v17531_v3 }
0x8ed1   :  { %v17546_v7 = vmul.f32 %v20783_v52, %v17530_v0 }
0x8ed2   :  { %v17553_v24 = vmul.f32 %v17551_v21, %v17547_v19 }
0x8ed3   :  { %v17552_v34 = vmul.f32 %v17551_v21, %v17546_v7 }
0x8ed4   :  { %v17559_v35 = vadd.f32 %v17557_v33, %v17553_v24 }
0x8ed5   :  { %v17558_v23 = vadd.f32 %v17557_v33, %v17552_v34 }
0x8ed6   :  { %17561 = vst.msk [vmem:[#allocation16 + $0x8] sm:$0xff] %vm188_vm0, %v17559_v35 }
0x8ed7   :  { %17560 = vst.msk [vmem:[#allocation16] sm:$0xff] %vm188_vm0, %v17558_v23 }
0x8ed8   :  { %20983 = shalt.err (!%p20980_p12)
}
0x8ed9   :  { %s24022_s9 = sld [smem:[#allocation31_spill]] }
0x8edf   :  { %s20984_s21 = scalar_lea.hbm %s24022_s9, 256 }
0x8ee0   :  { %p20985_p13 = scmp.ne.s32.totalorder %s24022_s9, %s20984_s21  ;;  %p20988_p0 = scmp.lt.u32.totalorder %s20984_s21, %s24022_s9 }
0x8ee2   :  { %p20990_p1 = pnand %p20988_p0, %p20985_p13 }
0x8ee4   :  { %20993 = shalt.err (!%p20990_p1)
}
0x8ee5   :  { %s24023_s14 = smov 128  }
0x8ee6   :  { %17573 = dma.vmem_to_hbm [thread:$0]  %s17568_s17, 256, %s24022_s9, [#allocation4], %s24023_s14, %s24023_s14, %s23993_s8  }
0x8ee7   :  { %21004 = dma.done.wait [#allocation4], 256  }
0x8ee8   :  { %21005 = vsyncadd [#allocation4], 4294967040 }
0x8ee9   :  { %17577 = vsyncpa [#allocation3], 1 }
0x8eea   :  { %17578 = vsyncpa [#allocation6], 1 }
0x8eeb   :  { %17579 = vsyncpa [#allocation9], 1 }
0x8eec   :  { %17580 = vsyncpa [#allocation12], 1 }
0x8eed   :  { %17581 = vsyncpa [#allocation15], 1 }
0x8eee   :  { %17582 = vsyncpa [#allocation4], 1 }

</bundles_post_ra>
